<compile_context>
chip_gen: v7x
topology: tpu7x:2x2x1
jax: 0.10.0
libtpu: 0.0.40
codegen_flags: <defaults>
</compile_context>

<pallas_src>
import functools
import math

import jax
import jax.numpy as jnp
from jax.experimental import pallas as pl
from jax.experimental.pallas import tpu as pltpu

NUM_CLASSES = 10
C1 = 32                  # conv1 output channels
C2 = 64                  # conv2 output channels
SLAB = 16                # padded spatial slab (14x14 valid + 1-pixel zero border)
SLAB_ROWS = SLAB * SLAB  # 256 rows per image in slab layout
KCOLS = 10               # 9 conv1 taps + fused bias/mask column
COMPUTE_DTYPE = jnp.bfloat16


def _compiler_params():
    return pltpu.CompilerParams(
        dimension_semantics=("parallel",),
        vmem_limit_bytes=64 * 1024 * 1024,
    )


# --------------------------------------------------------------------------
# Kernel 1 (fused): conv1 + ReLU + 2x2 pool  ->  conv2 + ReLU + 2x2 pool
# --------------------------------------------------------------------------

def _features_kernel(p_ref, w1_ref, w2_ref, b2_ref, o_ref, xs_ref, ys_ref, *, rows):
    r = rows
    w1 = w1_ref[...]

    # conv1 as 4 pool-window-separated im2col matmuls; bias is applied via the
    # mask column (row 9 of w1), so the zero-bordered slab rows stay exactly 0
    # after the ReLU.
    def conv1_window(q):
        z = jnp.dot(p_ref[q], w1, preferred_element_type=jnp.float32)
        return jnp.maximum(z, 0.0)

    pooled1 = jnp.maximum(jnp.maximum(conv1_window(0), conv1_window(1)),
                          jnp.maximum(conv1_window(2), conv1_window(3)))

    # Zero-haloed pool1 slab rows (never leaves VMEM).  The halo stands in for
    # the neighbouring images' all-zero border rows, so every conv2 tap slice
    # below stays in-bounds and 'same' padding falls out for free.
    xs_ref[pl.ds(0, 32), :] = jnp.zeros((32, C1), COMPUTE_DTYPE)
    xs_ref[pl.ds(32 + r, 32), :] = jnp.zeros((32, C1), COMPUTE_DTYPE)
    xs_ref[pl.ds(32, r), :] = pooled1.astype(COMPUTE_DTYPE)

    # In-VMEM im2col for conv2: accumulate 9 (rows, Cin) @ (Cin, Cout) tap
    # matmuls in f32.
    acc = jnp.zeros((r, C2), jnp.float32)
    for ky in range(3):
        for kx in range(3):
            off = 32 + (ky - 1) * SLAB + (kx - 1)
            tap = xs_ref[pl.ds(off, r), :]
            acc = acc + jnp.dot(tap, w2_ref[ky * 3 + kx],
                                preferred_element_type=jnp.float32)
    y = jnp.maximum(acc + b2_ref[...], 0.0)

    # Fused 2x2 max-pool: window max for every slab row via offset slices
    # (pure VPU maximums).  Only rows (2*pi+1, 2*pj+1) are consumed downstream.
    ys_ref[pl.ds(r, 32), :] = jnp.zeros((32, C2), jnp.float32)
    ys_ref[pl.ds(0, r), :] = y
    mv = jnp.maximum(
        jnp.maximum(ys_ref[pl.ds(0, r), :], ys_ref[pl.ds(1, r), :]),
        jnp.maximum(ys_ref[pl.ds(SLAB, r), :], ys_ref[pl.ds(SLAB + 1, r), :]))
    o_ref[...] = mv.astype(o_ref.dtype)


def conv_features(patches, w1_aug, w2_taps, b2, n_images, images_per_tile):
    rows = n_images * SLAB_ROWS
    tile_rows = images_per_tile * SLAB_ROWS
    kernel = functools.partial(_features_kernel, rows=tile_rows)
    return pl.pallas_call(
        kernel,
        out_shape=jax.ShapeDtypeStruct((rows, C2), COMPUTE_DTYPE),
        grid=(rows // tile_rows,),
        in_specs=[
            pl.BlockSpec((4, tile_rows, KCOLS), lambda i: (0, i, 0)),
            pl.BlockSpec((KCOLS, C1), lambda i: (0, 0)),
            pl.BlockSpec((9, C1, C2), lambda i: (0, 0, 0)),
            pl.BlockSpec((1, C2), lambda i: (0, 0)),
        ],
        out_specs=pl.BlockSpec((tile_rows, C2), lambda i: (i, 0)),
        scratch_shapes=[
            pltpu.VMEM((tile_rows + 64, C1), COMPUTE_DTYPE),   # haloed pool1
            pltpu.VMEM((tile_rows + 32, C2), jnp.float32),     # conv2 output
        ],
        compiler_params=_compiler_params(),
    )(patches, w1_aug, w2_taps, b2)


# --------------------------------------------------------------------------
# Kernel 2: final Linear (pool-position selection + NCHW flatten live in w_fc)
# --------------------------------------------------------------------------

def _fc_kernel(x_ref, w_ref, b_ref, o_ref):
    z = jnp.dot(x_ref[...], w_ref[...], preferred_element_type=jnp.float32)
    o_ref[...] = z + b_ref[...]


def fully_connected(x, w, b, rows_per_tile):
    n, k = x.shape
    m = w.shape[1]
    return pl.pallas_call(
        _fc_kernel,
        out_shape=jax.ShapeDtypeStruct((n, m), jnp.float32),
        grid=(n // rows_per_tile,),
        in_specs=[
            pl.BlockSpec((rows_per_tile, k), lambda i: (i, 0)),
            pl.BlockSpec((k, m), lambda i: (0, 0)),
            pl.BlockSpec((1, m), lambda i: (0, 0)),
        ],
        out_specs=pl.BlockSpec((rows_per_tile, m), lambda i: (i, 0)),
        compiler_params=_compiler_params(),
    )(x, w, b)


# --------------------------------------------------------------------------
# JAX glue (cheap, 1-channel-input-sized only) and parameter preparation
# --------------------------------------------------------------------------

def _conv1_pool_patches(x_nchw):
    """Stacked (4, N*256, 10) pool-window-separated conv1 im2col slabs.

    Each quadrant slab has 9 tap columns plus a constant-one mask column
    (1 on the 14x14 interior rows, 0 on the slab border rows) that both
    applies the bias and forces the border rows to exactly zero after ReLU.
    """
    n = x_nchw.shape[0]
    img = x_nchw[:, 0, :, :]                                  # (N, 28, 28)
    xp = jnp.pad(img, ((0, 0), (1, 3), (1, 3)))               # (N, 32, 32)
    ones = jnp.ones((n, 14, 14), x_nchw.dtype)
    slabs = []
    for qy in range(2):
        for qx in range(2):
            taps = [xp[:, qy + ky: qy + ky + 28: 2, qx + kx: qx + kx + 28: 2]
                    for ky in range(3) for kx in range(3)]
            taps.append(ones)
            p = jnp.stack(taps, axis=-1)                      # (N, 14, 14, 10)
            p = jnp.pad(p, ((0, 0), (1, 1), (1, 1), (0, 0)))  # (N, 16, 16, 10)
            slabs.append(p.reshape(n * SLAB_ROWS, KCOLS))
    return jnp.stack(slabs, axis=0).astype(COMPUTE_DTYPE)     # (4, N*256, 10)


def prepare_params(params):
    """One-time conversion of PyTorch-layout parameters into kernel-ready form."""
    w1 = params["conv1_w"]            # (32, 1, 3, 3)
    b1 = params["conv1_b"]            # (32,)
    w2 = params["conv2_w"]            # (64, 32, 3, 3)
    b2 = params["conv2_b"]            # (64,)
    wf = params["fc1_w"]              # (10, 64*7*7), NCHW flatten order
    bf = params["fc1_b"]              # (10,)

    # conv1: tap-major (ky, kx) rows, plus bias as a 10th row (pairs with the
    # constant-one mask column of the patch slabs).
    w1_mat = jnp.transpose(w1, (2, 3, 1, 0)).reshape(9, C1)
    w1_aug = jnp.concatenate([w1_mat, b1[None, :]], axis=0).astype(COMPUTE_DTYPE)

    # conv2: one (Cin, Cout) matrix per tap, tap index = ky*3 + kx.
    w2_taps = jnp.transpose(w2, (2, 3, 1, 0)).reshape(9, C1, C2).astype(COMPUTE_DTYPE)
    b2_row = b2.reshape(1, C2).astype(jnp.float32)

    # fc1: fold (a) PyTorch's channel-major flatten and (b) the selection of the
    # 7x7 valid pool positions out of the 16x16 slab into the weight, one time.
    wf_hw = wf.reshape(NUM_CLASSES, C2, 7, 7)
    wf_nhwc = jnp.transpose(wf_hw, (2, 3, 1, 0))              # (7, 7, 64, 10)
    w_fc = jnp.zeros((SLAB, SLAB, C2, NUM_CLASSES), jnp.float32)
    w_fc = w_fc.at[1:15:2, 1:15:2, :, :].set(wf_nhwc)
    w_fc = w_fc.reshape(SLAB_ROWS * C2, NUM_CLASSES).astype(COMPUTE_DTYPE)
    b_fc = bf.reshape(1, NUM_CLASSES).astype(jnp.float32)

    return {"w1_aug": w1_aug, "w2_taps": w2_taps, "b2": b2_row,
            "w_fc": w_fc, "b_fc": b_fc}


def init_params(key):
    k1, k2, k3, k4, k5, k6 = jax.random.split(key, 6)
    scale = 0.05
    return {
        "conv1_w": scale * jax.random.normal(k1, (C1, 1, 3, 3), jnp.float32),
        "conv1_b": scale * jax.random.normal(k2, (C1,), jnp.float32),
        "conv2_w": scale * jax.random.normal(k3, (C2, C1, 3, 3), jnp.float32),
        "conv2_b": scale * jax.random.normal(k4, (C2,), jnp.float32),
        "fc1_w":   scale * jax.random.normal(k5, (NUM_CLASSES, C2 * 7 * 7), jnp.float32),
        "fc1_b":   scale * jax.random.normal(k6, (NUM_CLASSES,), jnp.float32),
    }


@jax.jit
def mnist_convnet_forward(prep, x_nchw):
    # x: (N, 1, 28, 28) float32, NCHW as in the PyTorch module.
    n = x_nchw.shape[0]
    images_per_tile = math.gcd(n, 8)                  # divides n, <= 8 images/tile
    patches = _conv1_pool_patches(x_nchw)                                       # (4, N*256, 10)
    pooled2 = conv_features(patches, prep["w1_aug"], prep["w2_taps"],
                            prep["b2"], n, images_per_tile)                     # (N*256, 64)
    feats = pooled2.reshape(n, SLAB_ROWS * C2)        # free row-major reshape
    fc_tile = math.gcd(n, 128)
    if fc_tile % 8 != 0:
        fc_tile = n
    logits = fully_connected(feats, prep["w_fc"], prep["b_fc"], fc_tile)        # (N, 10)
    return logits


if __name__ == "__main__":
    key = jax.random.PRNGKey(0)
    pkey, xkey = jax.random.split(key)
    params = init_params(pkey)
    prep = prepare_params(params)
    x = jax.random.normal(xkey, (2, 1, 28, 28), jnp.float32)
    out = mnist_convnet_forward(prep, x)
    jax.block_until_ready(out)
    assert out.shape == (2, NUM_CLASSES), out.shape
    assert bool(jnp.all(jnp.isfinite(out))), "non-finite logits"
    print("KERNEL_OK")
</pallas_src>

<mosaic_0001>
module attributes {stable_mosaic.version = 11 : i64} {
  func.func @_features_kernel(%arg0: i32, %arg1: memref<4x512x10xbf16, #tpu.memory_space<vmem>>, %arg2: memref<10x32xbf16, #tpu.memory_space<vmem>>, %arg3: memref<9x32x64xbf16, #tpu.memory_space<vmem>>, %arg4: memref<1x64xf32, #tpu.memory_space<vmem>>, %arg5: memref<512x64xbf16, #tpu.memory_space<vmem>>, %arg6: memref<576x32xbf16, #tpu.memory_space<vmem>>, %arg7: memref<544x64xf32, #tpu.memory_space<vmem>>) attributes {dimension_semantics = [#tpu.dimension_semantics<parallel>], iteration_bounds = array<i64: 1>, scalar_prefetch = 0 : i64, scratch_operands = 2 : i64, tpu.core_type = #tpu.core_type<tc>, window_params = [{transform_indices = @transform_0, window_bounds = array<i64: 4, 512, 10>}, {pipeline_mode = #tpu.pipeline_mode<synchronous>, transform_indices = @transform_1, window_bounds = array<i64: 10, 32>}, {pipeline_mode = #tpu.pipeline_mode<synchronous>, transform_indices = @transform_2, window_bounds = array<i64: 9, 32, 64>}, {pipeline_mode = #tpu.pipeline_mode<synchronous>, transform_indices = @transform_3, window_bounds = array<i64: 1, 64>}, {transform_indices = @transform_4, window_bounds = array<i64: 512, 64>}]} {
    %c0 = arith.constant 0 : index
    %c0_0 = arith.constant 0 : index
    %0 = vector.load %arg2[%c0, %c0_0] : memref<10x32xbf16, #tpu.memory_space<vmem>>, vector<10x32xbf16>
    %c0_1 = arith.constant 0 : index
    %c0_2 = arith.constant 0 : index
    %c0_3 = arith.constant 0 : index
    %1 = vector.load %arg1[%c0_1, %c0_2, %c0_3] : memref<4x512x10xbf16, #tpu.memory_space<vmem>>, vector<1x512x10xbf16>
    %2 = vector.shape_cast %1 : vector<1x512x10xbf16> to vector<512x10xbf16>
    %cst = arith.constant dense<0.000000e+00> : vector<512x32xf32>
    %3 = tpu.matmul %2, %0, %cst {dimension_numbers = #tpu.dot_dimension_numbers<[1], [0], [0], [1], [0, 0, 1, 1], [], []>} : vector<512x10xbf16>, vector<10x32xbf16>, vector<512x32xf32> -> vector<512x32xf32>
    %cst_4 = arith.constant 0.000000e+00 : f32
    %4 = vector.broadcast %cst_4 : f32 to vector<512x32xf32>
    %5 = arith.maximumf %3, %4 : vector<512x32xf32>
    %c1 = arith.constant 1 : index
    %c0_5 = arith.constant 0 : index
    %c0_6 = arith.constant 0 : index
    %6 = vector.load %arg1[%c1, %c0_5, %c0_6] : memref<4x512x10xbf16, #tpu.memory_space<vmem>>, vector<1x512x10xbf16>
    %7 = vector.shape_cast %6 : vector<1x512x10xbf16> to vector<512x10xbf16>
    %cst_7 = arith.constant dense<0.000000e+00> : vector<512x32xf32>
    %8 = tpu.matmul %7, %0, %cst_7 {dimension_numbers = #tpu.dot_dimension_numbers<[1], [0], [0], [1], [0, 0, 1, 1], [], []>} : vector<512x10xbf16>, vector<10x32xbf16>, vector<512x32xf32> -> vector<512x32xf32>
    %cst_8 = arith.constant 0.000000e+00 : f32
    %9 = vector.broadcast %cst_8 : f32 to vector<512x32xf32>
    %10 = arith.maximumf %8, %9 : vector<512x32xf32>
    %11 = arith.maximumf %5, %10 : vector<512x32xf32>
    %c2 = arith.constant 2 : index
    %c0_9 = arith.constant 0 : index
    %c0_10 = arith.constant 0 : index
    %12 = vector.load %arg1[%c2, %c0_9, %c0_10] : memref<4x512x10xbf16, #tpu.memory_space<vmem>>, vector<1x512x10xbf16>
    %13 = vector.shape_cast %12 : vector<1x512x10xbf16> to vector<512x10xbf16>
    %cst_11 = arith.constant dense<0.000000e+00> : vector<512x32xf32>
    %14 = tpu.matmul %13, %0, %cst_11 {dimension_numbers = #tpu.dot_dimension_numbers<[1], [0], [0], [1], [0, 0, 1, 1], [], []>} : vector<512x10xbf16>, vector<10x32xbf16>, vector<512x32xf32> -> vector<512x32xf32>
    %cst_12 = arith.constant 0.000000e+00 : f32
    %15 = vector.broadcast %cst_12 : f32 to vector<512x32xf32>
    %16 = arith.maximumf %14, %15 : vector<512x32xf32>
    %c3 = arith.constant 3 : index
    %c0_13 = arith.constant 0 : index
    %c0_14 = arith.constant 0 : index
    %17 = vector.load %arg1[%c3, %c0_13, %c0_14] : memref<4x512x10xbf16, #tpu.memory_space<vmem>>, vector<1x512x10xbf16>
    %18 = vector.shape_cast %17 : vector<1x512x10xbf16> to vector<512x10xbf16>
    %cst_15 = arith.constant dense<0.000000e+00> : vector<512x32xf32>
    %19 = tpu.matmul %18, %0, %cst_15 {dimension_numbers = #tpu.dot_dimension_numbers<[1], [0], [0], [1], [0, 0, 1, 1], [], []>} : vector<512x10xbf16>, vector<10x32xbf16>, vector<512x32xf32> -> vector<512x32xf32>
    %cst_16 = arith.constant 0.000000e+00 : f32
    %20 = vector.broadcast %cst_16 : f32 to vector<512x32xf32>
    %21 = arith.maximumf %19, %20 : vector<512x32xf32>
    %22 = arith.maximumf %16, %21 : vector<512x32xf32>
    %23 = arith.maximumf %11, %22 : vector<512x32xf32>
    %cst_17 = arith.constant 0.000000e+00 : bf16
    %24 = vector.broadcast %cst_17 : bf16 to vector<32x32xbf16>
    %c0_18 = arith.constant 0 : index
    %c0_19 = arith.constant 0 : index
    %25 = vector.load %arg6[%c0_18, %c0_19] : memref<576x32xbf16, #tpu.memory_space<vmem>>, vector<32x32xbf16>
    tpu.vector_store %arg6[%c0_18, %c0_19], %24 {strides = array<i32>} : memref<576x32xbf16, #tpu.memory_space<vmem>>, vector<32x32xbf16>,
    %cst_20 = arith.constant 0.000000e+00 : bf16
    %26 = vector.broadcast %cst_20 : bf16 to vector<32x32xbf16>
    %c544 = arith.constant 544 : index
    %c0_21 = arith.constant 0 : index
    %27 = vector.load %arg6[%c544, %c0_21] : memref<576x32xbf16, #tpu.memory_space<vmem>>, vector<32x32xbf16>
    tpu.vector_store %arg6[%c544, %c0_21], %26 {strides = array<i32>} : memref<576x32xbf16, #tpu.memory_space<vmem>>, vector<32x32xbf16>,
    %28 = arith.truncf %23 : vector<512x32xf32> to vector<512x32xbf16>
    %c32 = arith.constant 32 : index
    %c0_22 = arith.constant 0 : index
    %29 = vector.load %arg6[%c32, %c0_22] : memref<576x32xbf16, #tpu.memory_space<vmem>>, vector<512x32xbf16>
    tpu.vector_store %arg6[%c32, %c0_22], %28 {strides = array<i32>} : memref<576x32xbf16, #tpu.memory_space<vmem>>, vector<512x32xbf16>,
    %cst_23 = arith.constant 0.000000e+00 : f32
    %30 = vector.broadcast %cst_23 : f32 to vector<512x64xf32>
    %c15 = arith.constant 15 : index
    %c0_24 = arith.constant 0 : index
    %31 = vector.load %arg6[%c15, %c0_24] : memref<576x32xbf16, #tpu.memory_space<vmem>>, vector<512x32xbf16>
    %c0_25 = arith.constant 0 : index
    %c0_26 = arith.constant 0 : index
    %c0_27 = arith.constant 0 : index
    %32 = vector.load %arg3[%c0_25, %c0_26, %c0_27] : memref<9x32x64xbf16, #tpu.memory_space<vmem>>, vector<1x32x64xbf16>
    %33 = vector.shape_cast %32 : vector<1x32x64xbf16> to vector<32x64xbf16>
    %cst_28 = arith.constant dense<0.000000e+00> : vector<512x64xf32>
    %34 = tpu.matmul %31, %33, %cst_28 {dimension_numbers = #tpu.dot_dimension_numbers<[1], [0], [0], [1], [0, 0, 1, 1], [], []>} : vector<512x32xbf16>, vector<32x64xbf16>, vector<512x64xf32> -> vector<512x64xf32>
    %35 = arith.addf %30, %34 : vector<512x64xf32>
    %c16 = arith.constant 16 : index
    %c0_29 = arith.constant 0 : index
    %36 = vector.load %arg6[%c16, %c0_29] : memref<576x32xbf16, #tpu.memory_space<vmem>>, vector<512x32xbf16>
    %c1_30 = arith.constant 1 : index
    %c0_31 = arith.constant 0 : index
    %c0_32 = arith.constant 0 : index
    %37 = vector.load %arg3[%c1_30, %c0_31, %c0_32] : memref<9x32x64xbf16, #tpu.memory_space<vmem>>, vector<1x32x64xbf16>
    %38 = vector.shape_cast %37 : vector<1x32x64xbf16> to vector<32x64xbf16>
    %cst_33 = arith.constant dense<0.000000e+00> : vector<512x64xf32>
    %39 = tpu.matmul %36, %38, %cst_33 {dimension_numbers = #tpu.dot_dimension_numbers<[1], [0], [0], [1], [0, 0, 1, 1], [], []>} : vector<512x32xbf16>, vector<32x64xbf16>, vector<512x64xf32> -> vector<512x64xf32>
    %40 = arith.addf %35, %39 : vector<512x64xf32>
    %c17 = arith.constant 17 : index
    %c0_34 = arith.constant 0 : index
    %41 = vector.load %arg6[%c17, %c0_34] : memref<576x32xbf16, #tpu.memory_space<vmem>>, vector<512x32xbf16>
    %c2_35 = arith.constant 2 : index
    %c0_36 = arith.constant 0 : index
    %c0_37 = arith.constant 0 : index
    %42 = vector.load %arg3[%c2_35, %c0_36, %c0_37] : memref<9x32x64xbf16, #tpu.memory_space<vmem>>, vector<1x32x64xbf16>
    %43 = vector.shape_cast %42 : vector<1x32x64xbf16> to vector<32x64xbf16>
    %cst_38 = arith.constant dense<0.000000e+00> : vector<512x64xf32>
    %44 = tpu.matmul %41, %43, %cst_38 {dimension_numbers = #tpu.dot_dimension_numbers<[1], [0], [0], [1], [0, 0, 1, 1], [], []>} : vector<512x32xbf16>, vector<32x64xbf16>, vector<512x64xf32> -> vector<512x64xf32>
    %45 = arith.addf %40, %44 : vector<512x64xf32>
    %c31 = arith.constant 31 : index
    %c0_39 = arith.constant 0 : index
    %46 = vector.load %arg6[%c31, %c0_39] : memref<576x32xbf16, #tpu.memory_space<vmem>>, vector<512x32xbf16>
    %c3_40 = arith.constant 3 : index
    %c0_41 = arith.constant 0 : index
    %c0_42 = arith.constant 0 : index
    %47 = vector.load %arg3[%c3_40, %c0_41, %c0_42] : memref<9x32x64xbf16, #tpu.memory_space<vmem>>, vector<1x32x64xbf16>
    %48 = vector.shape_cast %47 : vector<1x32x64xbf16> to vector<32x64xbf16>
    %cst_43 = arith.constant dense<0.000000e+00> : vector<512x64xf32>
    %49 = tpu.matmul %46, %48, %cst_43 {dimension_numbers = #tpu.dot_dimension_numbers<[1], [0], [0], [1], [0, 0, 1, 1], [], []>} : vector<512x32xbf16>, vector<32x64xbf16>, vector<512x64xf32> -> vector<512x64xf32>
    %50 = arith.addf %45, %49 : vector<512x64xf32>
    %c32_44 = arith.constant 32 : index
    %c0_45 = arith.constant 0 : index
    %51 = vector.load %arg6[%c32_44, %c0_45] : memref<576x32xbf16, #tpu.memory_space<vmem>>, vector<512x32xbf16>
    %c4 = arith.constant 4 : index
    %c0_46 = arith.constant 0 : index
    %c0_47 = arith.constant 0 : index
    %52 = vector.load %arg3[%c4, %c0_46, %c0_47] : memref<9x32x64xbf16, #tpu.memory_space<vmem>>, vector<1x32x64xbf16>
    %53 = vector.shape_cast %52 : vector<1x32x64xbf16> to vector<32x64xbf16>
    %cst_48 = arith.constant dense<0.000000e+00> : vector<512x64xf32>
    %54 = tpu.matmul %51, %53, %cst_48 {dimension_numbers = #tpu.dot_dimension_numbers<[1], [0], [0], [1], [0, 0, 1, 1], [], []>} : vector<512x32xbf16>, vector<32x64xbf16>, vector<512x64xf32> -> vector<512x64xf32>
    %55 = arith.addf %50, %54 : vector<512x64xf32>
    %c33 = arith.constant 33 : index
    %c0_49 = arith.constant 0 : index
    %56 = vector.load %arg6[%c33, %c0_49] : memref<576x32xbf16, #tpu.memory_space<vmem>>, vector<512x32xbf16>
    %c5 = arith.constant 5 : index
    %c0_50 = arith.constant 0 : index
    %c0_51 = arith.constant 0 : index
    %57 = vector.load %arg3[%c5, %c0_50, %c0_51] : memref<9x32x64xbf16, #tpu.memory_space<vmem>>, vector<1x32x64xbf16>
    %58 = vector.shape_cast %57 : vector<1x32x64xbf16> to vector<32x64xbf16>
    %cst_52 = arith.constant dense<0.000000e+00> : vector<512x64xf32>
    %59 = tpu.matmul %56, %58, %cst_52 {dimension_numbers = #tpu.dot_dimension_numbers<[1], [0], [0], [1], [0, 0, 1, 1], [], []>} : vector<512x32xbf16>, vector<32x64xbf16>, vector<512x64xf32> -> vector<512x64xf32>
    %60 = arith.addf %55, %59 : vector<512x64xf32>
    %c47 = arith.constant 47 : index
    %c0_53 = arith.constant 0 : index
    %61 = vector.load %arg6[%c47, %c0_53] : memref<576x32xbf16, #tpu.memory_space<vmem>>, vector<512x32xbf16>
    %c6 = arith.constant 6 : index
    %c0_54 = arith.constant 0 : index
    %c0_55 = arith.constant 0 : index
    %62 = vector.load %arg3[%c6, %c0_54, %c0_55] : memref<9x32x64xbf16, #tpu.memory_space<vmem>>, vector<1x32x64xbf16>
    %63 = vector.shape_cast %62 : vector<1x32x64xbf16> to vector<32x64xbf16>
    %cst_56 = arith.constant dense<0.000000e+00> : vector<512x64xf32>
    %64 = tpu.matmul %61, %63, %cst_56 {dimension_numbers = #tpu.dot_dimension_numbers<[1], [0], [0], [1], [0, 0, 1, 1], [], []>} : vector<512x32xbf16>, vector<32x64xbf16>, vector<512x64xf32> -> vector<512x64xf32>
    %65 = arith.addf %60, %64 : vector<512x64xf32>
    %c48 = arith.constant 48 : index
    %c0_57 = arith.constant 0 : index
    %66 = vector.load %arg6[%c48, %c0_57] : memref<576x32xbf16, #tpu.memory_space<vmem>>, vector<512x32xbf16>
    %c7 = arith.constant 7 : index
    %c0_58 = arith.constant 0 : index
    %c0_59 = arith.constant 0 : index
    %67 = vector.load %arg3[%c7, %c0_58, %c0_59] : memref<9x32x64xbf16, #tpu.memory_space<vmem>>, vector<1x32x64xbf16>
    %68 = vector.shape_cast %67 : vector<1x32x64xbf16> to vector<32x64xbf16>
    %cst_60 = arith.constant dense<0.000000e+00> : vector<512x64xf32>
    %69 = tpu.matmul %66, %68, %cst_60 {dimension_numbers = #tpu.dot_dimension_numbers<[1], [0], [0], [1], [0, 0, 1, 1], [], []>} : vector<512x32xbf16>, vector<32x64xbf16>, vector<512x64xf32> -> vector<512x64xf32>
    %70 = arith.addf %65, %69 : vector<512x64xf32>
    %c49 = arith.constant 49 : index
    %c0_61 = arith.constant 0 : index
    %71 = vector.load %arg6[%c49, %c0_61] : memref<576x32xbf16, #tpu.memory_space<vmem>>, vector<512x32xbf16>
    %c8 = arith.constant 8 : index
    %c0_62 = arith.constant 0 : index
    %c0_63 = arith.constant 0 : index
    %72 = vector.load %arg3[%c8, %c0_62, %c0_63] : memref<9x32x64xbf16, #tpu.memory_space<vmem>>, vector<1x32x64xbf16>
    %73 = vector.shape_cast %72 : vector<1x32x64xbf16> to vector<32x64xbf16>
    %cst_64 = arith.constant dense<0.000000e+00> : vector<512x64xf32>
    %74 = tpu.matmul %71, %73, %cst_64 {dimension_numbers = #tpu.dot_dimension_numbers<[1], [0], [0], [1], [0, 0, 1, 1], [], []>} : vector<512x32xbf16>, vector<32x64xbf16>, vector<512x64xf32> -> vector<512x64xf32>
    %75 = arith.addf %70, %74 : vector<512x64xf32>
    %c0_65 = arith.constant 0 : index
    %c0_66 = arith.constant 0 : index
    %76 = vector.load %arg4[%c0_65, %c0_66] : memref<1x64xf32, #tpu.memory_space<vmem>>, vector<1x64xf32>
    %77 = vector.broadcast %76 : vector<1x64xf32> to vector<512x64xf32>
    %78 = arith.addf %75, %77 : vector<512x64xf32>
    %cst_67 = arith.constant 0.000000e+00 : f32
    %79 = vector.broadcast %cst_67 : f32 to vector<512x64xf32>
    %80 = arith.maximumf %78, %79 : vector<512x64xf32>
    %cst_68 = arith.constant 0.000000e+00 : f32
    %81 = vector.broadcast %cst_68 : f32 to vector<32x64xf32>
    %c512 = arith.constant 512 : index
    %c0_69 = arith.constant 0 : index
    %82 = vector.load %arg7[%c512, %c0_69] : memref<544x64xf32, #tpu.memory_space<vmem>>, vector<32x64xf32>
    tpu.vector_store %arg7[%c512, %c0_69], %81 {strides = array<i32>} : memref<544x64xf32, #tpu.memory_space<vmem>>, vector<32x64xf32>,
    %c0_70 = arith.constant 0 : index
    %c0_71 = arith.constant 0 : index
    %83 = vector.load %arg7[%c0_70, %c0_71] : memref<544x64xf32, #tpu.memory_space<vmem>>, vector<512x64xf32>
    tpu.vector_store %arg7[%c0_70, %c0_71], %80 {strides = array<i32>} : memref<544x64xf32, #tpu.memory_space<vmem>>, vector<512x64xf32>,
    %c0_72 = arith.constant 0 : index
    %c0_73 = arith.constant 0 : index
    %84 = vector.load %arg7[%c0_72, %c0_73] : memref<544x64xf32, #tpu.memory_space<vmem>>, vector<512x64xf32>
    %c1_74 = arith.constant 1 : index
    %c0_75 = arith.constant 0 : index
    %85 = vector.load %arg7[%c1_74, %c0_75] : memref<544x64xf32, #tpu.memory_space<vmem>>, vector<512x64xf32>
    %86 = arith.maximumf %84, %85 : vector<512x64xf32>
    %c16_76 = arith.constant 16 : index
    %c0_77 = arith.constant 0 : index
    %87 = vector.load %arg7[%c16_76, %c0_77] : memref<544x64xf32, #tpu.memory_space<vmem>>, vector<512x64xf32>
    %c17_78 = arith.constant 17 : index
    %c0_79 = arith.constant 0 : index
    %88 = vector.load %arg7[%c17_78, %c0_79] : memref<544x64xf32, #tpu.memory_space<vmem>>, vector<512x64xf32>
    %89 = arith.maximumf %87, %88 : vector<512x64xf32>
    %90 = arith.maximumf %86, %89 : vector<512x64xf32>
    %91 = arith.truncf %90 : vector<512x64xf32> to vector<512x64xbf16>
    %c0_80 = arith.constant 0 : index
    %c0_81 = arith.constant 0 : index
    %92 = vector.load %arg5[%c0_80, %c0_81] : memref<512x64xbf16, #tpu.memory_space<vmem>>, vector<512x64xbf16>
    tpu.vector_store %arg5[%c0_80, %c0_81], %91 {strides = array<i32>} : memref<512x64xbf16, #tpu.memory_space<vmem>>, vector<512x64xbf16>,
    return
  }
  func.func @transform_0(%arg0: i32) -> (i32, i32, i32) {
    %c0_i32 = arith.constant 0 : i32
    %c0_i32_0 = arith.constant 0 : i32
    %c0_i32_1 = arith.constant 0 : i32
    return %c0_i32, %arg0, %c0_i32_0 : i32, i32, i32
  }
  func.func @transform_1(%arg0: i32) -> (i32, i32) {
    %c0_i32 = arith.constant 0 : i32
    %c0_i32_0 = arith.constant 0 : i32
    %c0_i32_1 = arith.constant 0 : i32
    return %c0_i32, %c0_i32_0 : i32, i32
  }
  func.func @transform_2(%arg0: i32) -> (i32, i32, i32) {
    %c0_i32 = arith.constant 0 : i32
    %c0_i32_0 = arith.constant 0 : i32
    %c0_i32_1 = arith.constant 0 : i32
    %c0_i32_2 = arith.constant 0 : i32
    return %c0_i32, %c0_i32_0, %c0_i32_1 : i32, i32, i32
  }
  func.func @transform_3(%arg0: i32) -> (i32, i32) {
    %c0_i32 = arith.constant 0 : i32
    %c0_i32_0 = arith.constant 0 : i32
    %c0_i32_1 = arith.constant 0 : i32
    return %c0_i32, %c0_i32_0 : i32, i32
  }
  func.func @transform_4(%arg0: i32) -> (i32, i32) {
    %c0_i32 = arith.constant 0 : i32
    %c0_i32_0 = arith.constant 0 : i32
    return %arg0, %c0_i32 : i32, i32
  }
}

module attributes {stable_mosaic.version = 11 : i64} {
  func.func @_fc_kernel(%arg0: i32, %arg1: memref<2x16384xbf16, #tpu.memory_space<vmem>>, %arg2: memref<16384x10xbf16, #tpu.memory_space<vmem>>, %arg3: memref<1x10xf32, #tpu.memory_space<vmem>>, %arg4: memref<2x10xf32, #tpu.memory_space<vmem>>) attributes {dimension_semantics = [#tpu.dimension_semantics<parallel>], iteration_bounds = array<i64: 1>, scalar_prefetch = 0 : i64, scratch_operands = 0 : i64, tpu.core_type = #tpu.core_type<tc>, window_params = [{transform_indices = @transform_0, window_bounds = array<i64: 2, 16384>}, {pipeline_mode = #tpu.pipeline_mode<synchronous>, transform_indices = @transform_1, window_bounds = array<i64: 16384, 10>}, {pipeline_mode = #tpu.pipeline_mode<synchronous>, transform_indices = @transform_2, window_bounds = array<i64: 1, 10>}, {transform_indices = @transform_3, window_bounds = array<i64: 2, 10>}]} {
    %c0 = arith.constant 0 : index
    %c0_0 = arith.constant 0 : index
    %0 = vector.load %arg1[%c0, %c0_0] : memref<2x16384xbf16, #tpu.memory_space<vmem>>, vector<2x16384xbf16>
    %c0_1 = arith.constant 0 : index
    %c0_2 = arith.constant 0 : index
    %1 = vector.load %arg2[%c0_1, %c0_2] : memref<16384x10xbf16, #tpu.memory_space<vmem>>, vector<16384x10xbf16>
    %cst = arith.constant dense<0.000000e+00> : vector<2x10xf32>
    %2 = tpu.matmul %0, %1, %cst {dimension_numbers = #tpu.dot_dimension_numbers<[1], [0], [0], [1], [0, 0, 1, 1], [], []>} : vector<2x16384xbf16>, vector<16384x10xbf16>, vector<2x10xf32> -> vector<2x10xf32>
    %c0_3 = arith.constant 0 : index
    %c0_4 = arith.constant 0 : index
    %3 = vector.load %arg3[%c0_3, %c0_4] : memref<1x10xf32, #tpu.memory_space<vmem>>, vector<1x10xf32>
    %4 = vector.broadcast %3 : vector<1x10xf32> to vector<2x10xf32>
    %5 = arith.addf %2, %4 : vector<2x10xf32>
    %c0_5 = arith.constant 0 : index
    %c0_6 = arith.constant 0 : index
    %6 = vector.load %arg4[%c0_5, %c0_6] : memref<2x10xf32, #tpu.memory_space<vmem>>, vector<2x10xf32>
    tpu.vector_store %arg4[%c0_5, %c0_6], %5 {strides = array<i32>} : memref<2x10xf32, #tpu.memory_space<vmem>>, vector<2x10xf32>,
    return
  }
  func.func @transform_0(%arg0: i32) -> (i32, i32) {
    %c0_i32 = arith.constant 0 : i32
    %c0_i32_0 = arith.constant 0 : i32
    return %arg0, %c0_i32 : i32, i32
  }
  func.func @transform_1(%arg0: i32) -> (i32, i32) {
    %c0_i32 = arith.constant 0 : i32
    %c0_i32_0 = arith.constant 0 : i32
    %c0_i32_1 = arith.constant 0 : i32
    return %c0_i32, %c0_i32_0 : i32, i32
  }
  func.func @transform_2(%arg0: i32) -> (i32, i32) {
    %c0_i32 = arith.constant 0 : i32
    %c0_i32_0 = arith.constant 0 : i32
    %c0_i32_1 = arith.constant 0 : i32
    return %c0_i32, %c0_i32_0 : i32, i32
  }
  func.func @transform_3(%arg0: i32) -> (i32, i32) {
    %c0_i32 = arith.constant 0 : i32
    %c0_i32_0 = arith.constant 0 : i32
    return %arg0, %c0_i32 : i32, i32
  }
}

</mosaic_0001>

<bundles_post_ra>
// kernel: mnist_convnet_forward.2
= control target key start
LH: loop header
LB: loop body
LE: loop exit
PB: predicated region body
PF: predicated region fallthrough
CT: control target
= control target key end

     0   :  { %9 = vsyncpa [#allocation5], 0  ;;  %s14924_s0 = inlined_call_operand.hbm [shape: bf16[4,512,10], index: 0, kind: input, shape index: {}]   ;;  %s14925_s1 = inlined_call_operand.hbm [shape: bf16[10,32], index: 1, kind: input, shape index: {}]   ;;  %s14926_s2 = inlined_call_operand.hbm [shape: bf16[9,32,64], index: 2, kind: input, shape index: {}]   ;;  %s14927_s3 = inlined_call_operand.hbm [shape: f32[1,64], index: 3, kind: input, shape index: {}]   ;;  %s14928_s4 = inlined_call_operand.hbm [shape: bf16[512,64], index: 4, kind: output, shape index: {}]  }
   0x1   :  { %10 = vsyncpa [#allocation8], 0 }
   0x2   :  { %11 = vsyncpa [#allocation11], 0 }
   0x3   :  { %12 = vsyncpa [#allocation6], 0  ;;  %s12050_s15 = smov [#allocation7]   ;;  %s12051_s17 = smov [#allocation4]  }
   0x4   :  { %s30_s16 = sshll.u32 %s12050_s15, 4  ;;  %s18_s18 = sshll.u32 %s12051_s17, 4  ;;  %s31_s16 = int_to_ptr.vmem [resolvable:$true] %s30_s16  ;;  %s12084_s18 = int_to_ptr.vmem [resolvable:$true] %s18_s18 }
   0x5   :  { %s11932_s21 = scalar_lea.hbm %s14925_s1, 128 }
   0x6   :  { %p11933_p0 = scmp.ne.s32.totalorder %s14925_s1, %s11932_s21  ;;  %p11936_p1 = scmp.lt.u32.totalorder %s11932_s21, %s14925_s1 }
   0x8   :  { %p11938_p2 = pnand %p11936_p1, %p11933_p0 }
   0xa   :  { %11941 = shalt.err (!%p11938_p2)
}
   0xb   :  { %s11942_s26 = scalar_lea.vmem %s31_s16, 128  ;;  %p11947_p4 = scmp.lt.s32.totalorder %s31_s16, %s31_s16 }
   0xc   :  { %p11943_p3 = scmp.ne.s32.totalorder %s31_s16, %s11942_s26  ;;  %p11948_p5 = scmp.lt.s32.totalorder %s11942_s26, %s11942_s26 }
   0xe   :  { %p11949_p6 = por %p11948_p5, %p11947_p4 }
  0x10   :  { %p11950_p7 = pnand %p11949_p6, %p11943_p3 }
  0x12   :  { %11953 = shalt.err (!%p11950_p7)
}
  0x13   :  { %s12052_s27 = smov 64   ;;  %s12053_s28 = smov 4  }
  0x14   :  { %36 = dma.hbm_to_vmem [thread:$0]  %s14925_s1, 128, %s31_s16, [#allocation8], %s12052_s27, %s12052_s27, %s12053_s28  }
  0x15   :  { %s11954_s7 = scalar_lea.hbm %s14924_s0, 16384 }
  0x16   :  { %p11955_p8 = scmp.ne.s32.totalorder %s14924_s0, %s11954_s7  ;;  %p11958_p9 = scmp.lt.u32.totalorder %s11954_s7, %s14924_s0 }
  0x18   :  { %p11960_p10 = pnand %p11958_p9, %p11955_p8 }
  0x1a   :  { %11963 = shalt.err (!%p11960_p10)
}
  0x1b   :  { %s11964_s12 = scalar_lea.vmem %s12084_s18, 16384  ;;  %p11969_p12 = scmp.lt.s32.totalorder %s12084_s18, %s12084_s18 }
  0x1c   :  { %p11965_p11 = scmp.ne.s32.totalorder %s12084_s18, %s11964_s12  ;;  %p11970_p13 = scmp.lt.s32.totalorder %s11964_s12, %s11964_s12 }
  0x1e   :  { %p11971_p0 = por %p11970_p13, %p11969_p12 }
  0x20   :  { %p11972_p1 = pnand %p11971_p0, %p11965_p11 }
  0x22   :  { %11975 = shalt.err (!%p11972_p1)
}
  0x23   :  { %24 = dma.hbm_to_vmem [thread:$0]  %s14924_s0, 16384, %s12084_s18, [#allocation5], %s12052_s27, %s12052_s27, %s12053_s28  }
  0x24   :  { %s12054_s14 = smov [#allocation9]   ;;  %s12055_s16 = smov [#allocation10]  }
  0x25   :  { %s42_s15 = sshll.u32 %s12054_s14, 4  ;;  %s55_s17 = sshll.u32 %s12055_s16, 4  ;;  %s43_s15 = int_to_ptr.vmem [resolvable:$true] %s42_s15  ;;  %s56_s17 = int_to_ptr.vmem [resolvable:$true] %s55_s17 }
  0x26   :  { %s11976_s21 = scalar_lea.hbm %s14926_s2, 2304 }
  0x27   :  { %p11977_p2 = scmp.ne.s32.totalorder %s14926_s2, %s11976_s21  ;;  %p11980_p3 = scmp.lt.u32.totalorder %s11976_s21, %s14926_s2 }
  0x29   :  { %p11982_p4 = pnand %p11980_p3, %p11977_p2 }
  0x2b   :  { %11985 = shalt.err (!%p11982_p4)
}
  0x2c   :  { %s11986_s0 = scalar_lea.vmem %s43_s15, 2304  ;;  %p11991_p6 = scmp.lt.s32.totalorder %s43_s15, %s43_s15 }
  0x2d   :  { %p11987_p5 = scmp.ne.s32.totalorder %s43_s15, %s11986_s0  ;;  %p11992_p7 = scmp.lt.s32.totalorder %s11986_s0, %s11986_s0 }
  0x2f   :  { %p11993_p8 = por %p11992_p7, %p11991_p6 }
  0x31   :  { %p11994_p9 = pnand %p11993_p8, %p11987_p5 }
  0x33   :  { %11997 = shalt.err (!%p11994_p9)
}
  0x34   :  { %48 = dma.hbm_to_vmem [thread:$0]  %s14926_s2, 2304, %s43_s15, [#allocation8], %s12052_s27, %s12052_s27, %s12053_s28  }
  0x35   :  { %s11998_s5 = scalar_lea.hbm %s14927_s3, 16 }
  0x36   :  { %p11999_p10 = scmp.ne.s32.totalorder %s14927_s3, %s11998_s5  ;;  %p12002_p11 = scmp.lt.u32.totalorder %s11998_s5, %s14927_s3 }
  0x38   :  { %p12004_p12 = pnand %p12002_p11, %p11999_p10 }
  0x3a   :  { %12007 = shalt.err (!%p12004_p12)
}
  0x3b   :  { %s12008_s10 = scalar_lea.vmem %s56_s17, 16  ;;  %s12012_s11 = scalar_lea.vmem %s56_s17, 32 }
  0x3c   :  { %p12009_p13 = scmp.ne.s32.totalorder %s56_s17, %s12008_s10  ;;  %p12013_p0 = scmp.lt.s32.totalorder %s56_s17, %s56_s17 }
  0x3d   :  { %p12014_p1 = scmp.lt.s32.totalorder %s12012_s11, %s12008_s10 }
  0x3f   :  { %p12015_p2 = por %p12014_p1, %p12013_p0 }
  0x41   :  { %p12016_p3 = pnand %p12015_p2, %p12009_p13 }
  0x43   :  { %12019 = shalt.err (!%p12016_p3)
}
  0x44   :  { %58 = dma.hbm_to_vmem [thread:$0]  %s14927_s3, 16, %s56_s17, [#allocation11]  }
  0x45   :  { %12042 = dma.done.wait [#allocation5], 16384  }
  0x46   :  { %12043 = vsyncadd [#allocation5], 4294950912 }
  0x47   :  { %12044 = dma.done.wait [#allocation8], 2432  }
  0x48   :  { %12045 = vsyncadd [#allocation8], 4294964864 }
  0x49   :  { %12046 = dma.done.wait [#allocation11], 16  }
  0x4a   :  { %12047 = vsyncadd [#allocation11], 4294967280  ;;  %vm400_vm0 = vcmask 1044480   ;;  %vm303_vm1 = vcmask 80896   ;;  %v12148_v0 = vld [vmem:[#allocation7] sm:$0x1f]  }
  0x4b   :  { %v11738_v1 = vld [vmem:[#allocation4] sm:$0xff]   ;;  %11723 = vmatprep.subr.msk.bf16.mxu1 %vm400_vm0, %v12148_v0  ;;  %v12154_v2 = vsel %vm400_vm0, %v12148_v0, 0  ;;  %v11739_v3 = vld [vmem:[#allocation4 + $0x8] sm:$0xff]   ;;  %11725 = vmatprep.subr.msk.bf16.mxu0 %vm400_vm0, %v12148_v0  ;;  %v11740_v4 = vld [vmem:[#allocation4 + $0x10] sm:$0xff]   ;;  %vm2971_vm2 = vcmask 261120   ;;  %vm8532_vm5 = vcmask 523264  }
  0x4c   :  { %10334 = vmatpush3.bf16.msra.mxu1 %v12154_v2  ;;  %10335 = vmatprep.mubr.msk.bf16.mxu1 %vm303_vm1, %v11738_v1  ;;  %v11741_v5 = vld [vmem:[#allocation4 + $0x18] sm:$0xff]   ;;  %v11742_v6 = vld [vmem:[#allocation4 + $0x20] sm:$0xff]   ;;  %v11743_v7 = vld [vmem:[#allocation4 + $0x28] sm:$0xff]   ;;  %vm3479_vm3 = vsmask.f32 256  ;;  %vm9119_vm6 = vcmask 519168  }
  0x4d   :  { %11724 = vmatprep.subr.msk.bf16.mxu1 %vm400_vm0, %v12148_v0  ;;  %10466 = vmatpush3.bf16.msra.mxu0 %v12154_v2  ;;  %v11744_v8 = vld [vmem:[#allocation4 + $0x30] sm:$0xff]   ;;  %v11745_v9 = vld [vmem:[#allocation4 + $0x38] sm:$0xff]   ;;  %v11746_v10 = vld [vmem:[#allocation4 + $0x40] sm:$0xff]   ;;  %vm4143_vm4 = vsmask.f32 7424  ;;  %s12058_s3 = smov [#allocation12]  }
  0x4e   :  { %v11747_v11 = vld [vmem:[#allocation4 + $0x48] sm:$0xff]   ;;  %v11748_v12 = vld [vmem:[#allocation4 + $0x50] sm:$0xff]   ;;  %v11749_v13 = vld [vmem:[#allocation4 + $0x58] sm:$0xff]   ;;  %s9189_s1 = sshll.u32 %s12058_s3, 4  ;;  %s9190_s1 = int_to_ptr.vmem [resolvable:$true] %s9189_s1 }
  0x4f   :  { %10336 = vmatmul.mubr.msk.bf16.vlgmr.msra.gmra.mrb[0].mxu1 %vm303_vm1, %v11739_v3  ;;  %v11750_v14 = vld [vmem:[#allocation4 + $0x60] sm:$0xff]   ;;  %v11751_v15 = vld [vmem:[#allocation4 + $0x68] sm:$0xff]   ;;  %v11752_v16 = vld [vmem:[#allocation4 + $0x70] sm:$0xff]   ;;  %s12020_s13 = scalar_lea.vmem %s9190_s1, 4096  ;;  %p12025_p5 = scmp.lt.s32.totalorder %s9190_s1, %s9190_s1 }
  0x50   :  { %10400 = vmatpush3.bf16.msra.mxu1 %v12154_v2  ;;  %10339 = vmatprep.mubr.msk.bf16.mxu1 %vm303_vm1, %v11740_v4  ;;  %v11753_v17 = vld [vmem:[#allocation4 + $0x78] sm:$0xff]   ;;  %v11754_v18 = vld [vmem:[#allocation4 + $0x80] sm:$0xff]   ;;  %v11755_v19 = vld [vmem:[#allocation4 + $0x88] sm:$0xff]   ;;  %p12021_p4 = scmp.ne.s32.totalorder %s9190_s1, %s12020_s13  ;;  %p12026_p6 = scmp.lt.s32.totalorder %s12020_s13, %s12020_s13 }
  0x51   :  { %11726 = vmatprep.subr.msk.bf16.mxu1 %vm400_vm0, %v12148_v0  ;;  %v11756_v20 = vld [vmem:[#allocation4 + $0x90] sm:$0xff]   ;;  %v11757_v21 = vld [vmem:[#allocation4 + $0x98] sm:$0xff]   ;;  %v11758_v22 = vld [vmem:[#allocation4 + $0xa0] sm:$0xff]  }
  0x52   :  { %v11759_v23 = vld [vmem:[#allocation4 + $0xa8] sm:$0xff]   ;;  %v11760_v24 = vld [vmem:[#allocation4 + $0xb0] sm:$0xff]   ;;  %v11761_v25 = vld [vmem:[#allocation4 + $0xb8] sm:$0xff]   ;;  %p12027_p7 = por %p12026_p6, %p12025_p5 }
  0x53   :  { %v11762_v26 = vld [vmem:[#allocation4 + $0xc0] sm:$0xff]   ;;  %v11763_v27 = vld [vmem:[#allocation4 + $0xc8] sm:$0xff]   ;;  %v11764_v28 = vld [vmem:[#allocation4 + $0xd0] sm:$0xff]  }
  0x54   :  { %v11765_v29 = vld [vmem:[#allocation4 + $0xd8] sm:$0xff]   ;;  %v11766_v30 = vld [vmem:[#allocation4 + $0xe0] sm:$0xff]   ;;  %v11767_v31 = vld [vmem:[#allocation4 + $0xe8] sm:$0xff]   ;;  %p12028_p8 = pnand %p12027_p7, %p12021_p4 }
  0x55   :  { %v11768_v32 = vld [vmem:[#allocation4 + $0xf0] sm:$0xff]   ;;  %v11769_v33 = vld [vmem:[#allocation4 + $0xf8] sm:$0xff]   ;;  %v11770_v34 = vld [vmem:[#allocation4 + $0x100] sm:$0xff]  }
  0x56   :  { %v11771_v35 = vld [vmem:[#allocation4 + $0x108] sm:$0xff]   ;;  %v11772_v36 = vld [vmem:[#allocation4 + $0x110] sm:$0xff]   ;;  %v11773_v37 = vld [vmem:[#allocation4 + $0x118] sm:$0xff]  }
  0x57   :  { %10340 = vmatmul.mubr.msk.bf16.gmra.mrb[4].mxu1 %vm303_vm1, %v11741_v5  ;;  %v11774_v38 = vld [vmem:[#allocation4 + $0x120] sm:$0xff]   ;;  %v11775_v39 = vld [vmem:[#allocation4 + $0x128] sm:$0xff]   ;;  %v11776_v40 = vld [vmem:[#allocation4 + $0x130] sm:$0xff]  }
  0x58   :  { %10343 = vmatprep.mubr.msk.bf16.mxu1 %vm303_vm1, %v11742_v6  ;;  %v11777_v41 = vld [vmem:[#allocation4 + $0x138] sm:$0xff]   ;;  %v11778_v42 = vld [vmem:[#allocation4 + $0x140] sm:$0xff]   ;;  %v11779_v43 = vld [vmem:[#allocation4 + $0x148] sm:$0xff]  }
  0x59   :  { %v11780_v44 = vld [vmem:[#allocation4 + $0x150] sm:$0xff]   ;;  %v11781_v45 = vld [vmem:[#allocation4 + $0x158] sm:$0xff]   ;;  %v11782_v46 = vld [vmem:[#allocation4 + $0x160] sm:$0xff]  }
  0x5a   :  { %v11783_v47 = vld [vmem:[#allocation4 + $0x168] sm:$0xff]   ;;  %v11784_v48 = vld [vmem:[#allocation4 + $0x170] sm:$0xff]   ;;  %v11785_v49 = vld [vmem:[#allocation4 + $0x178] sm:$0xff]  }
  0x5b   :  { %v11786_v50 = vld [vmem:[#allocation4 + $0x180] sm:$0xff]   ;;  %v11819_v52 = vld [vmem:[#allocation4 + $0x208] sm:$0xff]   ;;  %v11788_v54 = vld [vmem:[#allocation4 + $0x190] sm:$0xff]  }
  0x5c   :  { %v11818_v51 = vld [vmem:[#allocation4 + $0x200] sm:$0xff]   ;;  %v11787_v53 = vld [vmem:[#allocation4 + $0x188] sm:$0xff]   ;;  %v11822_v55 = vld [vmem:[#allocation4 + $0x210] sm:$0xff]  }
  0x5d   :  { %10467 = vmatprep.mubr.msk.bf16.mxu0 %vm303_vm1, %v11818_v51  ;;  %v11823_v56 = vld [vmem:[#allocation4 + $0x218] sm:$0xff]   ;;  %v11790_v58 = vld [vmem:[#allocation4 + $0x1a0] sm:$0xff]   ;;  %v11827_v60 = vld [vmem:[#allocation4 + $0x228] sm:$0xff]  }
  0x5e   :  { %10468 = vmatmul.mubr.msk.bf16.vlgmr.msra.gmra.mrb[0].mxu0 %vm303_vm1, %v11819_v52  ;;  %v11789_v57 = vld [vmem:[#allocation4 + $0x198] sm:$0xff]   ;;  %v11826_v59 = vld [vmem:[#allocation4 + $0x220] sm:$0xff]   ;;  %v11791_v61 = vld [vmem:[#allocation4 + $0x1a8] sm:$0xff]  }
  0x5f   :  { %10344 = vmatmul.mubr.msk.bf16.gmra.mrb[8].mxu1 %vm303_vm1, %v11743_v7  ;;  %10471 = vmatprep.mubr.msk.bf16.mxu0 %vm303_vm1, %v11822_v55  ;;  %v11792_v62 = vld [vmem:[#allocation4 + $0x1b0] sm:$0xff]   ;;  %v11831_v1 = vld [vmem:[#allocation4 + $0x238] sm:$0xff]   ;;  %v11794_v6 = vld [vmem:[#allocation4 + $0x1c0] sm:$0xff]  }
  0x60   :  { %10347 = vmatprep.mubr.msk.bf16.mxu1 %vm303_vm1, %v11744_v8  ;;  %v11830_v63 = vld [vmem:[#allocation4 + $0x230] sm:$0xff]   ;;  %v11793_v4 = vld [vmem:[#allocation4 + $0x1b8] sm:$0xff]   ;;  %v11834_v8 = vld [vmem:[#allocation4 + $0x240] sm:$0xff]  }
  0x61   :  { %v11808_v55 = vld [vmem:[#allocation4 + $0x2b0] sm:$0xff]  }
  0x66   :  { %10472 = vmatmul.mubr.msk.bf16.gmra.mrb[4].mxu0 %vm303_vm1, %v11823_v56 }
  0x67   :  { %10348 = vmatmul.mubr.msk.bf16.gmra.mrb[12].mxu1 %vm303_vm1, %v11745_v9  ;;  %10475 = vmatprep.mubr.msk.bf16.mxu0 %vm303_vm1, %v11826_v59  ;;  %v11809_v59 = vld [vmem:[#allocation4 + $0x2b8] sm:$0xff]  }
  0x68   :  { %10351 = vmatprep.mubr.msk.bf16.mxu1 %vm303_vm1, %v11746_v10  ;;  %v11835_v10 = vld [vmem:[#allocation4 + $0x248] sm:$0xff]  }
  0x6e   :  { %10476 = vmatmul.mubr.msk.bf16.gmra.mrb[8].mxu0 %vm303_vm1, %v11827_v60 }
  0x6f   :  { %10352 = vmatmul.mubr.msk.bf16.gmra.mrb[16].mxu1 %vm303_vm1, %v11747_v11  ;;  %10479 = vmatprep.mubr.msk.bf16.mxu0 %vm303_vm1, %v11830_v63 }
  0x70   :  { %10355 = vmatprep.mubr.msk.bf16.mxu1 %vm303_vm1, %v11748_v12  ;;  %v11795_v12 = vld [vmem:[#allocation4 + $0x1c8] sm:$0xff]  }
  0x76   :  { %10480 = vmatmul.mubr.msk.bf16.gmra.mrb[12].mxu0 %vm303_vm1, %v11831_v1 }
  0x77   :  { %10356 = vmatmul.mubr.msk.bf16.gmra.mrb[20].mxu1 %vm303_vm1, %v11749_v13  ;;  %10483 = vmatprep.mubr.msk.bf16.mxu0 %vm303_vm1, %v11834_v8  ;;  %v11812_v8 = vld [vmem:[#allocation4 + $0x2d0] sm:$0xff]  }
  0x78   :  { %10359 = vmatprep.mubr.msk.bf16.mxu1 %vm303_vm1, %v11750_v14  ;;  %v11796_v14 = vld [vmem:[#allocation4 + $0x1d0] sm:$0xff]  }
  0x7e   :  { %10484 = vmatmul.mubr.msk.bf16.gmra.mrb[16].mxu0 %vm303_vm1, %v11835_v10 }
  0x7f   :  { %10360 = vmatmul.mubr.msk.bf16.gmra.mrb[24].mxu1 %vm303_vm1, %v11751_v15 }
  0x80   :  { %10363 = vmatprep.mubr.msk.bf16.mxu1 %vm303_vm1, %v11752_v16  ;;  %v11838_v16 = vld [vmem:[#allocation4 + $0x250] sm:$0xff]  }
  0x81   :  { %10487 = vmatprep.mubr.msk.bf16.mxu0 %vm303_vm1, %v11838_v16  ;;  %v11813_v16 = vld [vmem:[#allocation4 + $0x2d8] sm:$0xff]  }
  0x87   :  { %10364 = vmatmul.mubr.msk.bf16.gmra.mrb[28].mxu1 %vm303_vm1, %v11753_v17 }
  0x88   :  { %10367 = vmatprep.mubr.msk.bf16.mxu1 %vm303_vm1, %v11754_v18  ;;  %v11839_v18 = vld [vmem:[#allocation4 + $0x258] sm:$0xff]  }
  0x89   :  { %10488 = vmatmul.mubr.msk.bf16.gmra.mrb[20].mxu0 %vm303_vm1, %v11839_v18 }
  0x8f   :  { %10368 = vmatmul.mubr.msk.bf16.gmra.mrb[32].mxu1 %vm303_vm1, %v11755_v19 }
  0x90   :  { %10371 = vmatprep.mubr.msk.bf16.mxu1 %vm303_vm1, %v11756_v20  ;;  %v11797_v20 = vld [vmem:[#allocation4 + $0x1d8] sm:$0xff]  }
  0x97   :  { %10372 = vmatmul.mubr.msk.bf16.gmra.mrb[36].mxu1 %vm303_vm1, %v11757_v21 }
  0x98   :  { %10375 = vmatprep.mubr.msk.bf16.mxu1 %vm303_vm1, %v11758_v22  ;;  %v11798_v22 = vld [vmem:[#allocation4 + $0x1e0] sm:$0xff]  }
  0x9f   :  { %10376 = vmatmul.mubr.msk.bf16.gmra.mrb[40].mxu1 %vm303_vm1, %v11759_v23 }
  0xa0   :  { %10379 = vmatprep.mubr.msk.bf16.mxu1 %vm303_vm1, %v11760_v24  ;;  %v11842_v24 = vld [vmem:[#allocation4 + $0x260] sm:$0xff]  }
  0xa1   :  { %10491 = vmatprep.mubr.msk.bf16.mxu0 %vm303_vm1, %v11842_v24 }
  0xa7   :  { %10380 = vmatmul.mubr.msk.bf16.gmra.mrb[44].mxu1 %vm303_vm1, %v11761_v25 }
  0xa8   :  { %10383 = vmatprep.mubr.msk.bf16.mxu1 %vm303_vm1, %v11762_v26  ;;  %v11843_v26 = vld [vmem:[#allocation4 + $0x268] sm:$0xff]  }
  0xa9   :  { %10492 = vmatmul.mubr.msk.bf16.gmra.mrb[24].mxu0 %vm303_vm1, %v11843_v26 }
  0xaf   :  { %10384 = vmatmul.mubr.msk.bf16.gmra.mrb[48].mxu1 %vm303_vm1, %v11763_v27 }
  0xb0   :  { %10387 = vmatprep.mubr.msk.bf16.mxu1 %vm303_vm1, %v11764_v28  ;;  %v11799_v28 = vld [vmem:[#allocation4 + $0x1e8] sm:$0xff]  }
  0xb7   :  { %10388 = vmatmul.mubr.msk.bf16.gmra.mrb[52].mxu1 %vm303_vm1, %v11765_v29 }
  0xb8   :  { %10391 = vmatprep.mubr.msk.bf16.mxu1 %vm303_vm1, %v11766_v30  ;;  %v11800_v30 = vld [vmem:[#allocation4 + $0x1f0] sm:$0xff]  }
  0xbf   :  { %10392 = vmatmul.mubr.msk.bf16.gmra.mrb[56].mxu1 %vm303_vm1, %v11767_v31 }
  0xc0   :  { %10395 = vmatprep.mubr.msk.bf16.mxu1 %vm303_vm1, %v11768_v32  ;;  %v11846_v32 = vld [vmem:[#allocation4 + $0x270] sm:$0xff]  }
  0xc1   :  { %10495 = vmatprep.mubr.msk.bf16.mxu0 %vm303_vm1, %v11846_v32  ;;  %v11816_v32 = vld [vmem:[#allocation4 + $0x2f0] sm:$0xff]  }
  0xc7   :  { %10396 = vmatmul.mubr.msk.bf16.gmra.mrb[60].mxu1 %vm303_vm1, %v11769_v33 }
  0xc8   :  { %10401 = vmatprep.mubr.msk.bf16.mxu1 %vm303_vm1, %v11770_v34  ;;  %v11847_v34 = vld [vmem:[#allocation4 + $0x278] sm:$0xff]  }
  0xc9   :  { %10496 = vmatmul.mubr.msk.bf16.gmra.mrb[28].mxu0 %vm303_vm1, %v11847_v34 }
  0xcf   :  { %10402 = vmatmul.mubr.msk.bf16.vlgmr.msra.gmra.mrb[64].mxu1 %vm303_vm1, %v11771_v35 }
  0xd0   :  { %11210 = vmatpush3.bf16.msra.mxu1 %v12154_v2  ;;  %10405 = vmatprep.mubr.msk.bf16.mxu1 %vm303_vm1, %v11772_v36  ;;  %v11801_v36 = vld [vmem:[#allocation4 + $0x1f8] sm:$0xff]  }
  0xd1   :  { %11727 = vmatprep.subr.msk.bf16.mxu1 %vm400_vm0, %v12148_v0 }
  0xd7   :  { %10406 = vmatmul.mubr.msk.bf16.gmra.mrb[68].mxu1 %vm303_vm1, %v11773_v37 }
  0xd8   :  { %10409 = vmatprep.mubr.msk.bf16.mxu1 %vm303_vm1, %v11774_v38  ;;  %v11802_v38 = vld [vmem:[#allocation4 + $0x280] sm:$0xff]  }
  0xdf   :  { %10410 = vmatmul.mubr.msk.bf16.gmra.mrb[72].mxu1 %vm303_vm1, %v11775_v39 }
  0xe0   :  { %10413 = vmatprep.mubr.msk.bf16.mxu1 %vm303_vm1, %v11776_v40 }
  0xe7   :  { %10414 = vmatmul.mubr.msk.bf16.gmra.mrb[76].mxu1 %vm303_vm1, %v11777_v41 }
  0xe8   :  { %10417 = vmatprep.mubr.msk.bf16.mxu1 %vm303_vm1, %v11778_v42  ;;  %v11803_v42 = vld [vmem:[#allocation4 + $0x288] sm:$0xff]  }
  0xef   :  { %10418 = vmatmul.mubr.msk.bf16.gmra.mrb[80].mxu1 %vm303_vm1, %v11779_v43 }
  0xf0   :  { %10421 = vmatprep.mubr.msk.bf16.mxu1 %vm303_vm1, %v11780_v44  ;;  %v11804_v44 = vld [vmem:[#allocation4 + $0x290] sm:$0xff]  }
  0xf7   :  { %10422 = vmatmul.mubr.msk.bf16.gmra.mrb[84].mxu1 %vm303_vm1, %v11781_v45 }
  0xf8   :  { %10425 = vmatprep.mubr.msk.bf16.mxu1 %vm303_vm1, %v11782_v46 }
  0xff   :  { %10426 = vmatmul.mubr.msk.bf16.gmra.mrb[88].mxu1 %vm303_vm1, %v11783_v47 }
 0x100   :  { %10429 = vmatprep.mubr.msk.bf16.mxu1 %vm303_vm1, %v11784_v48  ;;  %v11805_v48 = vld [vmem:[#allocation4 + $0x298] sm:$0xff]  }
 0x107   :  { %10430 = vmatmul.mubr.msk.bf16.gmra.mrb[92].mxu1 %vm303_vm1, %v11785_v49 }
 0x108   :  { %10433 = vmatprep.mubr.msk.bf16.mxu1 %vm303_vm1, %v11786_v50  ;;  %v11806_v50 = vld [vmem:[#allocation4 + $0x2a0] sm:$0xff]  }
 0x10f   :  { %10434 = vmatmul.mubr.msk.bf16.gmra.mrb[96].mxu1 %vm303_vm1, %v11787_v53 }
 0x110   :  { %10437 = vmatprep.mubr.msk.bf16.mxu1 %vm303_vm1, %v11788_v54 }
 0x117   :  { %10438 = vmatmul.mubr.msk.bf16.gmra.mrb[100].mxu1 %vm303_vm1, %v11789_v57 }
 0x118   :  { %10441 = vmatprep.mubr.msk.bf16.mxu1 %vm303_vm1, %v11790_v58 }
 0x11f   :  { %10442 = vmatmul.mubr.msk.bf16.gmra.mrb[104].mxu1 %vm303_vm1, %v11791_v61  ;;  %v11810_v61 = vld [vmem:[#allocation4 + $0x2c0] sm:$0xff]  }
 0x120   :  { %10445 = vmatprep.mubr.msk.bf16.mxu1 %vm303_vm1, %v11792_v62 }
 0x122   :  { %v12229_v0 = vpop.f32.mrb[0].mxu1 }
 0x123   :  { %v12231_v3 = vpop.f32.mrb[1].mxu1 }
 0x124   :  { %v12234_v5 = vpop.f32.mrb[2].mxu1 }
 0x125   :  { %v12237_v7 = vpop.f32.mrb[3].mxu1 }
 0x127   :  { %10446 = vmatmul.mubr.msk.bf16.gmra.mrb[108].mxu1 %vm303_vm1, %v11793_v4  ;;  %v11811_v4 = vld [vmem:[#allocation4 + $0x2c8] sm:$0xff]  }
 0x128   :  { %10449 = vmatprep.mubr.msk.bf16.mxu1 %vm303_vm1, %v11794_v6 }
 0x12a   :  { %v12241_v9 = vpop.f32.mrb[4].mxu1 }
 0x12b   :  { %v12243_v11 = vpop.f32.mrb[5].mxu1 }
 0x12c   :  { %v12246_v13 = vpop.f32.mrb[6].mxu1 }
 0x12d   :  { %v12249_v15 = vpop.f32.mrb[7].mxu1 }
 0x12f   :  { %10450 = vmatmul.mubr.msk.bf16.gmra.mrb[112].mxu1 %vm303_vm1, %v11795_v12 }
 0x130   :  { %10453 = vmatprep.mubr.msk.bf16.mxu1 %vm303_vm1, %v11796_v14 }
 0x132   :  { %v12253_v17 = vpop.f32.mrb[8].mxu1 }
 0x133   :  { %v12255_v19 = vpop.f32.mrb[9].mxu1 }
 0x134   :  { %v12258_v21 = vpop.f32.mrb[10].mxu1 }
 0x135   :  { %v12261_v23 = vpop.f32.mrb[11].mxu1 }
 0x137   :  { %10454 = vmatmul.mubr.msk.bf16.gmra.mrb[116].mxu1 %vm303_vm1, %v11797_v20  ;;  %v11814_v20 = vld [vmem:[#allocation4 + $0x2e0] sm:$0xff]  }
 0x138   :  { %10457 = vmatprep.mubr.msk.bf16.mxu1 %vm303_vm1, %v11798_v22 }
 0x13a   :  { %v12265_v25 = vpop.f32.mrb[12].mxu1 }
 0x13b   :  { %v12267_v27 = vpop.f32.mrb[13].mxu1 }
 0x13c   :  { %v12270_v29 = vpop.f32.mrb[14].mxu1 }
 0x13d   :  { %v12273_v31 = vpop.f32.mrb[15].mxu1 }
 0x13f   :  { %10458 = vmatmul.mubr.msk.bf16.gmra.mrb[120].mxu1 %vm303_vm1, %v11799_v28  ;;  %v11815_v28 = vld [vmem:[#allocation4 + $0x2e8] sm:$0xff]  }
 0x140   :  { %10461 = vmatprep.mubr.msk.bf16.mxu1 %vm303_vm1, %v11800_v30 }
 0x142   :  { %v12277_v33 = vpop.f32.mrb[16].mxu1 }
 0x143   :  { %v12279_v35 = vpop.f32.mrb[17].mxu1 }
 0x144   :  { %v12282_v37 = vpop.f32.mrb[18].mxu1 }
 0x145   :  { %v12285_v39 = vpop.f32.mrb[19].mxu1 }
 0x147   :  { %10462 = vmatmul.mubr.msk.bf16.gmra.mrb[124].mxu1 %vm303_vm1, %v11801_v36 }
 0x148   :  { %10499 = vmatprep.mubr.msk.bf16.mxu1 %vm303_vm1, %v11802_v38 }
 0x14a   :  { %v12289_v40 = vpop.f32.mrb[20].mxu1 }
 0x14b   :  { %v12291_v41 = vpop.f32.mrb[21].mxu1 }
 0x14c   :  { %v12293_v43 = vpop.f32.mrb[22].mxu1 }
 0x14d   :  { %v12295_v45 = vpop.f32.mrb[23].mxu1 }
 0x14f   :  { %10500 = vmatmul.mubr.msk.bf16.vlgmr.msra.gmra.mrb[128].mxu1 %vm303_vm1, %v11803_v42  ;;  %v11817_v42 = vld [vmem:[#allocation4 + $0x2f8] sm:$0xff]  }
 0x150   :  { %10532 = vmatpush3.bf16.msra.mxu1 %v12154_v2  ;;  %10503 = vmatprep.mubr.msk.bf16.mxu1 %vm303_vm1, %v11804_v44  ;;  %v11807_v2 = vld [vmem:[#allocation4 + $0x2a8] sm:$0xff]  }
 0x152   :  { %v12300_v46 = vpop.f32.mrb[24].mxu1 }
 0x153   :  { %v12302_v47 = vpop.f32.mrb[25].mxu1 }
 0x154   :  { %v12304_v49 = vpop.f32.mrb[26].mxu1 }
 0x155   :  { %v12306_v51 = vpop.f32.mrb[27].mxu1 }
 0x157   :  { %10504 = vmatmul.mubr.msk.bf16.gmra.mrb[132].mxu1 %vm303_vm1, %v11805_v48  ;;  %v11820_v48 = vld [vmem:[#allocation4 + $0x300] sm:$0xff]  }
 0x158   :  { %10507 = vmatprep.mubr.msk.bf16.mxu1 %vm303_vm1, %v11806_v50 }
 0x15a   :  { %v12310_v52 = vpop.f32.mrb[28].mxu1 }
 0x15b   :  { %v12312_v53 = vpop.f32.mrb[29].mxu1 }
 0x15c   :  { %v12314_v54 = vpop.f32.mrb[30].mxu1 }
 0x15d   :  { %v12316_v56 = vpop.f32.mrb[31].mxu1 }
 0x15f   :  { %10508 = vmatmul.mubr.msk.bf16.gmra.mrb[136].mxu1 %vm303_vm1, %v11807_v2 }
 0x160   :  { %10511 = vmatprep.mubr.msk.bf16.mxu1 %vm303_vm1, %v11808_v55 }
 0x162   :  { %v12320_v57 = vpop.f32.mrb[32].mxu1 }
 0x163   :  { %v12322_v58 = vpop.f32.mrb[33].mxu1 }
 0x164   :  { %v12324_v60 = vpop.f32.mrb[34].mxu1 }
 0x165   :  { %v12326_v62 = vpop.f32.mrb[35].mxu1 }
 0x167   :  { %10512 = vmatmul.mubr.msk.bf16.gmra.mrb[140].mxu1 %vm303_vm1, %v11809_v59  ;;  %v11821_v59 = vld [vmem:[#allocation4 + $0x308] sm:$0xff]  }
 0x168   :  { %10515 = vmatprep.mubr.msk.bf16.mxu1 %vm303_vm1, %v11810_v61 }
 0x16a   :  { %v12330_v63 = vpop.f32.mrb[36].mxu1 }
 0x16b   :  { %v12332_v1 = vpop.f32.mrb[37].mxu1 }
 0x16c   :  { %v12334_v6 = vpop.f32.mrb[38].mxu1 }
 0x16d   :  { %v12336_v10 = vpop.f32.mrb[39].mxu1 }
 0x16f   :  { %10516 = vmatmul.mubr.msk.bf16.gmra.mrb[144].mxu1 %vm303_vm1, %v11811_v4  ;;  %v11824_v4 = vld [vmem:[#allocation4 + $0x310] sm:$0xff]  }
 0x170   :  { %10519 = vmatprep.mubr.msk.bf16.mxu1 %vm303_vm1, %v11812_v8 }
 0x172   :  { %v12340_v12 = vpop.f32.mrb[40].mxu1 }
 0x173   :  { %v12342_v14 = vpop.f32.mrb[41].mxu1 }
 0x174   :  { %v12344_v18 = vpop.f32.mrb[42].mxu1 }
 0x175   :  { %v12346_v22 = vpop.f32.mrb[43].mxu1 }
 0x177   :  { %10520 = vmatmul.mubr.msk.bf16.gmra.mrb[148].mxu1 %vm303_vm1, %v11813_v16 }
 0x178   :  { %10523 = vmatprep.mubr.msk.bf16.mxu1 %vm303_vm1, %v11814_v20 }
 0x17a   :  { %v12350_v24 = vpop.f32.mrb[44].mxu1 }
 0x17b   :  { %v12352_v26 = vpop.f32.mrb[45].mxu1 }
 0x17c   :  { %v12354_v30 = vpop.f32.mrb[46].mxu1 }
 0x17d   :  { %v12356_v34 = vpop.f32.mrb[47].mxu1 }
 0x17f   :  { %10524 = vmatmul.mubr.msk.bf16.gmra.mrb[152].mxu1 %vm303_vm1, %v11815_v28  ;;  %v11825_v28 = vld [vmem:[#allocation4 + $0x318] sm:$0xff]  }
 0x180   :  { %10527 = vmatprep.mubr.msk.bf16.mxu1 %vm303_vm1, %v11816_v32 }
 0x182   :  { %v12360_v36 = vpop.f32.mrb[48].mxu1 }
 0x183   :  { %15065 = vst [vmem:[#allocation17_spill] sm:$0xff] %v12360_v36  ;;  %v12362_v38 = vpop.f32.mrb[49].mxu1 }
 0x184   :  { %15066 = vst [vmem:[#allocation18_spill] sm:$0xff] %v12362_v38  ;;  %v12364_v44 = vpop.f32.mrb[50].mxu1 }
 0x185   :  { %15067 = vst [vmem:[#allocation19_spill] sm:$0xff] %v12364_v44  ;;  %v12366_v50 = vpop.f32.mrb[51].mxu1 }
 0x186   :  { %15068 = vst [vmem:[#allocation20_spill] sm:$0xff] %v12366_v50  ;;  %v11836_v50 = vld [vmem:[#allocation4 + $0x340] sm:$0xff]  }
 0x187   :  { %10528 = vmatmul.mubr.msk.bf16.gmra.mrb[156].mxu1 %vm303_vm1, %v11817_v42  ;;  %v11828_v42 = vld [vmem:[#allocation4 + $0x320] sm:$0xff]  }
 0x188   :  { %10533 = vmatprep.mubr.msk.bf16.mxu1 %vm303_vm1, %v11820_v48 }
 0x18a   :  { %v12370_v2 = vpop.f32.mrb[52].mxu1 }
 0x18b   :  { %15069 = vst [vmem:[#allocation21_spill] sm:$0xff] %v12370_v2  ;;  %v12372_v55 = vpop.f32.mrb[53].mxu1 }
 0x18c   :  { %15070 = vst [vmem:[#allocation22_spill] sm:$0xff] %v12372_v55  ;;  %v12374_v61 = vpop.f32.mrb[54].mxu1 }
 0x18d   :  { %15071 = vst [vmem:[#allocation23_spill] sm:$0xff] %v12374_v61  ;;  %v12376_v8 = vpop.f32.mrb[55].mxu1 }
 0x18e   :  { %15072 = vst [vmem:[#allocation24_spill] sm:$0xff] %v12376_v8 }
 0x18f   :  { %10534 = vmatmul.mubr.msk.bf16.vlgmr.msra.gmra.mrb[160].mxu1 %vm303_vm1, %v11821_v59  ;;  %v11829_v59 = vld [vmem:[#allocation4 + $0x328] sm:$0xff]  }
 0x190   :  { %10537 = vmatprep.mubr.msk.bf16.mxu1 %vm303_vm1, %v11824_v4 }
 0x192   :  { %v12380_v16 = vpop.f32.mrb[56].mxu1 }
 0x193   :  { %15073 = vst [vmem:[#allocation25_spill] sm:$0xff] %v12380_v16  ;;  %v12382_v20 = vpop.f32.mrb[57].mxu1  ;;  %v11832_v16 = vld [vmem:[#allocation4 + $0x330] sm:$0xff]  }
 0x194   :  { %15074 = vst [vmem:[#allocation26_spill] sm:$0xff] %v12382_v20  ;;  %v12384_v32 = vpop.f32.mrb[58].mxu1 }
 0x195   :  { %15075 = vst [vmem:[#allocation27_spill] sm:$0xff] %v12384_v32  ;;  %v12386_v48 = vpop.f32.mrb[59].mxu1 }
 0x196   :  { %15076 = vst [vmem:[#allocation28_spill] sm:$0xff] %v12386_v48  ;;  %v695_v48 = vmax.f32 %v12229_v0, 0.0 }
 0x197   :  { %10538 = vmatmul.mubr.msk.bf16.gmra.mrb[164].mxu1 %vm303_vm1, %v11825_v28 }
 0x198   :  { %10541 = vmatprep.mubr.msk.bf16.mxu1 %vm303_vm1, %v11828_v42  ;;  %v11833_v42 = vld [vmem:[#allocation4 + $0x338] sm:$0xff]  }
 0x19a   :  { %v12390_v61 = vpop.f32.mrb[60].mxu1 }
 0x19b   :  { %15077 = vst [vmem:[#allocation29_spill] sm:$0xff] %v12390_v61  ;;  %v12392_v8 = vpop.f32.mrb[61].mxu1  ;;  %v693_v61 = vmax.f32 %v12231_v3, 0.0 }
 0x19c   :  { %15078 = vst [vmem:[#allocation30_spill] sm:$0xff] %v12392_v8  ;;  %v12394_v4 = vpop.f32.mrb[62].mxu1 }
 0x19d   :  { %15079 = vst [vmem:[#allocation31_spill] sm:$0xff] %v12394_v4  ;;  %v12396_v55 = vpop.f32.mrb[63].mxu1  ;;  %v696_v4 = vmax.f32 %v12234_v5, 0.0 }
 0x19e   :  { %15080 = vst [vmem:[#allocation32_spill] sm:$0xff] %v12396_v55 }
 0x19f   :  { %10542 = vmatmul.mubr.msk.bf16.gmra.mrb[168].mxu1 %vm303_vm1, %v11829_v59 }
 0x1a0   :  { %10545 = vmatprep.mubr.msk.bf16.mxu1 %vm303_vm1, %v11832_v16  ;;  %v694_v16 = vmax.f32 %v12237_v7, 0.0  ;;  %v11840_v7 = vld [vmem:[#allocation4 + $0x350] sm:$0xff]  }
 0x1a2   :  { %v10403_v32 = vpop.f32.mrb[64].mxu1 }
 0x1a3   :  { %v1369_v28 = vmax.f32 %v10403_v32, 0.0  ;;  %v1112_v20 = vpop.f32.mrb[65].mxu1 }
 0x1a4   :  { %v1367_v2 = vmax.f32 %v1112_v20, 0.0  ;;  %v10404_v8 = vpop.f32.mrb[66].mxu1  ;;  %v699_v20 = vmax.f32 %v12241_v9, 0.0 }
 0x1a5   :  { %v12402_v44 = vmax.f32 %v695_v48, %v1369_v28  ;;  %v1370_v55 = vmax.f32 %v10404_v8, 0.0  ;;  %v1115_v38 = vpop.f32.mrb[67].mxu1  ;;  %v11837_v8 = vld [vmem:[#allocation4 + $0x348] sm:$0xff]  }
 0x1a6   :  { %v12405_v59 = vmax.f32 %v693_v61, %v1367_v2  ;;  %v1368_v36 = vmax.f32 %v1115_v38, 0.0  ;;  %v697_v2 = vmax.f32 %v12243_v11, 0.0 }
 0x1a7   :  { %v12408_v0 = vmax.f32 %v696_v4, %v1370_v55  ;;  %10546 = vmatmul.mubr.msk.bf16.gmra.mrb[172].mxu1 %vm303_vm1, %v11833_v42  ;;  %v700_v55 = vmax.f32 %v12246_v13, 0.0 }
 0x1a8   :  { %v12411_v32 = vmax.f32 %v694_v16, %v1368_v36  ;;  %10549 = vmatprep.mubr.msk.bf16.mxu1 %vm303_vm1, %v11836_v50  ;;  %v698_v50 = vmax.f32 %v12249_v15, 0.0  ;;  %v11844_v15 = vld [vmem:[#allocation4 + $0x360] sm:$0xff]  }
 0x1aa   :  { %v10407_v3 = vpop.f32.mrb[68].mxu1 }
 0x1ab   :  { %v1373_v48 = vmax.f32 %v10407_v3, 0.0  ;;  %v1128_v5 = vpop.f32.mrb[69].mxu1 }
 0x1ac   :  { %v1371_v61 = vmax.f32 %v1128_v5, 0.0  ;;  %v10408_v28 = vpop.f32.mrb[70].mxu1  ;;  %v11841_v5 = vld [vmem:[#allocation4 + $0x358] sm:$0xff]  }
 0x1ad   :  { %v12416_v38 = vmax.f32 %v699_v20, %v1373_v48  ;;  %v1374_v4 = vmax.f32 %v10408_v28, 0.0  ;;  %v1131_v36 = vpop.f32.mrb[71].mxu1  ;;  %v703_v20 = vmax.f32 %v12253_v17, 0.0 }
 0x1ae   :  { %v12419_v42 = vmax.f32 %v697_v2, %v1371_v61  ;;  %v1372_v16 = vmax.f32 %v1131_v36, 0.0  ;;  %v701_v2 = vmax.f32 %v12255_v19, 0.0 }
 0x1af   :  { %v12422_v9 = vmax.f32 %v700_v55, %v1374_v4  ;;  %10550 = vmatmul.mubr.msk.bf16.gmra.mrb[176].mxu1 %vm303_vm1, %v11837_v8  ;;  %v704_v55 = vmax.f32 %v12258_v21, 0.0 }
 0x1b0   :  { %v12425_v3 = vmax.f32 %v698_v50, %v1372_v16  ;;  %10553 = vmatprep.mubr.msk.bf16.mxu1 %vm303_vm1, %v11840_v7  ;;  %v702_v7 = vmax.f32 %v12261_v23, 0.0  ;;  %v11848_v23 = vld [vmem:[#allocation4 + $0x370] sm:$0xff]  }
 0x1b2   :  { %v10411_v11 = vpop.f32.mrb[72].mxu1 }
 0x1b3   :  { %v1377_v48 = vmax.f32 %v10411_v11, 0.0  ;;  %v1144_v13 = vpop.f32.mrb[73].mxu1 }
 0x1b4   :  { %v1375_v61 = vmax.f32 %v1144_v13, 0.0  ;;  %v10412_v28 = vpop.f32.mrb[74].mxu1  ;;  %v11845_v13 = vld [vmem:[#allocation4 + $0x368] sm:$0xff]  }
 0x1b5   :  { %v12430_v36 = vmax.f32 %v703_v20, %v1377_v48  ;;  %v1378_v8 = vmax.f32 %v10412_v28, 0.0  ;;  %v1147_v4 = vpop.f32.mrb[75].mxu1  ;;  %v707_v20 = vmax.f32 %v12265_v25, 0.0  ;;  %v11866_v25 = vld [vmem:[#allocation9 + $0x30] sm:$0xff]  }
 0x1b6   :  { %v12433_v50 = vmax.f32 %v701_v2, %v1375_v61  ;;  %v1376_v16 = vmax.f32 %v1147_v4, 0.0  ;;  %v705_v2 = vmax.f32 %v12267_v27, 0.0  ;;  %10801 = vmatprep.subr.bf16.mxu0 %v11866_v25 }
 0x1b7   :  { %v12436_v17 = vmax.f32 %v704_v55, %v1378_v8  ;;  %10554 = vmatmul.mubr.msk.bf16.gmra.mrb[180].mxu1 %vm303_vm1, %v11841_v5  ;;  %v708_v55 = vmax.f32 %v12270_v29, 0.0  ;;  %10802 = vmatpush3.bf16.msra.mxu0 %v11866_v25  ;;  %v711_v29 = vmax.f32 %v12277_v33, 0.0 }
 0x1b8   :  { %v12439_v11 = vmax.f32 %v702_v7, %v1376_v16  ;;  %10557 = vmatprep.mubr.msk.bf16.mxu1 %vm303_vm1, %v11844_v15  ;;  %v706_v15 = vmax.f32 %v12273_v31, 0.0  ;;  %v709_v31 = vmax.f32 %v12279_v35, 0.0 }
 0x1ba   :  { %v10415_v19 = vpop.f32.mrb[76].mxu1 }
 0x1bb   :  { %v1381_v48 = vmax.f32 %v10415_v19, 0.0  ;;  %v1160_v21 = vpop.f32.mrb[77].mxu1 }
 0x1bc   :  { %v1379_v61 = vmax.f32 %v1160_v21, 0.0  ;;  %v10416_v28 = vpop.f32.mrb[78].mxu1 }
 0x1bd   :  { %v12444_v4 = vmax.f32 %v707_v20, %v1381_v48  ;;  %v1382_v5 = vmax.f32 %v10416_v28, 0.0  ;;  %v1163_v8 = vpop.f32.mrb[79].mxu1 }
 0x1be   :  { %v12447_v7 = vmax.f32 %v705_v2, %v1379_v61  ;;  %v1380_v16 = vmax.f32 %v1163_v8, 0.0  ;;  %v11849_v2 = vld [vmem:[#allocation4 + $0x378] sm:$0xff]  }
 0x1bf   :  { %v12450_v19 = vmax.f32 %v708_v55, %v1382_v5  ;;  %10558 = vmatmul.mubr.msk.bf16.gmra.mrb[184].mxu1 %vm303_vm1, %v11845_v13  ;;  %v11850_v55 = vld [vmem:[#allocation4 + $0x380] sm:$0xff]   ;;  %v712_v13 = vmax.f32 %v12282_v37, 0.0 }
 0x1c0   :  { %15081 = vst [vmem:[#allocation33_spill] sm:$0xff] %v12447_v7  ;;  %v12453_v27 = vmax.f32 %v706_v15, %v1380_v16  ;;  %10561 = vmatprep.mubr.msk.bf16.mxu1 %vm303_vm1, %v11848_v23  ;;  %v710_v16 = vmax.f32 %v12285_v39, 0.0  ;;  %v11852_v39 = vld [vmem:[#allocation4 + $0x390] sm:$0xff]  }
 0x1c1   :  { %15082 = vst [vmem:[#allocation34_spill] sm:$0xff] %v12450_v19 }
 0x1c2   :  { %15083 = vst [vmem:[#allocation35_spill] sm:$0xff] %v12453_v27  ;;  %v10419_v20 = vpop.f32.mrb[80].mxu1 }
 0x1c3   :  { %v1385_v48 = vmax.f32 %v10419_v20, 0.0  ;;  %v1176_v21 = vpop.f32.mrb[81].mxu1 }
 0x1c4   :  { %v1383_v61 = vmax.f32 %v1176_v21, 0.0  ;;  %v10420_v28 = vpop.f32.mrb[82].mxu1  ;;  %v11851_v21 = vld [vmem:[#allocation4 + $0x388] sm:$0xff]  }
 0x1c5   :  { %v12458_v5 = vmax.f32 %v711_v29, %v1385_v48  ;;  %v1386_v8 = vmax.f32 %v10420_v28, 0.0  ;;  %v1179_v15 = vpop.f32.mrb[83].mxu1  ;;  %v715_v29 = vmax.f32 %v12289_v40, 0.0 }
 0x1c6   :  { %v12461_v23 = vmax.f32 %v709_v31, %v1383_v61  ;;  %v1384_v25 = vmax.f32 %v1179_v15, 0.0  ;;  %v713_v31 = vmax.f32 %v12291_v41, 0.0 }
 0x1c7   :  { %15084 = vst [vmem:[#allocation36_spill] sm:$0xff] %v12458_v5  ;;  %v12464_v33 = vmax.f32 %v712_v13, %v1386_v8  ;;  %10562 = vmatmul.mubr.msk.bf16.gmra.mrb[188].mxu1 %vm303_vm1, %v11849_v2  ;;  %v716_v13 = vmax.f32 %v12293_v43, 0.0 }
 0x1c8   :  { %15085 = vst [vmem:[#allocation37_spill] sm:$0xff] %v12461_v23  ;;  %v12467_v20 = vmax.f32 %v710_v16, %v1384_v25  ;;  %10565 = vmatprep.mubr.msk.bf16.mxu1 %vm303_vm1, %v11850_v55  ;;  %v714_v55 = vmax.f32 %v12295_v45, 0.0  ;;  %v11854_v45 = vld [vmem:[#allocation4 + $0x3a0] sm:$0xff]  }
 0x1c9   :  { %15086 = vst [vmem:[#allocation38_spill] sm:$0xff] %v12464_v33 }
 0x1ca   :  { %15087 = vst [vmem:[#allocation39_spill] sm:$0xff] %v12467_v20  ;;  %v10423_v35 = vpop.f32.mrb[84].mxu1 }
 0x1cb   :  { %v1389_v48 = vmax.f32 %v10423_v35, 0.0  ;;  %v1192_v37 = vpop.f32.mrb[85].mxu1 }
 0x1cc   :  { %v1387_v61 = vmax.f32 %v1192_v37, 0.0  ;;  %v10424_v28 = vpop.f32.mrb[86].mxu1  ;;  %v11853_v37 = vld [vmem:[#allocation4 + $0x398] sm:$0xff]  }
 0x1cd   :  { %v12472_v15 = vmax.f32 %v715_v29, %v1389_v48  ;;  %v1390_v2 = vmax.f32 %v10424_v28, 0.0  ;;  %v1195_v8 = vpop.f32.mrb[87].mxu1  ;;  %v719_v29 = vmax.f32 %v12300_v46, 0.0 }
 0x1ce   :  { %v12475_v16 = vmax.f32 %v713_v31, %v1387_v61  ;;  %v1388_v25 = vmax.f32 %v1195_v8, 0.0  ;;  %v717_v31 = vmax.f32 %v12302_v47, 0.0 }
 0x1cf   :  { %15088 = vst [vmem:[#allocation40_spill] sm:$0xff] %v12472_v15  ;;  %v12478_v40 = vmax.f32 %v716_v13, %v1390_v2  ;;  %10566 = vmatmul.mubr.msk.bf16.gmra.mrb[192].mxu1 %vm303_vm1, %v11851_v21  ;;  %v720_v13 = vmax.f32 %v12304_v49, 0.0 }
 0x1d0   :  { %15089 = vst [vmem:[#allocation41_spill] sm:$0xff] %v12475_v16  ;;  %v12481_v35 = vmax.f32 %v714_v55, %v1388_v25  ;;  %10569 = vmatprep.mubr.msk.bf16.mxu1 %vm303_vm1, %v11852_v39  ;;  %v718_v39 = vmax.f32 %v12306_v51, 0.0  ;;  %v11856_v51 = vld [vmem:[#allocation4 + $0x3b0] sm:$0xff]  }
 0x1d1   :  { %15090 = vst [vmem:[#allocation42_spill] sm:$0xff] %v12478_v40 }
 0x1d2   :  { %15091 = vst [vmem:[#allocation43_spill] sm:$0xff] %v12481_v35  ;;  %v10427_v41 = vpop.f32.mrb[88].mxu1  ;;  %v15128_v35 = vld [vmem:[#allocation24_spill] sm:$0xff] }
 0x1d3   :  { %v1393_v48 = vmax.f32 %v10427_v41, 0.0  ;;  %v1208_v43 = vpop.f32.mrb[89].mxu1  ;;  %v746_v40 = vmax.f32 %v15128_v35, 0.0 }
 0x1d4   :  { %v1391_v61 = vmax.f32 %v1208_v43, 0.0  ;;  %v10428_v28 = vpop.f32.mrb[90].mxu1  ;;  %v11855_v43 = vld [vmem:[#allocation4 + $0x3a8] sm:$0xff]  }
 0x1d5   :  { %v12486_v8 = vmax.f32 %v719_v29, %v1393_v48  ;;  %v1394_v21 = vmax.f32 %v10428_v28, 0.0  ;;  %v1211_v2 = vpop.f32.mrb[91].mxu1  ;;  %v723_v29 = vmax.f32 %v12310_v52, 0.0  ;;  %v11867_v52 = vld [vmem:[#allocation9 + $0x38] sm:$0xff]  }
 0x1d6   :  { %v12489_v55 = vmax.f32 %v717_v31, %v1391_v61  ;;  %v1392_v25 = vmax.f32 %v1211_v2, 0.0  ;;  %v721_v31 = vmax.f32 %v12312_v53, 0.0  ;;  %v12509_v53 = vpop.f32.mrb[0].mxu0  ;;  %10803 = vmatprep.subr.bf16.mxu0 %v11867_v52 }
 0x1d7   :  { %15092 = vst [vmem:[#allocation44_spill] sm:$0xff] %v12486_v8  ;;  %v12492_v46 = vmax.f32 %v720_v13, %v1394_v21  ;;  %10570 = vmatmul.mubr.msk.bf16.gmra.mrb[196].mxu1 %vm303_vm1, %v11853_v37  ;;  %v724_v13 = vmax.f32 %v12314_v54, 0.0  ;;  %v12514_v54 = vpop.f32.mrb[1].mxu0  ;;  %10804 = vmatpush3.bf16.msra.mxu0 %v11867_v52 }
 0x1d8   :  { %15093 = vst [vmem:[#allocation45_spill] sm:$0xff] %v12489_v55  ;;  %v12495_v41 = vmax.f32 %v718_v39, %v1392_v25  ;;  %10573 = vmatprep.mubr.msk.bf16.mxu1 %vm303_vm1, %v11854_v45  ;;  %v722_v45 = vmax.f32 %v12316_v56, 0.0 }
 0x1d9   :  { %15094 = vst [vmem:[#allocation46_spill] sm:$0xff] %v12492_v46 }
 0x1da   :  { %15095 = vst [vmem:[#allocation47_spill] sm:$0xff] %v12495_v41  ;;  %v10431_v47 = vpop.f32.mrb[92].mxu1  ;;  %v15120_v41 = vld [vmem:[#allocation20_spill] sm:$0xff] }
 0x1db   :  { %v1397_v48 = vmax.f32 %v10431_v47, 0.0  ;;  %v1224_v49 = vpop.f32.mrb[93].mxu1  ;;  %v742_v46 = vmax.f32 %v15120_v41, 0.0 }
 0x1dc   :  { %v1395_v61 = vmax.f32 %v1224_v49, 0.0  ;;  %v10432_v28 = vpop.f32.mrb[94].mxu1 }
 0x1dd   :  { %v12500_v2 = vmax.f32 %v723_v29, %v1397_v48  ;;  %v1398_v37 = vmax.f32 %v10432_v28, 0.0  ;;  %v1227_v21 = vpop.f32.mrb[95].mxu1  ;;  %v12516_v29 = vpop.f32.mrb[2].mxu0 }
 0x1de   :  { %v12503_v39 = vmax.f32 %v721_v31, %v1395_v61  ;;  %v1396_v25 = vmax.f32 %v1227_v21, 0.0  ;;  %v12518_v56 = vpop.f32.mrb[3].mxu0  ;;  %v727_v31 = vmax.f32 %v12320_v57, 0.0 }
 0x1df   :  { %15096 = vst [vmem:[#allocation48_spill] sm:$0xff] %v12500_v2  ;;  %v12506_v47 = vmax.f32 %v724_v13, %v1398_v37  ;;  %10574 = vmatmul.mubr.msk.bf16.gmra.mrb[200].mxu1 %vm303_vm1, %v11855_v43  ;;  %v11857_v43 = vld [vmem:[#allocation4 + $0x3b8] sm:$0xff]   ;;  %v725_v13 = vmax.f32 %v12322_v58, 0.0 }
 0x1e0   :  { %15097 = vst [vmem:[#allocation49_spill] sm:$0xff] %v12503_v39  ;;  %v12511_v49 = vmax.f32 %v722_v45, %v1396_v25  ;;  %10577 = vmatprep.mubr.msk.bf16.mxu1 %vm303_vm1, %v11856_v51  ;;  %v11858_v45 = vld [vmem:[#allocation4 + $0x3c0] sm:$0xff]   ;;  %v728_v51 = vmax.f32 %v12324_v60, 0.0 }
 0x1e1   :  { %15098 = vst [vmem:[#allocation50_spill] sm:$0xff] %v12506_v47  ;;  %v726_v47 = vmax.f32 %v12326_v62, 0.0 }
 0x1e2   :  { %15099 = vst [vmem:[#allocation51_spill] sm:$0xff] %v12511_v49  ;;  %v10435_v48 = vpop.f32.mrb[96].mxu1 }
 0x1e3   :  { %v1401_v61 = vmax.f32 %v10435_v48, 0.0  ;;  %v1240_v28 = vpop.f32.mrb[97].mxu1  ;;  %v12531_v48 = vpop.f32.mrb[4].mxu0 }
 0x1e4   :  { %v1399_v37 = vmax.f32 %v1240_v28, 0.0  ;;  %v10436_v21 = vpop.f32.mrb[98].mxu1  ;;  %v12536_v60 = vpop.f32.mrb[5].mxu0 }
 0x1e5   :  { %v12523_v25 = vmax.f32 %v727_v31, %v1401_v61  ;;  %v1402_v52 = vmax.f32 %v10436_v21, 0.0  ;;  %v1243_v49 = vpop.f32.mrb[99].mxu1  ;;  %v12538_v31 = vpop.f32.mrb[6].mxu0 }
 0x1e6   :  { %v12526_v39 = vmax.f32 %v725_v13, %v1399_v37  ;;  %v1400_v2 = vmax.f32 %v1243_v49, 0.0  ;;  %v12540_v62 = vpop.f32.mrb[7].mxu0  ;;  %v731_v49 = vmax.f32 %v12330_v63, 0.0  ;;  %v11859_v37 = vld [vmem:[#allocation4 + $0x3c8] sm:$0xff]   ;;  %v730_v63 = vmax.f32 %v12336_v10, 0.0 }
 0x1e7   :  { %15100 = vst [vmem:[#allocation52_spill] sm:$0xff] %v12523_v25  ;;  %v12528_v57 = vmax.f32 %v728_v51, %v1402_v52  ;;  %10578 = vmatmul.mubr.msk.bf16.gmra.mrb[204].mxu1 %vm303_vm1, %v11857_v43  ;;  %v729_v43 = vmax.f32 %v12332_v1, 0.0  ;;  %v11868_v51 = vld [vmem:[#allocation9 + $0x10] sm:$0xff]  }
 0x1e8   :  { %15101 = vst [vmem:[#allocation53_spill] sm:$0xff] %v12526_v39  ;;  %v12533_v58 = vmax.f32 %v726_v47, %v1400_v2  ;;  %10581 = vmatprep.mubr.msk.bf16.mxu1 %vm303_vm1, %v11858_v45  ;;  %v11860_v47 = vld [vmem:[#allocation4 + $0x3d0] sm:$0xff]   ;;  %v732_v45 = vmax.f32 %v12334_v6, 0.0  ;;  %v12056_v39 = vmov 0   ;;  %10597 = vmatprep.subr.bf16.mxu1 %v11868_v51 }
 0x1e9   :  { %15102 = vst [vmem:[#allocation54_spill] sm:$0xff] %v12528_v57  ;;  %2973 = vst.msk [vmem:[#allocation2 + $0x8] sm:$0xff] %vm2971_vm2, %v12056_v39  ;;  %10598 = vmatpush3.bf16.msra.mxu1 %v11868_v51  ;;  %v736_v51 = vmax.f32 %v12344_v18, 0.0 }
 0x1ea   :  { %15103 = vst [vmem:[#allocation55_spill] sm:$0xff] %v12533_v58  ;;  %v10439_v61 = vpop.f32.mrb[100].mxu1  ;;  %2972 = vst.msk [vmem:[#allocation2] sm:$0xff] %vm2971_vm2, %v12056_v39 }
 0x1eb   :  { %v1405_v28 = vmax.f32 %v10439_v61, 0.0  ;;  %v1256_v13 = vpop.f32.mrb[101].mxu1  ;;  %2974 = vst.msk [vmem:[#allocation2 + $0x110] sm:$0xff] %vm2971_vm2, %v12056_v39  ;;  %2975 = vst.msk [vmem:[#allocation2 + $0x118] sm:$0xff] %vm2971_vm2, %v12056_v39  ;;  %v11869_v39 = vld [vmem:[#allocation9 + $0x18] sm:$0xff]  }
 0x1ec   :  { %v1403_v21 = vmax.f32 %v1256_v13, 0.0  ;;  %v10440_v2 = vpop.f32.mrb[102].mxu1  ;;  %10599 = vmatprep.subr.bf16.mxu1 %v11869_v39 }
 0x1ed   :  { %v12545_v52 = vmax.f32 %v731_v49, %v1405_v28  ;;  %v1406_v58 = vmax.f32 %v10440_v2, 0.0  ;;  %v1259_v57 = vpop.f32.mrb[103].mxu1  ;;  %v12557_v49 = vpop.f32.mrb[8].mxu0  ;;  %10600 = vmatpush3.bf16.msra.mxu1 %v11869_v39 }
 0x1ee   :  { %v12552_v1 = vmax.f32 %v729_v43, %v1403_v21  ;;  %v1404_v61 = vmax.f32 %v1259_v57, 0.0  ;;  %v12562_v13 = vpop.f32.mrb[9].mxu0  ;;  %v11861_v21 = vld [vmem:[#allocation4 + $0x3d8] sm:$0xff]  }
 0x1ef   :  { %15104 = vst [vmem:[#allocation56_spill] sm:$0xff] %v12545_v52  ;;  %v12554_v6 = vmax.f32 %v732_v45, %v1406_v58  ;;  %10582 = vmatmul.mubr.msk.bf16.gmra.mrb[208].mxu1 %vm303_vm1, %v11859_v37  ;;  %v12564_v2 = vpop.f32.mrb[10].mxu0  ;;  %v735_v58 = vmax.f32 %v12340_v12, 0.0  ;;  %v733_v45 = vmax.f32 %v12342_v14, 0.0  ;;  %v734_v52 = vmax.f32 %v12346_v22, 0.0 }
 0x1f0   :  { %15105 = vst [vmem:[#allocation57_spill] sm:$0xff] %v12552_v1  ;;  %v12559_v28 = vmax.f32 %v730_v63, %v1404_v61  ;;  %10585 = vmatprep.mubr.msk.bf16.mxu1 %vm303_vm1, %v11860_v47  ;;  %v12566_v57 = vpop.f32.mrb[11].mxu0  ;;  %v11862_v47 = vld [vmem:[#allocation4 + $0x3e0] sm:$0xff]   ;;  %v739_v22 = vmax.f32 %v12350_v24, 0.0 }
 0x1f1   :  { %15106 = vst [vmem:[#allocation58_spill] sm:$0xff] %v12554_v6  ;;  %v12579_v14 = vpop.f32.mrb[12].mxu0 }
 0x1f2   :  { %15107 = vst [vmem:[#allocation59_spill] sm:$0xff] %v12559_v28  ;;  %v10443_v10 = vpop.f32.mrb[104].mxu1  ;;  %v12584_v18 = vpop.f32.mrb[13].mxu0 }
 0x1f3   :  { %v1409_v43 = vmax.f32 %v10443_v10, 0.0  ;;  %v1272_v37 = vpop.f32.mrb[105].mxu1  ;;  %v12586_v39 = vpop.f32.mrb[14].mxu0 }
 0x1f4   :  { %v1407_v63 = vmax.f32 %v1272_v37, 0.0  ;;  %v10444_v61 = vpop.f32.mrb[106].mxu1 }
 0x1f5   :  { %v12571_v28 = vmax.f32 %v735_v58, %v1409_v43  ;;  %v1410_v6 = vmax.f32 %v10444_v61, 0.0  ;;  %v1275_v1 = vpop.f32.mrb[107].mxu1  ;;  %v12588_v43 = vpop.f32.mrb[15].mxu0 }
 0x1f6   :  { %v12574_v25 = vmax.f32 %v733_v45, %v1407_v63  ;;  %v1408_v12 = vmax.f32 %v1275_v1, 0.0  ;;  %v11863_v45 = vld [vmem:[#allocation4 + $0x3e8] sm:$0xff]  }
 0x1f7   :  { %15108 = vst [vmem:[#allocation60_spill] sm:$0xff] %v12571_v28  ;;  %v12576_v10 = vmax.f32 %v736_v51, %v1410_v6  ;;  %10586 = vmatmul.mubr.msk.bf16.gmra.mrb[212].mxu1 %vm303_vm1, %v11861_v21  ;;  %v737_v21 = vmax.f32 %v12352_v26, 0.0  ;;  %v740_v51 = vmax.f32 %v12354_v30, 0.0 }
 0x1f8   :  { %15109 = vst [vmem:[#allocation61_spill] sm:$0xff] %v12574_v25  ;;  %v12581_v37 = vmax.f32 %v734_v52, %v1408_v12  ;;  %10589 = vmatprep.mubr.msk.bf16.mxu1 %vm303_vm1, %v11862_v47  ;;  %v11864_v52 = vld [vmem:[#allocation4 + $0x3f0] sm:$0xff]  }
 0x1f9   :  { %15110 = vst [vmem:[#allocation62_spill] sm:$0xff] %v12576_v10  ;;  %v738_v10 = vmax.f32 %v12356_v34, 0.0  ;;  %v15116_v34 = vld [vmem:[#allocation17_spill] sm:$0xff] }
 0x1fa   :  { %15111 = vst [vmem:[#allocation63_spill] sm:$0xff] %v12581_v37  ;;  %v10447_v58 = vpop.f32.mrb[108].mxu1 }
 0x1fb   :  { %v1413_v1 = vmax.f32 %v10447_v58, 0.0  ;;  %v1288_v6 = vpop.f32.mrb[109].mxu1  ;;  %v12601_v58 = vpop.f32.mrb[16].mxu0 }
 0x1fc   :  { %v1411_v63 = vmax.f32 %v1288_v6, 0.0  ;;  %v10448_v61 = vpop.f32.mrb[110].mxu1  ;;  %v12606_v30 = vpop.f32.mrb[17].mxu0 }
 0x1fd   :  { %v12593_v47 = vmax.f32 %v739_v22, %v1413_v1  ;;  %v1414_v12 = vmax.f32 %v10448_v61, 0.0  ;;  %v1291_v37 = vpop.f32.mrb[111].mxu1  ;;  %v12608_v22 = vpop.f32.mrb[18].mxu0  ;;  %v11865_v61 = vld [vmem:[#allocation4 + $0x3f8] sm:$0xff]  }
 0x1fe   :  { %v12596_v25 = vmax.f32 %v737_v21, %v1411_v63  ;;  %v1412_v28 = vmax.f32 %v1291_v37, 0.0  ;;  %v12610_v6 = vpop.f32.mrb[19].mxu0  ;;  %v743_v21 = vmax.f32 %v15116_v34, 0.0 }
 0x1ff   :  { %15112 = vst [vmem:[#allocation64_spill] sm:$0xff] %v12593_v47  ;;  %v12598_v24 = vmax.f32 %v740_v51, %v1414_v12  ;;  %10590 = vmatmul.mubr.msk.bf16.gmra.mrb[216].mxu1 %vm303_vm1, %v11863_v45  ;;  %v15117_v51 = vld [vmem:[#allocation18_spill] sm:$0xff] }
 0x200   :  { %15113 = vst [vmem:[#allocation65_spill] sm:$0xff] %v12596_v25  ;;  %v12603_v26 = vmax.f32 %v738_v10, %v1412_v28  ;;  %10593 = vmatprep.mubr.msk.bf16.mxu1 %vm303_vm1, %v11864_v52  ;;  %v741_v45 = vmax.f32 %v15117_v51, 0.0  ;;  %v15118_v28 = vld [vmem:[#allocation19_spill] sm:$0xff] }
 0x201   :  { %15114 = vst [vmem:[#allocation66_spill] sm:$0xff] %v12598_v24  ;;  %v744_v10 = vmax.f32 %v15118_v28, 0.0  ;;  %v12617_v47 = vld [vmem:[#allocation2 + $0x8] sm:$0xff] }
 0x202   :  { %15115 = vst [vmem:[#allocation67_spill] sm:$0xff] %v12603_v26  ;;  %v10451_v1 = vpop.f32.mrb[112].mxu1  ;;  %v15125_v28 = vld [vmem:[#allocation22_spill] sm:$0xff] }
 0x203   :  { %v1417_v37 = vmax.f32 %v10451_v1, 0.0  ;;  %v1304_v63 = vpop.f32.mrb[113].mxu1  ;;  %v12622_v1 = vld [vmem:[#allocation9 + $0x40] sm:$0xff]  }
 0x204   :  { %v1415_v12 = vmax.f32 %v1304_v63, 0.0  ;;  %v10452_v24 = vpop.f32.mrb[114].mxu1  ;;  %v12627_v63 = vpop.f32.mrb[20].mxu0  ;;  %10869 = vmatprep.subr.bf16.mxu0 %v12622_v1 }
 0x205   :  { %v12615_v26 = vmax.f32 %v743_v21, %v1417_v37  ;;  %v1418_v52 = vmax.f32 %v10452_v24, 0.0  ;;  %v1307_v25 = vpop.f32.mrb[115].mxu1  ;;  %v12634_v24 = vpop.f32.mrb[21].mxu0  ;;  %v15124_v37 = vld [vmem:[#allocation21_spill] sm:$0xff] }
 0x206   :  { %v12620_v55 = vmax.f32 %v741_v45, %v1415_v12  ;;  %v1416_v34 = vmax.f32 %v1307_v25, 0.0  ;;  %v12636_v41 = vpop.f32.mrb[22].mxu0  ;;  %v747_v45 = vmax.f32 %v15124_v37, 0.0 }
 0x207   :  { %15119 = vst [vmem:[#allocation17_spill] sm:$0xff] %v12615_v26  ;;  %v12624_v8 = vmax.f32 %v744_v10, %v1418_v52  ;;  %10594 = vmatmul.mubr.msk.bf16.gmra.mrb[220].mxu1 %vm303_vm1, %v11865_v61  ;;  %v12638_v21 = vpop.f32.mrb[23].mxu0  ;;  %v745_v10 = vmax.f32 %v15125_v28, 0.0 }
 0x208   :  { %15121 = vst [vmem:[#allocation18_spill] sm:$0xff] %v12620_v55  ;;  %v12629_v51 = vmax.f32 %v742_v46, %v1416_v34  ;;  %10601 = vmatprep.mubr.msk.bf16.mxu1 %vm2971_vm2, %v12617_v47  ;;  %v15126_v34 = vld [vmem:[#allocation23_spill] sm:$0xff]  ;;  %v12650_v37 = vpop.f32.mrb[24].mxu0 }
 0x209   :  { %15122 = vst [vmem:[#allocation19_spill] sm:$0xff] %v12624_v8  ;;  %v12654_v28 = vpop.f32.mrb[25].mxu0 }
 0x20a   :  { %15123 = vst [vmem:[#allocation20_spill] sm:$0xff] %v12629_v51  ;;  %v10455_v25 = vpop.f32.mrb[116].mxu1  ;;  %v748_v51 = vmax.f32 %v15126_v34, 0.0 }
 0x20b   :  { %v1421_v12 = vmax.f32 %v10455_v25, 0.0  ;;  %v1320_v61 = vpop.f32.mrb[117].mxu1 }
 0x20c   :  { %v1419_v46 = vmax.f32 %v1320_v61, 0.0  ;;  %v10456_v52 = vpop.f32.mrb[118].mxu1  ;;  %v12656_v61 = vpop.f32.mrb[26].mxu0 }
 0x20d   :  { %v12643_v8 = vmax.f32 %v747_v45, %v1421_v12  ;;  %v1422_v55 = vmax.f32 %v10456_v52, 0.0  ;;  %v1323_v26 = vpop.f32.mrb[119].mxu1  ;;  %v12658_v45 = vpop.f32.mrb[27].mxu0  ;;  %v15132_v12 = vld [vmem:[#allocation25_spill] sm:$0xff] }
 0x20e   :  { %v12646_v16 = vmax.f32 %v745_v10, %v1419_v46  ;;  %v1420_v15 = vmax.f32 %v1323_v26, 0.0  ;;  %v751_v52 = vmax.f32 %v15132_v12, 0.0  ;;  %v15133_v10 = vld [vmem:[#allocation26_spill] sm:$0xff]  ;;  %v12670_v12 = vpop.f32.mrb[28].mxu0 }
 0x20f   :  { %15127 = vst [vmem:[#allocation21_spill] sm:$0xff] %v12643_v8  ;;  %v12648_v20 = vmax.f32 %v748_v51, %v1422_v55  ;;  %v749_v46 = vmax.f32 %v15133_v10, 0.0  ;;  %v15134_v51 = vld [vmem:[#allocation27_spill] sm:$0xff]  ;;  %v12674_v10 = vpop.f32.mrb[29].mxu0 }
 0x210   :  { %15129 = vst [vmem:[#allocation22_spill] sm:$0xff] %v12646_v16  ;;  %v12652_v25 = vmax.f32 %v746_v40, %v1420_v15 }
 0x211   :  { %15130 = vst [vmem:[#allocation23_spill] sm:$0xff] %v12648_v20  ;;  %v752_v20 = vmax.f32 %v15134_v51, 0.0 }
 0x212   :  { %15131 = vst [vmem:[#allocation24_spill] sm:$0xff] %v12652_v25  ;;  %v10459_v34 = vpop.f32.mrb[120].mxu1  ;;  %v15136_v25 = vld [vmem:[#allocation28_spill] sm:$0xff] }
 0x213   :  { %v1425_v8 = vmax.f32 %v10459_v34, 0.0  ;;  %v1336_v35 = vpop.f32.mrb[121].mxu1  ;;  %v750_v33 = vmax.f32 %v15136_v25, 0.0 }
 0x214   :  { %v1423_v26 = vmax.f32 %v1336_v35, 0.0  ;;  %v10460_v55 = vpop.f32.mrb[122].mxu1  ;;  %v12676_v35 = vpop.f32.mrb[30].mxu0 }
 0x215   :  { %v12663_v16 = vmax.f32 %v751_v52, %v1425_v8  ;;  %v1426_v15 = vmax.f32 %v10460_v55, 0.0  ;;  %v1339_v40 = vpop.f32.mrb[123].mxu1  ;;  %15140 = vst [vmem:[#allocation68_spill] sm:$0xff] %v12676_v35  ;;  %v12678_v8 = vpop.f32.mrb[31].mxu0  ;;  %v15142_v52 = vld [vmem:[#allocation29_spill] sm:$0xff] }
 0x216   :  { %v12666_v23 = vmax.f32 %v749_v46, %v1423_v26  ;;  %v1424_v5 = vmax.f32 %v1339_v40, 0.0  ;;  %15141 = vst [vmem:[#allocation69_spill] sm:$0xff] %v12678_v8  ;;  %v755_v55 = vmax.f32 %v15142_v52, 0.0  ;;  %v15143_v46 = vld [vmem:[#allocation30_spill] sm:$0xff] }
 0x217   :  { %15135 = vst [vmem:[#allocation25_spill] sm:$0xff] %v12663_v16  ;;  %v12668_v27 = vmax.f32 %v752_v20, %v1426_v15  ;;  %v753_v26 = vmax.f32 %v15143_v46, 0.0  ;;  %v15144_v15 = vld [vmem:[#allocation31_spill] sm:$0xff] }
 0x218   :  { %15137 = vst [vmem:[#allocation26_spill] sm:$0xff] %v12666_v23  ;;  %v12672_v34 = vmax.f32 %v750_v33, %v1424_v5 }
 0x219   :  { %15138 = vst [vmem:[#allocation27_spill] sm:$0xff] %v12668_v27  ;;  %v756_v27 = vmax.f32 %v15144_v15, 0.0 }
 0x21a   :  { %15139 = vst [vmem:[#allocation28_spill] sm:$0xff] %v12672_v34  ;;  %v10463_v51 = vpop.f32.mrb[124].mxu1  ;;  %v15146_v34 = vld [vmem:[#allocation32_spill] sm:$0xff] }
 0x21b   :  { %v1429_v16 = vmax.f32 %v10463_v51, 0.0  ;;  %v1352_v25 = vpop.f32.mrb[125].mxu1  ;;  %v754_v19 = vmax.f32 %v15146_v34, 0.0 }
 0x21c   :  { %v1427_v40 = vmax.f32 %v1352_v25, 0.0  ;;  %v10464_v20 = vpop.f32.mrb[126].mxu1 }
 0x21d   :  { %v12683_v23 = vmax.f32 %v755_v55, %v1429_v16  ;;  %v1430_v5 = vmax.f32 %v10464_v20, 0.0  ;;  %v1355_v33 = vpop.f32.mrb[127].mxu1 }
 0x21e   :  { %v12686_v35 = vmax.f32 %v753_v26, %v1427_v40  ;;  %v1428_v7 = vmax.f32 %v1355_v33, 0.0 }
 0x21f   :  { %15145 = vst [vmem:[#allocation29_spill] sm:$0xff] %v12683_v23  ;;  %v12688_v8 = vmax.f32 %v756_v27, %v1430_v5 }
 0x220   :  { %15147 = vst [vmem:[#allocation30_spill] sm:$0xff] %v12686_v35  ;;  %v12690_v52 = vmax.f32 %v754_v19, %v1428_v7 }
 0x221   :  { %15148 = vst [vmem:[#allocation31_spill] sm:$0xff] %v12688_v8 }
 0x222   :  { %15149 = vst [vmem:[#allocation32_spill] sm:$0xff] %v12690_v52  ;;  %v12692_v51 = vpop.f32.mrb[128].mxu1 }
 0x223   :  { %v12694_v46 = vpop.f32.mrb[129].mxu1 }
 0x224   :  { %v12696_v25 = vpop.f32.mrb[130].mxu1 }
 0x225   :  { %15150 = vst [vmem:[#allocation70_spill] sm:$0xff] %v12696_v25  ;;  %v12698_v15 = vpop.f32.mrb[131].mxu1 }
 0x226   :  { %15151 = vst [vmem:[#allocation71_spill] sm:$0xff] %v12698_v15  ;;  %v4865_v15 = vld [vmem:[#allocation2 + $0x8] sm:$0x80] }
 0x22a   :  { %v12700_v16 = vpop.f32.mrb[132].mxu1 }
 0x22b   :  { %15152 = vst [vmem:[#allocation72_spill] sm:$0xff] %v12700_v16  ;;  %v12702_v55 = vpop.f32.mrb[133].mxu1 }
 0x22c   :  { %15153 = vst [vmem:[#allocation73_spill] sm:$0xff] %v12702_v55  ;;  %v12704_v34 = vpop.f32.mrb[134].mxu1 }
 0x22d   :  { %15154 = vst [vmem:[#allocation74_spill] sm:$0xff] %v12704_v34  ;;  %v12706_v26 = vpop.f32.mrb[135].mxu1 }
 0x22e   :  { %15155 = vst [vmem:[#allocation75_spill] sm:$0xff] %v12706_v26 }
 0x232   :  { %v12708_v27 = vpop.f32.mrb[136].mxu1 }
 0x233   :  { %15156 = vst [vmem:[#allocation76_spill] sm:$0xff] %v12708_v27  ;;  %v12710_v7 = vpop.f32.mrb[137].mxu1 }
 0x234   :  { %15157 = vst [vmem:[#allocation77_spill] sm:$0xff] %v12710_v7  ;;  %v12712_v19 = vpop.f32.mrb[138].mxu1 }
 0x235   :  { %15158 = vst [vmem:[#allocation78_spill] sm:$0xff] %v12712_v19  ;;  %v12714_v40 = vpop.f32.mrb[139].mxu1 }
 0x236   :  { %15159 = vst [vmem:[#allocation79_spill] sm:$0xff] %v12714_v40 }
 0x23a   :  { %v12716_v20 = vpop.f32.mrb[140].mxu1 }
 0x23b   :  { %15160 = vst [vmem:[#allocation80_spill] sm:$0xff] %v12716_v20  ;;  %v12718_v5 = vpop.f32.mrb[141].mxu1 }
 0x23c   :  { %15161 = vst [vmem:[#allocation81_spill] sm:$0xff] %v12718_v5  ;;  %v12720_v33 = vpop.f32.mrb[142].mxu1 }
 0x23d   :  { %15162 = vst [vmem:[#allocation82_spill] sm:$0xff] %v12720_v33  ;;  %v12722_v52 = vpop.f32.mrb[143].mxu1 }
 0x23e   :  { %15163 = vst [vmem:[#allocation83_spill] sm:$0xff] %v12722_v52 }
 0x242   :  { %v12724_v8 = vpop.f32.mrb[144].mxu1 }
 0x243   :  { %15164 = vst [vmem:[#allocation84_spill] sm:$0xff] %v12724_v8  ;;  %v12726_v35 = vpop.f32.mrb[145].mxu1 }
 0x244   :  { %15165 = vst [vmem:[#allocation85_spill] sm:$0xff] %v12726_v35  ;;  %v12728_v23 = vpop.f32.mrb[146].mxu1 }
 0x245   :  { %15166 = vst [vmem:[#allocation86_spill] sm:$0xff] %v12728_v23  ;;  %v12730_v27 = vpop.f32.mrb[147].mxu1 }
 0x246   :  { %15167 = vst [vmem:[#allocation87_spill] sm:$0xff] %v12730_v27 }
 0x24a   :  { %v12732_v7 = vpop.f32.mrb[148].mxu1 }
 0x24b   :  { %15168 = vst [vmem:[#allocation88_spill] sm:$0xff] %v12732_v7  ;;  %v12734_v19 = vpop.f32.mrb[149].mxu1 }
 0x24c   :  { %15169 = vst [vmem:[#allocation89_spill] sm:$0xff] %v12734_v19  ;;  %v12736_v40 = vpop.f32.mrb[150].mxu1 }
 0x24d   :  { %15170 = vst [vmem:[#allocation90_spill] sm:$0xff] %v12736_v40  ;;  %v12738_v20 = vpop.f32.mrb[151].mxu1  ;;  %v2107_v40 = vmax.f32 %v12509_v53, 0.0 }
 0x24e   :  { %15171 = vst [vmem:[#allocation91_spill] sm:$0xff] %v12738_v20  ;;  %v2105_v20 = vmax.f32 %v12514_v54, 0.0 }
 0x252   :  { %v12740_v5 = vpop.f32.mrb[152].mxu1 }
 0x253   :  { %15172 = vst [vmem:[#allocation92_spill] sm:$0xff] %v12740_v5  ;;  %v12742_v33 = vpop.f32.mrb[153].mxu1 }
 0x254   :  { %15173 = vst [vmem:[#allocation93_spill] sm:$0xff] %v12742_v33  ;;  %v12744_v52 = vpop.f32.mrb[154].mxu1 }
 0x255   :  { %15174 = vst [vmem:[#allocation94_spill] sm:$0xff] %v12744_v52  ;;  %v12746_v8 = vpop.f32.mrb[155].mxu1  ;;  %v2108_v52 = vmax.f32 %v12516_v29, 0.0  ;;  %v2111_v29 = vmax.f32 %v12531_v48, 0.0 }
 0x256   :  { %15175 = vst [vmem:[#allocation95_spill] sm:$0xff] %v12746_v8 }
 0x25a   :  { %v12748_v35 = vpop.f32.mrb[156].mxu1 }
 0x25b   :  { %15176 = vst [vmem:[#allocation96_spill] sm:$0xff] %v12748_v35  ;;  %v12750_v23 = vpop.f32.mrb[157].mxu1 }
 0x25c   :  { %15177 = vst [vmem:[#allocation97_spill] sm:$0xff] %v12750_v23  ;;  %v12752_v27 = vpop.f32.mrb[158].mxu1  ;;  %v2106_v23 = vmax.f32 %v12518_v56, 0.0 }
 0x25d   :  { %15178 = vst [vmem:[#allocation98_spill] sm:$0xff] %v12752_v27  ;;  %v12754_v7 = vpop.f32.mrb[159].mxu1 }
 0x25e   :  { %15179 = vst [vmem:[#allocation99_spill] sm:$0xff] %v12754_v7 }
 0x262   :  { %v10535_v19 = vpop.f32.mrb[160].mxu1 }
 0x263   :  { %v2781_v5 = vmax.f32 %v10535_v19, 0.0  ;;  %v2524_v26 = vpop.f32.mrb[161].mxu1  ;;  %v3484_v19 = vshrl.u32 %v12617_v47, 16  ;;  %v2113_v47 = vmax.f32 %v12562_v13, 0.0 }
 0x264   :  { %v2779_v33 = vmax.f32 %v2524_v26, 0.0  ;;  %v10536_v34 = vpop.f32.mrb[162].mxu1 }
 0x265   :  { %v2845_v8 = vmax.f32 %v2107_v40, %v2781_v5  ;;  %v2782_v55 = vmax.f32 %v10536_v34, 0.0  ;;  %v2527_v35 = vpop.f32.mrb[163].mxu1  ;;  %v2109_v34 = vmax.f32 %v12536_v60, 0.0  ;;  %v4873_v40 = vshrl.u32 %v4865_v15, 16 }
 0x266   :  { %v2843_v16 = vmax.f32 %v2105_v20, %v2779_v33  ;;  %v2780_v27 = vmax.f32 %v2527_v35, 0.0  ;;  %v2112_v35 = vmax.f32 %v12538_v31, 0.0  ;;  %v2114_v15 = vmax.f32 %v12566_v57, 0.0  ;;  %v11872_v31 = vld [vmem:[#allocation9] sm:$0xff]  }
 0x267   :  { %v2909_v7 = vmax.f32 %v12402_v44, %v2845_v8  ;;  %v2846_v53 = vmax.f32 %v2108_v52, %v2782_v55  ;;  %v2110_v44 = vmax.f32 %v12540_v62, 0.0  ;;  %v2115_v8 = vmax.f32 %v12557_v49, 0.0  ;;  %10665 = vmatprep.subr.bf16.mxu1 %v11872_v31 }
 0x268   :  { %v2907_v54 = vmax.f32 %v12405_v59, %v2843_v16  ;;  %v2844_v25 = vmax.f32 %v2106_v23, %v2780_v27  ;;  %v2119_v55 = vmax.f32 %v12579_v14, 0.0  ;;  %v12777_v27 = vrot.slane %v4873_v40, 7 }
 0x269   :  { %v2910_v26 = vmax.f32 %v12408_v0, %v2846_v53  ;;  %v2116_v0 = vmax.f32 %v12564_v2, 0.0  ;;  %v2117_v5 = vmax.f32 %v12584_v18, 0.0  ;;  %v2120_v33 = vmax.f32 %v12586_v39, 0.0  ;;  %v11874_v39 = vld [vmem:[#allocation9 + $0x50] sm:$0xff]  }
 0x26a   :  { %v2908_v56 = vmax.f32 %v12411_v32, %v2844_v25  ;;  %v10539_v20 = vpop.f32.mrb[164].mxu1  ;;  %v12773_v32 = vrot.slane %v3484_v19, 7  ;;  %v2118_v19 = vmax.f32 %v12588_v43, 0.0 }
 0x26b   :  { %v2977_v59 = vpack.c.bf16 %v2910_v26, %v2909_v7  ;;  %v2785_v23 = vmax.f32 %v10539_v20, 0.0  ;;  %v2540_v52 = vpop.f32.mrb[165].mxu1  ;;  %v2123_v26 = vmax.f32 %v12601_v58, 0.0 }
 0x26c   :  { %v2976_v48 = vpack.c.bf16 %v2908_v56, %v2907_v54  ;;  %v2783_v16 = vmax.f32 %v2540_v52, 0.0  ;;  %v10540_v60 = vpop.f32.mrb[166].mxu1  ;;  %v2121_v56 = vmax.f32 %v12606_v30, 0.0 }
 0x26d   :  { %3009 = vst.msk [vmem:[#allocation2 + $0x18] sm:$0xff] %vm2971_vm2, %v2977_v59  ;;  %v2849_v62 = vmax.f32 %v2111_v29, %v2785_v23  ;;  %v2786_v25 = vmax.f32 %v10540_v60, 0.0  ;;  %v2543_v49 = vpop.f32.mrb[167].mxu1  ;;  %v2122_v59 = vmax.f32 %v12610_v6, 0.0  ;;  %v2127_v23 = vmax.f32 %v12627_v63, 0.0 }
 0x26e   :  { %3008 = vst.msk [vmem:[#allocation2 + $0x10] sm:$0xff] %vm2971_vm2, %v2976_v48  ;;  %v2847_v13 = vmax.f32 %v2109_v34, %v2783_v16  ;;  %v2784_v7 = vmax.f32 %v2543_v49, 0.0  ;;  %v2124_v34 = vmax.f32 %v12608_v22, 0.0  ;;  %v11873_v48 = vld [vmem:[#allocation9 + $0x8] sm:$0xff]   ;;  %v2139_v22 = vmax.f32 %v12692_v51, 0.0 }
 0x26f   :  { %v2913_v53 = vmax.f32 %v12416_v38, %v2849_v62  ;;  %v2850_v54 = vmax.f32 %v2112_v35, %v2786_v25 }
 0x270   :  { %v2911_v29 = vmax.f32 %v12419_v42, %v2847_v13  ;;  %v2848_v40 = vmax.f32 %v2110_v44, %v2784_v7 }
 0x271   :  { %v2914_v20 = vmax.f32 %v12422_v9, %v2850_v54  ;;  %v2129_v9 = vmax.f32 %v12654_v28, 0.0 }
 0x272   :  { %v2912_v35 = vmax.f32 %v12425_v3, %v2848_v40  ;;  %v10543_v52 = vpop.f32.mrb[168].mxu1 }
 0x273   :  { %v2979_v16 = vpack.c.bf16 %v2914_v20, %v2913_v53  ;;  %v2789_v60 = vmax.f32 %v10543_v52, 0.0  ;;  %v2556_v62 = vpop.f32.mrb[169].mxu1 }
 0x274   :  { %v2978_v49 = vpack.c.bf16 %v2912_v35, %v2911_v29  ;;  %v2787_v13 = vmax.f32 %v2556_v62, 0.0  ;;  %v10544_v7 = vpop.f32.mrb[170].mxu1  ;;  %v3043_v54 = vld [vmem:[#allocation2 + $0x18] sm:$0xff] }
 0x275   :  { %3011 = vst.msk [vmem:[#allocation2 + $0x28] sm:$0xff] %vm2971_vm2, %v2979_v16  ;;  %v2853_v42 = vmax.f32 %v2115_v8, %v2789_v60  ;;  %v2790_v44 = vmax.f32 %v10544_v7, 0.0  ;;  %v2559_v53 = vpop.f32.mrb[171].mxu1  ;;  %v3042_v20 = vld [vmem:[#allocation2 + $0x10] sm:$0xff]  ;;  %v3498_v52 = vshrl.u32 %v3043_v54, 16  ;;  %v3501_v38 = vshll.u32 %v3043_v54, 16 }
 0x276   :  { %3010 = vst.msk [vmem:[#allocation2 + $0x20] sm:$0xff] %vm2971_vm2, %v2978_v49  ;;  %v2851_v25 = vmax.f32 %v2113_v47, %v2787_v13  ;;  %v2788_v29 = vmax.f32 %v2559_v53, 0.0  ;;  %10602 = vmatmul.mubr.msk.bf16.vlgmr.msra.gmra.mrb[224].mxu1 %vm2971_vm2, %v3042_v20  ;;  %v3491_v35 = vshrl.u32 %v3042_v20, 16  ;;  %v3494_v62 = vshll.u32 %v3042_v20, 16 }
 0x277   :  { %v2917_v3 = vmax.f32 %v12430_v36, %v2853_v42  ;;  %v2854_v40 = vmax.f32 %v2116_v0, %v2790_v44  ;;  %10605 = vmatprep.mubr.msk.bf16.mxu1 %vm2971_vm2, %v3043_v54  ;;  %v12807_v8 = vrot.slane %v3498_v52, 7  ;;  %10666 = vmatpush3.bf16.msra.mxu1 %v11872_v31  ;;  %v4162_v16 = vrot.slane %v3501_v38, 1 }
 0x278   :  { %v2915_v60 = vmax.f32 %v12433_v50, %v2851_v25  ;;  %v2852_v47 = vmax.f32 %v2114_v15, %v2788_v29  ;;  %v3493_v49 = vrot.slane %v3491_v35, 7  ;;  %v2133_v13 = vmax.f32 %v12674_v10, 0.0  ;;  %10667 = vmatprep.subr.bf16.mxu1 %v11873_v48 }
 0x279   :  { %v2918_v36 = vmax.f32 %v12436_v17, %v2854_v40  ;;  %v3503_v2 = vor.u32 %v3501_v38, %v12807_v8  ;;  %v4166_v0 = vor.u32 %v4162_v16, %v3498_v52  ;;  %v12816_v7 = vrot.slane %v3494_v62, 1 }
 0x27a   :  { %v2916_v42 = vmax.f32 %v12439_v11, %v2852_v47  ;;  %v3496_v44 = vor.u32 %v3494_v62, %v3493_v49  ;;  %v10547_v31 = vpop.f32.mrb[172].mxu1  ;;  %v11871_v11 = vld [vmem:[#allocation9 + $0x48] sm:$0xff]  }
 0x27b   :  { %15180 = vst [vmem:[#allocation100_spill] sm:$0xff] %v12816_v7  ;;  %v2981_v50 = vpack.c.bf16 %v2918_v36, %v2917_v3  ;;  %v2793_v25 = vmax.f32 %v10547_v31, 0.0  ;;  %v2572_v57 = vpop.f32.mrb[173].mxu1  ;;  %v12819_v15 = vsel %vm3479_vm3, %v3493_v49, %v3503_v2  ;;  %10668 = vmatpush3.bf16.msra.mxu1 %v11873_v48  ;;  %v15181_v2 = vld [vmem:[#allocation33_spill] sm:$0xff]  ;;  %v15182_v31 = vld [vmem:[#allocation34_spill] sm:$0xff] }
 0x27c   :  { %v2980_v54 = vpack.c.bf16 %v2916_v42, %v2915_v60  ;;  %v2791_v53 = vmax.f32 %v2572_v57, 0.0  ;;  %v10548_v20 = vpop.f32.mrb[174].mxu1  ;;  %v4878_v17 = vsel %vm3479_vm3, %v12777_v27, %v3496_v44  ;;  %v12823_v38 = vld [vmem:[#allocation2 + $0x28] sm:$0xff]  ;;  %v12827_v40 = vsel %vm3479_vm3, %v12773_v32, %v3496_v44 }
 0x27d   :  { %3013 = vst.msk [vmem:[#allocation2 + $0x38] sm:$0xff] %vm2971_vm2, %v2981_v50  ;;  %v2857_v3 = vmax.f32 %v2119_v55, %v2793_v25  ;;  %v2794_v52 = vmax.f32 %v10548_v20, 0.0  ;;  %v2575_v48 = vpop.f32.mrb[175].mxu1  ;;  %10805 = vmatprep.mubr.msk.bf16.mxu0 %vm2971_vm2, %v4878_v17  ;;  %v12833_v29 = vld [vmem:[#allocation2 + $0x20] sm:$0xff]  ;;  %v3512_v27 = vshrl.u32 %v12823_v38, 16  ;;  %v3515_v62 = vshll.u32 %v12823_v38, 16 }
 0x27e   :  { %3012 = vst.msk [vmem:[#allocation2 + $0x30] sm:$0xff] %vm2971_vm2, %v2980_v54  ;;  %v2855_v60 = vmax.f32 %v2117_v5, %v2791_v53  ;;  %v2792_v47 = vmax.f32 %v2575_v48, 0.0  ;;  %10606 = vmatmul.mubr.msk.bf16.gmra.mrb[228].mxu1 %vm2971_vm2, %v12833_v29  ;;  %v3505_v14 = vshrl.u32 %v12833_v29, 16  ;;  %v3508_v55 = vshll.u32 %v12833_v29, 16  ;;  %10806 = vmatmul.mubr.msk.bf16.vlgmr.msra.gmra.mrb[32].mxu0 %vm2971_vm2, %v12819_v15  ;;  %v15184_v25 = vld [vmem:[#allocation35_spill] sm:$0xff] }
 0x27f   :  { %v2921_v49 = vmax.f32 %v12444_v4, %v2857_v3  ;;  %v2858_v36 = vmax.f32 %v2120_v33, %v2794_v52  ;;  %10609 = vmatprep.mubr.msk.bf16.mxu1 %vm2971_vm2, %v12823_v38  ;;  %v12853_v18 = vrot.slane %v3512_v27, 7  ;;  %10870 = vmatpush3.bf16.msra.mxu0 %v12622_v1  ;;  %v4158_v5 = vor.u32 %v12816_v7, %v3491_v35  ;;  %v15186_v3 = vld [vmem:[#allocation68_spill] sm:$0xff] }
 0x280   :  { %v2919_v42 = vmax.f32 %v15181_v2, %v2855_v60  ;;  %v2856_v44 = vmax.f32 %v2118_v19, %v2792_v47  ;;  %v3507_v4 = vrot.slane %v3505_v14, 7  ;;  %10871 = vmatprep.subr.bf16.mxu0 %v11871_v11  ;;  %v12862_v33 = vrot.slane %v3508_v55, 1 }
 0x281   :  { %v2922_v50 = vmax.f32 %v15182_v31, %v2858_v36  ;;  %v3517_v1 = vor.u32 %v3515_v62, %v12853_v18  ;;  %v12869_v35 = vsel %vm4143_vm4, %v4158_v5, %v4162_v16  ;;  %v2136_v52 = vmax.f32 %v15186_v3, 0.0 }
 0x282   :  { %15183 = vst [vmem:[#allocation33_spill] sm:$0xff] %v12869_v35  ;;  %v2920_v57 = vmax.f32 %v15184_v25, %v2856_v44  ;;  %v3510_v43 = vor.u32 %v3508_v55, %v3507_v4  ;;  %v10551_v19 = vpop.f32.mrb[176].mxu1  ;;  %v12874_v54 = vsel %vm4143_vm4, %v4166_v0, %v12862_v33 }
 0x283   :  { %15185 = vst [vmem:[#allocation34_spill] sm:$0xff] %v12874_v54  ;;  %v2983_v53 = vpack.c.bf16 %v2922_v50, %v2921_v49  ;;  %v2797_v20 = vmax.f32 %v10551_v19, 0.0  ;;  %v2588_v17 = vpop.f32.mrb[177].mxu1  ;;  %10872 = vmatpush3.bf16.msra.mxu0 %v11871_v11  ;;  %v12878_v48 = vsel %vm3479_vm3, %v3507_v4, %v3517_v1  ;;  %v15188_v4 = vld [vmem:[#allocation36_spill] sm:$0xff]  ;;  %v15189_v50 = vld [vmem:[#allocation37_spill] sm:$0xff] }
 0x284   :  { %v2982_v60 = vpack.c.bf16 %v2920_v57, %v2919_v42  ;;  %v2795_v16 = vmax.f32 %v2588_v17, 0.0  ;;  %v10552_v47 = vpop.f32.mrb[178].mxu1  ;;  %v12882_v55 = vsel %vm3479_vm3, %v12807_v8, %v3510_v43  ;;  %v12884_v36 = vld [vmem:[#allocation2 + $0x38] sm:$0xff]  ;;  %10937 = vmatprep.subr.bf16.mxu0 %v11874_v39  ;;  %v15191_v17 = vld [vmem:[#allocation39_spill] sm:$0xff] }
 0x285   :  { %3015 = vst.msk [vmem:[#allocation2 + $0x48] sm:$0xff] %vm2971_vm2, %v2983_v53  ;;  %v2861_v0 = vmax.f32 %v2123_v26, %v2797_v20  ;;  %v2798_v49 = vmax.f32 %v10552_v47, 0.0  ;;  %v2591_v11 = vpop.f32.mrb[179].mxu1  ;;  %10809 = vmatprep.mubr.msk.bf16.mxu0 %vm2971_vm2, %v12882_v55  ;;  %v12891_v5 = vld [vmem:[#allocation2 + $0x30] sm:$0xff]  ;;  %v14948_v2 = vshrl.u32 %v12884_v36, 16  ;;  %v15187_v26 = vld [vmem:[#allocation69_spill] sm:$0xff] }
 0x286   :  { %3014 = vst.msk [vmem:[#allocation2 + $0x40] sm:$0xff] %vm2971_vm2, %v2982_v60  ;;  %v2859_v8 = vmax.f32 %v2121_v56, %v2795_v16  ;;  %v2796_v42 = vmax.f32 %v2591_v11, 0.0  ;;  %10610 = vmatmul.mubr.msk.bf16.gmra.mrb[232].mxu1 %vm2971_vm2, %v12891_v5  ;;  %v14951_v58 = vshrl.u32 %v12891_v5, 16  ;;  %10810 = vmatmul.mubr.msk.bf16.gmra.mrb[36].mxu0 %vm2971_vm2, %v12878_v48  ;;  %v2134_v44 = vmax.f32 %v15187_v26, 0.0  ;;  %v15192_v16 = vld [vmem:[#allocation70_spill] sm:$0xff] }
 0x287   :  { %v2925_v39 = vmax.f32 %v15188_v4, %v2861_v0  ;;  %v2862_v31 = vmax.f32 %v2124_v34, %v2798_v49  ;;  %10613 = vmatprep.mubr.msk.bf16.mxu1 %vm2971_vm2, %v12884_v36  ;;  %v3528_v30 = vrot.slane %v14948_v2, 7  ;;  %v14950_v56 = vshll.u32 %v12884_v36, 16  ;;  %v15190_v34 = vld [vmem:[#allocation38_spill] sm:$0xff] }
 0x288   :  { %v2923_v1 = vmax.f32 %v15189_v50, %v2859_v8  ;;  %v2860_v25 = vmax.f32 %v2122_v59, %v2796_v42  ;;  %v3521_v57 = vrot.slane %v14951_v58, 7  ;;  %v14953_v43 = vshll.u32 %v12891_v5, 16  ;;  %v15204_v58 = vld [vmem:[#allocation43_spill] sm:$0xff] }
 0x289   :  { %v2926_v19 = vmax.f32 %v15190_v34, %v2862_v31  ;;  %v3531_v53 = vor.u32 %v14950_v56, %v3528_v30  ;;  %v2137_v20 = vmax.f32 %v12694_v46, 0.0 }
 0x28a   :  { %v2924_v60 = vmax.f32 %v15191_v17, %v2860_v25  ;;  %v3524_v6 = vor.u32 %v14953_v43, %v3521_v57  ;;  %v10555_v59 = vpop.f32.mrb[180].mxu1 }
 0x28b   :  { %v2985_v0 = vpack.c.bf16 %v2926_v19, %v2925_v39  ;;  %v2801_v49 = vmax.f32 %v10555_v59, 0.0  ;;  %v2604_v11 = vpop.f32.mrb[181].mxu1  ;;  %v12927_v8 = vsel %vm3479_vm3, %v3521_v57, %v3531_v53  ;;  %v15195_v53 = vld [vmem:[#allocation71_spill] sm:$0xff] }
 0x28c   :  { %v2984_v42 = vpack.c.bf16 %v2924_v60, %v2923_v1  ;;  %v2799_v4 = vmax.f32 %v2604_v11, 0.0  ;;  %v10556_v31 = vpop.f32.mrb[182].mxu1  ;;  %v12931_v50 = vsel %vm3479_vm3, %v12853_v18, %v3524_v6  ;;  %v12933_v25 = vld [vmem:[#allocation2 + $0x48] sm:$0xff]  ;;  %v15196_v18 = vmax.f32 %v12634_v24, 0.0 }
 0x28d   :  { %15193 = vst [vmem:[#allocation35_spill] sm:$0xff] %v12933_v25  ;;  %3017 = vst.msk [vmem:[#allocation2 + $0x58] sm:$0xff] %vm2971_vm2, %v2985_v0  ;;  %v2865_v34 = vmax.f32 %v2127_v23, %v2801_v49  ;;  %v2802_v39 = vmax.f32 %v10556_v31, 0.0  ;;  %v2607_v19 = vpop.f32.mrb[183].mxu1  ;;  %10813 = vmatprep.mubr.msk.bf16.mxu0 %vm2971_vm2, %v12931_v50  ;;  %v12940_v57 = vld [vmem:[#allocation2 + $0x40] sm:$0xff]  ;;  %v14949_v1 = vshrl.u32 %v12933_v25, 16 }
 0x28e   :  { %15194 = vst [vmem:[#allocation68_spill] sm:$0xff] %v12940_v57  ;;  %3016 = vst.msk [vmem:[#allocation2 + $0x50] sm:$0xff] %vm2971_vm2, %v2984_v42  ;;  %v2863_v60 = vmax.f32 %v15196_v18, %v2799_v4  ;;  %v2800_v6 = vmax.f32 %v2607_v19, 0.0  ;;  %10614 = vmatmul.mubr.msk.bf16.gmra.mrb[236].mxu1 %vm2971_vm2, %v12940_v57  ;;  %v14952_v63 = vshrl.u32 %v12940_v57, 16  ;;  %10814 = vmatmul.mubr.msk.bf16.gmra.mrb[40].mxu0 %vm2971_vm2, %v12927_v8  ;;  %v15197_v23 = vld [vmem:[#allocation40_spill] sm:$0xff]  ;;  %v15198_v0 = vmax.f32 %v12636_v41, 0.0 }
 0x28f   :  { %v2929_v59 = vmax.f32 %v15197_v23, %v2865_v34  ;;  %10617 = vmatprep.mubr.msk.bf16.mxu1 %vm2971_vm2, %v12933_v25  ;;  %v3542_v24 = vrot.slane %v14949_v1, 7  ;;  %v14954_v11 = vshll.u32 %v12933_v25, 16  ;;  %v15199_v42 = vld [vmem:[#allocation41_spill] sm:$0xff]  ;;  %v15200_v31 = vmax.f32 %v12638_v21, 0.0  ;;  %v15201_v41 = vld [vmem:[#allocation72_spill] sm:$0xff]  ;;  %v15202_v23 = vld [vmem:[#allocation42_spill] sm:$0xff] }
 0x290   :  { %v2866_v49 = vmax.f32 %v15198_v0, %v2802_v39  ;;  %v2927_v4 = vmax.f32 %v15199_v42, %v2863_v60  ;;  %v3535_v18 = vrot.slane %v14952_v63, 7  ;;  %v14955_v34 = vshll.u32 %v12940_v57, 16  ;;  %v15203_v1 = vld [vmem:[#allocation73_spill] sm:$0xff] }
 0x291   :  { %v2864_v19 = vmax.f32 %v15200_v31, %v2800_v6  ;;  %v3545_v2 = vor.u32 %v14954_v11, %v3542_v24  ;;  %v15205_v6 = vld [vmem:[#allocation74_spill] sm:$0xff] }
 0x292   :  { %v2930_v0 = vmax.f32 %v15202_v23, %v2866_v49  ;;  %v3538_v21 = vor.u32 %v14955_v34, %v3535_v18  ;;  %v10559_v60 = vpop.f32.mrb[184].mxu1  ;;  %v2144_v42 = vmax.f32 %v15205_v6, 0.0  ;;  %v15246_v6 = vld [vmem:[#allocation82_spill] sm:$0xff] }
 0x293   :  { %v2928_v17 = vmax.f32 %v15204_v58, %v2864_v19  ;;  %v2805_v63 = vmax.f32 %v10559_v60, 0.0  ;;  %v2620_v43 = vpop.f32.mrb[185].mxu1  ;;  %v12976_v39 = vsel %vm3479_vm3, %v3535_v18, %v3545_v2  ;;  %v15207_v58 = vmax.f32 %v12650_v37, 0.0 }
 0x294   :  { %v2987_v31 = vpack.c.bf16 %v2930_v0, %v2929_v59  ;;  %v2803_v23 = vmax.f32 %v2620_v43, 0.0  ;;  %v10560_v47 = vpop.f32.mrb[186].mxu1  ;;  %v12979_v11 = vsel %vm3479_vm3, %v3528_v30, %v3538_v21  ;;  %v12981_v56 = vld [vmem:[#allocation2 + $0x58] sm:$0xff]  ;;  %v15210_v18 = vmax.f32 %v12656_v61, 0.0 }
 0x295   :  { %v2986_v49 = vpack.c.bf16 %v2928_v17, %v2927_v4  ;;  %15206 = vst [vmem:[#allocation69_spill] sm:$0xff] %v12981_v56  ;;  %v2869_v19 = vmax.f32 %v15207_v58, %v2805_v63  ;;  %v2806_v34 = vmax.f32 %v10560_v47, 0.0  ;;  %v2623_v59 = vpop.f32.mrb[187].mxu1  ;;  %10817 = vmatprep.mubr.msk.bf16.mxu0 %vm2971_vm2, %v12979_v11  ;;  %v12988_v2 = vld [vmem:[#allocation2 + $0x50] sm:$0xff]  ;;  %v14956_v43 = vshrl.u32 %v12981_v56, 16 }
 0x296   :  { %3019 = vst.msk [vmem:[#allocation2 + $0x68] sm:$0xff] %vm2971_vm2, %v2987_v31  ;;  %15208 = vst [vmem:[#allocation36_spill] sm:$0xff] %v12988_v2  ;;  %v2867_v30 = vmax.f32 %v2129_v9, %v2803_v23  ;;  %v2804_v17 = vmax.f32 %v2623_v59, 0.0  ;;  %10618 = vmatmul.mubr.msk.bf16.gmra.mrb[240].mxu1 %vm2971_vm2, %v12988_v2  ;;  %v14957_v37 = vshrl.u32 %v12988_v2, 16  ;;  %10818 = vmatmul.mubr.msk.bf16.gmra.mrb[44].mxu0 %vm2971_vm2, %v12976_v39  ;;  %v14958_v47 = vshll.u32 %v12981_v56, 16  ;;  %v15209_v63 = vld [vmem:[#allocation44_spill] sm:$0xff] }
 0x297   :  { %3018 = vst.msk [vmem:[#allocation2 + $0x60] sm:$0xff] %vm2971_vm2, %v2986_v49  ;;  %v2933_v4 = vmax.f32 %v15209_v63, %v2869_v19  ;;  %v2870_v0 = vmax.f32 %v15210_v18, %v2806_v34  ;;  %v14965_v21 = vshll.u32 %v12988_v2, 16  ;;  %10621 = vmatprep.mubr.msk.bf16.mxu1 %vm2971_vm2, %v12981_v56  ;;  %v3556_v28 = vrot.slane %v14956_v43, 7  ;;  %v15211_v9 = vld [vmem:[#allocation45_spill] sm:$0xff]  ;;  %v15213_v34 = vld [vmem:[#allocation75_spill] sm:$0xff]  ;;  %v15214_v19 = vld [vmem:[#allocation46_spill] sm:$0xff] }
 0x298   :  { %v2931_v60 = vmax.f32 %v15211_v9, %v2867_v30  ;;  %v15212_v31 = vmax.f32 %v12658_v45, 0.0  ;;  %v3549_v23 = vrot.slane %v14957_v37, 7  ;;  %v4174_v61 = vor.u32 %v12862_v33, %v3505_v14  ;;  %v15215_v18 = vld [vmem:[#allocation76_spill] sm:$0xff]  ;;  %v15216_v30 = vld [vmem:[#allocation47_spill] sm:$0xff] }
 0x299   :  { %v2142_v58 = vmax.f32 %v15213_v34, 0.0  ;;  %v2934_v59 = vmax.f32 %v15214_v19, %v2870_v0  ;;  %v3559_v63 = vor.u32 %v14958_v47, %v3556_v28  ;;  %v4178_v33 = vrot.slane %v3515_v62, 1 }
 0x29a   :  { %v2868_v49 = vmax.f32 %v15212_v31, %v2804_v17  ;;  %v3552_v45 = vor.u32 %v14965_v21, %v3549_v23  ;;  %v10563_v17 = vpop.f32.mrb[188].mxu1  ;;  %v15249_v34 = vshrl.u32 %v12891_v5, 16 }
 0x29b   :  { %v2989_v31 = vpack.c.bf16 %v2934_v59, %v2933_v4  ;;  %v2809_v37 = vmax.f32 %v10563_v17, 0.0  ;;  %v2636_v29 = vpop.f32.mrb[189].mxu1  ;;  %v13025_v14 = vsel %vm3479_vm3, %v3549_v23, %v3559_v63  ;;  %v15218_v4 = vmax.f32 %v12670_v12, 0.0 }
 0x29c   :  { %v2932_v9 = vmax.f32 %v15216_v30, %v2868_v49  ;;  %v2807_v19 = vmax.f32 %v2636_v29, 0.0  ;;  %v10564_v47 = vpop.f32.mrb[190].mxu1  ;;  %v13030_v43 = vsel %vm3479_vm3, %v3542_v24, %v3552_v45  ;;  %v15222_v45 = vld [vmem:[#allocation49_spill] sm:$0xff] }
 0x29d   :  { %v13032_v49 = vld [vmem:[#allocation2 + $0x68] sm:$0xff]  ;;  %3021 = vst.msk [vmem:[#allocation2 + $0x78] sm:$0xff] %vm2971_vm2, %v2989_v31  ;;  %v2873_v59 = vmax.f32 %v15218_v4, %v2809_v37  ;;  %v2810_v30 = vmax.f32 %v10564_v47, 0.0  ;;  %v2639_v17 = vpop.f32.mrb[191].mxu1  ;;  %10821 = vmatprep.mubr.msk.bf16.mxu0 %vm2971_vm2, %v13030_v43  ;;  %v15220_v47 = vld [vmem:[#allocation48_spill] sm:$0xff] }
 0x29e   :  { %v2988_v0 = vpack.c.bf16 %v2932_v9, %v2931_v60  ;;  %15217 = vst [vmem:[#allocation37_spill] sm:$0xff] %v13032_v49  ;;  %v13039_v23 = vld [vmem:[#allocation2 + $0x60] sm:$0xff]  ;;  %v14959_v62 = vshrl.u32 %v13032_v49, 16  ;;  %v2871_v24 = vmax.f32 %v2133_v13, %v2807_v19  ;;  %v2808_v60 = vmax.f32 %v2639_v17, 0.0  ;;  %10822 = vmatmul.mubr.msk.bf16.gmra.mrb[48].mxu0 %vm2971_vm2, %v13025_v14  ;;  %v15225_v17 = vld [vmem:[#allocation51_spill] sm:$0xff] }
 0x29f   :  { %15219 = vst [vmem:[#allocation38_spill] sm:$0xff] %v13039_v23  ;;  %10622 = vmatmul.mubr.msk.bf16.gmra.mrb[244].mxu1 %vm2971_vm2, %v13039_v23  ;;  %v14960_v12 = vshrl.u32 %v13039_v23, 16  ;;  %v14961_v37 = vshll.u32 %v13032_v49, 16  ;;  %v2937_v63 = vmax.f32 %v15220_v47, %v2873_v59  ;;  %v2874_v9 = vmax.f32 %v2136_v52, %v2810_v30  ;;  %v15223_v52 = vld [vmem:[#allocation50_spill] sm:$0xff] }
 0x2a0   :  { %3020 = vst.msk [vmem:[#allocation2 + $0x70] sm:$0xff] %vm2971_vm2, %v2988_v0  ;;  %10625 = vmatprep.mubr.msk.bf16.mxu1 %vm2971_vm2, %v13032_v49  ;;  %v3570_v10 = vrot.slane %v14959_v62, 7  ;;  %v13059_v13 = vsel %vm4143_vm4, %v4174_v61, %v4178_v33  ;;  %v2935_v31 = vmax.f32 %v15222_v45, %v2871_v24  ;;  %v2872_v29 = vmax.f32 %v2134_v44, %v2808_v60  ;;  %v15224_v61 = vld [vmem:[#allocation77_spill] sm:$0xff]  ;;  %v15226_v60 = vld [vmem:[#allocation78_spill] sm:$0xff] }
 0x2a1   :  { %15221 = vst [vmem:[#allocation39_spill] sm:$0xff] %v13059_v13  ;;  %v3563_v0 = vrot.slane %v14960_v12, 7  ;;  %v14964_v3 = vshll.u32 %v13039_v23, 16  ;;  %v2938_v19 = vmax.f32 %v15223_v52, %v2874_v9  ;;  %v4182_v59 = vor.u32 %v4178_v33, %v3512_v27  ;;  %v15285_v23 = vld [vmem:[#allocation20_spill] sm:$0xff] }
 0x2a2   :  { %v3573_v4 = vor.u32 %v14961_v37, %v3570_v10  ;;  %v2936_v24 = vmax.f32 %v15225_v17, %v2872_v29  ;;  %v10567_v44 = vpop.f32.mrb[192].mxu1 }
 0x2a3   :  { %v3566_v26 = vor.u32 %v14964_v3, %v3563_v0  ;;  %v2991_v45 = vpack.c.bf16 %v2938_v19, %v2937_v63  ;;  %v2813_v62 = vmax.f32 %v10567_v44, 0.0  ;;  %v2652_v12 = vpop.f32.mrb[193].mxu1 }
 0x2a4   :  { %v13078_v9 = vsel %vm3479_vm3, %v3563_v0, %v3573_v4  ;;  %v2990_v52 = vpack.c.bf16 %v2936_v24, %v2935_v31  ;;  %v2811_v37 = vmax.f32 %v2652_v12, 0.0  ;;  %v10568_v38 = vpop.f32.mrb[194].mxu1  ;;  %v13083_v33 = vld [vmem:[#allocation2 + $0x78] sm:$0xff]  ;;  %v15230_v4 = vmax.f32 %v15192_v16, 0.0 }
 0x2a5   :  { %v13081_v27 = vsel %vm3479_vm3, %v3556_v28, %v3566_v26  ;;  %15227 = vst [vmem:[#allocation70_spill] sm:$0xff] %v13083_v33  ;;  %3023 = vst.msk [vmem:[#allocation2 + $0x88] sm:$0xff] %vm2971_vm2, %v2991_v45  ;;  %v2877_v29 = vmax.f32 %v2139_v22, %v2813_v62  ;;  %v2814_v17 = vmax.f32 %v10568_v38, 0.0  ;;  %v2655_v63 = vpop.f32.mrb[195].mxu1  ;;  %v14962_v12 = vshrl.u32 %v13083_v33, 16  ;;  %v15229_v62 = vld [vmem:[#allocation52_spill] sm:$0xff] }
 0x2a6   :  { %10825 = vmatprep.mubr.msk.bf16.mxu0 %vm2971_vm2, %v13081_v27  ;;  %3022 = vst.msk [vmem:[#allocation2 + $0x80] sm:$0xff] %vm2971_vm2, %v2990_v52  ;;  %v2875_v28 = vmax.f32 %v2137_v20, %v2811_v37  ;;  %v2812_v31 = vmax.f32 %v2655_v63, 0.0  ;;  %v14966_v22 = vshll.u32 %v13083_v33, 16  ;;  %v15231_v20 = vshll.u32 %v12891_v5, 16  ;;  %v15232_v26 = vld [vmem:[#allocation53_spill] sm:$0xff] }
 0x2a7   :  { %v13090_v0 = vld [vmem:[#allocation2 + $0x70] sm:$0xff]  ;;  %10826 = vmatmul.mubr.msk.bf16.gmra.mrb[52].mxu0 %vm2971_vm2, %v13078_v9  ;;  %v2941_v19 = vmax.f32 %v15229_v62, %v2877_v29  ;;  %v2878_v24 = vmax.f32 %v15230_v4, %v2814_v17  ;;  %v3584_v46 = vrot.slane %v14962_v12, 7  ;;  %v15233_v45 = vmax.f32 %v15195_v53, 0.0  ;;  %v15234_v29 = vld [vmem:[#allocation54_spill] sm:$0xff] }
 0x2a8   :  { %15228 = vst [vmem:[#allocation71_spill] sm:$0xff] %v13090_v0  ;;  %10626 = vmatmul.mubr.msk.bf16.gmra.mrb[248].mxu1 %vm2971_vm2, %v13090_v0  ;;  %v14963_v51 = vshrl.u32 %v13090_v0, 16  ;;  %v4186_v37 = vrot.slane %v15231_v20, 1  ;;  %v2939_v44 = vmax.f32 %v15232_v26, %v2875_v28  ;;  %v14967_v16 = vshll.u32 %v13090_v0, 16  ;;  %v15236_v4 = vld [vmem:[#allocation79_spill] sm:$0xff]  ;;  %v15238_v26 = vld [vmem:[#allocation80_spill] sm:$0xff] }
 0x2a9   :  { %10629 = vmatprep.mubr.msk.bf16.mxu1 %vm2971_vm2, %v13083_v33  ;;  %v2876_v52 = vmax.f32 %v15233_v45, %v2812_v31  ;;  %v2942_v17 = vmax.f32 %v15234_v29, %v2878_v24  ;;  %v3587_v63 = vor.u32 %v14966_v22, %v3584_v46  ;;  %v15237_v12 = vld [vmem:[#allocation55_spill] sm:$0xff] }
 0x2aa   :  { %v3577_v38 = vrot.slane %v14963_v51, 7  ;;  %v13121_v62 = vsel %vm4143_vm4, %v4182_v59, %v4186_v37  ;;  %v10571_v31 = vpop.f32.mrb[196].mxu1 }
 0x2ab   :  { %15235 = vst [vmem:[#allocation40_spill] sm:$0xff] %v13121_v62  ;;  %v2940_v28 = vmax.f32 %v15237_v12, %v2876_v52  ;;  %v2993_v51 = vpack.c.bf16 %v2942_v17, %v2941_v19  ;;  %v2817_v3 = vmax.f32 %v10571_v31, 0.0  ;;  %v2668_v21 = vpop.f32.mrb[197].mxu1  ;;  %v15240_v12 = vmax.f32 %v15201_v41, 0.0  ;;  %v15245_v31 = vld [vmem:[#allocation57_spill] sm:$0xff] }
 0x2ac   :  { %v3580_v53 = vor.u32 %v14967_v16, %v3577_v38  ;;  %v13129_v24 = vsel %vm3479_vm3, %v3577_v38, %v3587_v63  ;;  %v2815_v22 = vmax.f32 %v2668_v21, 0.0  ;;  %v10572_v59 = vpop.f32.mrb[198].mxu1  ;;  %v13134_v20 = vld [vmem:[#allocation2 + $0x88] sm:$0xff] }
 0x2ad   :  { %v2992_v29 = vpack.c.bf16 %v2940_v28, %v2939_v44  ;;  %15239 = vst [vmem:[#allocation41_spill] sm:$0xff] %v13134_v20  ;;  %3025 = vst.msk [vmem:[#allocation2 + $0x98] sm:$0xff] %vm2971_vm2, %v2993_v51  ;;  %v2881_v52 = vmax.f32 %v15240_v12, %v2817_v3  ;;  %v2818_v16 = vmax.f32 %v10572_v59, 0.0  ;;  %v2671_v19 = vpop.f32.mrb[199].mxu1  ;;  %v13141_v38 = vld [vmem:[#allocation2 + $0x80] sm:$0xff]  ;;  %v14968_v21 = vshrl.u32 %v13134_v20, 16 }
 0x2ae   :  { %v13132_v47 = vsel %vm3479_vm3, %v3570_v10, %v3580_v53  ;;  %15241 = vst [vmem:[#allocation72_spill] sm:$0xff] %v13141_v38  ;;  %v15242_v44 = vld [vmem:[#allocation81_spill] sm:$0xff]  ;;  %v15243_v10 = vmax.f32 %v15203_v1, 0.0  ;;  %v2816_v51 = vmax.f32 %v2671_v19, 0.0  ;;  %v14969_v41 = vshrl.u32 %v13141_v38, 16  ;;  %v15244_v3 = vld [vmem:[#allocation56_spill] sm:$0xff] }
 0x2af   :  { %10829 = vmatprep.mubr.msk.bf16.mxu0 %vm2971_vm2, %v13132_v47  ;;  %3024 = vst.msk [vmem:[#allocation2 + $0x90] sm:$0xff] %vm2971_vm2, %v2992_v29  ;;  %v2945_v28 = vmax.f32 %v15244_v3, %v2881_v52  ;;  %v2882_v53 = vmax.f32 %v2144_v42, %v2818_v16  ;;  %v3598_v1 = vrot.slane %v14968_v21, 7  ;;  %v14971_v52 = vshll.u32 %v13141_v38, 16  ;;  %v15247_v16 = vld [vmem:[#allocation58_spill] sm:$0xff]  ;;  %v15248_v3 = vld [vmem:[#allocation59_spill] sm:$0xff] }
 0x2b0   :  { %v2879_v63 = vmax.f32 %v15243_v10, %v2815_v22  ;;  %10630 = vmatmul.mubr.msk.bf16.gmra.mrb[252].mxu1 %vm2971_vm2, %v13141_v38  ;;  %10830 = vmatmul.mubr.msk.bf16.gmra.mrb[56].mxu0 %vm2971_vm2, %v13129_v24  ;;  %v14970_v22 = vshll.u32 %v13134_v20, 16  ;;  %v2880_v59 = vmax.f32 %v2142_v58, %v2816_v51  ;;  %v3591_v12 = vrot.slane %v14969_v41, 7  ;;  %v15250_v51 = vld [vmem:[#allocation83_spill] sm:$0xff] }
 0x2b1   :  { %10633 = vmatprep.mubr.msk.bf16.mxu1 %vm2971_vm2, %v13134_v20  ;;  %v2946_v19 = vmax.f32 %v15247_v16, %v2882_v53  ;;  %v13176_v58 = vor.u32 %v4186_v37, %v15249_v34  ;;  %v15252_v37 = vmax.f32 %v15215_v18, 0.0  ;;  %v15255_v18 = vld [vmem:[#allocation60_spill] sm:$0xff] }
 0x2b2   :  { %v2943_v29 = vmax.f32 %v15245_v31, %v2879_v63  ;;  %v3601_v10 = vor.u32 %v14970_v22, %v3598_v1  ;;  %v2944_v21 = vmax.f32 %v15248_v3, %v2880_v59  ;;  %v3594_v63 = vor.u32 %v14971_v52, %v3591_v12  ;;  %v10575_v31 = vpop.f32.mrb[200].mxu1 }
 0x2b3   :  { %v2995_v17 = vpack.c.bf16 %v2946_v19, %v2945_v28  ;;  %v2821_v45 = vmax.f32 %v10575_v31, 0.0  ;;  %v2684_v42 = vpop.f32.mrb[201].mxu1 }
 0x2b4   :  { %v13180_v53 = vsel %vm3479_vm3, %v3591_v12, %v3601_v10  ;;  %v2994_v16 = vpack.c.bf16 %v2944_v21, %v2943_v29  ;;  %v2819_v22 = vmax.f32 %v2684_v42, 0.0  ;;  %v10576_v30 = vpop.f32.mrb[202].mxu1  ;;  %v13183_v59 = vsel %vm3479_vm3, %v3584_v46, %v3594_v63  ;;  %v13185_v3 = vld [vmem:[#allocation2 + $0x98] sm:$0xff] }
 0x2b5   :  { %3027 = vst.msk [vmem:[#allocation2 + $0xa8] sm:$0xff] %vm2971_vm2, %v2995_v17  ;;  %v2885_v28 = vmax.f32 %v15252_v37, %v2821_v45  ;;  %v2822_v19 = vmax.f32 %v10576_v30, 0.0  ;;  %v2687_v31 = vpop.f32.mrb[203].mxu1  ;;  %10833 = vmatprep.mubr.msk.bf16.mxu0 %vm2971_vm2, %v13183_v59  ;;  %v14972_v21 = vshrl.u32 %v13185_v3, 16  ;;  %v15253_v29 = vld [vmem:[#allocation84_spill] sm:$0xff]  ;;  %v15254_v17 = vmax.f32 %v15224_v61, 0.0 }
 0x2b6   :  { %v13188_v5 = vld [vmem:[#allocation2 + $0x90] sm:$0xff]  ;;  %3026 = vst.msk [vmem:[#allocation2 + $0xa0] sm:$0xff] %vm2971_vm2, %v2994_v16  ;;  %v2820_v10 = vmax.f32 %v2687_v31, 0.0  ;;  %v15256_v45 = vmax.f32 %v15226_v60, 0.0  ;;  %v14980_v61 = vshll.u32 %v13185_v3, 16  ;;  %v15257_v37 = vld [vmem:[#allocation61_spill] sm:$0xff] }
 0x2b7   :  { %15251 = vst [vmem:[#allocation42_spill] sm:$0xff] %v13188_v5  ;;  %v14973_v46 = vshrl.u32 %v13188_v5, 16  ;;  %v2883_v42 = vmax.f32 %v15254_v17, %v2819_v22  ;;  %v2949_v30 = vmax.f32 %v15255_v18, %v2885_v28  ;;  %v3612_v34 = vrot.slane %v14972_v21, 7  ;;  %v15259_v60 = vld [vmem:[#allocation85_spill] sm:$0xff]  ;;  %v15260_v18 = vld [vmem:[#allocation62_spill] sm:$0xff] }
 0x2b8   :  { %10634 = vmatmul.mubr.msk.bf16.gmra.mrb[0].mxu1 %vm2971_vm2, %v13188_v5  ;;  %10834 = vmatmul.mubr.msk.bf16.gmra.mrb[60].mxu0 %vm2971_vm2, %v13180_v53  ;;  %v2886_v63 = vmax.f32 %v15256_v45, %v2822_v19  ;;  %v14981_v16 = vshll.u32 %v13188_v5, 16  ;;  %v15258_v28 = vmax.f32 %v15236_v4, 0.0  ;;  %v15261_v21 = vld [vmem:[#allocation86_spill] sm:$0xff] }
 0x2b9   :  { %10637 = vmatprep.mubr.msk.bf16.mxu1 %vm2971_vm2, %v13185_v3  ;;  %v3605_v22 = vrot.slane %v14973_v46, 7  ;;  %v2947_v31 = vmax.f32 %v15257_v37, %v2883_v42  ;;  %v3615_v52 = vor.u32 %v14980_v61, %v3612_v34  ;;  %v15262_v46 = vld [vmem:[#allocation63_spill] sm:$0xff] }
 0x2ba   :  { %v2884_v17 = vmax.f32 %v15258_v28, %v2820_v10  ;;  %v2950_v45 = vmax.f32 %v15260_v18, %v2886_v63  ;;  %v10579_v38 = vpop.f32.mrb[204].mxu1  ;;  %v15263_v10 = vshll.u32 %v12884_v36, 16 }
 0x2bb   :  { %v3608_v41 = vor.u32 %v14981_v16, %v3605_v22  ;;  %v2825_v42 = vmax.f32 %v10579_v38, 0.0  ;;  %v2700_v37 = vpop.f32.mrb[205].mxu1  ;;  %v13227_v4 = vsel %vm3479_vm3, %v3605_v22, %v3615_v52  ;;  %v15264_v38 = vmax.f32 %v15238_v26, 0.0 }
 0x2bc   :  { %v2948_v20 = vmax.f32 %v15262_v46, %v2884_v17  ;;  %v2997_v33 = vpack.c.bf16 %v2950_v45, %v2949_v30  ;;  %v13231_v63 = vrot.slane %v15263_v10, 1  ;;  %v2823_v61 = vmax.f32 %v2700_v37, 0.0  ;;  %v10580_v12 = vpop.f32.mrb[206].mxu1  ;;  %v13236_v16 = vld [vmem:[#allocation2 + $0xa8] sm:$0xff]  ;;  %v15266_v17 = vld [vmem:[#allocation64_spill] sm:$0xff]  ;;  %v15268_v10 = vld [vmem:[#allocation65_spill] sm:$0xff] }
 0x2bd   :  { %v13234_v28 = vsel %vm3479_vm3, %v3598_v1, %v3608_v41  ;;  %v13239_v46 = vld [vmem:[#allocation2 + $0xa0] sm:$0xff]  ;;  %v2889_v52 = vmax.f32 %v15264_v38, %v2825_v42  ;;  %v2826_v30 = vmax.f32 %v10580_v12, 0.0  ;;  %v2703_v22 = vpop.f32.mrb[207].mxu1  ;;  %v14982_v41 = vshrl.u32 %v13236_v16, 16 }
 0x2be   :  { %v2996_v18 = vpack.c.bf16 %v2948_v20, %v2947_v31  ;;  %3029 = vst.msk [vmem:[#allocation2 + $0xb8] sm:$0xff] %vm2971_vm2, %v2997_v33  ;;  %10837 = vmatprep.mubr.msk.bf16.mxu0 %vm2971_vm2, %v13234_v28  ;;  %v14983_v20 = vshrl.u32 %v13239_v46, 16  ;;  %v15265_v1 = vmax.f32 %v15242_v44, 0.0  ;;  %v2824_v33 = vmax.f32 %v2703_v22, 0.0 }
 0x2bf   :  { %v14988_v26 = vshll.u32 %v13236_v16, 16  ;;  %v14991_v12 = vshll.u32 %v13239_v46, 16  ;;  %v2953_v45 = vmax.f32 %v15266_v17, %v2889_v52  ;;  %v15267_v42 = vmax.f32 %v15246_v6, 0.0  ;;  %v15271_v6 = vld [vmem:[#allocation87_spill] sm:$0xff] }
 0x2c0   :  { %3028 = vst.msk [vmem:[#allocation2 + $0xb0] sm:$0xff] %vm2971_vm2, %v2996_v18  ;;  %v2887_v31 = vmax.f32 %v15265_v1, %v2823_v61  ;;  %10638 = vmatmul.mubr.msk.bf16.gmra.mrb[4].mxu1 %vm2971_vm2, %v13239_v46  ;;  %10838 = vmatmul.mubr.msk.bf16.gmra.mrb[64].mxu0 %vm2971_vm2, %v13227_v4  ;;  %v3626_v44 = vrot.slane %v14982_v41, 7  ;;  %v3619_v61 = vrot.slane %v14983_v20, 7  ;;  %v15269_v38 = vmax.f32 %v15250_v51, 0.0  ;;  %v15272_v1 = vld [vmem:[#allocation66_spill] sm:$0xff]  ;;  %v15273_v41 = vld [vmem:[#allocation88_spill] sm:$0xff] }
 0x2c1   :  { %v2890_v37 = vmax.f32 %v15267_v42, %v2826_v30  ;;  %10641 = vmatprep.mubr.msk.bf16.mxu1 %vm2971_vm2, %v13236_v16  ;;  %v13271_v52 = vsel %vm4143_vm4, %v13176_v58, %v13231_v63  ;;  %v2154_v30 = vmax.f32 %v15271_v6, 0.0  ;;  %v2159_v19 = vmax.f32 %v15273_v41, 0.0 }
 0x2c2   :  { %v2951_v18 = vmax.f32 %v15268_v10, %v2887_v31  ;;  %v2888_v22 = vmax.f32 %v15269_v38, %v2824_v33  ;;  %15270 = vst [vmem:[#allocation73_spill] sm:$0xff] %v13271_v52  ;;  %v3629_v42 = vor.u32 %v14988_v26, %v3626_v44  ;;  %v3622_v31 = vor.u32 %v14991_v12, %v3619_v61  ;;  %v15274_v10 = vld [vmem:[#allocation67_spill] sm:$0xff]  ;;  %v10583_v33 = vpop.f32.mrb[208].mxu1  ;;  %v15275_v38 = vld [vmem:[#allocation89_spill] sm:$0xff] }
 0x2c3   :  { %v2954_v17 = vmax.f32 %v15272_v1, %v2890_v37  ;;  %v2157_v20 = vmax.f32 %v15275_v38, 0.0  ;;  %v2829_v58 = vmax.f32 %v10583_v33, 0.0  ;;  %v2716_v0 = vpop.f32.mrb[209].mxu1  ;;  %v15280_v38 = vmax.f32 %v15261_v21, 0.0  ;;  %v15283_v21 = vld [vmem:[#allocation19_spill] sm:$0xff] }
 0x2c4   :  { %v2952_v51 = vmax.f32 %v15274_v10, %v2888_v22  ;;  %v13283_v6 = vsel %vm3479_vm3, %v3619_v61, %v3629_v42  ;;  %v13286_v37 = vsel %vm3479_vm3, %v3612_v34, %v3622_v31  ;;  %v2827_v26 = vmax.f32 %v2716_v0, 0.0  ;;  %v10584_v41 = vpop.f32.mrb[210].mxu1  ;;  %v15277_v61 = vld [vmem:[#allocation90_spill] sm:$0xff] }
 0x2c5   :  { %v2999_v5 = vpack.c.bf16 %v2954_v17, %v2953_v45  ;;  %v13288_v49 = vld [vmem:[#allocation2 + $0xb8] sm:$0xff]  ;;  %v15276_v10 = vmax.f32 %v15253_v29, 0.0  ;;  %v2830_v17 = vmax.f32 %v10584_v41, 0.0  ;;  %v2719_v33 = vpop.f32.mrb[211].mxu1  ;;  %10841 = vmatprep.mubr.msk.bf16.mxu0 %vm2971_vm2, %v13286_v37 }
 0x2c6   :  { %v2998_v1 = vpack.c.bf16 %v2952_v51, %v2951_v18  ;;  %v14992_v34 = vshrl.u32 %v13288_v49, 16  ;;  %v2160_v18 = vmax.f32 %v15277_v61, 0.0  ;;  %v2828_v31 = vmax.f32 %v2719_v33, 0.0  ;;  %v15279_v29 = vld [vmem:[#allocation17_spill] sm:$0xff] }
 0x2c7   :  { %3031 = vst.msk [vmem:[#allocation2 + $0xc8] sm:$0xff] %vm2971_vm2, %v2999_v5  ;;  %v13291_v22 = vld [vmem:[#allocation2 + $0xb0] sm:$0xff]  ;;  %v2893_v45 = vmax.f32 %v15276_v10, %v2829_v58  ;;  %v15278_v5 = vmax.f32 %v15259_v60, 0.0  ;;  %v2894_v58 = vmax.f32 %v15280_v38, %v2830_v17  ;;  %v15007_v60 = vshll.u32 %v13288_v49, 16  ;;  %v15281_v10 = vld [vmem:[#allocation18_spill] sm:$0xff] }
 0x2c8   :  { %3030 = vst.msk [vmem:[#allocation2 + $0xc0] sm:$0xff] %vm2971_vm2, %v2998_v1  ;;  %v14997_v0 = vshrl.u32 %v13291_v22, 16  ;;  %10642 = vmatmul.mubr.msk.bf16.gmra.mrb[8].mxu1 %vm2971_vm2, %v13291_v22  ;;  %10842 = vmatmul.mubr.msk.bf16.gmra.mrb[68].mxu0 %vm2971_vm2, %v13283_v6  ;;  %v3640_v1 = vrot.slane %v14992_v34, 7  ;;  %v15006_v41 = vshll.u32 %v13291_v22, 16  ;;  %v2892_v61 = vmax.f32 %v2154_v30, %v2828_v31  ;;  %v15284_v38 = vld [vmem:[#allocation92_spill] sm:$0xff] }
 0x2c9   :  { %v2891_v42 = vmax.f32 %v15278_v5, %v2827_v26  ;;  %v2957_v51 = vmax.f32 %v15279_v29, %v2893_v45  ;;  %10645 = vmatprep.mubr.msk.bf16.mxu1 %vm2971_vm2, %v13288_v49  ;;  %v15282_v45 = vld [vmem:[#allocation91_spill] sm:$0xff]  ;;  %v2958_v17 = vmax.f32 %v15283_v21, %v2894_v58  ;;  %v2163_v12 = vmax.f32 %v15284_v38, 0.0 }
 0x2ca   :  { %v3633_v26 = vrot.slane %v14997_v0, 7  ;;  %v2158_v5 = vmax.f32 %v15282_v45, 0.0  ;;  %v3643_v29 = vor.u32 %v15007_v60, %v3640_v1  ;;  %v2956_v56 = vmax.f32 %v15285_v23, %v2892_v61  ;;  %v10587_v0 = vpop.f32.mrb[212].mxu1  ;;  %v15288_v61 = vld [vmem:[#allocation22_spill] sm:$0xff] }
 0x2cb   :  { %v2955_v33 = vmax.f32 %v15281_v10, %v2891_v42  ;;  %v3001_v2 = vpack.c.bf16 %v2958_v17, %v2957_v51  ;;  %v2833_v25 = vmax.f32 %v10587_v0, 0.0  ;;  %v2732_v52 = vpop.f32.mrb[213].mxu1  ;;  %v15286_v42 = vshrl.u32 %v12884_v36, 16 }
 0x2cc   :  { %v3636_v34 = vor.u32 %v15006_v41, %v3633_v26  ;;  %v13328_v30 = vsel %vm3479_vm3, %v3633_v26, %v3643_v29  ;;  %v2831_v45 = vmax.f32 %v2732_v52, 0.0  ;;  %v10588_v21 = vpop.f32.mrb[214].mxu1 }
 0x2cd   :  { %v4198_v31 = vor.u32 %v13231_v63, %v15286_v42  ;;  %v3000_v10 = vpack.c.bf16 %v2956_v56, %v2955_v33  ;;  %3033 = vst.msk [vmem:[#allocation2 + $0xd8] sm:$0xff] %vm2971_vm2, %v3001_v2  ;;  %v2897_v0 = vmax.f32 %v2159_v19, %v2833_v25  ;;  %v2834_v51 = vmax.f32 %v10588_v21, 0.0  ;;  %v2735_v26 = vpop.f32.mrb[215].mxu1  ;;  %v15287_v19 = vld [vmem:[#allocation21_spill] sm:$0xff] }
 0x2ce   :  { %v13334_v58 = vsel %vm3479_vm3, %v3626_v44, %v3636_v34  ;;  %v13336_v38 = vld [vmem:[#allocation2 + $0xc8] sm:$0xff]  ;;  %v2895_v63 = vmax.f32 %v2157_v20, %v2831_v45  ;;  %v2832_v44 = vmax.f32 %v2735_v26, 0.0  ;;  %v15289_v42 = vshll.u32 %v12940_v57, 16  ;;  %v15291_v45 = vld [vmem:[#allocation93_spill] sm:$0xff] }
 0x2cf   :  { %v13339_v23 = vld [vmem:[#allocation2 + $0xc0] sm:$0xff]  ;;  %10845 = vmatprep.mubr.msk.bf16.mxu0 %vm2971_vm2, %v13334_v58  ;;  %v15002_v36 = vshrl.u32 %v13336_v38, 16  ;;  %3032 = vst.msk [vmem:[#allocation2 + $0xd0] sm:$0xff] %vm2971_vm2, %v3000_v10  ;;  %v15004_v25 = vshll.u32 %v13336_v38, 16  ;;  %v2961_v52 = vmax.f32 %v15287_v19, %v2897_v0  ;;  %v2898_v34 = vmax.f32 %v2160_v18, %v2834_v51  ;;  %v15292_v0 = vld [vmem:[#allocation23_spill] sm:$0xff]  ;;  %v15293_v19 = vld [vmem:[#allocation24_spill] sm:$0xff] }
 0x2d0   :  { %v15003_v56 = vshrl.u32 %v13339_v23, 16  ;;  %10646 = vmatmul.mubr.msk.bf16.gmra.mrb[12].mxu1 %vm2971_vm2, %v13339_v23  ;;  %10846 = vmatmul.mubr.msk.bf16.gmra.mrb[72].mxu0 %vm2971_vm2, %v13328_v30  ;;  %v15005_v2 = vshll.u32 %v13339_v23, 16  ;;  %v2959_v17 = vmax.f32 %v15288_v61, %v2895_v63  ;;  %v2896_v29 = vmax.f32 %v2158_v5, %v2832_v44  ;;  %v15295_v63 = vld [vmem:[#allocation94_spill] sm:$0xff] }
 0x2d1   :  { %10649 = vmatprep.mubr.msk.bf16.mxu1 %vm2971_vm2, %v13336_v38  ;;  %v3654_v20 = vrot.slane %v15002_v36, 7  ;;  %v13362_v10 = vrot.slane %v15289_v42, 1  ;;  %v2161_v21 = vmax.f32 %v15291_v45, 0.0  ;;  %v2962_v18 = vmax.f32 %v15292_v0, %v2898_v34 }
 0x2d2   :  { %v3647_v33 = vrot.slane %v15003_v56, 7  ;;  %v2960_v36 = vmax.f32 %v15293_v19, %v2896_v29  ;;  %v10591_v56 = vpop.f32.mrb[216].mxu1  ;;  %v2164_v44 = vmax.f32 %v15295_v63, 0.0 }
 0x2d3   :  { %15290 = vst [vmem:[#allocation43_spill] sm:$0xff] %v13362_v10  ;;  %v3657_v51 = vor.u32 %v15004_v25, %v3654_v20  ;;  %v13373_v5 = vsel %vm4143_vm4, %v4198_v31, %v13362_v10  ;;  %v3003_v61 = vpack.c.bf16 %v2962_v18, %v2961_v52  ;;  %v2837_v42 = vmax.f32 %v10591_v56, 0.0  ;;  %v2748_v45 = vpop.f32.mrb[217].mxu1  ;;  %v15302_v10 = vld [vmem:[#allocation28_spill] sm:$0xff] }
 0x2d4   :  { %v3650_v26 = vor.u32 %v15005_v2, %v3647_v33  ;;  %15294 = vst [vmem:[#allocation74_spill] sm:$0xff] %v13373_v5  ;;  %v3002_v25 = vpack.c.bf16 %v2960_v36, %v2959_v17  ;;  %v2835_v2 = vmax.f32 %v2748_v45, 0.0  ;;  %v10592_v41 = vpop.f32.mrb[218].mxu1  ;;  %v13382_v29 = vld [vmem:[#allocation2 + $0xd8] sm:$0xff]  ;;  %v15303_v5 = vld [vmem:[#allocation98_spill] sm:$0xff] }
 0x2d5   :  { %v13377_v34 = vsel %vm3479_vm3, %v3647_v33, %v3657_v51  ;;  %3035 = vst.msk [vmem:[#allocation2 + $0xe8] sm:$0xff] %vm2971_vm2, %v3003_v61  ;;  %v2901_v19 = vmax.f32 %v2163_v12, %v2837_v42  ;;  %v2838_v63 = vmax.f32 %v10592_v41, 0.0  ;;  %v2751_v52 = vpop.f32.mrb[219].mxu1  ;;  %v15008_v56 = vshrl.u32 %v13382_v29, 16  ;;  %v15296_v33 = vld [vmem:[#allocation95_spill] sm:$0xff]  ;;  %v15297_v12 = vld [vmem:[#allocation25_spill] sm:$0xff] }
 0x2d6   :  { %v13380_v0 = vsel %vm3479_vm3, %v3640_v1, %v3650_v26  ;;  %v13385_v31 = vld [vmem:[#allocation2 + $0xd0] sm:$0xff]  ;;  %v2162_v1 = vmax.f32 %v15296_v33, 0.0  ;;  %3034 = vst.msk [vmem:[#allocation2 + $0xe0] sm:$0xff] %vm2971_vm2, %v3002_v25  ;;  %v2899_v17 = vmax.f32 %v2161_v21, %v2835_v2  ;;  %v2836_v18 = vmax.f32 %v2751_v52, 0.0  ;;  %v15298_v61 = vld [vmem:[#allocation26_spill] sm:$0xff] }
 0x2d7   :  { %10849 = vmatprep.mubr.msk.bf16.mxu0 %vm2971_vm2, %v13380_v0  ;;  %v15011_v36 = vshrl.u32 %v13385_v31, 16  ;;  %v2965_v41 = vmax.f32 %v15297_v12, %v2901_v19  ;;  %v2902_v51 = vmax.f32 %v2164_v44, %v2838_v63  ;;  %v3668_v26 = vrot.slane %v15008_v56, 7  ;;  %v15299_v52 = vld [vmem:[#allocation96_spill] sm:$0xff]  ;;  %v15300_v19 = vld [vmem:[#allocation27_spill] sm:$0xff]  ;;  %v15301_v12 = vld [vmem:[#allocation97_spill] sm:$0xff] }
 0x2d8   :  { %10650 = vmatmul.mubr.msk.bf16.gmra.mrb[16].mxu1 %vm2971_vm2, %v13385_v31  ;;  %10850 = vmatmul.mubr.msk.bf16.gmra.mrb[76].mxu0 %vm2971_vm2, %v13377_v34  ;;  %v15014_v25 = vshll.u32 %v13382_v29, 16  ;;  %v15013_v21 = vshll.u32 %v13385_v31, 16  ;;  %v2963_v42 = vmax.f32 %v15298_v61, %v2899_v17  ;;  %v2900_v45 = vmax.f32 %v2162_v1, %v2836_v18 }
 0x2d9   :  { %10653 = vmatprep.mubr.msk.bf16.mxu1 %vm2971_vm2, %v13382_v29  ;;  %v3661_v2 = vrot.slane %v15011_v36, 7  ;;  %v2167_v33 = vmax.f32 %v15299_v52, 0.0  ;;  %v2966_v44 = vmax.f32 %v15300_v19, %v2902_v51  ;;  %v2165_v60 = vmax.f32 %v15301_v12, 0.0 }
 0x2da   :  { %v3671_v63 = vor.u32 %v15014_v25, %v3668_v26  ;;  %v2964_v57 = vmax.f32 %v15302_v10, %v2900_v45  ;;  %v10595_v36 = vpop.f32.mrb[220].mxu1  ;;  %v2168_v62 = vmax.f32 %v15303_v5, 0.0 }
 0x2db   :  { %v3664_v56 = vor.u32 %v15013_v21, %v3661_v2  ;;  %v3005_v13 = vpack.c.bf16 %v2966_v44, %v2965_v41  ;;  %v2841_v17 = vmax.f32 %v10595_v36, 0.0  ;;  %v2764_v1 = vpop.f32.mrb[221].mxu1  ;;  %v11884_v21 = vld [vmem:[#allocation2 + $0x8] sm:$0xff] }
 0x2dc   :  { %v13417_v18 = vsel %vm3479_vm3, %v3661_v2, %v3671_v63  ;;  %v3004_v61 = vpack.c.bf16 %v2964_v57, %v2963_v42  ;;  %v2839_v52 = vmax.f32 %v2764_v1, 0.0  ;;  %v10596_v19 = vpop.f32.mrb[222].mxu1  ;;  %v13422_v12 = vld [vmem:[#allocation2 + $0xe8] sm:$0xff]  ;;  %v3487_v25 = vshll.u32 %v11884_v21, 16 }
 0x2dd   :  { %v13420_v51 = vsel %vm3479_vm3, %v3654_v20, %v3664_v56  ;;  %15304 = vst [vmem:[#allocation44_spill] sm:$0xff] %v13422_v12  ;;  %3037 = vst.msk [vmem:[#allocation2 + $0xf8] sm:$0xff] %vm2971_vm2, %v3005_v13  ;;  %v13425_v10 = vld [vmem:[#allocation2 + $0xe0] sm:$0xff]  ;;  %v2905_v45 = vmax.f32 %v2167_v33, %v2841_v17  ;;  %v2842_v5 = vmax.f32 %v10596_v19, 0.0  ;;  %v2767_v41 = vpop.f32.mrb[223].mxu1  ;;  %v15012_v36 = vshrl.u32 %v13422_v12, 16 }
 0x2de   :  { %10853 = vmatprep.mubr.msk.bf16.mxu0 %vm2971_vm2, %v13420_v51  ;;  %v15305_v2 = vld [vmem:[#allocation99_spill] sm:$0xff]  ;;  %3036 = vst.msk [vmem:[#allocation2 + $0xf0] sm:$0xff] %vm2971_vm2, %v3004_v61  ;;  %v15015_v57 = vshrl.u32 %v13425_v10, 16  ;;  %v2903_v56 = vmax.f32 %v2165_v60, %v2839_v52  ;;  %v2840_v42 = vmax.f32 %v2767_v41, 0.0  ;;  %v15306_v13 = vld [vmem:[#allocation29_spill] sm:$0xff]  ;;  %v15022_v17 = vshll.u32 %v13422_v12, 16 }
 0x2df   :  { %v2166_v20 = vmax.f32 %v15305_v2, 0.0  ;;  %v2969_v33 = vmax.f32 %v15306_v13, %v2905_v45  ;;  %v2906_v44 = vmax.f32 %v2168_v62, %v2842_v5  ;;  %v3682_v63 = vrot.slane %v15012_v36, 7  ;;  %v15307_v61 = vld [vmem:[#allocation30_spill] sm:$0xff]  ;;  %v15308_v41 = vld [vmem:[#allocation31_spill] sm:$0xff]  ;;  %v15310_v13 = vld [vmem:[#allocation32_spill] sm:$0xff] }
 0x2e0   :  { %10654 = vmatmul.mubr.msk.bf16.gmra.mrb[20].mxu1 %vm2971_vm2, %v13425_v10  ;;  %10854 = vmatmul.mubr.msk.bf16.gmra.mrb[80].mxu0 %vm2971_vm2, %v13417_v18  ;;  %v3675_v60 = vrot.slane %v15015_v57, 7  ;;  %v15025_v1 = vshll.u32 %v13425_v10, 16  ;;  %v2967_v52 = vmax.f32 %v15307_v61, %v2903_v56  ;;  %v3040_v45 = vld [vmem:[#allocation2] sm:$0x80] }
 0x2e1   :  { %10657 = vmatprep.mubr.msk.bf16.mxu1 %vm2971_vm2, %v13422_v12  ;;  %v2904_v19 = vmax.f32 %v2166_v20, %v2840_v42  ;;  %v2970_v2 = vmax.f32 %v15308_v41, %v2906_v44  ;;  %v13450_v62 = vor.u32 %v15022_v17, %v3682_v63  ;;  %v3481_v44 = vshrl.u32 %v3040_v45, 16 }
 0x2e2   :  { %v3678_v5 = vor.u32 %v15025_v1, %v3675_v60 }
 0x2e3   :  { %15309 = vst [vmem:[#allocation45_spill] sm:$0xff] %v13450_v62  ;;  %v2968_v36 = vmax.f32 %v15310_v13, %v2904_v19  ;;  %v3007_v57 = vpack.c.bf16 %v2970_v2, %v2969_v33  ;;  %v13457_v54 = vsel %vm3479_vm3, %v3675_v60, %v13450_v62  ;;  %v3483_v19 = vrot.slane %v3481_v44, 7  ;;  %v11876_v13 = vld [vmem:[#allocation9 + $0x20] sm:$0xff]  }
 0x2e4   :  { %v13460_v20 = vsel %vm3479_vm3, %v3668_v26, %v3678_v5  ;;  %v13462_v42 = vld [vmem:[#allocation2 + $0xf8] sm:$0xff]  ;;  %10733 = vmatprep.subr.bf16.mxu1 %v11876_v13  ;;  %v13646_v62 = vld [vmem:[#allocation2 + $0x68] sm:$0xff] }
 0x2e5   :  { %v3006_v56 = vpack.c.bf16 %v2968_v36, %v2967_v52  ;;  %15311 = vst [vmem:[#allocation75_spill] sm:$0xff] %v13462_v42  ;;  %3039 = vst.msk [vmem:[#allocation2 + $0x108] sm:$0xff] %vm2971_vm2, %v3007_v57  ;;  %v13465_v61 = vld [vmem:[#allocation2 + $0xf0] sm:$0xff]  ;;  %10857 = vmatprep.mubr.msk.bf16.mxu0 %vm2971_vm2, %v13460_v20  ;;  %v15016_v21 = vshrl.u32 %v13462_v42, 16  ;;  %v15020_v36 = vshll.u32 %v13462_v42, 16  ;;  %v3489_v57 = vor.u32 %v3487_v25, %v12773_v32 }
 0x2e6   :  { %15312 = vst [vmem:[#allocation46_spill] sm:$0xff] %v13465_v61  ;;  %v15018_v33 = vshrl.u32 %v13465_v61, 16  ;;  %v15021_v52 = vshll.u32 %v13465_v61, 16 }
 0x2e7   :  { %3038 = vst.msk [vmem:[#allocation2 + $0x100] sm:$0xff] %vm2971_vm2, %v3006_v56  ;;  %v3696_v26 = vrot.slane %v15016_v21, 7  ;;  %v3490_v32 = vsel %vm3479_vm3, %v3483_v19, %v3489_v57 }
 0x2e8   :  { %10658 = vmatmul.mubr.msk.bf16.gmra.mrb[24].mxu1 %vm2971_vm2, %v13465_v61  ;;  %10858 = vmatmul.mubr.msk.bf16.gmra.mrb[84].mxu0 %vm2971_vm2, %v13457_v54  ;;  %v3689_v60 = vrot.slane %v15018_v33, 7  ;;  %v11877_v33 = vld [vmem:[#allocation9 + $0x28] sm:$0xff]  }
 0x2e9   :  { %10661 = vmatprep.mubr.msk.bf16.mxu1 %vm2971_vm2, %v13462_v42  ;;  %v3699_v41 = vor.u32 %v15020_v36, %v3696_v26  ;;  %v15324_v36 = vshll.u32 %v13236_v16, 16 }
 0x2ea   :  { %v3692_v2 = vor.u32 %v15021_v52, %v3689_v60 }
 0x2eb   :  { %v13490_v45 = vsel %vm3479_vm3, %v3689_v60, %v3699_v41  ;;  %v4306_v52 = vrot.slane %v15324_v36, 1 }
 0x2ec   :  { %15313 = vst [vmem:[#allocation76_spill] sm:$0xff] %v13490_v45  ;;  %v13493_v5 = vsel %vm3479_vm3, %v3682_v63, %v3692_v2  ;;  %v13496_v25 = vld [vmem:[#allocation2 + $0x108] sm:$0xff] }
 0x2ed   :  { %15314 = vst [vmem:[#allocation47_spill] sm:$0xff] %v13493_v5  ;;  %15315 = vst [vmem:[#allocation48_spill] sm:$0xff] %v13496_v25  ;;  %10861 = vmatprep.mubr.msk.bf16.mxu0 %vm2971_vm2, %v13493_v5  ;;  %v15017_v44 = vshrl.u32 %v13496_v25, 16  ;;  %v15019_v57 = vshll.u32 %v13496_v25, 16 }
 0x2ee   :  { %v13498_v56 = vld [vmem:[#allocation2 + $0x100] sm:$0xff] }
 0x2ef   :  { %15316 = vst [vmem:[#allocation49_spill] sm:$0xff] %v13498_v56  ;;  %v15023_v21 = vshrl.u32 %v13498_v56, 16  ;;  %v13511_v63 = vrot.slane %v15017_v44, 7  ;;  %v15024_v19 = vshll.u32 %v13498_v56, 16 }
 0x2f0   :  { %10662 = vmatmul.mubr.msk.bf16.gmra.mrb[28].mxu1 %vm2971_vm2, %v13498_v56  ;;  %10862 = vmatmul.mubr.msk.bf16.gmra.mrb[88].mxu0 %vm2971_vm2, %v13490_v45 }
 0x2f1   :  { %10669 = vmatprep.mubr.msk.bf16.mxu1 %vm2971_vm2, %v3490_v32  ;;  %15317 = vst [vmem:[#allocation50_spill] sm:$0xff] %v13511_v63  ;;  %v3703_v60 = vrot.slane %v15023_v21, 7  ;;  %v4975_v41 = vor.u32 %v15019_v57, %v13511_v63  ;;  %v11885_v57 = vld [vmem:[#allocation2 + $0x10] sm:$0xff] }
 0x2f3   :  { %v3706_v2 = vor.u32 %v15024_v19, %v3703_v60  ;;  %v13528_v44 = vsel %vm3479_vm3, %v3703_v60, %v4975_v41  ;;  %v11875_v60 = vld [vmem:[#allocation9 + $0x58] sm:$0xff]   ;;  %v15322_v41 = vshrl.u32 %v13185_v3, 16 }
 0x2f4   :  { %15319 = vst [vmem:[#allocation51_spill] sm:$0xff] %v13528_v44 }
 0x2f5   :  { %v13523_v32 = vsel %vm3479_vm3, %v3696_v26, %v3706_v2  ;;  %v15320_v26 = vshll.u32 %v13185_v3, 16  ;;  %v15326_v3 = vshrl.u32 %v13239_v46, 16 }
 0x2f6   :  { %15318 = vst [vmem:[#allocation77_spill] sm:$0xff] %v13523_v32  ;;  %10865 = vmatprep.mubr.msk.bf16.mxu0 %vm2971_vm2, %v13523_v32 }
 0x2f7   :  { %v13539_v2 = vrot.slane %v15320_v26, 1 }
 0x2f8   :  { %10670 = vmatmul.mubr.msk.bf16.vlgmr.msra.gmra.mrb[224].mxu1 %vm2971_vm2, %v12827_v40  ;;  %10866 = vmatmul.mubr.msk.bf16.gmra.mrb[92].mxu0 %vm2971_vm2, %v13528_v44  ;;  %v11886_v40 = vld [vmem:[#allocation2 + $0x18] sm:$0xff] }
 0x2f9   :  { %10673 = vmatprep.mubr.msk.bf16.mxu1 %vm2971_vm2, %v12819_v15  ;;  %10873 = vmatprep.mubr.msk.bf16.mxu0 %vm2971_vm2, %v11885_v57  ;;  %15321 = vst [vmem:[#allocation78_spill] sm:$0xff] %v13539_v2  ;;  %v4294_v15 = vor.u32 %v13539_v2, %v15322_v41  ;;  %v15323_v57 = vshll.u32 %v13239_v46, 16  ;;  %v13559_v41 = vld [vmem:[#allocation9 + $0x60] sm:$0xff]   ;;  %v11895_v2 = vld [vmem:[#allocation2 + $0x58] sm:$0xff] }
 0x2fa   :  { %10734 = vmatpush3.bf16.msra.mxu1 %v11876_v13  ;;  %15327 = vst [vmem:[#allocation53_spill] sm:$0xff] %v13559_v41 }
 0x2fb   :  { %10735 = vmatprep.subr.bf16.mxu1 %v11877_v33  ;;  %v4298_v13 = vrot.slane %v15323_v57, 1  ;;  %v15328_v57 = vshll.u32 %v13288_v49, 16 }
 0x2fd   :  { %v13555_v26 = vsel %vm4143_vm4, %v4294_v15, %v4298_v13  ;;  %v4322_v36 = vrot.slane %v15328_v57, 1  ;;  %v15334_v57 = vshll.u32 %v13336_v38, 16 }
 0x2fe   :  { %10736 = vmatpush3.bf16.msra.mxu1 %v11877_v33  ;;  %v11887_v33 = vld [vmem:[#allocation2 + $0x20] sm:$0xff]  ;;  %15325 = vst [vmem:[#allocation52_spill] sm:$0xff] %v13555_v26 }
 0x2ff   :  { %v4338_v19 = vrot.slane %v15334_v57, 1 }
 0x300   :  { %10674 = vmatmul.mubr.msk.bf16.gmra.mrb[228].mxu1 %vm2971_vm2, %v12882_v55  ;;  %10874 = vmatmul.mubr.msk.bf16.vlgmr.msra.gmra.mrb[32].mxu0 %vm2971_vm2, %v11886_v40  ;;  %v11888_v55 = vld [vmem:[#allocation9 + $0x50] sm:$0xff]   ;;  %v4302_v40 = vor.u32 %v4298_v13, %v15326_v3  ;;  %v15333_v13 = vshrl.u32 %v13291_v22, 16 }
 0x301   :  { %10677 = vmatprep.mubr.msk.bf16.mxu1 %vm2971_vm2, %v12878_v48  ;;  %10877 = vmatprep.mubr.msk.bf16.mxu0 %vm2971_vm2, %v11887_v33  ;;  %v15330_v48 = vshrl.u32 %v13236_v16, 16 }
 0x302   :  { %10938 = vmatpush3.bf16.msra.mxu0 %v11888_v55  ;;  %v13564_v17 = vsel %vm4143_vm4, %v4302_v40, %v4306_v52  ;;  %v15331_v55 = vshll.u32 %v13291_v22, 16  ;;  %v11889_v40 = vld [vmem:[#allocation2 + $0x28] sm:$0xff] }
 0x303   :  { %10939 = vmatprep.subr.bf16.mxu0 %v11875_v60  ;;  %15329 = vst [vmem:[#allocation54_spill] sm:$0xff] %v13564_v17  ;;  %v4310_v33 = vor.u32 %v4306_v52, %v15330_v48  ;;  %v15335_v52 = vshrl.u32 %v13288_v49, 16  ;;  %v11890_v48 = vld [vmem:[#allocation2 + $0x30] sm:$0xff]  ;;  %v13689_v17 = vld [vmem:[#allocation2 + $0xa8] sm:$0xff] }
 0x304   :  { %v4314_v21 = vrot.slane %v15331_v55, 1 }
 0x306   :  { %10940 = vmatpush3.bf16.msra.mxu0 %v11875_v60  ;;  %v13572_v15 = vsel %vm4143_vm4, %v4310_v33, %v4314_v21  ;;  %v4318_v3 = vor.u32 %v4314_v21, %v15333_v13  ;;  %v4326_v60 = vor.u32 %v4322_v36, %v15335_v52  ;;  %v15337_v33 = vshll.u32 %v13339_v23, 16 }
 0x307   :  { %11005 = vmatprep.subr.bf16.mxu0 %v13559_v41  ;;  %15332 = vst [vmem:[#allocation79_spill] sm:$0xff] %v13572_v15  ;;  %v15339_v13 = vshrl.u32 %v13339_v23, 16  ;;  %v13704_v15 = vld [vmem:[#allocation2 + $0xc0] sm:$0xff] }
 0x308   :  { %10678 = vmatmul.mubr.msk.bf16.gmra.mrb[232].mxu1 %vm2971_vm2, %v12931_v50  ;;  %10878 = vmatmul.mubr.msk.bf16.gmra.mrb[36].mxu0 %vm2971_vm2, %v11889_v40  ;;  %v13587_v21 = vsel %vm4143_vm4, %v4318_v3, %v4322_v36  ;;  %v4330_v55 = vrot.slane %v15337_v33, 1  ;;  %v15340_v40 = vshll.u32 %v13382_v29, 16 }
 0x309   :  { %10681 = vmatprep.mubr.msk.bf16.mxu1 %vm2971_vm2, %v12927_v8  ;;  %10881 = vmatprep.mubr.msk.bf16.mxu0 %vm2971_vm2, %v11890_v48  ;;  %15336 = vst [vmem:[#allocation55_spill] sm:$0xff] %v13587_v21  ;;  %v15341_v8 = vshrl.u32 %v13336_v38, 16  ;;  %v15342_v48 = vshll.u32 %v13385_v31, 16  ;;  %v13676_v21 = vld [vmem:[#allocation2 + $0x98] sm:$0xff] }
 0x30a   :  { %v13592_v50 = vsel %vm4143_vm4, %v4326_v60, %v4330_v55  ;;  %v4334_v57 = vor.u32 %v4330_v55, %v15339_v13  ;;  %v4354_v52 = vrot.slane %v15340_v40, 1  ;;  %v15345_v60 = vshrl.u32 %v13385_v31, 16  ;;  %v11891_v55 = vld [vmem:[#allocation2 + $0x38] sm:$0xff] }
 0x30b   :  { %15338 = vst [vmem:[#allocation80_spill] sm:$0xff] %v13592_v50  ;;  %v4342_v1 = vor.u32 %v4338_v19, %v15341_v8  ;;  %v4346_v63 = vrot.slane %v15342_v48, 1  ;;  %v15347_v40 = vshrl.u32 %v13382_v29, 16 }
 0x30c   :  { %v13603_v36 = vsel %vm4143_vm4, %v4334_v57, %v4338_v19  ;;  %v15348_v19 = vshll.u32 %v13425_v10, 16 }
 0x30d   :  { %15343 = vst [vmem:[#allocation81_spill] sm:$0xff] %v13603_v36  ;;  %v13606_v3 = vsel %vm4143_vm4, %v4342_v1, %v4346_v63  ;;  %v4350_v33 = vor.u32 %v4346_v63, %v15345_v60  ;;  %v4358_v8 = vor.u32 %v4354_v52, %v15347_v40  ;;  %v11892_v1 = vld [vmem:[#allocation2 + $0x40] sm:$0xff]  ;;  %v13623_v63 = vld [vmem:[#allocation2 + $0x38] sm:$0xff]  ;;  %v15352_v60 = vshrl.u32 %v13425_v10, 16  ;;  %v13661_v36 = vld [vmem:[#allocation2 + $0x88] sm:$0xff] }
 0x30e   :  { %15344 = vst [vmem:[#allocation56_spill] sm:$0xff] %v13606_v3  ;;  %v4362_v57 = vrot.slane %v15348_v19, 1  ;;  %15349 = vst [vmem:[#allocation82_spill] sm:$0xff] %v13623_v63  ;;  %v13638_v40 = vld [vmem:[#allocation2 + $0x58] sm:$0xff]  ;;  %v13656_v19 = vld [vmem:[#allocation2 + $0x80] sm:$0xff] }
 0x30f   :  { %v13614_v13 = vsel %vm4143_vm4, %v4350_v33, %v4354_v52  ;;  %v13634_v52 = vld [vmem:[#allocation2 + $0x48] sm:$0xff]  ;;  %v13654_v3 = vld [vmem:[#allocation2 + $0x78] sm:$0xff]  ;;  %v15366_v44 = vshrl.u32 %v13638_v40, 16 }
 0x310   :  { %10682 = vmatmul.mubr.msk.bf16.gmra.mrb[236].mxu1 %vm2971_vm2, %v12979_v11  ;;  %10882 = vmatmul.mubr.msk.bf16.gmra.mrb[40].mxu0 %vm2971_vm2, %v11891_v55  ;;  %15346 = vst [vmem:[#allocation57_spill] sm:$0xff] %v13614_v13  ;;  %v13625_v11 = vld [vmem:[#allocation2 + $0x40] sm:$0xff]  ;;  %v13628_v48 = vsel %vm4143_vm4, %v4358_v8, %v4362_v57  ;;  %v13632_v33 = vor.u32 %v4362_v57, %v15352_v60  ;;  %15354 = vst [vmem:[#allocation84_spill] sm:$0xff] %v13634_v52  ;;  %v13636_v55 = vld [vmem:[#allocation2 + $0x50] sm:$0xff]  ;;  %v15355_v60 = vshll.u32 %v13498_v56, 16 }
 0x311   :  { %10685 = vmatprep.mubr.msk.bf16.mxu1 %vm2971_vm2, %v12976_v39  ;;  %10885 = vmatprep.mubr.msk.bf16.mxu0 %vm2971_vm2, %v11892_v1  ;;  %15350 = vst [vmem:[#allocation58_spill] sm:$0xff] %v13625_v11  ;;  %15351 = vst [vmem:[#allocation59_spill] sm:$0xff] %v13628_v48  ;;  %v13640_v39 = vld [vmem:[#allocation2 + $0x60] sm:$0xff]  ;;  %v13648_v57 = vld [vmem:[#allocation2 + $0x70] sm:$0xff]  ;;  %v15359_v8 = vshrl.u32 %v13623_v63, 16  ;;  %v15360_v7 = vshrl.u32 %v13625_v11, 16 }
 0x312   :  { %15353 = vst [vmem:[#allocation83_spill] sm:$0xff] %v13632_v33  ;;  %v13665_v50 = vrot.slane %v15355_v60, 1  ;;  %v11893_v48 = vld [vmem:[#allocation2 + $0x48] sm:$0xff]  ;;  %v13674_v33 = vld [vmem:[#allocation2 + $0x90] sm:$0xff]  ;;  %v13685_v13 = vld [vmem:[#allocation2 + $0xa0] sm:$0xff]  ;;  %v15361_v35 = vshrl.u32 %v13634_v52, 16 }
 0x313   :  { %v11894_v60 = vld [vmem:[#allocation2 + $0x50] sm:$0xff]  ;;  %v13702_v1 = vld [vmem:[#allocation2 + $0xb8] sm:$0xff]  ;;  %v6654_v26 = vrot.slane %v15359_v8, 7  ;;  %v6657_v42 = vrot.slane %v15360_v7, 7  ;;  %v11896_v8 = vld [vmem:[#allocation2 + $0x60] sm:$0xff]  ;;  %v15362_v7 = vshll.u32 %v13623_v63, 16 }
 0x314   :  { %15356 = vst [vmem:[#allocation60_spill] sm:$0xff] %v13665_v50  ;;  %v6660_v41 = vrot.slane %v15361_v35, 7  ;;  %v6666_v61 = vrot.slane %v15366_v44, 7  ;;  %v15367_v45 = vshll.u32 %v13634_v52, 16  ;;  %v15368_v63 = vshrl.u32 %v13640_v39, 16 }
 0x315   :  { %v15371_v44 = vshll.u32 %v13638_v40, 16  ;;  %v15374_v52 = vshrl.u32 %v13646_v62, 16 }
 0x317   :  { %v6667_v12 = vor.u32 %v6666_v61, %v15371_v44 }
 0x318   :  { %10686 = vmatmul.mubr.msk.bf16.gmra.mrb[240].mxu1 %vm2971_vm2, %v13030_v43  ;;  %10886 = vmatmul.mubr.msk.bf16.gmra.mrb[44].mxu0 %vm2971_vm2, %v11893_v48  ;;  %v15365_v48 = vshrl.u32 %v13636_v55, 16 }
 0x319   :  { %10689 = vmatprep.mubr.msk.bf16.mxu1 %vm2971_vm2, %v13025_v14  ;;  %10889 = vmatprep.mubr.msk.bf16.mxu0 %vm2971_vm2, %v11894_v60  ;;  %v13691_v14 = vld [vmem:[#allocation2 + $0xb0] sm:$0xff]  ;;  %v15357_v60 = vshrl.u32 %v13498_v56, 16  ;;  %v13725_v56 = vld [vmem:[#allocation2 + $0xe0] sm:$0xff] }
 0x31a   :  { %v6663_v32 = vrot.slane %v15365_v48, 7  ;;  %v15370_v48 = vshll.u32 %v13636_v55, 16 }
 0x31b   :  { %v13696_v43 = vor.u32 %v13665_v50, %v15357_v60  ;;  %v13709_v60 = vld [vmem:[#allocation2 + $0xc8] sm:$0xff]  ;;  %v13717_v50 = vld [vmem:[#allocation2 + $0xd8] sm:$0xff] }
 0x31d   :  { %15358 = vst [vmem:[#allocation61_spill] sm:$0xff] %v13696_v43  ;;  %v13715_v43 = vld [vmem:[#allocation2 + $0xd0] sm:$0xff] }
 0x320   :  { %10690 = vmatmul.mubr.msk.bf16.gmra.mrb[244].mxu1 %vm2971_vm2, %v13081_v27  ;;  %10890 = vmatmul.mubr.msk.bf16.gmra.mrb[48].mxu0 %vm2971_vm2, %v11895_v2  ;;  %v13744_v27 = vor.u32 %v6654_v26, %v15362_v7  ;;  %v15364_v2 = vshll.u32 %v13625_v11, 16  ;;  %v6669_v7 = vrot.slane %v15368_v63, 7  ;;  %v6664_v11 = vor.u32 %v6663_v32, %v15370_v48 }
 0x321   :  { %10693 = vmatprep.mubr.msk.bf16.mxu1 %vm2971_vm2, %v13078_v9  ;;  %10893 = vmatprep.mubr.msk.bf16.mxu0 %vm2971_vm2, %v11896_v8  ;;  %v6661_v8 = vor.u32 %v6660_v41, %v15367_v45  ;;  %v15373_v9 = vshll.u32 %v13640_v39, 16  ;;  %v6672_v63 = vrot.slane %v15374_v52, 7  ;;  %v15378_v48 = vshrl.u32 %v13654_v3, 16 }
 0x322   :  { %15363 = vst [vmem:[#allocation85_spill] sm:$0xff] %v13744_v27  ;;  %v6658_v25 = vor.u32 %v6657_v42, %v15364_v2  ;;  %v15375_v27 = vshrl.u32 %v13648_v57, 16  ;;  %v15381_v52 = vshll.u32 %v13646_v62, 16 }
 0x323   :  { %v13767_v35 = vsel %vm3479_vm3, %v6657_v42, %v6661_v8  ;;  %v6670_v45 = vor.u32 %v6669_v7, %v15373_v9  ;;  %v6678_v44 = vrot.slane %v15378_v48, 7  ;;  %v15379_v42 = vshrl.u32 %v13656_v19, 16 }
 0x324   :  { %v13760_v2 = vsel %vm3479_vm3, %v6654_v26, %v6658_v25  ;;  %15372 = vst [vmem:[#allocation86_spill] sm:$0xff] %v13767_v35  ;;  %v6675_v5 = vrot.slane %v15375_v27, 7  ;;  %v13776_v25 = vsel %vm3479_vm3, %v6660_v41, %v6664_v11  ;;  %v13779_v26 = vsel %vm3479_vm3, %v6663_v32, %v6667_v12 }
 0x325   :  { %15369 = vst [vmem:[#allocation62_spill] sm:$0xff] %v13760_v2  ;;  %15376 = vst [vmem:[#allocation63_spill] sm:$0xff] %v13776_v25  ;;  %v6681_v8 = vrot.slane %v15379_v42, 7  ;;  %v13786_v9 = vsel %vm3479_vm3, %v6666_v61, %v6670_v45  ;;  %v6673_v35 = vor.u32 %v6672_v63, %v15381_v52  ;;  %v15382_v27 = vshll.u32 %v13648_v57, 16  ;;  %v11897_v52 = vld [vmem:[#allocation2 + $0x68] sm:$0xff] }
 0x326   :  { %15377 = vst [vmem:[#allocation64_spill] sm:$0xff] %v13779_v26  ;;  %15380 = vst [vmem:[#allocation65_spill] sm:$0xff] %v13786_v9  ;;  %v15383_v41 = vshrl.u32 %v13661_v36, 16  ;;  %v15384_v12 = vshll.u32 %v13654_v3, 16  ;;  %v15385_v48 = vshll.u32 %v13656_v19, 16  ;;  %v15386_v42 = vshrl.u32 %v13674_v33, 16 }
 0x327   :  { %v6676_v2 = vor.u32 %v6675_v5, %v15382_v27  ;;  %v15387_v61 = vshrl.u32 %v13676_v21, 16  ;;  %v13806_v27 = vsel %vm3479_vm3, %v6669_v7, %v6673_v35  ;;  %v15393_v7 = vshll.u32 %v13674_v33, 16 }
 0x328   :  { %v6684_v11 = vrot.slane %v15383_v41, 7  ;;  %v6679_v32 = vor.u32 %v6678_v44, %v15384_v12  ;;  %v6682_v26 = vor.u32 %v6681_v8, %v15385_v48  ;;  %v6687_v25 = vrot.slane %v15386_v42, 7  ;;  %10694 = vmatmul.mubr.msk.bf16.gmra.mrb[248].mxu1 %vm2971_vm2, %v13132_v47  ;;  %10894 = vmatmul.mubr.msk.bf16.gmra.mrb[52].mxu0 %vm2971_vm2, %v11897_v52 }
 0x329   :  { %v6690_v45 = vrot.slane %v15387_v61, 7  ;;  %v13809_v41 = vsel %vm3479_vm3, %v6672_v63, %v6676_v2  ;;  %v15389_v12 = vshll.u32 %v13661_v36, 16  ;;  %v15390_v42 = vshrl.u32 %v13685_v13, 16  ;;  %10697 = vmatprep.mubr.msk.bf16.mxu1 %vm2971_vm2, %v13129_v24  ;;  %v11898_v61 = vld [vmem:[#allocation2 + $0x70] sm:$0xff] }
 0x32a   :  { %15388 = vst [vmem:[#allocation87_spill] sm:$0xff] %v13809_v41  ;;  %10897 = vmatprep.mubr.msk.bf16.mxu0 %vm2971_vm2, %v11898_v61  ;;  %v13819_v47 = vsel %vm3479_vm3, %v6675_v5, %v6679_v32  ;;  %v13822_v35 = vsel %vm3479_vm3, %v6678_v44, %v6682_v26  ;;  %v6688_v2 = vor.u32 %v6687_v25, %v15393_v7  ;;  %v15394_v63 = vshrl.u32 %v13689_v17, 16 }
 0x32b   :  { %v6685_v48 = vor.u32 %v6684_v11, %v15389_v12  ;;  %v6693_v9 = vrot.slane %v15390_v42, 7  ;;  %15391 = vst [vmem:[#allocation66_spill] sm:$0xff] %v13819_v47  ;;  %15392 = vst [vmem:[#allocation88_spill] sm:$0xff] %v13822_v35  ;;  %v15396_v24 = vshll.u32 %v13676_v21, 16  ;;  %v15397_v61 = vshll.u32 %v13685_v13, 16 }
 0x32c   :  { %v6696_v52 = vrot.slane %v15394_v63, 7  ;;  %v15398_v5 = vshrl.u32 %v13691_v14, 16  ;;  %v13838_v26 = vsel %vm3479_vm3, %v6684_v11, %v6688_v2  ;;  %v15400_v44 = vshll.u32 %v13689_v17, 16 }
 0x32d   :  { %v13829_v12 = vsel %vm3479_vm3, %v6681_v8, %v6685_v48  ;;  %v6691_v42 = vor.u32 %v6690_v45, %v15396_v24  ;;  %v6694_v41 = vor.u32 %v6693_v9, %v15397_v61  ;;  %15399 = vst [vmem:[#allocation89_spill] sm:$0xff] %v13838_v26  ;;  %v15401_v63 = vshrl.u32 %v13702_v1, 16 }
 0x32e   :  { %15395 = vst [vmem:[#allocation67_spill] sm:$0xff] %v13829_v12  ;;  %v6699_v32 = vrot.slane %v15398_v5, 7  ;;  %v6697_v7 = vor.u32 %v6696_v52, %v15400_v44  ;;  %v15402_v8 = vshrl.u32 %v13704_v15, 16  ;;  %v15404_v5 = vshll.u32 %v13691_v14, 16 }
 0x32f   :  { %v6702_v35 = vrot.slane %v15401_v63, 7  ;;  %v13847_v24 = vsel %vm3479_vm3, %v6687_v25, %v6691_v42  ;;  %v13850_v61 = vsel %vm3479_vm3, %v6690_v45, %v6694_v41  ;;  %v15405_v11 = vshrl.u32 %v13709_v60, 16 }
 0x330   :  { %v6705_v48 = vrot.slane %v15402_v8, 7  ;;  %15403 = vst [vmem:[#allocation90_spill] sm:$0xff] %v13850_v61  ;;  %v6700_v12 = vor.u32 %v6699_v32, %v15404_v5  ;;  %v13857_v44 = vsel %vm3479_vm3, %v6693_v9, %v6697_v7  ;;  %v15406_v63 = vshll.u32 %v13702_v1, 16  ;;  %10698 = vmatmul.mubr.msk.bf16.gmra.mrb[252].mxu1 %vm2971_vm2, %v13183_v59 }
 0x331   :  { %v6708_v2 = vrot.slane %v15405_v11, 7  ;;  %v15407_v8 = vshll.u32 %v13704_v15, 16  ;;  %v15408_v25 = vshrl.u32 %v13715_v43, 16  ;;  %v15409_v41 = vshll.u32 %v13709_v60, 16  ;;  %10701 = vmatprep.mubr.msk.bf16.mxu1 %vm2971_vm2, %v13180_v53  ;;  %v11902_v53 = vld [vmem:[#allocation2 + $0x90] sm:$0xff] }
 0x332   :  { %v6703_v26 = vor.u32 %v6702_v35, %v15406_v63  ;;  %v13866_v45 = vsel %vm3479_vm3, %v6696_v52, %v6700_v12  ;;  %v15410_v11 = vshrl.u32 %v13717_v50, 16  ;;  %v15411_v9 = vshrl.u32 %v13725_v56, 16  ;;  %v11899_v12 = vld [vmem:[#allocation2 + $0x78] sm:$0xff] }
 0x333   :  { %v6706_v47 = vor.u32 %v6705_v48, %v15407_v8  ;;  %v6711_v42 = vrot.slane %v15408_v25, 7  ;;  %v6709_v5 = vor.u32 %v6708_v2, %v15409_v41  ;;  %v15412_v25 = vshll.u32 %v13715_v43, 16  ;;  %10898 = vmatmul.mubr.msk.bf16.gmra.mrb[56].mxu0 %vm2971_vm2, %v11899_v12  ;;  %v15423_v12 = vld [vmem:[#allocation33_spill] sm:$0xff] }
 0x334   :  { %v6714_v61 = vrot.slane %v15410_v11, 7  ;;  %v13874_v7 = vrot.slane %v15411_v9, 7  ;;  %v13877_v63 = vsel %vm3479_vm3, %v6699_v32, %v6703_v26  ;;  %v15413_v11 = vshll.u32 %v13717_v50, 16 }
 0x335   :  { %v13880_v8 = vsel %vm3479_vm3, %v6702_v35, %v6706_v47  ;;  %v6712_v52 = vor.u32 %v6711_v42, %v15412_v25  ;;  %v13888_v41 = vsel %vm3479_vm3, %v6705_v48, %v6709_v5  ;;  %v15414_v32 = vshll.u32 %v13725_v56, 16  ;;  %v11900_v35 = vld [vmem:[#allocation2 + $0x80] sm:$0xff]  ;;  %v11901_v5 = vld [vmem:[#allocation2 + $0x88] sm:$0xff] }
 0x336   :  { %v6715_v9 = vor.u32 %v6714_v61, %v15413_v11  ;;  %10901 = vmatprep.mubr.msk.bf16.mxu0 %vm2971_vm2, %v11900_v35  ;;  %v15424_v11 = vld [vmem:[#allocation48_spill] sm:$0xff] }
 0x337   :  { %v6718_v47 = vor.u32 %v13874_v7, %v15414_v32  ;;  %v13899_v59 = vsel %vm3479_vm3, %v6708_v2, %v6712_v52  ;;  %v11903_v2 = vld [vmem:[#allocation2 + $0x98] sm:$0xff]  ;;  %v13977_v52 = vld [vmem:[#allocation2 + $0x28] sm:$0xff]  ;;  %v13989_v35 = vld [vmem:[#allocation2 + $0x30] sm:$0xff] }
 0x338   :  { %v13902_v26 = vsel %vm3479_vm3, %v6711_v42, %v6715_v9  ;;  %10702 = vmatmul.mubr.msk.bf16.gmra.mrb[0].mxu1 %vm2971_vm2, %v13234_v28  ;;  %v15416_v28 = vld [vmem:[#allocation44_spill] sm:$0xff] }
 0x339   :  { %v13905_v48 = vsel %vm3479_vm3, %v6714_v61, %v6718_v47  ;;  %10705 = vmatprep.mubr.msk.bf16.mxu1 %vm2971_vm2, %v13227_v4  ;;  %v15415_v4 = vld [vmem:[#allocation47_spill] sm:$0xff]  ;;  %v15425_v47 = vld [vmem:[#allocation34_spill] sm:$0xff] }
 0x33b   :  { %10902 = vmatmul.mubr.msk.bf16.gmra.mrb[60].mxu0 %vm2971_vm2, %v11901_v5 }
 0x33c   :  { %10905 = vmatprep.mubr.msk.bf16.mxu0 %vm2971_vm2, %v11902_v53  ;;  %v15057_v53 = vshll.u32 %v13977_v52, 16 }
 0x340   :  { %10706 = vmatmul.mubr.msk.bf16.gmra.mrb[4].mxu1 %vm2971_vm2, %v13286_v37  ;;  %v15417_v37 = vld [vmem:[#allocation76_spill] sm:$0xff] }
 0x341   :  { %10709 = vmatprep.mubr.msk.bf16.mxu1 %vm2971_vm2, %v13283_v6 }
 0x343   :  { %10906 = vmatmul.mubr.msk.bf16.gmra.mrb[64].mxu0 %vm2971_vm2, %v11903_v2 }
 0x344   :  { %10909 = vmatprep.mubr.msk.bf16.mxu0 %vm2971_vm2, %v13239_v46 }
 0x348   :  { %10710 = vmatmul.mubr.msk.bf16.gmra.mrb[8].mxu1 %vm2971_vm2, %v13334_v58 }
 0x349   :  { %10713 = vmatprep.mubr.msk.bf16.mxu1 %vm2971_vm2, %v13328_v30 }
 0x34b   :  { %10910 = vmatmul.mubr.msk.bf16.gmra.mrb[68].mxu0 %vm2971_vm2, %v13236_v16 }
 0x34c   :  { %10913 = vmatprep.mubr.msk.bf16.mxu0 %vm2971_vm2, %v13291_v22  ;;  %v15418_v22 = vld [vmem:[#allocation46_spill] sm:$0xff] }
 0x350   :  { %10714 = vmatmul.mubr.msk.bf16.gmra.mrb[12].mxu1 %vm2971_vm2, %v13380_v0  ;;  %v15421_v0 = vld [vmem:[#allocation100_spill] sm:$0xff] }
 0x351   :  { %10717 = vmatprep.mubr.msk.bf16.mxu1 %vm2971_vm2, %v13377_v34  ;;  %v15420_v34 = vld [vmem:[#allocation75_spill] sm:$0xff] }
 0x353   :  { %10914 = vmatmul.mubr.msk.bf16.gmra.mrb[72].mxu0 %vm2971_vm2, %v13288_v49  ;;  %v4105_v49 = vld [vmem:[#allocation2 + $0x8] sm:$0xff] }
 0x354   :  { %10917 = vmatprep.mubr.msk.bf16.mxu0 %vm2971_vm2, %v13339_v23  ;;  %v4147_v16 = vshll.u32 %v4105_v49, 16  ;;  %v4145_v46 = vshrl.u32 %v4105_v49, 16  ;;  %v15419_v23 = vld [vmem:[#allocation77_spill] sm:$0xff] }
 0x356   :  { %v4149_v6 = vrot.slane %v4147_v16, 1  ;;  %v15055_v16 = vshll.u32 %v13989_v35, 16 }
 0x358   :  { %10718 = vmatmul.mubr.msk.bf16.gmra.mrb[16].mxu1 %vm2971_vm2, %v13420_v51  ;;  %v4150_v30 = vor.u32 %v4149_v6, %v4145_v46  ;;  %v13971_v51 = vld [vmem:[#allocation2 + $0x20] sm:$0xff]  ;;  %v5936_v6 = vrot.slane %v15057_v53, 1 }
 0x359   :  { %10721 = vmatprep.mubr.msk.bf16.mxu1 %vm2971_vm2, %v13417_v18  ;;  %v15422_v18 = vld [vmem:[#allocation49_spill] sm:$0xff]  ;;  %v15058_v42 = vshll.u32 %v13971_v51, 16  ;;  %v15060_v5 = vshrl.u32 %v13971_v51, 16 }
 0x35b   :  { %10918 = vmatmul.mubr.msk.bf16.gmra.mrb[76].mxu0 %vm2971_vm2, %v13336_v38  ;;  %v13960_v38 = vld [vmem:[#allocation2 + $0x18] sm:$0xff]  ;;  %v5928_v32 = vrot.slane %v15058_v42, 1 }
 0x35c   :  { %10921 = vmatprep.mubr.msk.bf16.mxu0 %vm2971_vm2, %v13385_v31  ;;  %v15062_v2 = vshrl.u32 %v13960_v38, 16 }
 0x35d   :  { %v5932_v49 = vor.u32 %v15060_v5, %v5928_v32 }
 0x360   :  { %10722 = vmatmul.mubr.msk.bf16.gmra.mrb[20].mxu1 %vm2971_vm2, %v13460_v20  ;;  %v15061_v20 = vshll.u32 %v13960_v38, 16 }
 0x361   :  { %10725 = vmatprep.mubr.msk.bf16.mxu1 %vm2971_vm2, %v13457_v54  ;;  %v5872_v54 = vld [vmem:[#allocation2 + $0x10] sm:$0xff] }
 0x362   :  { %v5913_v58 = vshll.u32 %v5872_v54, 16  ;;  %v5920_v25 = vrot.slane %v15061_v20, 1 }
 0x363   :  { %10922 = vmatmul.mubr.msk.bf16.gmra.mrb[80].mxu0 %vm2971_vm2, %v13382_v29  ;;  %v4155_v29 = vsel %vm4143_vm4, %v4150_v30, %v15421_v0  ;;  %v11879_v30 = vld [vmem:[#allocation9 + $0x68] sm:$0xff]   ;;  %v5937_v0 = vsel %vm4143_vm4, %v5932_v49, %v5936_v6 }
 0x364   :  { %10925 = vmatprep.mubr.msk.bf16.mxu0 %vm2971_vm2, %v13425_v10  ;;  %v5915_v31 = vrot.slane %v5913_v58, 1  ;;  %v5911_v10 = vshrl.u32 %v5872_v54, 16  ;;  %v5924_v46 = vor.u32 %v15062_v2, %v5920_v25  ;;  %v15426_v58 = vld [vmem:[#allocation39_spill] sm:$0xff] }
 0x366   :  { %v5916_v61 = vor.u32 %v5915_v31, %v5911_v10  ;;  %v5929_v54 = vsel %vm4143_vm4, %v5924_v46, %v5928_v32  ;;  %v15427_v31 = vld [vmem:[#allocation40_spill] sm:$0xff]  ;;  %v15056_v10 = vshrl.u32 %v13989_v35, 16  ;;  %v15429_v32 = vld [vmem:[#allocation82_spill] sm:$0xff] }
 0x368   :  { %10726 = vmatmul.mubr.msk.bf16.gmra.mrb[24].mxu1 %vm2971_vm2, %v15415_v4  ;;  %v5921_v9 = vsel %vm4143_vm4, %v5916_v61, %v5920_v25  ;;  %v15059_v61 = vshrl.u32 %v13977_v52, 16  ;;  %v14014_v25 = vld [vmem:[#allocation9 + $0x70] sm:$0xff]  }
 0x369   :  { %10729 = vmatprep.mubr.msk.bf16.mxu1 %vm2971_vm2, %v15417_v37 }
 0x36b   :  { %10926 = vmatmul.mubr.msk.bf16.gmra.mrb[84].mxu0 %vm2971_vm2, %v15416_v28 }
 0x36c   :  { %10929 = vmatprep.mubr.msk.bf16.mxu0 %vm2971_vm2, %v15418_v22 }
 0x370   :  { %10730 = vmatmul.mubr.msk.bf16.gmra.mrb[28].mxu1 %vm2971_vm2, %v15419_v23 }
 0x371   :  { %10737 = vmatprep.mubr.msk.bf16.mxu1 %vm2971_vm2, %v4155_v29  ;;  %v5944_v29 = vrot.slane %v15055_v16, 1  ;;  %v15434_v16 = vld [vmem:[#allocation74_spill] sm:$0xff] }
 0x373   :  { %10930 = vmatmul.mubr.msk.bf16.gmra.mrb[88].mxu0 %vm2971_vm2, %v15420_v34 }
 0x374   :  { %10933 = vmatprep.mubr.msk.bf16.mxu0 %vm2971_vm2, %v15422_v18  ;;  %v15428_v18 = vld [vmem:[#allocation53_spill] sm:$0xff] }
 0x378   :  { %10738 = vmatmul.mubr.msk.bf16.vlgmr.msra.gmra.mrb[224].mxu1 %vm2971_vm2, %v15423_v12  ;;  %v5948_v12 = vor.u32 %v15056_v10, %v5944_v29  ;;  %v15439_v10 = vld [vmem:[#allocation43_spill] sm:$0xff] }
 0x379   :  { %10741 = vmatprep.mubr.msk.bf16.mxu1 %vm2971_vm2, %v15425_v47  ;;  %v15430_v47 = vshll.u32 %v15429_v32, 16 }
 0x37b   :  { %10934 = vmatmul.mubr.msk.bf16.gmra.mrb[92].mxu0 %vm2971_vm2, %v15424_v11  ;;  %v5952_v49 = vrot.slane %v15430_v47, 1 }
 0x37c   :  { %10941 = vmatprep.mubr.msk.bf16.mxu0 %vm2971_vm2, %v5921_v9  ;;  %v5940_v9 = vor.u32 %v15059_v61, %v5936_v6  ;;  %v15435_v6 = vld [vmem:[#allocation35_spill] sm:$0xff] }
 0x37e   :  { %v5945_v46 = vsel %vm4143_vm4, %v5940_v9, %v5944_v29  ;;  %v15437_v9 = vld [vmem:[#allocation68_spill] sm:$0xff] }
 0x37f   :  { %v15438_v47 = vshrl.u32 %v15437_v9, 16 }
 0x380   :  { %10742 = vmatmul.mubr.msk.bf16.gmra.mrb[228].mxu1 %vm2971_vm2, %v15426_v58  ;;  %v5953_v58 = vsel %vm4143_vm4, %v5948_v12, %v5952_v49 }
 0x381   :  { %10745 = vmatprep.mubr.msk.bf16.mxu1 %vm2971_vm2, %v15427_v31  ;;  %v4206_v53 = vor.u32 %v15439_v10, %v15438_v47 }
 0x383   :  { %10942 = vmatmul.mubr.msk.bf16.vlgmr.msra.gmra.mrb[32].mxu0 %vm2971_vm2, %v5929_v54  ;;  %v15431_v54 = vld [vmem:[#allocation73_spill] sm:$0xff] }
 0x384   :  { %10945 = vmatprep.mubr.msk.bf16.mxu0 %vm2971_vm2, %v5937_v0  ;;  %11006 = vmatpush3.bf16.msra.mxu0 %v15428_v18  ;;  %v15432_v0 = vld [vmem:[#allocation58_spill] sm:$0xff] }
 0x385   :  { %11007 = vmatprep.subr.bf16.mxu0 %v11879_v30  ;;  %v15433_v31 = vshll.u32 %v15432_v0, 16  ;;  %v15442_v12 = vshrl.u32 %v15432_v0, 16 }
 0x387   :  { %v5960_v18 = vrot.slane %v15433_v31, 1  ;;  %v15443_v31 = vshrl.u32 %v15429_v32, 16  ;;  %v15447_v32 = vshll.u32 %v13636_v55, 16 }
 0x388   :  { %11008 = vmatpush3.bf16.msra.mxu0 %v11879_v30  ;;  %10746 = vmatmul.mubr.msk.bf16.gmra.mrb[232].mxu1 %vm2971_vm2, %v15431_v54  ;;  %v15436_v30 = vshll.u32 %v15435_v6, 16  ;;  %v15440_v54 = vld [vmem:[#allocation36_spill] sm:$0xff] }
 0x389   :  { %11073 = vmatprep.subr.bf16.mxu0 %v14014_v25  ;;  %10749 = vmatprep.mubr.msk.bf16.mxu1 %vm2971_vm2, %v15434_v16  ;;  %v15441_v42 = vshll.u32 %v15440_v54, 16  ;;  %v5964_v61 = vor.u32 %v15442_v12, %v5960_v18  ;;  %v5956_v5 = vor.u32 %v15443_v31, %v5952_v49  ;;  %v15444_v16 = vshrl.u32 %v15435_v6, 16  ;;  %v15451_v6 = vld [vmem:[#allocation38_spill] sm:$0xff] }
 0x38a   :  { %v4210_v29 = vrot.slane %v15436_v30, 1  ;;  %v5976_v49 = vrot.slane %v15447_v32, 1  ;;  %v15458_v32 = vld [vmem:[#allocation37_spill] sm:$0xff] }
 0x38b   :  { %10946 = vmatmul.mubr.msk.bf16.gmra.mrb[36].mxu0 %vm2971_vm2, %v5945_v46  ;;  %v4218_v46 = vrot.slane %v15441_v42, 1  ;;  %v5961_v9 = vsel %vm4143_vm4, %v5956_v5, %v5960_v18  ;;  %v15450_v5 = vshrl.u32 %v15440_v54, 16 }
 0x38c   :  { %10949 = vmatprep.mubr.msk.bf16.mxu0 %vm2971_vm2, %v5953_v58  ;;  %v4214_v20 = vor.u32 %v4210_v29, %v15444_v16  ;;  %v15445_v58 = vld [vmem:[#allocation84_spill] sm:$0xff]  ;;  %v4211_v30 = vsel %vm4143_vm4, %v4206_v53, %v4210_v29  ;;  %v15452_v29 = vshll.u32 %v15451_v6, 16 }
 0x38d   :  { %v15446_v2 = vshll.u32 %v15445_v58, 16  ;;  %v4222_v18 = vor.u32 %v4218_v46, %v15450_v5  ;;  %v15461_v5 = vld [vmem:[#allocation71_spill] sm:$0xff] }
 0x38e   :  { %v4219_v42 = vsel %vm4143_vm4, %v4214_v20, %v4218_v46  ;;  %v4234_v47 = vrot.slane %v15452_v29, 1  ;;  %v15453_v20 = vshrl.u32 %v13636_v55, 16 }
 0x38f   :  { %v5968_v23 = vrot.slane %v15446_v2, 1  ;;  %v15448_v2 = vld [vmem:[#allocation69_spill] sm:$0xff] }
 0x390   :  { %10750 = vmatmul.mubr.msk.bf16.gmra.mrb[236].mxu1 %vm2971_vm2, %v4211_v30  ;;  %v15449_v0 = vshll.u32 %v15448_v2, 16  ;;  %v5980_v12 = vor.u32 %v15453_v20, %v5976_v49  ;;  %v15455_v16 = vshrl.u32 %v15448_v2, 16  ;;  %v15459_v2 = vshll.u32 %v15458_v32, 16 }
 0x391   :  { %v5969_v10 = vsel %vm4143_vm4, %v5964_v61, %v5968_v23  ;;  %10753 = vmatprep.mubr.msk.bf16.mxu1 %vm2971_vm2, %v4219_v42  ;;  %v15454_v61 = vshrl.u32 %v15445_v58, 16  ;;  %v15463_v20 = vshrl.u32 %v13640_v39, 16 }
 0x392   :  { %v4226_v53 = vrot.slane %v15449_v0, 1  ;;  %v4242_v0 = vrot.slane %v15459_v2, 1  ;;  %v15471_v2 = vld [vmem:[#allocation72_spill] sm:$0xff] }
 0x393   :  { %10950 = vmatmul.mubr.msk.bf16.gmra.mrb[40].mxu0 %vm2971_vm2, %v5961_v9  ;;  %v5972_v31 = vor.u32 %v15454_v61, %v5968_v23  ;;  %v15456_v9 = vshll.u32 %v13638_v40, 16  ;;  %v15457_v23 = vshll.u32 %v13640_v39, 16 }
 0x394   :  { %10953 = vmatprep.mubr.msk.bf16.mxu0 %vm2971_vm2, %v5969_v10  ;;  %v4230_v30 = vor.u32 %v4226_v53, %v15455_v16  ;;  %v4227_v10 = vsel %vm4143_vm4, %v4222_v18, %v4226_v53  ;;  %v15462_v18 = vshll.u32 %v15461_v5, 16  ;;  %v15465_v16 = vshrl.u32 %v15458_v32, 16 }
 0x395   :  { %v5984_v42 = vrot.slane %v15456_v9, 1  ;;  %v5977_v54 = vsel %vm4143_vm4, %v5972_v31, %v5976_v49  ;;  %v5992_v58 = vrot.slane %v15457_v23, 1  ;;  %v15460_v49 = vshrl.u32 %v15451_v6, 16 }
 0x396   :  { %v4235_v55 = vsel %vm4143_vm4, %v4230_v30, %v4234_v47  ;;  %v4250_v29 = vrot.slane %v15462_v18, 1  ;;  %v4246_v30 = vor.u32 %v4242_v0, %v15465_v16  ;;  %v15466_v9 = vshll.u32 %v13646_v62, 16 }
 0x397   :  { %v5985_v46 = vsel %vm4143_vm4, %v5980_v12, %v5984_v42  ;;  %v4238_v53 = vor.u32 %v4234_v47, %v15460_v49  ;;  %v5996_v61 = vor.u32 %v15463_v20, %v5992_v58  ;;  %v15464_v12 = vshrl.u32 %v13638_v40, 16 }
 0x398   :  { %10754 = vmatmul.mubr.msk.bf16.gmra.mrb[240].mxu1 %vm2971_vm2, %v4227_v10  ;;  %v6000_v10 = vrot.slane %v15466_v9, 1  ;;  %v4251_v39 = vsel %vm4143_vm4, %v4246_v30, %v4250_v29  ;;  %v15467_v40 = vshll.u32 %v13648_v57, 16  ;;  %v15474_v20 = vshrl.u32 %v13646_v62, 16 }
 0x399   :  { %10757 = vmatprep.mubr.msk.bf16.mxu1 %vm2971_vm2, %v4235_v55  ;;  %v5988_v31 = vor.u32 %v15464_v12, %v5984_v42  ;;  %v15468_v55 = vld [vmem:[#allocation70_spill] sm:$0xff]  ;;  %v15476_v16 = vshll.u32 %v13654_v3, 16  ;;  %v15477_v62 = vshll.u32 %v13656_v19, 16 }
 0x39a   :  { %v6001_v47 = vsel %vm4143_vm4, %v5996_v61, %v6000_v10  ;;  %v6008_v42 = vrot.slane %v15467_v40, 1  ;;  %v6004_v61 = vor.u32 %v15474_v20, %v6000_v10  ;;  %v15475_v12 = vshrl.u32 %v15468_v55, 16 }
 0x39b   :  { %10954 = vmatmul.mubr.msk.bf16.gmra.mrb[44].mxu0 %vm2971_vm2, %v5977_v54  ;;  %v4243_v54 = vsel %vm4143_vm4, %v4238_v53, %v4242_v0  ;;  %v5993_v6 = vsel %vm4143_vm4, %v5988_v31, %v5992_v58  ;;  %v15470_v58 = vshrl.u32 %v15461_v5, 16  ;;  %v15472_v0 = vshll.u32 %v15471_v2, 16 }
 0x39c   :  { %10957 = vmatprep.mubr.msk.bf16.mxu0 %vm2971_vm2, %v5985_v46  ;;  %v15469_v46 = vshll.u32 %v15468_v55, 16  ;;  %v15473_v53 = vshrl.u32 %v13648_v57, 16  ;;  %v6016_v30 = vrot.slane %v15476_v16, 1  ;;  %v6009_v5 = vsel %vm4143_vm4, %v6004_v61, %v6008_v42 }
 0x39d   :  { %v4254_v32 = vor.u32 %v4250_v29, %v15470_v58  ;;  %v4266_v49 = vrot.slane %v15472_v0, 1  ;;  %v6024_v10 = vrot.slane %v15477_v62, 1  ;;  %v15486_v20 = vshll.u32 %v13661_v36, 16 }
 0x39e   :  { %v4258_v23 = vrot.slane %v15469_v46, 1  ;;  %v6012_v18 = vor.u32 %v15473_v53, %v6008_v42  ;;  %v15481_v42 = vld [vmem:[#allocation42_spill] sm:$0xff]  ;;  %v15491_v62 = vshll.u32 %v13676_v21, 16 }
 0x39f   :  { %v15482_v55 = vshll.u32 %v15481_v42, 16  ;;  %v6032_v61 = vrot.slane %v15486_v20, 1  ;;  %v15488_v16 = vshrl.u32 %v15481_v42, 16  ;;  %v15494_v42 = vld [vmem:[#allocation52_spill] sm:$0xff] }
 0x3a0   :  { %10758 = vmatmul.mubr.msk.bf16.gmra.mrb[244].mxu1 %vm2971_vm2, %v4243_v54  ;;  %v4262_v31 = vor.u32 %v4258_v23, %v15475_v12  ;;  %v4259_v9 = vsel %vm4143_vm4, %v4254_v32, %v4258_v23  ;;  %v6017_v29 = vsel %vm4143_vm4, %v6012_v18, %v6016_v30  ;;  %v15478_v54 = vld [vmem:[#allocation41_spill] sm:$0xff]  ;;  %v15483_v23 = vshrl.u32 %v13656_v19, 16 }
 0x3a1   :  { %10761 = vmatprep.mubr.msk.bf16.mxu1 %vm2971_vm2, %v4251_v39  ;;  %v4282_v46 = vrot.slane %v15482_v55, 1  ;;  %v15484_v32 = vshrl.u32 %v13654_v3, 16  ;;  %v15485_v53 = vshrl.u32 %v15478_v54, 16  ;;  %v15487_v3 = vshll.u32 %v13674_v33, 16 }
 0x3a2   :  { %v4267_v57 = vsel %vm4143_vm4, %v4262_v31, %v4266_v49  ;;  %v6028_v58 = vor.u32 %v15483_v23, %v6024_v10 }
 0x3a3   :  { %10958 = vmatmul.mubr.msk.bf16.gmra.mrb[48].mxu0 %vm2971_vm2, %v5993_v6  ;;  %v15479_v6 = vshll.u32 %v15478_v54, 16  ;;  %v6020_v0 = vor.u32 %v15484_v32, %v6016_v30  ;;  %v6040_v31 = vrot.slane %v15487_v3, 1  ;;  %v4286_v30 = vor.u32 %v4282_v46, %v15488_v16  ;;  %v15492_v54 = vld [vmem:[#allocation78_spill] sm:$0xff]  ;;  %v15504_v16 = vld [vmem:[#allocation55_spill] sm:$0xff] }
 0x3a4   :  { %10961 = vmatprep.mubr.msk.bf16.mxu0 %vm2971_vm2, %v6001_v47  ;;  %v15480_v47 = vshrl.u32 %v15471_v2, 16 }
 0x3a5   :  { %v4274_v39 = vrot.slane %v15479_v6, 1  ;;  %v6025_v2 = vsel %vm4143_vm4, %v6020_v0, %v6024_v10  ;;  %v6048_v10 = vrot.slane %v15491_v62, 1  ;;  %v4291_v6 = vsel %vm4143_vm4, %v4286_v30, %v15492_v54 }
 0x3a6   :  { %v4270_v40 = vor.u32 %v4266_v49, %v15480_v47  ;;  %v6033_v49 = vsel %vm4143_vm4, %v6028_v58, %v6032_v61  ;;  %v15497_v58 = vshll.u32 %v13689_v17, 16 }
 0x3a7   :  { %v4278_v18 = vor.u32 %v4274_v39, %v15485_v53  ;;  %v15498_v53 = vld [vmem:[#allocation54_spill] sm:$0xff] }
 0x3a8   :  { %10762 = vmatmul.mubr.msk.bf16.gmra.mrb[248].mxu1 %vm2971_vm2, %v4259_v9  ;;  %v4275_v12 = vsel %vm4143_vm4, %v4270_v40, %v4274_v39  ;;  %v15489_v9 = vshrl.u32 %v13674_v33, 16  ;;  %v15493_v33 = vshll.u32 %v13685_v13, 16  ;;  %v14179_v32 = vrot.slane %v15497_v58, 1 }
 0x3a9   :  { %10765 = vmatprep.mubr.msk.bf16.mxu1 %vm2971_vm2, %v4267_v57  ;;  %v4283_v19 = vsel %vm4143_vm4, %v4278_v18, %v4282_v46  ;;  %v15490_v57 = vshrl.u32 %v13661_v36, 16  ;;  %v15495_v36 = vshrl.u32 %v13685_v13, 16  ;;  %v15496_v46 = vshrl.u32 %v13676_v21, 16 }
 0x3aa   :  { %v6056_v40 = vrot.slane %v15493_v33, 1  ;;  %v15499_v13 = vshll.u32 %v13691_v14, 16  ;;  %v15501_v21 = vshrl.u32 %v13691_v14, 16  ;;  %v15505_v14 = vshll.u32 %v13704_v15, 16 }
 0x3ab   :  { %10962 = vmatmul.mubr.msk.bf16.gmra.mrb[52].mxu0 %vm2971_vm2, %v6009_v5  ;;  %v6044_v5 = vor.u32 %v15489_v9, %v6040_v31  ;;  %v6052_v23 = vor.u32 %v15496_v46, %v6048_v10  ;;  %v15515_v46 = vshll.u32 %v13717_v50, 16 }
 0x3ac   :  { %10965 = vmatprep.mubr.msk.bf16.mxu0 %vm2971_vm2, %v6017_v29  ;;  %v6036_v29 = vor.u32 %v15490_v57, %v6032_v61  ;;  %v6060_v55 = vor.u32 %v15495_v36, %v6056_v40  ;;  %v6072_v20 = vrot.slane %v15499_v13, 1  ;;  %v15500_v61 = vld [vmem:[#allocation79_spill] sm:$0xff]  ;;  %v6088_v9 = vrot.slane %v15505_v14, 1 }
 0x3ad   :  { %v6049_v47 = vsel %vm4143_vm4, %v6044_v5, %v6048_v10  ;;  %v6057_v0 = vsel %vm4143_vm4, %v6052_v23, %v6056_v40  ;;  %v15507_v5 = vshrl.u32 %v13704_v15, 16  ;;  %v15509_v10 = vshll.u32 %v13709_v60, 16  ;;  %v15524_v14 = vld [vmem:[#allocation83_spill] sm:$0xff] }
 0x3ae   :  { %v6041_v39 = vsel %vm4143_vm4, %v6036_v29, %v6040_v31  ;;  %v6065_v18 = vsel %vm4143_vm4, %v6060_v55, %v14179_v32  ;;  %v15508_v29 = vshrl.u32 %v13702_v1, 16  ;;  %v15511_v15 = vshll.u32 %v13715_v43, 16 }
 0x3af   :  { %v6092_v57 = vor.u32 %v15507_v5, %v6088_v9  ;;  %v6096_v54 = vrot.slane %v15509_v10, 1  ;;  %v15513_v40 = vshrl.u32 %v13715_v43, 16  ;;  %v15514_v36 = vshrl.u32 %v13709_v60, 16  ;;  %v15518_v60 = vld [vmem:[#allocation59_spill] sm:$0xff] }
 0x3b0   :  { %10766 = vmatmul.mubr.msk.bf16.gmra.mrb[252].mxu1 %vm2971_vm2, %v4275_v12  ;;  %v6076_v12 = vor.u32 %v15501_v21, %v6072_v20  ;;  %v6104_v33 = vrot.slane %v15511_v15, 1  ;;  %v6112_v23 = vrot.slane %v15515_v46, 1  ;;  %v15517_v43 = vshll.u32 %v13725_v56, 16  ;;  %v15528_v15 = vld [vmem:[#allocation60_spill] sm:$0xff] }
 0x3b1   :  { %10769 = vmatprep.mubr.msk.bf16.mxu1 %vm2971_vm2, %v4283_v19  ;;  %v6100_v55 = vor.u32 %v15514_v36, %v6096_v54  ;;  %v15519_v13 = vshll.u32 %v15416_v28, 16  ;;  %v15527_v10 = vshrl.u32 %v15420_v34, 16 }
 0x3b3   :  { %10966 = vmatmul.mubr.msk.bf16.gmra.mrb[56].mxu0 %vm2971_vm2, %v6025_v2  ;;  %v15502_v2 = vshrl.u32 %v13689_v17, 16  ;;  %v15506_v17 = vld [vmem:[#allocation80_spill] sm:$0xff]  ;;  %v14244_v58 = vsel %vm4143_vm4, %v6100_v55, %v6104_v33  ;;  %v15530_v55 = vld [vmem:[#allocation61_spill] sm:$0xff] }
 0x3b4   :  { %10969 = vmatprep.mubr.msk.bf16.mxu0 %vm2971_vm2, %v6033_v49  ;;  %v15503_v49 = vshll.u32 %v13702_v1, 16  ;;  %v15512_v1 = vld [vmem:[#allocation56_spill] sm:$0xff] }
 0x3b5   :  { %v6068_v19 = vor.u32 %v15502_v2, %v14179_v32 }
 0x3b6   :  { %v6080_v3 = vrot.slane %v15503_v49, 1 }
 0x3b7   :  { %v14200_v31 = vsel %vm4143_vm4, %v6068_v19, %v6072_v20  ;;  %v4370_v20 = vrot.slane %v15519_v13, 1  ;;  %v15522_v19 = vshrl.u32 %v13717_v50, 16  ;;  %v15532_v13 = vshrl.u32 %v15424_v11, 16 }
 0x3b8   :  { %10770 = vmatmul.mubr.msk.bf16.gmra.mrb[0].mxu1 %vm2971_vm2, %v4291_v6  ;;  %v14207_v30 = vsel %vm4143_vm4, %v6076_v12, %v6080_v3  ;;  %v6084_v62 = vor.u32 %v15508_v29, %v6080_v3  ;;  %v15521_v12 = vshrl.u32 %v13725_v56, 16  ;;  %v15523_v3 = vshrl.u32 %v15416_v28, 16 }
 0x3b9   :  { %10773 = vmatprep.mubr.msk.bf16.mxu1 %vm2971_vm2, %v15494_v42  ;;  %v6108_v42 = vor.u32 %v15513_v40, %v6104_v33  ;;  %v6116_v49 = vor.u32 %v15522_v19, %v6112_v23  ;;  %v15525_v28 = vshll.u32 %v15420_v34, 16  ;;  %v15529_v34 = vshll.u32 %v15424_v11, 16 }
 0x3ba   :  { %v14222_v6 = vsel %vm4143_vm4, %v6084_v62, %v6088_v9  ;;  %v4371_v9 = vsel %vm4143_vm4, %v15524_v14, %v4370_v20  ;;  %v4137_v62 = vld [vmem:[#allocation2 + $0x108] sm:$0x1]  ;;  %v15536_v11 = vshll.u32 %v13971_v51, 16 }
 0x3bb   :  { %10970 = vmatmul.mubr.msk.bf16.gmra.mrb[60].mxu0 %vm2971_vm2, %v6041_v39  ;;  %v15510_v39 = vld [vmem:[#allocation81_spill] sm:$0xff]  ;;  %v4386_v5 = vrot.slane %v15525_v28, 1  ;;  %v6160_v36 = vrot.slane %v15529_v34, 1  ;;  %v15537_v28 = vshll.u32 %v13977_v52, 16  ;;  %v15543_v34 = vld [vmem:[#allocation63_spill] sm:$0xff] }
 0x3bc   :  { %10973 = vmatprep.mubr.msk.bf16.mxu0 %vm2971_vm2, %v6049_v47  ;;  %v14229_v47 = vsel %vm4143_vm4, %v6092_v57, %v6096_v54  ;;  %v15526_v57 = vshrl.u32 %v15418_v22, 16 }
 0x3bd   :  { %v4390_v54 = vor.u32 %v4386_v5, %v15527_v10 }
 0x3bf   :  { %v4395_v33 = vsel %vm4143_vm4, %v4390_v54, %v15528_v15  ;;  %v15539_v15 = vshll.u32 %v13989_v35, 16 }
 0x3c0   :  { %10774 = vmatmul.mubr.msk.bf16.gmra.mrb[4].mxu1 %vm2971_vm2, %v15498_v53  ;;  %v14251_v53 = vsel %vm4143_vm4, %v6108_v42, %v6112_v23  ;;  %v6631_v42 = vld [vmem:[#allocation2 + $0x10] sm:$0x80] }
 0x3c1   :  { %10777 = vmatprep.mubr.msk.bf16.mxu1 %vm2971_vm2, %v15500_v61  ;;  %v15520_v61 = vshll.u32 %v15418_v22, 16  ;;  %v5904_v22 = vld [vmem:[#allocation2 + $0x110] sm:$0x1] }
 0x3c2   :  { %v6166_v23 = vshll.u32 %v5904_v22, 16  ;;  %v15540_v22 = vld [vmem:[#allocation85_spill] sm:$0xff] }
 0x3c3   :  { %10974 = vmatmul.mubr.msk.bf16.gmra.mrb[64].mxu0 %vm2971_vm2, %v6057_v0  ;;  %v15516_v0 = vld [vmem:[#allocation57_spill] sm:$0xff]  ;;  %v4378_v21 = vrot.slane %v15520_v61, 1 }
 0x3c4   :  { %10977 = vmatprep.mubr.msk.bf16.mxu0 %vm2971_vm2, %v6065_v18  ;;  %v6120_v18 = vrot.slane %v15517_v43, 1  ;;  %v6639_v43 = vshrl.u32 %v6631_v42, 16  ;;  %v6168_v61 = vrot.slane %v6166_v23, 1  ;;  %v15541_v42 = vld [vmem:[#allocation62_spill] sm:$0xff] }
 0x3c5   :  { %v4382_v29 = vor.u32 %v4378_v21, %v15526_v57  ;;  %v11881_v57 = vld [vmem:[#allocation9 + $0x78] sm:$0xff]  }
 0x3c6   :  { %v14265_v2 = vor.u32 %v15521_v12, %v6120_v18  ;;  %v15533_v12 = vshll.u32 %v13960_v38, 16  ;;  %v15547_v23 = vld [vmem:[#allocation66_spill] sm:$0xff] }
 0x3c8   :  { %10778 = vmatmul.mubr.msk.bf16.gmra.mrb[8].mxu1 %vm2971_vm2, %v15504_v16  ;;  %v4374_v16 = vor.u32 %v4370_v20, %v15523_v3  ;;  %v6129_v50 = vsel %vm4143_vm4, %v14265_v2, %v4370_v20  ;;  %v6164_v20 = vor.u32 %v6160_v36, %v15532_v13 }
 0x3c9   :  { %10781 = vmatprep.mubr.msk.bf16.mxu1 %vm2971_vm2, %v15506_v17  ;;  %v14274_v17 = vsel %vm4143_vm4, %v6116_v49, %v6120_v18  ;;  %v15531_v18 = vshrl.u32 %v13960_v38, 16  ;;  %v15534_v49 = vshrl.u32 %v13971_v51, 16 }
 0x3ca   :  { %v4379_v56 = vsel %vm4143_vm4, %v4374_v16, %v4378_v21  ;;  %v6641_v21 = vrot.slane %v6639_v43, 7  ;;  %v6169_v16 = vsel %vm4143_vm4, %v6164_v20, %v6168_v61  ;;  %v15549_v43 = vld [vmem:[#allocation67_spill] sm:$0xff] }
 0x3cb   :  { %10978 = vmatmul.mubr.msk.bf16.gmra.mrb[68].mxu0 %vm2971_vm2, %v14200_v31  ;;  %v6645_v3 = vrot.slane %v15534_v49, 7 }
 0x3cc   :  { %10981 = vmatprep.mubr.msk.bf16.mxu0 %vm2971_vm2, %v14207_v30 }
 0x3d0   :  { %10782 = vmatmul.mubr.msk.bf16.gmra.mrb[12].mxu1 %vm2971_vm2, %v15510_v39  ;;  %v4387_v39 = vsel %vm4143_vm4, %v4382_v29, %v4386_v5 }
 0x3d1   :  { %10785 = vmatprep.mubr.msk.bf16.mxu1 %vm2971_vm2, %v15512_v1  ;;  %v4400_v1 = vshll.u32 %v4137_v62, 16  ;;  %v15538_v62 = vshrl.u32 %v13989_v35, 16 }
 0x3d3   :  { %10982 = vmatmul.mubr.msk.bf16.gmra.mrb[72].mxu0 %vm2971_vm2, %v14222_v6  ;;  %v4402_v40 = vrot.slane %v4400_v1, 1  ;;  %v6651_v10 = vrot.slane %v15538_v62, 7 }
 0x3d4   :  { %10985 = vmatprep.mubr.msk.bf16.mxu0 %vm2971_vm2, %v14229_v47 }
 0x3d5   :  { %v4403_v46 = vsel %vm4143_vm4, %v15530_v55, %v4402_v40  ;;  %v6656_v40 = vsel %vm3479_vm3, %v6651_v10, %v15540_v22 }
 0x3d8   :  { %10786 = vmatmul.mubr.msk.bf16.gmra.mrb[16].mxu1 %vm2971_vm2, %v15516_v0  ;;  %v6161_v0 = vsel %vm4143_vm4, %v15530_v55, %v6160_v36  ;;  %v15544_v36 = vld [vmem:[#allocation64_spill] sm:$0xff]  ;;  %v15545_v55 = vld [vmem:[#allocation65_spill] sm:$0xff] }
 0x3d9   :  { %10789 = vmatprep.mubr.msk.bf16.mxu1 %vm2971_vm2, %v15518_v60  ;;  %v6642_v60 = vrot.slane %v15531_v18, 7  ;;  %v15550_v18 = vld [vmem:[#allocation89_spill] sm:$0xff] }
 0x3db   :  { %10986 = vmatmul.mubr.msk.bf16.gmra.mrb[76].mxu0 %vm2971_vm2, %v14244_v58  ;;  %v6643_v19 = vor.u32 %v6642_v60, %v15533_v12 }
 0x3dc   :  { %10989 = vmatprep.mubr.msk.bf16.mxu0 %vm2971_vm2, %v14251_v53 }
 0x3dd   :  { %v6644_v14 = vsel %vm3479_vm3, %v6641_v21, %v6643_v19  ;;  %v15552_v19 = vld [vmem:[#allocation45_spill] sm:$0xff] }
 0x3de   :  { %v6722_v49 = vsel %vm3479_vm3, %v13874_v7, %v15552_v19  ;;  %v11907_v19 = vld [vmem:[#allocation2 + $0x50] sm:$0xff] }
 0x3e0   :  { %10790 = vmatmul.mubr.msk.bf16.gmra.mrb[20].mxu1 %vm2971_vm2, %v4371_v9  ;;  %v15535_v9 = vshrl.u32 %v13977_v52, 16 }
 0x3e1   :  { %10793 = vmatprep.mubr.msk.bf16.mxu1 %vm2971_vm2, %v4379_v56 }
 0x3e3   :  { %10990 = vmatmul.mubr.msk.bf16.gmra.mrb[80].mxu0 %vm2971_vm2, %v14274_v17 }
 0x3e4   :  { %10993 = vmatprep.mubr.msk.bf16.mxu0 %vm2971_vm2, %v6129_v50  ;;  %v6646_v50 = vor.u32 %v6645_v3, %v15536_v11 }
 0x3e6   :  { %v6647_v29 = vsel %vm3479_vm3, %v6642_v60, %v6646_v50  ;;  %v15551_v60 = vld [vmem:[#allocation90_spill] sm:$0xff] }
 0x3e8   :  { %10794 = vmatmul.mubr.msk.bf16.gmra.mrb[24].mxu1 %vm2971_vm2, %v4387_v39 }
 0x3e9   :  { %10797 = vmatprep.mubr.msk.bf16.mxu1 %vm2971_vm2, %v4395_v33 }
 0x3eb   :  { %10994 = vmatmul.mubr.msk.bf16.gmra.mrb[84].mxu0 %vm2971_vm2, %v4379_v56  ;;  %v6648_v56 = vrot.slane %v15535_v9, 7 }
 0x3ec   :  { %10997 = vmatprep.mubr.msk.bf16.mxu0 %vm2971_vm2, %v4387_v39  ;;  %v14331_v39 = vld [vmem:[#allocation9 + $0x80] sm:$0xff]  }
 0x3ed   :  { %v6649_v5 = vor.u32 %v6648_v56, %v15537_v28  ;;  %v15553_v28 = vld [vmem:[#allocation77_spill] sm:$0xff] }
 0x3ef   :  { %v6650_v54 = vsel %vm3479_vm3, %v6645_v3, %v6649_v5  ;;  %v15554_v5 = vld [vmem:[#allocation51_spill] sm:$0xff] }
 0x3f0   :  { %10798 = vmatmul.mubr.msk.bf16.gmra.mrb[28].mxu1 %vm2971_vm2, %v4403_v46  ;;  %v15546_v46 = vld [vmem:[#allocation87_spill] sm:$0xff] }
 0x3f3   :  { %10998 = vmatmul.mubr.msk.bf16.gmra.mrb[88].mxu0 %vm2971_vm2, %v4395_v33  ;;  %v6652_v33 = vor.u32 %v6651_v10, %v15539_v15 }
 0x3f4   :  { %11001 = vmatprep.mubr.msk.bf16.mxu0 %vm2971_vm2, %v6161_v0  ;;  %v15548_v0 = vld [vmem:[#allocation88_spill] sm:$0xff] }
 0x3f5   :  { %v6653_v1 = vsel %vm3479_vm3, %v6648_v56, %v6652_v33 }
 0x3fb   :  { %11002 = vmatmul.mubr.msk.bf16.gmra.mrb[92].mxu0 %vm2971_vm2, %v6169_v16 }
 0x3fc   :  { %11009 = vmatprep.mubr.msk.bf16.mxu0 %vm2971_vm2, %v6644_v14  ;;  %v14421_v14 = vld [vmem:[#allocation2 + $0x110] sm:$0xff] }
 0x3fd   :  { %v15063_v7 = vshrl.u32 %v14421_v14, 16 }
 0x3ff   :  { %v6738_v50 = vrot.slane %v15063_v7, 7 }
 0x403   :  { %11010 = vmatmul.mubr.msk.bf16.vlgmr.msra.gmra.mrb[32].mxu0 %vm2971_vm2, %v6647_v29 }
 0x404   :  { %11013 = vmatprep.mubr.msk.bf16.mxu0 %vm2971_vm2, %v6650_v54  ;;  %11074 = vmatpush3.bf16.msra.mxu0 %v14014_v25  ;;  %v15542_v25 = vld [vmem:[#allocation86_spill] sm:$0xff] }
 0x405   :  { %11075 = vmatprep.subr.bf16.mxu0 %v11881_v57  ;;  %v15555_v54 = vld [vmem:[#allocation50_spill] sm:$0xff] }
 0x408   :  { %11076 = vmatpush3.bf16.msra.mxu0 %v11881_v57 }
 0x409   :  { %11141 = vmatprep.subr.bf16.mxu0 %v14331_v39 }
 0x40b   :  { %11014 = vmatmul.mubr.msk.bf16.gmra.mrb[36].mxu0 %vm2971_vm2, %v6653_v1 }
 0x40c   :  { %11017 = vmatprep.mubr.msk.bf16.mxu0 %vm2971_vm2, %v6656_v40 }
 0x413   :  { %11018 = vmatmul.mubr.msk.bf16.gmra.mrb[40].mxu0 %vm2971_vm2, %v15541_v42  ;;  %v11883_v42 = vld [vmem:[#allocation9 + $0x88] sm:$0xff]  }
 0x414   :  { %11021 = vmatprep.mubr.msk.bf16.mxu0 %vm2971_vm2, %v15542_v25 }
 0x41b   :  { %11022 = vmatmul.mubr.msk.bf16.gmra.mrb[44].mxu0 %vm2971_vm2, %v15543_v34 }
 0x41c   :  { %11025 = vmatprep.mubr.msk.bf16.mxu0 %vm2971_vm2, %v15544_v36 }
 0x423   :  { %11026 = vmatmul.mubr.msk.bf16.gmra.mrb[48].mxu0 %vm2971_vm2, %v15545_v55  ;;  %v11904_v55 = vld [vmem:[#allocation2 + $0x38] sm:$0xff] }
 0x424   :  { %11029 = vmatprep.mubr.msk.bf16.mxu0 %vm2971_vm2, %v13806_v27 }
 0x42b   :  { %11030 = vmatmul.mubr.msk.bf16.gmra.mrb[52].mxu0 %vm2971_vm2, %v15546_v46 }
 0x42c   :  { %11033 = vmatprep.mubr.msk.bf16.mxu0 %vm2971_vm2, %v15547_v23  ;;  %v11905_v23 = vld [vmem:[#allocation2 + $0x40] sm:$0xff] }
 0x433   :  { %11034 = vmatmul.mubr.msk.bf16.gmra.mrb[56].mxu0 %vm2971_vm2, %v15548_v0  ;;  %v11906_v0 = vld [vmem:[#allocation2 + $0x48] sm:$0xff] }
 0x434   :  { %11037 = vmatprep.mubr.msk.bf16.mxu0 %vm2971_vm2, %v15549_v43 }
 0x43b   :  { %11038 = vmatmul.mubr.msk.bf16.gmra.mrb[60].mxu0 %vm2971_vm2, %v15550_v18 }
 0x43c   :  { %11041 = vmatprep.mubr.msk.bf16.mxu0 %vm2971_vm2, %v13847_v24 }
 0x443   :  { %11042 = vmatmul.mubr.msk.bf16.gmra.mrb[64].mxu0 %vm2971_vm2, %v15551_v60 }
 0x444   :  { %11045 = vmatprep.mubr.msk.bf16.mxu0 %vm2971_vm2, %v13857_v44 }
 0x44b   :  { %11046 = vmatmul.mubr.msk.bf16.gmra.mrb[68].mxu0 %vm2971_vm2, %v13866_v45  ;;  %v14373_v27 = vpop.f32.mrb[224].mxu1 }
 0x44c   :  { %11049 = vmatprep.mubr.msk.bf16.mxu0 %vm2971_vm2, %v13877_v63  ;;  %v14375_v13 = vpop.f32.mrb[225].mxu1 }
 0x44d   :  { %v14377_v20 = vpop.f32.mrb[226].mxu1 }
 0x44e   :  { %v14379_v61 = vpop.f32.mrb[227].mxu1 }
 0x453   :  { %11050 = vmatmul.mubr.msk.bf16.gmra.mrb[72].mxu0 %vm2971_vm2, %v13880_v8  ;;  %v14385_v24 = vpop.f32.mrb[228].mxu1 }
 0x454   :  { %11053 = vmatprep.mubr.msk.bf16.mxu0 %vm2971_vm2, %v13888_v41  ;;  %v14387_v44 = vpop.f32.mrb[229].mxu1 }
 0x455   :  { %v14389_v45 = vpop.f32.mrb[230].mxu1 }
 0x456   :  { %v14391_v63 = vpop.f32.mrb[231].mxu1 }
 0x45b   :  { %11054 = vmatmul.mubr.msk.bf16.gmra.mrb[76].mxu0 %vm2971_vm2, %v13899_v59  ;;  %v14397_v21 = vpop.f32.mrb[232].mxu1 }
 0x45c   :  { %11057 = vmatprep.mubr.msk.bf16.mxu0 %vm2971_vm2, %v13902_v26  ;;  %v14399_v8 = vpop.f32.mrb[233].mxu1 }
 0x45d   :  { %v14401_v12 = vpop.f32.mrb[234].mxu1 }
 0x45e   :  { %v14403_v41 = vpop.f32.mrb[235].mxu1 }
 0x463   :  { %11058 = vmatmul.mubr.msk.bf16.gmra.mrb[80].mxu0 %vm2971_vm2, %v13905_v48  ;;  %v14411_v59 = vpop.f32.mrb[236].mxu1 }
 0x464   :  { %11061 = vmatprep.mubr.msk.bf16.mxu0 %vm2971_vm2, %v6722_v49  ;;  %v14413_v26 = vpop.f32.mrb[237].mxu1  ;;  %v11908_v49 = vld [vmem:[#allocation2 + $0x58] sm:$0xff] }
 0x465   :  { %v14415_v3 = vpop.f32.mrb[238].mxu1 }
 0x466   :  { %v14417_v16 = vpop.f32.mrb[239].mxu1 }
 0x46b   :  { %11062 = vmatmul.mubr.msk.bf16.gmra.mrb[84].mxu0 %vm2971_vm2, %v15415_v4  ;;  %v14425_v48 = vpop.f32.mrb[240].mxu1  ;;  %v15064_v4 = vshll.u32 %v14421_v14, 16 }
 0x46c   :  { %11065 = vmatprep.mubr.msk.bf16.mxu0 %vm2971_vm2, %v15417_v37  ;;  %v14428_v9 = vpop.f32.mrb[241].mxu1 }
 0x46d   :  { %v14430_v56 = vpop.f32.mrb[242].mxu1  ;;  %v6741_v57 = vor.u32 %v15064_v4, %v6738_v50 }
 0x46e   :  { %v14432_v11 = vpop.f32.mrb[243].mxu1 }
 0x46f   :  { %v6742_v15 = vsel %vm3479_vm3, %v15555_v54, %v6741_v57  ;;  %v11909_v54 = vld [vmem:[#allocation2 + $0x60] sm:$0xff] }
 0x473   :  { %11066 = vmatmul.mubr.msk.bf16.gmra.mrb[88].mxu0 %vm2971_vm2, %v15553_v28  ;;  %v14441_v37 = vpop.f32.mrb[244].mxu1 }
 0x474   :  { %11069 = vmatprep.mubr.msk.bf16.mxu0 %vm2971_vm2, %v15554_v5  ;;  %v14445_v29 = vpop.f32.mrb[245].mxu1 }
 0x475   :  { %v14447_v62 = vpop.f32.mrb[246].mxu1 }
 0x476   :  { %v14449_v10 = vpop.f32.mrb[247].mxu1 }
 0x47b   :  { %11070 = vmatmul.mubr.msk.bf16.gmra.mrb[92].mxu0 %vm2971_vm2, %v6742_v15  ;;  %v14456_v33 = vpop.f32.mrb[248].mxu1  ;;  %v11910_v15 = vld [vmem:[#allocation2 + $0x68] sm:$0xff] }
 0x47c   :  { %11077 = vmatprep.mubr.msk.bf16.mxu0 %vm2971_vm2, %v13960_v38  ;;  %v14458_v1 = vpop.f32.mrb[249].mxu1 }
 0x47d   :  { %v14460_v22 = vpop.f32.mrb[250].mxu1 }
 0x47e   :  { %v14462_v40 = vpop.f32.mrb[251].mxu1 }
 0x483   :  { %11078 = vmatmul.mubr.msk.bf16.vlgmr.msra.gmra.mrb[32].mxu0 %vm2971_vm2, %v13971_v51  ;;  %v14469_v25 = vpop.f32.mrb[252].mxu1 }
 0x484   :  { %11081 = vmatprep.mubr.msk.bf16.mxu0 %vm2971_vm2, %v13977_v52  ;;  %11142 = vmatpush3.bf16.msra.mxu0 %v14331_v39  ;;  %v14471_v38 = vpop.f32.mrb[253].mxu1 }
 0x485   :  { %11143 = vmatprep.subr.bf16.mxu0 %v11883_v42  ;;  %v14473_v34 = vpop.f32.mrb[254].mxu1 }
 0x486   :  { %v14475_v36 = vpop.f32.mrb[255].mxu1 }
 0x488   :  { %11144 = vmatpush3.bf16.msra.mxu0 %v11883_v42 }
 0x48b   :  { %11082 = vmatmul.mubr.msk.bf16.gmra.mrb[36].mxu0 %vm2971_vm2, %v13989_v35  ;;  %v14480_v51 = vpop.f32.mrb[0].mxu1 }
 0x48c   :  { %11085 = vmatprep.mubr.msk.bf16.mxu0 %vm2971_vm2, %v11904_v55  ;;  %v14482_v52 = vpop.f32.mrb[1].mxu1 }
 0x48d   :  { %15556 = vst [vmem:[#allocation17_spill] sm:$0xff] %v14482_v52  ;;  %v14484_v39 = vpop.f32.mrb[2].mxu1 }
 0x48e   :  { %15557 = vst [vmem:[#allocation18_spill] sm:$0xff] %v14484_v39  ;;  %v14486_v46 = vpop.f32.mrb[3].mxu1 }
 0x48f   :  { %15558 = vst [vmem:[#allocation91_spill] sm:$0xff] %v14486_v46  ;;  %v7643_v46 = vld [vmem:[#allocation2 + $0x40] sm:$0xff] }
 0x490   :  { %v7716_v39 = vshll.u32 %v7643_v46, 16 }
 0x493   :  { %11086 = vmatmul.mubr.msk.bf16.gmra.mrb[40].mxu0 %vm2971_vm2, %v11905_v23  ;;  %v14490_v43 = vpop.f32.mrb[4].mxu1 }
 0x494   :  { %11089 = vmatprep.mubr.msk.bf16.mxu0 %vm2971_vm2, %v11906_v0  ;;  %15559 = vst [vmem:[#allocation19_spill] sm:$0xff] %v14490_v43  ;;  %v14492_v35 = vpop.f32.mrb[5].mxu1  ;;  %v7642_v43 = vld [vmem:[#allocation2 + $0x38] sm:$0xff] }
 0x495   :  { %15560 = vst [vmem:[#allocation92_spill] sm:$0xff] %v14492_v35  ;;  %v14494_v18 = vpop.f32.mrb[6].mxu1 }
 0x496   :  { %15561 = vst [vmem:[#allocation20_spill] sm:$0xff] %v14494_v18  ;;  %v14496_v60 = vpop.f32.mrb[7].mxu1 }
 0x497   :  { %15562 = vst [vmem:[#allocation21_spill] sm:$0xff] %v14496_v60 }
 0x49b   :  { %11090 = vmatmul.mubr.msk.bf16.gmra.mrb[44].mxu0 %vm2971_vm2, %v11907_v19  ;;  %v14500_v50 = vpop.f32.mrb[8].mxu1  ;;  %v11911_v19 = vld [vmem:[#allocation2 + $0x70] sm:$0xff] }
 0x49c   :  { %11093 = vmatprep.mubr.msk.bf16.mxu0 %vm2971_vm2, %v11908_v49  ;;  %15563 = vst [vmem:[#allocation22_spill] sm:$0xff] %v14500_v50  ;;  %v14502_v28 = vpop.f32.mrb[9].mxu1  ;;  %v11912_v49 = vld [vmem:[#allocation2 + $0x78] sm:$0xff] }
 0x49d   :  { %15564 = vst [vmem:[#allocation93_spill] sm:$0xff] %v14502_v28  ;;  %v14504_v5 = vpop.f32.mrb[10].mxu1  ;;  %v7641_v28 = vld [vmem:[#allocation2 + $0x30] sm:$0xff] }
 0x49e   :  { %15565 = vst [vmem:[#allocation23_spill] sm:$0xff] %v14504_v5  ;;  %v14506_v57 = vpop.f32.mrb[11].mxu1  ;;  %v7700_v60 = vshll.u32 %v7641_v28, 16 }
 0x49f   :  { %15566 = vst [vmem:[#allocation24_spill] sm:$0xff] %v14506_v57  ;;  %v7640_v57 = vld [vmem:[#allocation2 + $0x28] sm:$0xff] }
 0x4a3   :  { %11094 = vmatmul.mubr.msk.bf16.gmra.mrb[48].mxu0 %vm2971_vm2, %v11909_v54  ;;  %v14510_v42 = vpop.f32.mrb[12].mxu1 }
 0x4a4   :  { %11097 = vmatprep.mubr.msk.bf16.mxu0 %vm2971_vm2, %v11910_v15  ;;  %15567 = vst [vmem:[#allocation94_spill] sm:$0xff] %v14510_v42  ;;  %v14512_v55 = vpop.f32.mrb[13].mxu1  ;;  %v11913_v42 = vld [vmem:[#allocation2 + $0x80] sm:$0xff] }
 0x4a5   :  { %15568 = vst [vmem:[#allocation95_spill] sm:$0xff] %v14512_v55  ;;  %v14514_v23 = vpop.f32.mrb[14].mxu1 }
 0x4a6   :  { %15569 = vst [vmem:[#allocation25_spill] sm:$0xff] %v14514_v23  ;;  %v14516_v0 = vpop.f32.mrb[15].mxu1  ;;  %v11914_v23 = vld [vmem:[#allocation2 + $0x88] sm:$0xff] }
 0x4a7   :  { %15570 = vst [vmem:[#allocation26_spill] sm:$0xff] %v14516_v0 }
 0x4ab   :  { %11098 = vmatmul.mubr.msk.bf16.gmra.mrb[52].mxu0 %vm2971_vm2, %v11911_v19  ;;  %v14520_v7 = vpop.f32.mrb[16].mxu1 }
 0x4ac   :  { %11101 = vmatprep.mubr.msk.bf16.mxu0 %vm2971_vm2, %v11912_v49  ;;  %15571 = vst [vmem:[#allocation96_spill] sm:$0xff] %v14520_v7  ;;  %v14522_v54 = vpop.f32.mrb[17].mxu1  ;;  %v11915_v7 = vld [vmem:[#allocation2 + $0x90] sm:$0xff] }
 0x4ad   :  { %15572 = vst [vmem:[#allocation27_spill] sm:$0xff] %v14522_v54  ;;  %v14524_v4 = vpop.f32.mrb[18].mxu1 }
 0x4ae   :  { %15573 = vst [vmem:[#allocation97_spill] sm:$0xff] %v14524_v4  ;;  %v14526_v15 = vpop.f32.mrb[19].mxu1  ;;  %v11916_v4 = vld [vmem:[#allocation2 + $0x98] sm:$0xff] }
 0x4af   :  { %15574 = vst [vmem:[#allocation28_spill] sm:$0xff] %v14526_v15 }
 0x4b3   :  { %11102 = vmatmul.mubr.msk.bf16.gmra.mrb[56].mxu0 %vm2971_vm2, %v11913_v42  ;;  %v14530_v0 = vpop.f32.mrb[20].mxu1 }
 0x4b4   :  { %11105 = vmatprep.mubr.msk.bf16.mxu0 %vm2971_vm2, %v11914_v23  ;;  %15575 = vst [vmem:[#allocation98_spill] sm:$0xff] %v14530_v0  ;;  %v14532_v19 = vpop.f32.mrb[21].mxu1  ;;  %v11917_v0 = vld [vmem:[#allocation2 + $0xa0] sm:$0xff] }
 0x4b5   :  { %15576 = vst [vmem:[#allocation99_spill] sm:$0xff] %v14532_v19  ;;  %v14534_v55 = vpop.f32.mrb[22].mxu1 }
 0x4b6   :  { %15577 = vst [vmem:[#allocation29_spill] sm:$0xff] %v14534_v55  ;;  %v14536_v49 = vpop.f32.mrb[23].mxu1  ;;  %v11918_v55 = vld [vmem:[#allocation2 + $0xa8] sm:$0xff] }
 0x4b7   :  { %15578 = vst [vmem:[#allocation30_spill] sm:$0xff] %v14536_v49 }
 0x4bb   :  { %11106 = vmatmul.mubr.msk.bf16.gmra.mrb[60].mxu0 %vm2971_vm2, %v11915_v7  ;;  %v14540_v15 = vpop.f32.mrb[24].mxu1 }
 0x4bc   :  { %11109 = vmatprep.mubr.msk.bf16.mxu0 %vm2971_vm2, %v11916_v4  ;;  %15579 = vst [vmem:[#allocation31_spill] sm:$0xff] %v14540_v15  ;;  %v14542_v42 = vpop.f32.mrb[25].mxu1  ;;  %v11919_v15 = vld [vmem:[#allocation2 + $0xb0] sm:$0xff] }
 0x4bd   :  { %15580 = vst [vmem:[#allocation32_spill] sm:$0xff] %v14542_v42  ;;  %v14544_v54 = vpop.f32.mrb[26].mxu1  ;;  %v11929_v42 = vld [vmem:[#allocation2 + $0x100] sm:$0xff] }
 0x4be   :  { %15581 = vst [vmem:[#allocation47_spill] sm:$0xff] %v14544_v54  ;;  %v14546_v23 = vpop.f32.mrb[27].mxu1  ;;  %v11920_v54 = vld [vmem:[#allocation2 + $0xb8] sm:$0xff] }
 0x4bf   :  { %15582 = vst [vmem:[#allocation44_spill] sm:$0xff] %v14546_v23  ;;  %v11921_v23 = vld [vmem:[#allocation2 + $0xc0] sm:$0xff] }
 0x4c3   :  { %11110 = vmatmul.mubr.msk.bf16.gmra.mrb[64].mxu0 %vm2971_vm2, %v11917_v0  ;;  %v14550_v49 = vpop.f32.mrb[28].mxu1  ;;  %v11922_v0 = vld [vmem:[#allocation2 + $0xc8] sm:$0xff] }
 0x4c4   :  { %11113 = vmatprep.mubr.msk.bf16.mxu0 %vm2971_vm2, %v11918_v55  ;;  %15583 = vst [vmem:[#allocation76_spill] sm:$0xff] %v14550_v49  ;;  %v14552_v7 = vpop.f32.mrb[29].mxu1  ;;  %v11923_v55 = vld [vmem:[#allocation2 + $0xd0] sm:$0xff] }
 0x4c5   :  { %15584 = vst [vmem:[#allocation46_spill] sm:$0xff] %v14552_v7  ;;  %v14554_v19 = vpop.f32.mrb[30].mxu1  ;;  %v11924_v7 = vld [vmem:[#allocation2 + $0xd8] sm:$0xff] }
 0x4c6   :  { %15585 = vst [vmem:[#allocation75_spill] sm:$0xff] %v14554_v19  ;;  %v14556_v4 = vpop.f32.mrb[31].mxu1  ;;  %v11925_v19 = vld [vmem:[#allocation2 + $0xe0] sm:$0xff] }
 0x4c7   :  { %15586 = vst [vmem:[#allocation100_spill] sm:$0xff] %v14556_v4  ;;  %v11926_v4 = vld [vmem:[#allocation2 + $0xe8] sm:$0xff] }
 0x4cb   :  { %11114 = vmatmul.mubr.msk.bf16.gmra.mrb[68].mxu0 %vm2971_vm2, %v11919_v15  ;;  %v11927_v15 = vld [vmem:[#allocation2 + $0xf0] sm:$0xff] }
 0x4cc   :  { %11117 = vmatprep.mubr.msk.bf16.mxu0 %vm2971_vm2, %v11920_v54  ;;  %v11928_v54 = vld [vmem:[#allocation2 + $0xf8] sm:$0xff] }
 0x4d3   :  { %11118 = vmatmul.mubr.msk.bf16.gmra.mrb[72].mxu0 %vm2971_vm2, %v11921_v23  ;;  %v7638_v23 = vld [vmem:[#allocation2 + $0x18] sm:$0xff] }
 0x4d4   :  { %11121 = vmatprep.mubr.msk.bf16.mxu0 %vm2971_vm2, %v11922_v0  ;;  %v7639_v0 = vld [vmem:[#allocation2 + $0x20] sm:$0xff]  ;;  %v7679_v49 = vshll.u32 %v7638_v23, 16  ;;  %v7677_v5 = vshrl.u32 %v7638_v23, 16 }
 0x4d5   :  { %v7688_v18 = vshrl.u32 %v7639_v0, 16 }
 0x4db   :  { %11122 = vmatmul.mubr.msk.bf16.gmra.mrb[76].mxu0 %vm2971_vm2, %v11923_v55  ;;  %v7684_v55 = vshll.u32 %v7639_v0, 16 }
 0x4dc   :  { %11125 = vmatprep.mubr.msk.bf16.mxu0 %vm2971_vm2, %v11924_v7  ;;  %v11930_v7 = vld [vmem:[#allocation2 + $0x108] sm:$0xff] }
 0x4e3   :  { %11126 = vmatmul.mubr.msk.bf16.gmra.mrb[80].mxu0 %vm2971_vm2, %v11925_v19  ;;  %v7681_v19 = vrot.slane %v7679_v49, 1  ;;  %v7702_v49 = vrot.slane %v7700_v60, 1 }
 0x4e4   :  { %11129 = vmatprep.mubr.msk.bf16.mxu0 %vm2971_vm2, %v11926_v4  ;;  %v7686_v4 = vrot.slane %v7684_v55, 1  ;;  %v7708_v55 = vshll.u32 %v7642_v43, 16 }
 0x4e5   :  { %v7682_v50 = vor.u32 %v7681_v19, %v7677_v5 }
 0x4e6   :  { %v7690_v35 = vor.u32 %v7688_v18, %v7686_v4  ;;  %v7710_v0 = vrot.slane %v7708_v55, 1  ;;  %v7712_v18 = vshrl.u32 %v7642_v43, 16  ;;  %v7646_v55 = vld [vmem:[#allocation2 + $0x58] sm:$0xff]  ;;  %v7647_v43 = vld [vmem:[#allocation2 + $0x60] sm:$0xff] }
 0x4e8   :  { %v7714_v60 = vor.u32 %v7712_v18, %v7710_v0 }
 0x4eb   :  { %11130 = vmatmul.mubr.msk.bf16.gmra.mrb[84].mxu0 %vm2971_vm2, %v11927_v15  ;;  %v7692_v15 = vshll.u32 %v7640_v57, 16 }
 0x4ec   :  { %11133 = vmatprep.mubr.msk.bf16.mxu0 %vm2971_vm2, %v11928_v54  ;;  %v7687_v54 = vsel %vm4143_vm4, %v7682_v50, %v7686_v4  ;;  %v7704_v50 = vshrl.u32 %v7641_v28, 16  ;;  %v7718_v4 = vrot.slane %v7716_v39, 1 }
 0x4f3   :  { %11134 = vmatmul.mubr.msk.bf16.gmra.mrb[88].mxu0 %vm2971_vm2, %v11929_v42  ;;  %v7694_v42 = vrot.slane %v7692_v15, 1  ;;  %v7644_v15 = vld [vmem:[#allocation2 + $0x48] sm:$0xff] }
 0x4f4   :  { %11137 = vmatprep.mubr.msk.bf16.mxu0 %vm2971_vm2, %v11930_v7  ;;  %v7696_v7 = vshrl.u32 %v7640_v57, 16  ;;  %v7645_v57 = vld [vmem:[#allocation2 + $0x50] sm:$0xff]  ;;  %v7724_v52 = vshll.u32 %v7644_v15, 16 }
 0x4f5   :  { %v7695_v5 = vsel %vm4143_vm4, %v7690_v35, %v7694_v42  ;;  %v7719_v35 = vsel %vm4143_vm4, %v7714_v60, %v7718_v4  ;;  %v7736_v60 = vshrl.u32 %v7645_v57, 16 }
 0x4f6   :  { %v7698_v23 = vor.u32 %v7696_v7, %v7694_v42  ;;  %v7732_v42 = vshll.u32 %v7645_v57, 16 }
 0x4f8   :  { %v7703_v19 = vsel %vm4143_vm4, %v7698_v23, %v7702_v49  ;;  %v7720_v23 = vshrl.u32 %v7643_v46, 16 }
 0x4fa   :  { %v7722_v28 = vor.u32 %v7720_v23, %v7718_v4  ;;  %v7744_v4 = vshrl.u32 %v7646_v55, 16 }
 0x4fb   :  { %11138 = vmatmul.mubr.msk.bf16.gmra.mrb[92].mxu0 %vm2971_vm2, %v14421_v14 }
 0x4fc   :  { %11145 = vmatprep.mubr.msk.bf16.mxu0 %vm2971_vm2, %v7687_v54  ;;  %v7706_v54 = vor.u32 %v7704_v50, %v7702_v49  ;;  %v7728_v49 = vshrl.u32 %v7644_v15, 16  ;;  %v7740_v50 = vshll.u32 %v7646_v55, 16  ;;  %v7649_v15 = vld [vmem:[#allocation2 + $0x70] sm:$0xff]  ;;  %v7651_v55 = vld [vmem:[#allocation2 + $0x80] sm:$0xff] }
 0x4fe   :  { %v7711_v7 = vsel %vm4143_vm4, %v7706_v54, %v7710_v0  ;;  %v7748_v54 = vshll.u32 %v7647_v43, 16 }
 0x503   :  { %11146 = vmatmul.mubr.msk.bf16.vlgmr.msra.gmra.mrb[32].mxu0 %vm2971_vm2, %v7695_v5  ;;  %v7726_v5 = vrot.slane %v7724_v52, 1  ;;  %v7648_v52 = vld [vmem:[#allocation2 + $0x68] sm:$0xff] }
 0x504   :  { %11149 = vmatprep.mubr.msk.bf16.mxu0 %vm2971_vm2, %v7703_v19  ;;  %v7734_v19 = vrot.slane %v7732_v42, 1  ;;  %v7756_v23 = vshll.u32 %v7648_v52, 16 }
 0x505   :  { %v7730_v39 = vor.u32 %v7728_v49, %v7726_v5  ;;  %v7727_v18 = vsel %vm4143_vm4, %v7722_v28, %v7726_v5  ;;  %v7764_v28 = vshll.u32 %v7649_v15, 16 }
 0x506   :  { %v7738_v46 = vor.u32 %v7736_v60, %v7734_v19 }
 0x507   :  { %v7735_v0 = vsel %vm4143_vm4, %v7730_v39, %v7734_v19  ;;  %v7752_v39 = vshrl.u32 %v7647_v43, 16  ;;  %v7760_v19 = vshrl.u32 %v7648_v52, 16  ;;  %v7653_v52 = vld [vmem:[#allocation2 + $0x90] sm:$0xff] }
 0x50b   :  { %11150 = vmatmul.mubr.msk.bf16.gmra.mrb[36].mxu0 %vm2971_vm2, %v7711_v7  ;;  %v7742_v7 = vrot.slane %v7740_v50, 1  ;;  %v7650_v50 = vld [vmem:[#allocation2 + $0x78] sm:$0xff] }
 0x50c   :  { %11153 = vmatprep.mubr.msk.bf16.mxu0 %vm2971_vm2, %v7719_v35  ;;  %v7750_v35 = vrot.slane %v7748_v54, 1  ;;  %v7772_v60 = vshll.u32 %v7650_v50, 16 }
 0x50d   :  { %v7746_v42 = vor.u32 %v7744_v4, %v7742_v7  ;;  %v7743_v49 = vsel %vm4143_vm4, %v7738_v46, %v7742_v7  ;;  %v7780_v46 = vshll.u32 %v7651_v55, 16 }
 0x50e   :  { %v7754_v57 = vor.u32 %v7752_v39, %v7750_v35 }
 0x50f   :  { %v7751_v5 = vsel %vm4143_vm4, %v7746_v42, %v7750_v35  ;;  %v7768_v42 = vshrl.u32 %v7649_v15, 16  ;;  %v7776_v35 = vshrl.u32 %v7650_v50, 16  ;;  %v7655_v50 = vld [vmem:[#allocation2 + $0xa0] sm:$0xff] }
 0x513   :  { %11154 = vmatmul.mubr.msk.bf16.gmra.mrb[40].mxu0 %vm2971_vm2, %v7727_v18  ;;  %v7758_v18 = vrot.slane %v7756_v23, 1  ;;  %v7652_v23 = vld [vmem:[#allocation2 + $0x88] sm:$0xff] }
 0x514   :  { %11157 = vmatprep.mubr.msk.bf16.mxu0 %vm2971_vm2, %v7735_v0  ;;  %v7766_v0 = vrot.slane %v7764_v28, 1  ;;  %v7788_v39 = vshll.u32 %v7652_v23, 16 }
 0x515   :  { %v7762_v54 = vor.u32 %v7760_v19, %v7758_v18  ;;  %v7759_v4 = vsel %vm4143_vm4, %v7754_v57, %v7758_v18  ;;  %v7796_v57 = vshll.u32 %v7653_v52, 16 }
 0x516   :  { %v7770_v43 = vor.u32 %v7768_v42, %v7766_v0 }
 0x517   :  { %v7767_v7 = vsel %vm4143_vm4, %v7762_v54, %v7766_v0  ;;  %v7784_v54 = vshrl.u32 %v7651_v55, 16  ;;  %v7792_v0 = vshrl.u32 %v7652_v23, 16 }
 0x51b   :  { %11158 = vmatmul.mubr.msk.bf16.gmra.mrb[44].mxu0 %vm2971_vm2, %v7743_v49  ;;  %v7774_v49 = vrot.slane %v7772_v60, 1  ;;  %v7654_v60 = vld [vmem:[#allocation2 + $0x98] sm:$0xff] }
 0x51c   :  { %11161 = vmatprep.mubr.msk.bf16.mxu0 %vm2971_vm2, %v7751_v5  ;;  %v7782_v5 = vrot.slane %v7780_v46, 1  ;;  %v7804_v42 = vshll.u32 %v7654_v60, 16 }
 0x51d   :  { %v7778_v28 = vor.u32 %v7776_v35, %v7774_v49  ;;  %v7775_v19 = vsel %vm4143_vm4, %v7770_v43, %v7774_v49  ;;  %v7812_v43 = vshll.u32 %v7655_v50, 16 }
 0x51e   :  { %v7786_v15 = vor.u32 %v7784_v54, %v7782_v5  ;;  %v7816_v54 = vshrl.u32 %v7655_v50, 16  ;;  %v7667_v50 = vld [vmem:[#allocation2 + $0x100] sm:$0xff] }
 0x51f   :  { %v7783_v18 = vsel %vm4143_vm4, %v7778_v28, %v7782_v5  ;;  %v7800_v28 = vshrl.u32 %v7653_v52, 16  ;;  %v7814_v5 = vrot.slane %v7812_v43, 1  ;;  %v7664_v52 = vld [vmem:[#allocation2 + $0xe8] sm:$0xff] }
 0x523   :  { %11162 = vmatmul.mubr.msk.bf16.gmra.mrb[48].mxu0 %vm2971_vm2, %v7759_v4  ;;  %v7790_v4 = vrot.slane %v7788_v39, 1  ;;  %v7808_v39 = vshrl.u32 %v7654_v60, 16  ;;  %v7665_v60 = vld [vmem:[#allocation2 + $0xf0] sm:$0xff] }
 0x524   :  { %11165 = vmatprep.mubr.msk.bf16.mxu0 %vm2971_vm2, %v7767_v7  ;;  %v7798_v7 = vrot.slane %v7796_v57, 1 }
 0x525   :  { %v7794_v46 = vor.u32 %v7792_v0, %v7790_v4  ;;  %v7791_v35 = vsel %vm4143_vm4, %v7786_v15, %v7790_v4  ;;  %v7818_v4 = vor.u32 %v7816_v54, %v7814_v5  ;;  %v7892_v0 = vshll.u32 %v7665_v60, 16  ;;  %v7670_v54 = vld [vmem:[#allocation2 + $0x118] sm:$0x1] }
 0x526   :  { %v7802_v55 = vor.u32 %v7800_v28, %v7798_v7 }
 0x527   :  { %v7799_v49 = vsel %vm4143_vm4, %v7794_v46, %v7798_v7  ;;  %v7823_v15 = vsel %vm4143_vm4, %v7818_v4, %v14179_v32  ;;  %v7884_v32 = vshll.u32 %v7664_v52, 16  ;;  %v7888_v7 = vshrl.u32 %v7664_v52, 16 }
 0x528   :  { %v15587_v52 = vshll.u32 %v14421_v14, 16 }
 0x52b   :  { %11166 = vmatmul.mubr.msk.bf16.gmra.mrb[52].mxu0 %vm2971_vm2, %v7775_v19  ;;  %v7806_v19 = vrot.slane %v7804_v42, 1 }
 0x52c   :  { %11169 = vmatprep.mubr.msk.bf16.mxu0 %vm2971_vm2, %v7783_v18 }
 0x52d   :  { %v7810_v18 = vor.u32 %v7808_v39, %v7806_v19  ;;  %v7807_v23 = vsel %vm4143_vm4, %v7802_v55, %v7806_v19 }
 0x52f   :  { %v7815_v57 = vsel %vm4143_vm4, %v7810_v18, %v7814_v5 }
 0x533   :  { %11170 = vmatmul.mubr.msk.bf16.gmra.mrb[56].mxu0 %vm2971_vm2, %v7791_v35  ;;  %v7908_v35 = vshll.u32 %v7667_v50, 16 }
 0x534   :  { %11173 = vmatprep.mubr.msk.bf16.mxu0 %vm2971_vm2, %v7799_v49  ;;  %v7668_v49 = vld [vmem:[#allocation2 + $0x108] sm:$0xff] }
 0x535   :  { %v7910_v19 = vrot.slane %v7908_v35, 1  ;;  %v7916_v55 = vshll.u32 %v7668_v49, 16 }
 0x537   :  { %v7918_v18 = vrot.slane %v7916_v55, 1 }
 0x53b   :  { %11174 = vmatmul.mubr.msk.bf16.gmra.mrb[60].mxu0 %vm2971_vm2, %v7807_v23  ;;  %v7912_v23 = vshrl.u32 %v7667_v50, 16 }
 0x53c   :  { %11177 = vmatprep.mubr.msk.bf16.mxu0 %vm2971_vm2, %v7815_v57  ;;  %v7920_v57 = vshrl.u32 %v7668_v49, 16 }
 0x53d   :  { %v7914_v4 = vor.u32 %v7912_v23, %v7910_v19 }
 0x543   :  { %11178 = vmatmul.mubr.msk.bf16.gmra.mrb[64].mxu0 %vm2971_vm2, %v7823_v15  ;;  %v7922_v15 = vor.u32 %v7920_v57, %v7918_v18 }
 0x544   :  { %11181 = vmatprep.mubr.msk.bf16.mxu0 %vm2971_vm2, %v14200_v31  ;;  %v7886_v31 = vrot.slane %v7884_v32, 1  ;;  %v7932_v32 = vshll.u32 %v7670_v54, 16 }
 0x546   :  { %v7890_v46 = vor.u32 %v7888_v7, %v7886_v31 }
 0x54b   :  { %11182 = vmatmul.mubr.msk.bf16.gmra.mrb[68].mxu0 %vm2971_vm2, %v14207_v30  ;;  %v7666_v30 = vld [vmem:[#allocation2 + $0xf8] sm:$0xff] }
 0x54c   :  { %11185 = vmatprep.mubr.msk.bf16.mxu0 %vm2971_vm2, %v14222_v6  ;;  %v7894_v6 = vrot.slane %v7892_v0, 1  ;;  %v7904_v28 = vshrl.u32 %v7666_v30, 16  ;;  %v7919_v0 = vsel %vm4143_vm4, %v7914_v4, %v7918_v18 }
 0x54e   :  { %v7895_v42 = vsel %vm4143_vm4, %v7890_v46, %v7894_v6 }
 0x553   :  { %11186 = vmatmul.mubr.msk.bf16.gmra.mrb[72].mxu0 %vm2971_vm2, %v14229_v47  ;;  %v7900_v47 = vshll.u32 %v7666_v30, 16  ;;  %v15588_v30 = vshrl.u32 %v14421_v14, 16 }
 0x554   :  { %11189 = vmatprep.mubr.msk.bf16.mxu0 %vm2971_vm2, %v14244_v58  ;;  %v7887_v58 = vsel %vm4143_vm4, %v14265_v2, %v7886_v31 }
 0x55b   :  { %11190 = vmatmul.mubr.msk.bf16.gmra.mrb[76].mxu0 %vm2971_vm2, %v14251_v53  ;;  %v7896_v53 = vshrl.u32 %v7665_v60, 16  ;;  %v7926_v60 = vrot.slane %v15587_v52, 1 }
 0x55c   :  { %11193 = vmatprep.mubr.msk.bf16.mxu0 %vm2971_vm2, %v14274_v17  ;;  %v7902_v17 = vrot.slane %v7900_v47, 1  ;;  %v14642_v47 = vld [vmem:[#allocation10] ss:$0 sm:$0xff] }
 0x55d   :  { %v7898_v43 = vor.u32 %v7896_v53, %v7894_v6  ;;  %v7927_v31 = vsel %vm4143_vm4, %v7922_v15, %v7926_v60  ;;  %v7930_v7 = vor.u32 %v7926_v60, %v15588_v30  ;;  %v7934_v6 = vrot.slane %v7932_v32, 1 }
 0x55e   :  { %v7906_v39 = vor.u32 %v7904_v28, %v7902_v17 }
 0x55f   :  { %v7903_v5 = vsel %vm4143_vm4, %v7898_v43, %v7902_v17  ;;  %v7935_v50 = vsel %vm4143_vm4, %v7930_v7, %v7934_v6 }
 0x560   :  { %v7911_v2 = vsel %vm4143_vm4, %v7906_v39, %v7910_v19 }
 0x563   :  { %11194 = vmatmul.mubr.msk.bf16.gmra.mrb[80].mxu0 %vm2971_vm2, %v7887_v58 }
 0x564   :  { %11197 = vmatprep.mubr.msk.bf16.mxu0 %vm2971_vm2, %v7895_v42 }
 0x56b   :  { %11198 = vmatmul.mubr.msk.bf16.gmra.mrb[84].mxu0 %vm2971_vm2, %v7903_v5 }
 0x56c   :  { %11201 = vmatprep.mubr.msk.bf16.mxu0 %vm2971_vm2, %v7911_v2 }
 0x573   :  { %11202 = vmatmul.mubr.msk.bf16.gmra.mrb[88].mxu0 %vm2971_vm2, %v7919_v0 }
 0x574   :  { %11205 = vmatprep.mubr.msk.bf16.mxu0 %vm2971_vm2, %v7927_v31 }
 0x57b   :  { %11206 = vmatmul.mubr.msk.bf16.gmra.mrb[92].mxu0 %vm2971_vm2, %v7935_v50 }
 0x5d6   :  { %v11147_v46 = vpop.f32.mrb[32].mxu0 }
 0x5d7   :  { %v11211_v58 = vadd.f32 %v11147_v46, %v14373_v27  ;;  %v8078_v42 = vpop.f32.mrb[33].mxu0 }
 0x5d8   :  { %v11212_v35 = vadd.f32 %v8078_v42, %v14375_v13  ;;  %v11148_v53 = vpop.f32.mrb[34].mxu0 }
 0x5d9   :  { %v8406_v49 = vadd.f32 %v11211_v58, %v14642_v47  ;;  %v11213_v17 = vadd.f32 %v11148_v53, %v14377_v20  ;;  %v8081_v14 = vpop.f32.mrb[35].mxu0 }
 0x5da   :  { %v8404_v43 = vadd.f32 %v11212_v35, %v14642_v47  ;;  %v11214_v28 = vadd.f32 %v8081_v14, %v14379_v61 }
 0x5db   :  { %v8470_v19 = vmax.f32 %v8406_v49, 0.0  ;;  %v8407_v55 = vadd.f32 %v11213_v17, %v14642_v47 }
 0x5dc   :  { %v8468_v39 = vmax.f32 %v8404_v43, 0.0  ;;  %v8405_v27 = vadd.f32 %v11214_v28, %v14642_v47 }
 0x5dd   :  { %8539 = vst.msk [vmem:[#allocation3 + $0x10] sm:$0xff] %vm8532_vm5, %v8470_v19  ;;  %v8471_v13 = vmax.f32 %v8407_v55, 0.0 }
 0x5de   :  { %8537 = vst.msk [vmem:[#allocation3] sm:$0xff] %vm8532_vm5, %v8468_v39  ;;  %v8469_v5 = vmax.f32 %v8405_v27, 0.0  ;;  %v11151_v2 = vpop.f32.mrb[36].mxu0 }
 0x5df   :  { %8540 = vst.msk [vmem:[#allocation3 + $0x18] sm:$0xff] %vm8532_vm5, %v8471_v13  ;;  %v11215_v20 = vadd.f32 %v11151_v2, %v14385_v24  ;;  %v8094_v18 = vpop.f32.mrb[37].mxu0 }
 0x5e0   :  { %8538 = vst.msk [vmem:[#allocation3 + $0x8] sm:$0xff] %vm8532_vm5, %v8469_v5  ;;  %v11216_v61 = vadd.f32 %v8094_v18, %v14387_v44  ;;  %v11152_v23 = vpop.f32.mrb[38].mxu0  ;;  %v12057_v44 = vmov 0.0  }
 0x5e1   :  { %v8410_v57 = vadd.f32 %v11215_v20, %v14642_v47  ;;  %v11217_v54 = vadd.f32 %v11152_v23, %v14389_v45  ;;  %v8097_v4 = vpop.f32.mrb[39].mxu0  ;;  %8533 = vst.msk [vmem:[#allocation3 + $0x200] sm:$0xff] %vm8532_vm5, %v12057_v44  ;;  %8534 = vst.msk [vmem:[#allocation3 + $0x208] sm:$0xff] %vm8532_vm5, %v12057_v44 }
 0x5e2   :  { %v8408_v15 = vadd.f32 %v11216_v61, %v14642_v47  ;;  %v11218_v52 = vadd.f32 %v8097_v4, %v14391_v63  ;;  %8535 = vst.msk [vmem:[#allocation3 + $0x210] sm:$0xff] %vm8532_vm5, %v12057_v44 }
 0x5e3   :  { %v8474_v60 = vmax.f32 %v8410_v57, 0.0  ;;  %v8411_v32 = vadd.f32 %v11217_v54, %v14642_v47 }
 0x5e4   :  { %v8472_v0 = vmax.f32 %v8408_v15, 0.0  ;;  %v8409_v24 = vadd.f32 %v11218_v52, %v14642_v47  ;;  %v8603_v45 = vld [vmem:[#allocation3 + $0x10] sm:$0xff] }
 0x5e5   :  { %8543 = vst.msk [vmem:[#allocation3 + $0x30] sm:$0xff] %vm8532_vm5, %v8474_v60  ;;  %v8475_v31 = vmax.f32 %v8411_v32, 0.0  ;;  %v8601_v6 = vld [vmem:[#allocation3] sm:$0xff] }
 0x5e6   :  { %v8667_v30 = vld [vmem:[#allocation3 + $0x11] sm:$0xff]  ;;  %8541 = vst.msk [vmem:[#allocation3 + $0x20] sm:$0xff] %vm8532_vm5, %v8472_v0  ;;  %v8473_v63 = vmax.f32 %v8409_v24, 0.0  ;;  %v11155_v7 = vpop.f32.mrb[40].mxu0 }
 0x5e7   :  { %v8731_v50 = vmax.f32 %v8603_v45, %v8667_v30  ;;  %v8665_v46 = vld [vmem:[#allocation3 + $0x1] sm:$0xff]  ;;  %8544 = vst.msk [vmem:[#allocation3 + $0x38] sm:$0xff] %vm8532_vm5, %v8475_v31  ;;  %v11219_v58 = vadd.f32 %v11155_v7, %v14397_v21  ;;  %v8110_v42 = vpop.f32.mrb[41].mxu0  ;;  %v8666_v27 = vld [vmem:[#allocation3 + $0x9] sm:$0xff]  ;;  %v8604_v20 = vld [vmem:[#allocation3 + $0x18] sm:$0xff] }
 0x5e8   :  { %v8729_v35 = vmax.f32 %v8601_v6, %v8665_v46  ;;  %8542 = vst.msk [vmem:[#allocation3 + $0x28] sm:$0xff] %vm8532_vm5, %v8473_v63  ;;  %v11220_v53 = vadd.f32 %v8110_v42, %v14399_v8  ;;  %v11156_v49 = vpop.f32.mrb[42].mxu0  ;;  %v8602_v39 = vld [vmem:[#allocation3 + $0x8] sm:$0xff] }
 0x5e9   :  { %v8414_v17 = vadd.f32 %v11219_v58, %v14642_v47  ;;  %v11221_v14 = vadd.f32 %v11156_v49, %v14401_v12  ;;  %v8113_v43 = vpop.f32.mrb[43].mxu0  ;;  %v8730_v61 = vmax.f32 %v8602_v39, %v8666_v27 }
 0x5ea   :  { %v8799_v28 = vmax.f32 %v8729_v35, %v8731_v50  ;;  %v8412_v19 = vadd.f32 %v11220_v53, %v14642_v47  ;;  %v11222_v55 = vadd.f32 %v8113_v43, %v14403_v41 }
 0x5eb   :  { %v8478_v21 = vmax.f32 %v8414_v17, 0.0  ;;  %v8415_v13 = vadd.f32 %v11221_v14, %v14642_v47 }
 0x5ec   :  { %v9831_v5 = vpack.c.bf16 %v8799_v28, %v8799_v28  ;;  %v8476_v2 = vmax.f32 %v8412_v19, 0.0  ;;  %v8413_v8 = vadd.f32 %v11222_v55, %v14642_v47  ;;  %v8607_v23 = vld [vmem:[#allocation3 + $0x30] sm:$0xff] }
 0x5ed   :  { %v8668_v18 = vld [vmem:[#allocation3 + $0x19] sm:$0xff]  ;;  %8547 = vst.msk [vmem:[#allocation3 + $0x50] sm:$0xff] %vm8532_vm5, %v8478_v21  ;;  %v8479_v12 = vmax.f32 %v8415_v13, 0.0 }
 0x5ee   :  { %9120 = vst.msk [vmem:[#allocation12] sm:$0xf] %vm9119_vm6, %v9831_v5  ;;  %v8605_v41 = vld [vmem:[#allocation3 + $0x20] sm:$0xff]  ;;  %v8732_v57 = vmax.f32 %v8604_v20, %v8668_v18  ;;  %v8671_v54 = vld [vmem:[#allocation3 + $0x31] sm:$0xff]  ;;  %v8477_v4 = vmax.f32 %v8413_v8, 0.0  ;;  %v11159_v15 = vpop.f32.mrb[44].mxu0 }
 0x5ef   :  { %8545 = vst.msk [vmem:[#allocation3 + $0x40] sm:$0xff] %vm8532_vm5, %v8476_v2  ;;  %v8735_v52 = vmax.f32 %v8607_v23, %v8671_v54  ;;  %v8606_v60 = vld [vmem:[#allocation3 + $0x28] sm:$0xff]  ;;  %8548 = vst.msk [vmem:[#allocation3 + $0x58] sm:$0xff] %vm8532_vm5, %v8479_v12  ;;  %v11223_v24 = vadd.f32 %v11159_v15, %v14411_v59  ;;  %v8126_v31 = vpop.f32.mrb[45].mxu0  ;;  %v8608_v55 = vld [vmem:[#allocation3 + $0x38] sm:$0xff] }
 0x5f0   :  { %v8669_v32 = vld [vmem:[#allocation3 + $0x21] sm:$0xff]  ;;  %v8670_v0 = vld [vmem:[#allocation3 + $0x29] sm:$0xff]  ;;  %v8800_v44 = vmax.f32 %v8730_v61, %v8732_v57  ;;  %8546 = vst.msk [vmem:[#allocation3 + $0x48] sm:$0xff] %vm8532_vm5, %v8477_v4  ;;  %v11224_v63 = vadd.f32 %v8126_v31, %v14413_v26  ;;  %v11160_v7 = vpop.f32.mrb[46].mxu0 }
 0x5f1   :  { %v8733_v45 = vmax.f32 %v8605_v41, %v8669_v32  ;;  %v8734_v30 = vmax.f32 %v8606_v60, %v8670_v0  ;;  %v8418_v6 = vadd.f32 %v11223_v24, %v14642_v47  ;;  %v11225_v46 = vadd.f32 %v11160_v7, %v14415_v3  ;;  %v8129_v58 = vpop.f32.mrb[47].mxu0 }
 0x5f2   :  { %v9832_v42 = vpack.c.bf16 %v8800_v44, %v8800_v44  ;;  %v8416_v59 = vadd.f32 %v11224_v63, %v14642_v47  ;;  %v11226_v43 = vadd.f32 %v8129_v58, %v14417_v16 }
 0x5f3   :  { %v8801_v35 = vmax.f32 %v8731_v50, %v8733_v45  ;;  %v8802_v53 = vmax.f32 %v8732_v57, %v8734_v30  ;;  %v8803_v49 = vmax.f32 %v8733_v45, %v8735_v52  ;;  %v8482_v17 = vmax.f32 %v8418_v6, 0.0 }
 0x5f4   :  { %v8419_v14 = vadd.f32 %v11225_v46, %v14642_v47  ;;  %9121 = vst.msk [vmem:[#allocation12 + $0x4] sm:$0xf] %vm9119_vm6, %v9832_v42  ;;  %v8480_v3 = vmax.f32 %v8416_v59, 0.0  ;;  %v8417_v27 = vadd.f32 %v11226_v43, %v14642_v47  ;;  %v8611_v16 = vld [vmem:[#allocation3 + $0x50] sm:$0xff] }
 0x5f5   :  { %v9833_v26 = vpack.c.bf16 %v8801_v35, %v8801_v35  ;;  %v9834_v28 = vpack.c.bf16 %v8802_v53, %v8802_v53  ;;  %v9835_v19 = vpack.c.bf16 %v8803_v49, %v8803_v49  ;;  %8551 = vst.msk [vmem:[#allocation3 + $0x70] sm:$0xff] %vm8532_vm5, %v8482_v17 }
 0x5f6   :  { %v8672_v39 = vld [vmem:[#allocation3 + $0x39] sm:$0xff]  ;;  %v8483_v50 = vmax.f32 %v8419_v14, 0.0  ;;  %v8675_v5 = vld [vmem:[#allocation3 + $0x51] sm:$0xff]  ;;  %v11163_v2 = vpop.f32.mrb[48].mxu0  ;;  %8549 = vst.msk [vmem:[#allocation3 + $0x60] sm:$0xff] %vm8532_vm5, %v8480_v3  ;;  %v8481_v61 = vmax.f32 %v8417_v27, 0.0 }
 0x5f7   :  { %9122 = vst.msk [vmem:[#allocation12 + $0x8] sm:$0xf] %vm9119_vm6, %v9833_v26  ;;  %9123 = vst.msk [vmem:[#allocation12 + $0xc] sm:$0xf] %vm9119_vm6, %v9834_v28  ;;  %v8609_v21 = vld [vmem:[#allocation3 + $0x40] sm:$0xff]  ;;  %v8736_v13 = vmax.f32 %v8608_v55, %v8672_v39  ;;  %v14697_v8 = vmax.f32 %v8611_v16, %v8675_v5  ;;  %v8610_v20 = vld [vmem:[#allocation3 + $0x48] sm:$0xff]  ;;  %v11227_v23 = vadd.f32 %v11163_v2, %v14425_v48 }
 0x5f8   :  { %9124 = vst.msk [vmem:[#allocation12 + $0x10] sm:$0xf] %vm9119_vm6, %v9835_v19  ;;  %v8673_v18 = vld [vmem:[#allocation3 + $0x41] sm:$0xff]  ;;  %v8674_v12 = vld [vmem:[#allocation3 + $0x49] sm:$0xff]  ;;  %v8142_v41 = vpop.f32.mrb[49].mxu0  ;;  %v8612_v35 = vld [vmem:[#allocation3 + $0x58] sm:$0xff] }
 0x5f9   :  { %8552 = vst.msk [vmem:[#allocation3 + $0x78] sm:$0xff] %vm8532_vm5, %v8483_v50  ;;  %v8804_v57 = vmax.f32 %v8734_v30, %v8736_v13  ;;  %v8737_v54 = vmax.f32 %v8609_v21, %v8673_v18  ;;  %v8738_v4 = vmax.f32 %v8610_v20, %v8674_v12  ;;  %v11228_v15 = vadd.f32 %v8142_v41, %v14428_v9  ;;  %v11164_v60 = vpop.f32.mrb[50].mxu0 }
 0x5fa   :  { %8550 = vst.msk [vmem:[#allocation3 + $0x68] sm:$0xff] %vm8532_vm5, %v8481_v61  ;;  %v8422_v32 = vadd.f32 %v11227_v23, %v14642_v47  ;;  %v11229_v0 = vadd.f32 %v11164_v60, %v14430_v56  ;;  %v8145_v24 = vpop.f32.mrb[51].mxu0 }
 0x5fb   :  { %v9836_v31 = vpack.c.bf16 %v8804_v57, %v8804_v57  ;;  %v8805_v44 = vmax.f32 %v8735_v52, %v8737_v54  ;;  %v8806_v45 = vmax.f32 %v8736_v13, %v8738_v4  ;;  %v8807_v63 = vmax.f32 %v8737_v54, %v14697_v8 }
 0x5fc   :  { %v8486_v48 = vmax.f32 %v8422_v32, 0.0  ;;  %v8420_v30 = vadd.f32 %v11228_v15, %v14642_v47  ;;  %v8423_v7 = vadd.f32 %v11229_v0, %v14642_v47  ;;  %v11230_v9 = vadd.f32 %v8145_v24, %v14432_v11  ;;  %v8615_v49 = vld [vmem:[#allocation3 + $0x70] sm:$0xff] }
 0x5fd   :  { %9125 = vst.msk [vmem:[#allocation12 + $0x14] sm:$0xf] %vm9119_vm6, %v9836_v31  ;;  %v9837_v6 = vpack.c.bf16 %v8805_v44, %v8805_v44  ;;  %v9838_v46 = vpack.c.bf16 %v8806_v45, %v8806_v45  ;;  %v9839_v58 = vpack.c.bf16 %v8807_v63, %v8807_v63  ;;  %v8676_v53 = vld [vmem:[#allocation3 + $0x59] sm:$0xff] }
 0x5fe   :  { %8555 = vst.msk [vmem:[#allocation3 + $0x90] sm:$0xff] %vm8532_vm5, %v8486_v48  ;;  %v8484_v56 = vmax.f32 %v8420_v30, 0.0  ;;  %v8487_v42 = vmax.f32 %v8423_v7, 0.0  ;;  %v8421_v52 = vadd.f32 %v11230_v9, %v14642_v47  ;;  %v11167_v11 = vpop.f32.mrb[52].mxu0  ;;  %v8613_v17 = vld [vmem:[#allocation3 + $0x60] sm:$0xff]  ;;  %v8740_v59 = vmax.f32 %v8612_v35, %v8676_v53 }
 0x5ff   :  { %9126 = vst.msk [vmem:[#allocation12 + $0x18] sm:$0xf] %vm9119_vm6, %v9837_v6  ;;  %9127 = vst.msk [vmem:[#allocation12 + $0x1c] sm:$0xf] %vm9119_vm6, %v9838_v46  ;;  %v11231_v26 = vadd.f32 %v11167_v11, %v14441_v37  ;;  %v8158_v28 = vpop.f32.mrb[53].mxu0 }
 0x600   :  { %9128 = vst.msk [vmem:[#allocation12 + $0x20] sm:$0xf] %vm9119_vm6, %v9839_v58  ;;  %v8679_v14 = vld [vmem:[#allocation3 + $0x71] sm:$0xff]  ;;  %v8485_v43 = vmax.f32 %v8421_v52, 0.0  ;;  %v11232_v50 = vadd.f32 %v8158_v28, %v14445_v29  ;;  %v11168_v27 = vpop.f32.mrb[54].mxu0  ;;  %v8808_v16 = vmax.f32 %v8738_v4, %v8740_v59 }
 0x601   :  { %8553 = vst.msk [vmem:[#allocation3 + $0x80] sm:$0xff] %vm8532_vm5, %v8484_v56  ;;  %8556 = vst.msk [vmem:[#allocation3 + $0x98] sm:$0xff] %vm8532_vm5, %v8487_v42  ;;  %v8743_v19 = vmax.f32 %v8615_v49, %v8679_v14  ;;  %v8614_v55 = vld [vmem:[#allocation3 + $0x68] sm:$0xff]  ;;  %v8426_v5 = vadd.f32 %v11231_v26, %v14642_v47  ;;  %v8161_v2 = vpop.f32.mrb[55].mxu0  ;;  %v11233_v37 = vadd.f32 %v11168_v27, %v14447_v62  ;;  %v8616_v0 = vld [vmem:[#allocation3 + $0x78] sm:$0xff] }
 0x602   :  { %v8677_v39 = vld [vmem:[#allocation3 + $0x61] sm:$0xff]  ;;  %v8678_v3 = vld [vmem:[#allocation3 + $0x69] sm:$0xff]  ;;  %8554 = vst.msk [vmem:[#allocation3 + $0x88] sm:$0xff] %vm8532_vm5, %v8485_v43  ;;  %v8424_v20 = vadd.f32 %v11232_v50, %v14642_v47  ;;  %v11234_v18 = vadd.f32 %v8161_v2, %v14449_v10  ;;  %v9840_v12 = vpack.c.bf16 %v8808_v16, %v8808_v16 }
 0x603   :  { %v8741_v21 = vmax.f32 %v8613_v17, %v8677_v39  ;;  %v8742_v13 = vmax.f32 %v8614_v55, %v8678_v3  ;;  %v8490_v41 = vmax.f32 %v8426_v5, 0.0  ;;  %v8427_v54 = vadd.f32 %v11233_v37, %v14642_v47 }
 0x604   :  { %v8488_v57 = vmax.f32 %v8424_v20, 0.0  ;;  %v8425_v4 = vadd.f32 %v11234_v18, %v14642_v47  ;;  %9129 = vst.msk [vmem:[#allocation12 + $0x24] sm:$0xf] %vm9119_vm6, %v9840_v12 }
 0x605   :  { %v8809_v61 = vmax.f32 %v14697_v8, %v8741_v21  ;;  %v8810_v23 = vmax.f32 %v8740_v59, %v8742_v13  ;;  %v8811_v29 = vmax.f32 %v8741_v21, %v8743_v19  ;;  %8559 = vst.msk [vmem:[#allocation3 + $0xb0] sm:$0xff] %vm8532_vm5, %v8490_v41  ;;  %v8491_v10 = vmax.f32 %v8427_v54, 0.0  ;;  %v8619_v31 = vld [vmem:[#allocation3 + $0x90] sm:$0xff] }
 0x606   :  { %8557 = vst.msk [vmem:[#allocation3 + $0xa0] sm:$0xff] %vm8532_vm5, %v8488_v57  ;;  %v8489_v8 = vmax.f32 %v8425_v4, 0.0  ;;  %v11171_v24 = vpop.f32.mrb[56].mxu0 }
 0x607   :  { %v9841_v15 = vpack.c.bf16 %v8809_v61, %v8809_v61  ;;  %v9842_v60 = vpack.c.bf16 %v8810_v23, %v8810_v23  ;;  %v9843_v32 = vpack.c.bf16 %v8811_v29, %v8811_v29  ;;  %v11235_v48 = vadd.f32 %v11171_v24, %v14456_v33  ;;  %v8174_v30 = vpop.f32.mrb[57].mxu0  ;;  %8560 = vst.msk [vmem:[#allocation3 + $0xb8] sm:$0xff] %vm8532_vm5, %v8491_v10 }
 0x608   :  { %v8680_v62 = vld [vmem:[#allocation3 + $0x79] sm:$0xff]  ;;  %v8683_v63 = vld [vmem:[#allocation3 + $0x91] sm:$0xff]  ;;  %8558 = vst.msk [vmem:[#allocation3 + $0xa8] sm:$0xff] %vm8532_vm5, %v8489_v8  ;;  %v11236_v58 = vadd.f32 %v8174_v30, %v14458_v1  ;;  %v11172_v56 = vpop.f32.mrb[58].mxu0 }
 0x609   :  { %9130 = vst.msk [vmem:[#allocation12 + $0x28] sm:$0xf] %vm9119_vm6, %v9841_v15  ;;  %9131 = vst.msk [vmem:[#allocation12 + $0x2c] sm:$0xf] %vm9119_vm6, %v9842_v60  ;;  %v8617_v44 = vld [vmem:[#allocation3 + $0x80] sm:$0xff]  ;;  %v8744_v45 = vmax.f32 %v8616_v0, %v8680_v62  ;;  %v8747_v7 = vmax.f32 %v8619_v31, %v8683_v63  ;;  %v8618_v9 = vld [vmem:[#allocation3 + $0x88] sm:$0xff]  ;;  %v8430_v53 = vadd.f32 %v11235_v48, %v14642_v47 }
 0x60a   :  { %9132 = vst.msk [vmem:[#allocation12 + $0x30] sm:$0xf] %vm9119_vm6, %v9843_v32  ;;  %v8681_v6 = vld [vmem:[#allocation3 + $0x81] sm:$0xff]  ;;  %v8682_v46 = vld [vmem:[#allocation3 + $0x89] sm:$0xff]  ;;  %v8177_v11 = vpop.f32.mrb[59].mxu0  ;;  %v8428_v33 = vadd.f32 %v11236_v58, %v14642_v47  ;;  %v11237_v49 = vadd.f32 %v11172_v56, %v14460_v22  ;;  %v8620_v3 = vld [vmem:[#allocation3 + $0x98] sm:$0xff] }
 0x60b   :  { %v8812_v42 = vmax.f32 %v8742_v13, %v8744_v45  ;;  %v8745_v52 = vmax.f32 %v8617_v44, %v8681_v6  ;;  %v8746_v35 = vmax.f32 %v8618_v9, %v8682_v46  ;;  %v11238_v17 = vadd.f32 %v8177_v11, %v14462_v40 }
 0x60c   :  { %v8494_v28 = vmax.f32 %v8430_v53, 0.0  ;;  %v8492_v55 = vmax.f32 %v8428_v33, 0.0  ;;  %v8431_v1 = vadd.f32 %v11237_v49, %v14642_v47  ;;  %v8623_v5 = vld [vmem:[#allocation3 + $0xb0] sm:$0xff] }
 0x60d   :  { %v9844_v59 = vpack.c.bf16 %v8812_v42, %v8812_v42  ;;  %v8813_v14 = vmax.f32 %v8743_v19, %v8745_v52  ;;  %v8814_v43 = vmax.f32 %v8744_v45, %v8746_v35  ;;  %v8815_v26 = vmax.f32 %v8745_v52, %v8747_v7  ;;  %v8684_v21 = vld [vmem:[#allocation3 + $0x99] sm:$0xff] }
 0x60e   :  { %v8429_v39 = vadd.f32 %v11238_v17, %v14642_v47  ;;  %v8748_v22 = vmax.f32 %v8620_v3, %v8684_v21  ;;  %8563 = vst.msk [vmem:[#allocation3 + $0xd0] sm:$0xff] %vm8532_vm5, %v8494_v28  ;;  %8561 = vst.msk [vmem:[#allocation3 + $0xc0] sm:$0xff] %vm8532_vm5, %v8492_v55  ;;  %v8495_v40 = vmax.f32 %v8431_v1, 0.0  ;;  %v11175_v13 = vpop.f32.mrb[60].mxu0  ;;  %v8687_v2 = vld [vmem:[#allocation3 + $0xb1] sm:$0xff]  ;;  %v8621_v12 = vld [vmem:[#allocation3 + $0xa0] sm:$0xff] }
 0x60f   :  { %9133 = vst.msk [vmem:[#allocation12 + $0x34] sm:$0xf] %vm9119_vm6, %v9844_v59  ;;  %v9845_v50 = vpack.c.bf16 %v8813_v14, %v8813_v14  ;;  %v9846_v27 = vpack.c.bf16 %v8814_v43, %v8814_v43  ;;  %v9847_v16 = vpack.c.bf16 %v8815_v26, %v8815_v26  ;;  %v8622_v20 = vld [vmem:[#allocation3 + $0xa8] sm:$0xff]  ;;  %v11239_v37 = vadd.f32 %v11175_v13, %v14469_v25  ;;  %v8190_v18 = vpop.f32.mrb[61].mxu0  ;;  %v8624_v48 = vld [vmem:[#allocation3 + $0xb8] sm:$0xff] }
 0x610   :  { %v8493_v19 = vmax.f32 %v8429_v39, 0.0  ;;  %v8816_v61 = vmax.f32 %v8746_v35, %v8748_v22  ;;  %v8751_v23 = vmax.f32 %v8623_v5, %v8687_v2  ;;  %v8685_v29 = vld [vmem:[#allocation3 + $0xa1] sm:$0xff]  ;;  %v8686_v41 = vld [vmem:[#allocation3 + $0xa9] sm:$0xff]  ;;  %8564 = vst.msk [vmem:[#allocation3 + $0xd8] sm:$0xff] %vm8532_vm5, %v8495_v40  ;;  %v11240_v57 = vadd.f32 %v8190_v18, %v14471_v38  ;;  %v11176_v54 = vpop.f32.mrb[62].mxu0 }
 0x611   :  { %9134 = vst.msk [vmem:[#allocation12 + $0x38] sm:$0xf] %vm9119_vm6, %v9845_v50  ;;  %9135 = vst.msk [vmem:[#allocation12 + $0x3c] sm:$0xf] %vm9119_vm6, %v9846_v27  ;;  %v8749_v4 = vmax.f32 %v8621_v12, %v8685_v29  ;;  %v8750_v15 = vmax.f32 %v8622_v20, %v8686_v41  ;;  %v8434_v60 = vadd.f32 %v11239_v37, %v14642_v47  ;;  %v8193_v25 = vpop.f32.mrb[63].mxu0  ;;  %v15589_v14 = vld [vmem:[#allocation17_spill] sm:$0xff] }
 0x612   :  { %9136 = vst.msk [vmem:[#allocation12 + $0x40] sm:$0xf] %vm9119_vm6, %v9847_v16  ;;  %v11241_v32 = vadd.f32 %v11176_v54, %v14473_v34  ;;  %v9848_v0 = vpack.c.bf16 %v8816_v61, %v8816_v61  ;;  %v8432_v62 = vadd.f32 %v11240_v57, %v14642_v47  ;;  %v11242_v10 = vadd.f32 %v8193_v25, %v14475_v36  ;;  %v15590_v39 = vld [vmem:[#allocation18_spill] sm:$0xff]  ;;  %v15591_v16 = vld [vmem:[#allocation91_spill] sm:$0xff] }
 0x613   :  { %8562 = vst.msk [vmem:[#allocation3 + $0xc8] sm:$0xff] %vm8532_vm5, %v8493_v19  ;;  %v8817_v8 = vmax.f32 %v8747_v7, %v8749_v4  ;;  %v8818_v24 = vmax.f32 %v8748_v22, %v8750_v15  ;;  %v8819_v31 = vmax.f32 %v8749_v4, %v8751_v23  ;;  %v8498_v44 = vmax.f32 %v8434_v60, 0.0 }
 0x614   :  { %9137 = vst.msk [vmem:[#allocation12 + $0x44] sm:$0xf] %vm9119_vm6, %v9848_v0  ;;  %v8496_v38 = vmax.f32 %v8432_v62, 0.0  ;;  %v8435_v45 = vadd.f32 %v11241_v32, %v14642_v47  ;;  %v8433_v63 = vadd.f32 %v11242_v10, %v14642_v47  ;;  %v15592_v32 = vld [vmem:[#allocation19_spill] sm:$0xff] }
 0x615   :  { %v9849_v30 = vpack.c.bf16 %v8817_v8, %v8817_v8  ;;  %v9850_v34 = vpack.c.bf16 %v8818_v24, %v8818_v24  ;;  %v9851_v9 = vpack.c.bf16 %v8819_v31, %v8819_v31  ;;  %v8688_v6 = vld [vmem:[#allocation3 + $0xb9] sm:$0xff]  ;;  %8567 = vst.msk [vmem:[#allocation3 + $0xf0] sm:$0xff] %vm8532_vm5, %v8498_v44  ;;  %v8627_v56 = vld [vmem:[#allocation3 + $0xd0] sm:$0xff] }
 0x616   :  { %v8752_v46 = vmax.f32 %v8624_v48, %v8688_v6  ;;  %8565 = vst.msk [vmem:[#allocation3 + $0xe0] sm:$0xff] %vm8532_vm5, %v8496_v38  ;;  %v8499_v36 = vmax.f32 %v8435_v45, 0.0  ;;  %v8497_v7 = vmax.f32 %v8433_v63, 0.0  ;;  %v11179_v58 = vpop.f32.mrb[64].mxu0  ;;  %v8625_v11 = vld [vmem:[#allocation3 + $0xc0] sm:$0xff]  ;;  %v15593_v44 = vld [vmem:[#allocation92_spill] sm:$0xff] }
 0x617   :  { %9138 = vst.msk [vmem:[#allocation12 + $0x48] sm:$0xf] %vm9119_vm6, %v9849_v30  ;;  %9139 = vst.msk [vmem:[#allocation12 + $0x4c] sm:$0xf] %vm9119_vm6, %v9850_v34  ;;  %v8691_v42 = vld [vmem:[#allocation3 + $0xd1] sm:$0xff]  ;;  %v11243_v35 = vadd.f32 %v11179_v58, %v14480_v51  ;;  %v8206_v53 = vpop.f32.mrb[65].mxu0 }
 0x618   :  { %9140 = vst.msk [vmem:[#allocation12 + $0x50] sm:$0xf] %vm9119_vm6, %v9851_v9  ;;  %v8820_v33 = vmax.f32 %v8750_v15, %v8752_v46  ;;  %v8755_v49 = vmax.f32 %v8627_v56, %v8691_v42  ;;  %v11244_v43 = vadd.f32 %v8206_v53, %v15589_v14  ;;  %v11180_v26 = vpop.f32.mrb[66].mxu0  ;;  %v8628_v37 = vld [vmem:[#allocation3 + $0xd8] sm:$0xff] }
 0x619   :  { %8568 = vst.msk [vmem:[#allocation3 + $0xf8] sm:$0xff] %vm8532_vm5, %v8499_v36  ;;  %8566 = vst.msk [vmem:[#allocation3 + $0xe8] sm:$0xff] %vm8532_vm5, %v8497_v7  ;;  %v8438_v1 = vadd.f32 %v11243_v35, %v14642_v47  ;;  %v11245_v3 = vadd.f32 %v11180_v26, %v15590_v39  ;;  %v8209_v51 = vpop.f32.mrb[67].mxu0  ;;  %v15594_v34 = vld [vmem:[#allocation20_spill] sm:$0xff]  ;;  %v15595_v7 = vld [vmem:[#allocation21_spill] sm:$0xff] }
 0x61a   :  { %v8626_v52 = vld [vmem:[#allocation3 + $0xc8] sm:$0xff]  ;;  %v9852_v50 = vpack.c.bf16 %v8820_v33, %v8820_v33  ;;  %v8436_v27 = vadd.f32 %v11244_v43, %v14642_v47  ;;  %v11246_v21 = vadd.f32 %v8209_v51, %v15591_v16 }
 0x61b   :  { %v8689_v17 = vld [vmem:[#allocation3 + $0xc1] sm:$0xff]  ;;  %v8690_v59 = vld [vmem:[#allocation3 + $0xc9] sm:$0xff]  ;;  %v8502_v13 = vmax.f32 %v8438_v1, 0.0  ;;  %v8439_v2 = vadd.f32 %v11245_v3, %v14642_v47 }
 0x61c   :  { %v8753_v28 = vmax.f32 %v8625_v11, %v8689_v17  ;;  %v8754_v55 = vmax.f32 %v8626_v52, %v8690_v59  ;;  %9141 = vst.msk [vmem:[#allocation12 + $0x54] sm:$0xf] %vm9119_vm6, %v9852_v50  ;;  %v8500_v5 = vmax.f32 %v8436_v27, 0.0  ;;  %v8437_v20 = vadd.f32 %v11246_v21, %v14642_v47  ;;  %v8631_v4 = vld [vmem:[#allocation3 + $0xf0] sm:$0xff]  ;;  %v15596_v50 = vld [vmem:[#allocation22_spill] sm:$0xff] }
 0x61d   :  { %v8692_v29 = vld [vmem:[#allocation3 + $0xd9] sm:$0xff]  ;;  %8571 = vst.msk [vmem:[#allocation3 + $0x110] sm:$0xff] %vm8532_vm5, %v8502_v13 }
 0x61e   :  { %v8821_v22 = vmax.f32 %v8751_v23, %v8753_v28  ;;  %v8822_v40 = vmax.f32 %v8752_v46, %v8754_v55  ;;  %v8823_v19 = vmax.f32 %v8753_v28, %v8755_v49  ;;  %v8756_v41 = vmax.f32 %v8628_v37, %v8692_v29  ;;  %8569 = vst.msk [vmem:[#allocation3 + $0x100] sm:$0xff] %vm8532_vm5, %v8500_v5  ;;  %v11183_v54 = vpop.f32.mrb[68].mxu0  ;;  %v8629_v62 = vld [vmem:[#allocation3 + $0xe0] sm:$0xff] }
 0x61f   :  { %v8503_v23 = vmax.f32 %v8439_v2, 0.0  ;;  %v8501_v57 = vmax.f32 %v8437_v20, 0.0  ;;  %v11247_v25 = vadd.f32 %v11183_v54, %v15592_v32  ;;  %v8222_v0 = vpop.f32.mrb[69].mxu0  ;;  %v15597_v5 = vld [vmem:[#allocation93_spill] sm:$0xff]  ;;  %v15599_v54 = vld [vmem:[#allocation24_spill] sm:$0xff] }
 0x620   :  { %v9853_v18 = vpack.c.bf16 %v8821_v22, %v8821_v22  ;;  %v9854_v12 = vpack.c.bf16 %v8822_v40, %v8822_v40  ;;  %v9855_v61 = vpack.c.bf16 %v8823_v19, %v8823_v19  ;;  %v8695_v15 = vld [vmem:[#allocation3 + $0xf1] sm:$0xff]  ;;  %v8630_v60 = vld [vmem:[#allocation3 + $0xe8] sm:$0xff]  ;;  %v8824_v10 = vmax.f32 %v8754_v55, %v8756_v41  ;;  %v11184_v45 = vpop.f32.mrb[70].mxu0 }
 0x621   :  { %v8759_v8 = vmax.f32 %v8631_v4, %v8695_v15  ;;  %v8693_v24 = vld [vmem:[#allocation3 + $0xe1] sm:$0xff]  ;;  %v8694_v31 = vld [vmem:[#allocation3 + $0xe9] sm:$0xff]  ;;  %8572 = vst.msk [vmem:[#allocation3 + $0x118] sm:$0xff] %vm8532_vm5, %v8503_v23  ;;  %8570 = vst.msk [vmem:[#allocation3 + $0x108] sm:$0xff] %vm8532_vm5, %v8501_v57  ;;  %v11248_v38 = vadd.f32 %v8222_v0, %v15593_v44  ;;  %v8442_v30 = vadd.f32 %v11247_v25, %v14642_v47  ;;  %v8225_v6 = vpop.f32.mrb[71].mxu0 }
 0x622   :  { %9142 = vst.msk [vmem:[#allocation12 + $0x58] sm:$0xf] %vm9119_vm6, %v9853_v18  ;;  %9143 = vst.msk [vmem:[#allocation12 + $0x5c] sm:$0xf] %vm9119_vm6, %v9854_v12  ;;  %v8757_v63 = vmax.f32 %v8629_v62, %v8693_v24  ;;  %v8758_v48 = vmax.f32 %v8630_v60, %v8694_v31  ;;  %v11249_v9 = vadd.f32 %v11184_v45, %v15594_v34  ;;  %v8632_v17 = vld [vmem:[#allocation3 + $0xf8] sm:$0xff] }
 0x623   :  { %9144 = vst.msk [vmem:[#allocation12 + $0x60] sm:$0xf] %vm9119_vm6, %v9855_v61  ;;  %v9856_v46 = vpack.c.bf16 %v8824_v10, %v8824_v10  ;;  %v8440_v36 = vadd.f32 %v11248_v38, %v14642_v47  ;;  %v11250_v58 = vadd.f32 %v8225_v6, %v15595_v7  ;;  %v8506_v35 = vmax.f32 %v8442_v30, 0.0  ;;  %v15598_v61 = vld [vmem:[#allocation23_spill] sm:$0xff] }
 0x624   :  { %v8825_v56 = vmax.f32 %v8755_v49, %v8757_v63  ;;  %v8826_v42 = vmax.f32 %v8756_v41, %v8758_v48  ;;  %v8827_v52 = vmax.f32 %v8757_v63, %v8759_v8  ;;  %v8443_v11 = vadd.f32 %v11249_v9, %v14642_v47  ;;  %v8635_v39 = vld [vmem:[#allocation3 + $0x110] sm:$0xff] }
 0x625   :  { %9145 = vst.msk [vmem:[#allocation12 + $0x64] sm:$0xf] %vm9119_vm6, %v9856_v46  ;;  %v8504_v53 = vmax.f32 %v8440_v36, 0.0  ;;  %v8441_v33 = vadd.f32 %v11250_v58, %v14642_v47  ;;  %v8696_v26 = vld [vmem:[#allocation3 + $0xf9] sm:$0xff]  ;;  %v15600_v46 = vld [vmem:[#allocation94_spill] sm:$0xff] }
 0x626   :  { %v9857_v59 = vpack.c.bf16 %v8825_v56, %v8825_v56  ;;  %v9858_v14 = vpack.c.bf16 %v8826_v42, %v8826_v42  ;;  %v9859_v43 = vpack.c.bf16 %v8827_v52, %v8827_v52  ;;  %8575 = vst.msk [vmem:[#allocation3 + $0x130] sm:$0xff] %vm8532_vm5, %v8506_v35  ;;  %v8760_v28 = vmax.f32 %v8632_v17, %v8696_v26  ;;  %v11187_v1 = vpop.f32.mrb[72].mxu0  ;;  %v8633_v21 = vld [vmem:[#allocation3 + $0x100] sm:$0xff] }
 0x627   :  { %8573 = vst.msk [vmem:[#allocation3 + $0x120] sm:$0xff] %vm8532_vm5, %v8504_v53  ;;  %v8507_v49 = vmax.f32 %v8443_v11, 0.0  ;;  %v8505_v55 = vmax.f32 %v8441_v33, 0.0  ;;  %v11251_v27 = vadd.f32 %v11187_v1, %v15596_v50  ;;  %v8238_v16 = vpop.f32.mrb[73].mxu0  ;;  %v15601_v53 = vld [vmem:[#allocation95_spill] sm:$0xff]  ;;  %v15603_v1 = vld [vmem:[#allocation26_spill] sm:$0xff] }
 0x628   :  { %9146 = vst.msk [vmem:[#allocation12 + $0x68] sm:$0xf] %vm9119_vm6, %v9857_v59  ;;  %9147 = vst.msk [vmem:[#allocation12 + $0x6c] sm:$0xf] %vm9119_vm6, %v9858_v14  ;;  %v8699_v3 = vld [vmem:[#allocation3 + $0x111] sm:$0xff]  ;;  %v8634_v51 = vld [vmem:[#allocation3 + $0x108] sm:$0xff]  ;;  %v8828_v22 = vmax.f32 %v8758_v48, %v8760_v28  ;;  %v11252_v2 = vadd.f32 %v8238_v16, %v15597_v5 }
 0x629   :  { %9148 = vst.msk [vmem:[#allocation12 + $0x70] sm:$0xf] %vm9119_vm6, %v9859_v43  ;;  %v8763_v40 = vmax.f32 %v8635_v39, %v8699_v3  ;;  %v8697_v19 = vld [vmem:[#allocation3 + $0x101] sm:$0xff]  ;;  %v8698_v13 = vld [vmem:[#allocation3 + $0x109] sm:$0xff]  ;;  %v11188_v20 = vpop.f32.mrb[74].mxu0  ;;  %v8446_v12 = vadd.f32 %v11251_v27, %v14642_v47  ;;  %v8636_v24 = vld [vmem:[#allocation3 + $0x118] sm:$0xff] }
 0x62a   :  { %8576 = vst.msk [vmem:[#allocation3 + $0x138] sm:$0xff] %vm8532_vm5, %v8507_v49  ;;  %8574 = vst.msk [vmem:[#allocation3 + $0x128] sm:$0xff] %vm8532_vm5, %v8505_v55  ;;  %v8761_v37 = vmax.f32 %v8633_v21, %v8697_v19  ;;  %v8762_v18 = vmax.f32 %v8634_v51, %v8698_v13  ;;  %v11253_v29 = vadd.f32 %v11188_v20, %v15598_v61  ;;  %v8241_v41 = vpop.f32.mrb[75].mxu0  ;;  %v15602_v43 = vld [vmem:[#allocation25_spill] sm:$0xff] }
 0x62b   :  { %v9860_v23 = vpack.c.bf16 %v8828_v22, %v8828_v22  ;;  %v8444_v57 = vadd.f32 %v11252_v2, %v14642_v47  ;;  %v11254_v4 = vadd.f32 %v8241_v41, %v15599_v54  ;;  %v8510_v25 = vmax.f32 %v8446_v12, 0.0 }
 0x62c   :  { %v8829_v15 = vmax.f32 %v8759_v8, %v8761_v37  ;;  %v8830_v60 = vmax.f32 %v8760_v28, %v8762_v18  ;;  %v8831_v32 = vmax.f32 %v8761_v37, %v8763_v40  ;;  %v8447_v62 = vadd.f32 %v11253_v29, %v14642_v47 }
 0x62d   :  { %9149 = vst.msk [vmem:[#allocation12 + $0x74] sm:$0xf] %vm9119_vm6, %v9860_v23  ;;  %v8508_v0 = vmax.f32 %v8444_v57, 0.0  ;;  %v8445_v10 = vadd.f32 %v11254_v4, %v14642_v47  ;;  %v8639_v34 = vld [vmem:[#allocation3 + $0x130] sm:$0xff] }
 0x62e   :  { %v9861_v31 = vpack.c.bf16 %v8829_v15, %v8829_v15  ;;  %v9862_v44 = vpack.c.bf16 %v8830_v60, %v8830_v60  ;;  %v9863_v38 = vpack.c.bf16 %v8831_v32, %v8831_v32  ;;  %v8700_v45 = vld [vmem:[#allocation3 + $0x119] sm:$0xff]  ;;  %8579 = vst.msk [vmem:[#allocation3 + $0x150] sm:$0xff] %vm8532_vm5, %v8510_v25  ;;  %v8511_v8 = vmax.f32 %v8447_v62, 0.0  ;;  %v11191_v30 = vpop.f32.mrb[76].mxu0 }
 0x62f   :  { %v8764_v63 = vmax.f32 %v8636_v24, %v8700_v45  ;;  %8577 = vst.msk [vmem:[#allocation3 + $0x140] sm:$0xff] %vm8532_vm5, %v8508_v0  ;;  %v8509_v48 = vmax.f32 %v8445_v10, 0.0  ;;  %v11255_v36 = vadd.f32 %v11191_v30, %v15600_v46  ;;  %v8254_v7 = vpop.f32.mrb[77].mxu0  ;;  %v8637_v58 = vld [vmem:[#allocation3 + $0x120] sm:$0xff]  ;;  %v15604_v23 = vld [vmem:[#allocation96_spill] sm:$0xff]  ;;  %v15605_v0 = vld [vmem:[#allocation27_spill] sm:$0xff] }
 0x630   :  { %9150 = vst.msk [vmem:[#allocation12 + $0x78] sm:$0xf] %vm9119_vm6, %v9861_v31  ;;  %9151 = vst.msk [vmem:[#allocation12 + $0x7c] sm:$0xf] %vm9119_vm6, %v9862_v44  ;;  %v11256_v11 = vadd.f32 %v8254_v7, %v15601_v53  ;;  %v11192_v33 = vpop.f32.mrb[78].mxu0  ;;  %v15607_v30 = vld [vmem:[#allocation28_spill] sm:$0xff] }
 0x631   :  { %9152 = vst.msk [vmem:[#allocation12 + $0x80] sm:$0xf] %vm9119_vm6, %v9863_v38  ;;  %v8703_v9 = vld [vmem:[#allocation3 + $0x131] sm:$0xff]  ;;  %v8638_v6 = vld [vmem:[#allocation3 + $0x128] sm:$0xff]  ;;  %v8832_v56 = vmax.f32 %v8762_v18, %v8764_v63  ;;  %v8450_v14 = vadd.f32 %v11255_v36, %v14642_v47  ;;  %v11257_v26 = vadd.f32 %v11192_v33, %v15602_v43  ;;  %v8257_v28 = vpop.f32.mrb[79].mxu0  ;;  %v15606_v38 = vld [vmem:[#allocation97_spill] sm:$0xff] }
 0x632   :  { %v8767_v42 = vmax.f32 %v8639_v34, %v8703_v9  ;;  %v8701_v52 = vld [vmem:[#allocation3 + $0x121] sm:$0xff]  ;;  %v8702_v35 = vld [vmem:[#allocation3 + $0x129] sm:$0xff]  ;;  %8580 = vst.msk [vmem:[#allocation3 + $0x158] sm:$0xff] %vm8532_vm5, %v8511_v8  ;;  %8578 = vst.msk [vmem:[#allocation3 + $0x148] sm:$0xff] %vm8532_vm5, %v8509_v48  ;;  %v8448_v55 = vadd.f32 %v11256_v11, %v14642_v47  ;;  %v11258_v39 = vadd.f32 %v8257_v28, %v15603_v1 }
 0x633   :  { %v8765_v17 = vmax.f32 %v8637_v58, %v8701_v52  ;;  %v8766_v59 = vmax.f32 %v8638_v6, %v8702_v35  ;;  %v9864_v49 = vpack.c.bf16 %v8832_v56, %v8832_v56  ;;  %v8514_v27 = vmax.f32 %v8450_v14, 0.0  ;;  %v8640_v19 = vld [vmem:[#allocation3 + $0x138] sm:$0xff]  ;;  %v15608_v28 = vld [vmem:[#allocation98_spill] sm:$0xff] }
 0x634   :  { %v8512_v16 = vmax.f32 %v8448_v55, 0.0  ;;  %v8451_v21 = vadd.f32 %v11257_v26, %v14642_v47  ;;  %v8449_v22 = vadd.f32 %v11258_v39, %v14642_v47 }
 0x635   :  { %v8833_v3 = vmax.f32 %v8763_v40, %v8765_v17  ;;  %v8834_v51 = vmax.f32 %v8764_v63, %v8766_v59  ;;  %v8835_v50 = vmax.f32 %v8765_v17, %v8767_v42  ;;  %9153 = vst.msk [vmem:[#allocation12 + $0x84] sm:$0xf] %vm9119_vm6, %v9864_v49  ;;  %v8643_v61 = vld [vmem:[#allocation3 + $0x150] sm:$0xff] }
 0x636   :  { %v8704_v20 = vld [vmem:[#allocation3 + $0x139] sm:$0xff]  ;;  %8583 = vst.msk [vmem:[#allocation3 + $0x170] sm:$0xff] %vm8532_vm5, %v8514_v27  ;;  %8581 = vst.msk [vmem:[#allocation3 + $0x160] sm:$0xff] %vm8532_vm5, %v8512_v16  ;;  %v8515_v40 = vmax.f32 %v8451_v21, 0.0  ;;  %v8513_v18 = vmax.f32 %v8449_v22, 0.0  ;;  %v11195_v12 = vpop.f32.mrb[80].mxu0 }
 0x637   :  { %v9865_v13 = vpack.c.bf16 %v8833_v3, %v8833_v3  ;;  %v9866_v5 = vpack.c.bf16 %v8834_v51, %v8834_v51  ;;  %v9867_v2 = vpack.c.bf16 %v8835_v50, %v8835_v50  ;;  %v8768_v37 = vmax.f32 %v8640_v19, %v8704_v20  ;;  %v8270_v54 = vpop.f32.mrb[81].mxu0  ;;  %v8641_v4 = vld [vmem:[#allocation3 + $0x140] sm:$0xff]  ;;  %v15609_v27 = vld [vmem:[#allocation99_spill] sm:$0xff] }
 0x638   :  { %v11259_v57 = vadd.f32 %v11195_v12, %v15604_v23  ;;  %8584 = vst.msk [vmem:[#allocation3 + $0x178] sm:$0xff] %vm8532_vm5, %v8515_v40  ;;  %8582 = vst.msk [vmem:[#allocation3 + $0x168] sm:$0xff] %vm8532_vm5, %v8513_v18  ;;  %v11260_v62 = vadd.f32 %v8270_v54, %v15605_v0  ;;  %v11196_v10 = vpop.f32.mrb[82].mxu0  ;;  %v15611_v12 = vld [vmem:[#allocation30_spill] sm:$0xff] }
 0x639   :  { %9154 = vst.msk [vmem:[#allocation12 + $0x88] sm:$0xf] %vm9119_vm6, %v9865_v13  ;;  %9155 = vst.msk [vmem:[#allocation12 + $0x8c] sm:$0xf] %vm9119_vm6, %v9866_v5  ;;  %v8707_v29 = vld [vmem:[#allocation3 + $0x151] sm:$0xff]  ;;  %v8642_v41 = vld [vmem:[#allocation3 + $0x148] sm:$0xff]  ;;  %v8836_v15 = vmax.f32 %v8766_v59, %v8768_v37  ;;  %v11261_v45 = vadd.f32 %v11196_v10, %v15606_v38 }
 0x63a   :  { %9156 = vst.msk [vmem:[#allocation12 + $0x90] sm:$0xf] %vm9119_vm6, %v9867_v2  ;;  %v8771_v60 = vmax.f32 %v8643_v61, %v8707_v29  ;;  %v8705_v32 = vld [vmem:[#allocation3 + $0x141] sm:$0xff]  ;;  %v8706_v25 = vld [vmem:[#allocation3 + $0x149] sm:$0xff]  ;;  %v8454_v44 = vadd.f32 %v11259_v57, %v14642_v47  ;;  %v8273_v63 = vpop.f32.mrb[83].mxu0  ;;  %v8452_v48 = vadd.f32 %v11260_v62, %v14642_v47  ;;  %v8644_v52 = vld [vmem:[#allocation3 + $0x158] sm:$0xff] }
 0x63b   :  { %v8769_v24 = vmax.f32 %v8641_v4, %v8705_v32  ;;  %v8770_v31 = vmax.f32 %v8642_v41, %v8706_v25  ;;  %v9868_v8 = vpack.c.bf16 %v8836_v15, %v8836_v15  ;;  %v11262_v34 = vadd.f32 %v8273_v63, %v15607_v30  ;;  %v14850_v13 = vld [vmem:[#allocation10] ss:$0 sm:$0xff]  ;;  %v15610_v2 = vld [vmem:[#allocation29_spill] sm:$0xff] }
 0x63c   :  { %v8518_v36 = vmax.f32 %v8454_v44, 0.0  ;;  %v8516_v7 = vmax.f32 %v8452_v48, 0.0  ;;  %v8455_v58 = vadd.f32 %v11261_v45, %v14642_v47 }
 0x63d   :  { %v8837_v9 = vmax.f32 %v8767_v42, %v8769_v24  ;;  %v8838_v6 = vmax.f32 %v8768_v37, %v8770_v31  ;;  %v8839_v46 = vmax.f32 %v8769_v24, %v8771_v60  ;;  %9157 = vst.msk [vmem:[#allocation12 + $0x94] sm:$0xf] %vm9119_vm6, %v9868_v8  ;;  %v8453_v56 = vadd.f32 %v11262_v34, %v14642_v47  ;;  %v8708_v33 = vld [vmem:[#allocation3 + $0x159] sm:$0xff]  ;;  %v8647_v47 = vld [vmem:[#allocation3 + $0x170] sm:$0xff] }
 0x63e   :  { %8587 = vst.msk [vmem:[#allocation3 + $0x190] sm:$0xff] %vm8532_vm5, %v8518_v36  ;;  %v8772_v17 = vmax.f32 %v8644_v52, %v8708_v33  ;;  %8585 = vst.msk [vmem:[#allocation3 + $0x180] sm:$0xff] %vm8532_vm5, %v8516_v7  ;;  %v8519_v42 = vmax.f32 %v8455_v58, 0.0  ;;  %v11199_v14 = vpop.f32.mrb[84].mxu0  ;;  %v8645_v1 = vld [vmem:[#allocation3 + $0x160] sm:$0xff]  ;;  %v15612_v8 = vld [vmem:[#allocation31_spill] sm:$0xff] }
 0x63f   :  { %v9869_v35 = vpack.c.bf16 %v8837_v9, %v8837_v9  ;;  %v9870_v53 = vpack.c.bf16 %v8838_v6, %v8838_v6  ;;  %v9871_v11 = vpack.c.bf16 %v8839_v46, %v8839_v46  ;;  %v8517_v59 = vmax.f32 %v8453_v56, 0.0  ;;  %v8711_v43 = vld [vmem:[#allocation3 + $0x171] sm:$0xff]  ;;  %v8646_v26 = vld [vmem:[#allocation3 + $0x168] sm:$0xff]  ;;  %v8286_v55 = vpop.f32.mrb[85].mxu0 }
 0x640   :  { %v11263_v49 = vadd.f32 %v11199_v14, %v15608_v28  ;;  %v8840_v39 = vmax.f32 %v8770_v31, %v8772_v17  ;;  %v8775_v3 = vmax.f32 %v8647_v47, %v8711_v43  ;;  %v8709_v51 = vld [vmem:[#allocation3 + $0x161] sm:$0xff]  ;;  %v8710_v50 = vld [vmem:[#allocation3 + $0x169] sm:$0xff]  ;;  %8588 = vst.msk [vmem:[#allocation3 + $0x198] sm:$0xff] %vm8532_vm5, %v8519_v42  ;;  %v11264_v16 = vadd.f32 %v8286_v55, %v15609_v27  ;;  %v11200_v21 = vpop.f32.mrb[86].mxu0  ;;  %v8648_v32 = vld [vmem:[#allocation3 + $0x178] sm:$0xff] }
 0x641   :  { %9158 = vst.msk [vmem:[#allocation12 + $0x98] sm:$0xf] %vm9119_vm6, %v9869_v35  ;;  %9159 = vst.msk [vmem:[#allocation12 + $0x9c] sm:$0xf] %vm9119_vm6, %v9870_v53  ;;  %v8773_v22 = vmax.f32 %v8645_v1, %v8709_v51  ;;  %v8774_v19 = vmax.f32 %v8646_v26, %v8710_v50  ;;  %v11265_v20 = vadd.f32 %v11200_v21, %v15610_v2  ;;  %v8289_v37 = vpop.f32.mrb[87].mxu0  ;;  %v15613_v7 = vld [vmem:[#allocation32_spill] sm:$0xff] }
 0x642   :  { %9160 = vst.msk [vmem:[#allocation12 + $0xa0] sm:$0xf] %vm9119_vm6, %v9871_v11  ;;  %v8458_v5 = vadd.f32 %v14850_v13, %v11263_v49  ;;  %v9872_v40 = vpack.c.bf16 %v8840_v39, %v8840_v39  ;;  %v8456_v18 = vadd.f32 %v14850_v13, %v11264_v16  ;;  %v11266_v61 = vadd.f32 %v8289_v37, %v15611_v12  ;;  %v15614_v11 = vld [vmem:[#allocation47_spill] sm:$0xff]  ;;  %v15615_v14 = vld [vmem:[#allocation44_spill] sm:$0xff] }
 0x643   :  { %8586 = vst.msk [vmem:[#allocation3 + $0x188] sm:$0xff] %vm8532_vm5, %v8517_v59  ;;  %v8841_v29 = vmax.f32 %v8771_v60, %v8773_v22  ;;  %v8842_v41 = vmax.f32 %v8772_v17, %v8774_v19  ;;  %v8843_v23 = vmax.f32 %v8773_v22, %v8775_v3  ;;  %v8459_v4 = vadd.f32 %v14850_v13, %v11265_v20 }
 0x644   :  { %v8522_v57 = vmax.f32 %v8458_v5, 0.0  ;;  %9161 = vst.msk [vmem:[#allocation12 + $0xa4] sm:$0xf] %vm9119_vm6, %v9872_v40  ;;  %v8520_v54 = vmax.f32 %v8456_v18, 0.0  ;;  %v8457_v15 = vadd.f32 %v14850_v13, %v11266_v61  ;;  %v15616_v40 = vld [vmem:[#allocation76_spill] sm:$0xff] }
 0x645   :  { %v9873_v25 = vpack.c.bf16 %v8841_v29, %v8841_v29  ;;  %v9874_v0 = vpack.c.bf16 %v8842_v41, %v8842_v41  ;;  %v9875_v62 = vpack.c.bf16 %v8843_v23, %v8843_v23  ;;  %v8712_v10 = vld [vmem:[#allocation3 + $0x179] sm:$0xff]  ;;  %v8523_v60 = vmax.f32 %v8459_v4, 0.0  ;;  %v8651_v38 = vld [vmem:[#allocation3 + $0x190] sm:$0xff] }
 0x646   :  { %8591 = vst.msk [vmem:[#allocation3 + $0x1b0] sm:$0xff] %vm8532_vm5, %v8522_v57  ;;  %v8776_v24 = vmax.f32 %v8648_v32, %v8712_v10  ;;  %8589 = vst.msk [vmem:[#allocation3 + $0x1a0] sm:$0xff] %vm8532_vm5, %v8520_v54  ;;  %v8521_v31 = vmax.f32 %v8457_v15, 0.0  ;;  %v11203_v44 = vpop.f32.mrb[88].mxu0  ;;  %v8649_v34 = vld [vmem:[#allocation3 + $0x180] sm:$0xff] }
 0x647   :  { %9162 = vst.msk [vmem:[#allocation12 + $0xa8] sm:$0xf] %vm9119_vm6, %v9873_v25  ;;  %9163 = vst.msk [vmem:[#allocation12 + $0xac] sm:$0xf] %vm9119_vm6, %v9874_v0  ;;  %v8715_v45 = vld [vmem:[#allocation3 + $0x191] sm:$0xff]  ;;  %v11267_v48 = vadd.f32 %v11203_v44, %v15612_v8  ;;  %v8302_v30 = vpop.f32.mrb[89].mxu0 }
 0x648   :  { %9164 = vst.msk [vmem:[#allocation12 + $0xb0] sm:$0xf] %vm9119_vm6, %v9875_v62  ;;  %v8844_v9 = vmax.f32 %v8774_v19, %v8776_v24  ;;  %v8779_v6 = vmax.f32 %v8651_v38, %v8715_v45  ;;  %v11268_v58 = vadd.f32 %v8302_v30, %v15613_v7  ;;  %v11204_v56 = vpop.f32.mrb[90].mxu0  ;;  %v8652_v51 = vld [vmem:[#allocation3 + $0x198] sm:$0xff]  ;;  %v15617_v54 = vld [vmem:[#allocation46_spill] sm:$0xff]  ;;  %v15618_v62 = vld [vmem:[#allocation75_spill] sm:$0xff] }
 0x649   :  { %8592 = vst.msk [vmem:[#allocation3 + $0x1b8] sm:$0xff] %vm8532_vm5, %v8523_v60  ;;  %8590 = vst.msk [vmem:[#allocation3 + $0x1a8] sm:$0xff] %vm8532_vm5, %v8521_v31  ;;  %v8462_v53 = vadd.f32 %v14850_v13, %v11267_v48  ;;  %v11269_v33 = vadd.f32 %v11204_v56, %v15614_v11  ;;  %v8305_v17 = vpop.f32.mrb[91].mxu0  ;;  %v15619_v44 = vld [vmem:[#allocation100_spill] sm:$0xff] }
 0x64a   :  { %v8650_v63 = vld [vmem:[#allocation3 + $0x188] sm:$0xff]  ;;  %v9876_v42 = vpack.c.bf16 %v8844_v9, %v8844_v9  ;;  %v8460_v59 = vadd.f32 %v14850_v13, %v11268_v58  ;;  %v11270_v47 = vadd.f32 %v8305_v17, %v15615_v14 }
 0x64b   :  { %v8713_v46 = vld [vmem:[#allocation3 + $0x181] sm:$0xff]  ;;  %v8714_v36 = vld [vmem:[#allocation3 + $0x189] sm:$0xff]  ;;  %v8526_v49 = vmax.f32 %v8462_v53, 0.0  ;;  %v8463_v1 = vadd.f32 %v14850_v13, %v11269_v33 }
 0x64c   :  { %v8777_v52 = vmax.f32 %v8649_v34, %v8713_v46  ;;  %v8778_v35 = vmax.f32 %v8650_v63, %v8714_v36  ;;  %9165 = vst.msk [vmem:[#allocation12 + $0xb4] sm:$0xf] %vm9119_vm6, %v9876_v42  ;;  %v8524_v55 = vmax.f32 %v8460_v59, 0.0  ;;  %v8461_v39 = vadd.f32 %v14850_v13, %v11270_v47 }
 0x64d   :  { %v8716_v21 = vld [vmem:[#allocation3 + $0x199] sm:$0xff]  ;;  %8595 = vst.msk [vmem:[#allocation3 + $0x1d0] sm:$0xff] %vm8532_vm5, %v8526_v49  ;;  %v8655_v2 = vld [vmem:[#allocation3 + $0x1b0] sm:$0xff] }
 0x64e   :  { %v8845_v43 = vmax.f32 %v8775_v3, %v8777_v52  ;;  %v8846_v26 = vmax.f32 %v8776_v24, %v8778_v35  ;;  %v8847_v28 = vmax.f32 %v8777_v52, %v8779_v6  ;;  %v8780_v22 = vmax.f32 %v8652_v51, %v8716_v21  ;;  %8593 = vst.msk [vmem:[#allocation3 + $0x1c0] sm:$0xff] %vm8532_vm5, %v8524_v55  ;;  %v11207_v5 = vpop.f32.mrb[92].mxu0  ;;  %v8653_v61 = vld [vmem:[#allocation3 + $0x1a0] sm:$0xff] }
 0x64f   :  { %v8527_v3 = vmax.f32 %v8463_v1, 0.0  ;;  %v8525_v19 = vmax.f32 %v8461_v39, 0.0  ;;  %v11271_v18 = vadd.f32 %v11207_v5, %v15616_v40  ;;  %v8318_v12 = vpop.f32.mrb[93].mxu0  ;;  %v8794_v39 = vld [vmem:[#allocation3 + $0x208] sm:$0xff] }
 0x650   :  { %v9877_v50 = vpack.c.bf16 %v8845_v43, %v8845_v43  ;;  %v9878_v27 = vpack.c.bf16 %v8846_v26, %v8846_v26  ;;  %v9879_v16 = vpack.c.bf16 %v8847_v28, %v8847_v28  ;;  %v8719_v20 = vld [vmem:[#allocation3 + $0x1b1] sm:$0xff]  ;;  %v8654_v37 = vld [vmem:[#allocation3 + $0x1a8] sm:$0xff]  ;;  %v8848_v29 = vmax.f32 %v8778_v35, %v8780_v22  ;;  %v11208_v15 = vpop.f32.mrb[94].mxu0  ;;  %v8793_v28 = vld [vmem:[#allocation3 + $0x200] sm:$0xff] }
 0x651   :  { %v8783_v41 = vmax.f32 %v8655_v2, %v8719_v20  ;;  %v8717_v23 = vld [vmem:[#allocation3 + $0x1a1] sm:$0xff]  ;;  %v8718_v57 = vld [vmem:[#allocation3 + $0x1a9] sm:$0xff]  ;;  %8596 = vst.msk [vmem:[#allocation3 + $0x1d8] sm:$0xff] %vm8532_vm5, %v8527_v3  ;;  %8594 = vst.msk [vmem:[#allocation3 + $0x1c8] sm:$0xff] %vm8532_vm5, %v8525_v19  ;;  %v11272_v4 = vadd.f32 %v8318_v12, %v15617_v54  ;;  %v8466_v0 = vadd.f32 %v14850_v13, %v11271_v18  ;;  %v8321_v24 = vpop.f32.mrb[95].mxu0 }
 0x652   :  { %9166 = vst.msk [vmem:[#allocation12 + $0xb8] sm:$0xf] %vm9119_vm6, %v9877_v50  ;;  %9167 = vst.msk [vmem:[#allocation12 + $0xbc] sm:$0xf] %vm9119_vm6, %v9878_v27  ;;  %v8781_v32 = vmax.f32 %v8653_v61, %v8717_v23  ;;  %v8782_v25 = vmax.f32 %v8654_v37, %v8718_v57  ;;  %v11273_v10 = vadd.f32 %v11208_v15, %v15618_v62  ;;  %v8656_v46 = vld [vmem:[#allocation3 + $0x1b8] sm:$0xff]  ;;  %v8795_v51 = vld [vmem:[#allocation3 + $0x201] sm:$0xff] }
 0x653   :  { %9168 = vst.msk [vmem:[#allocation12 + $0xc0] sm:$0xf] %vm9119_vm6, %v9879_v16  ;;  %v9880_v60 = vpack.c.bf16 %v8848_v29, %v8848_v29  ;;  %v8464_v31 = vadd.f32 %v14850_v13, %v11272_v4  ;;  %v11274_v38 = vadd.f32 %v8321_v24, %v15619_v44  ;;  %v8530_v48 = vmax.f32 %v8466_v0, 0.0  ;;  %v8796_v50 = vld [vmem:[#allocation3 + $0x209] sm:$0xff] }
 0x654   :  { %v8849_v45 = vmax.f32 %v8779_v6, %v8781_v32  ;;  %v8850_v63 = vmax.f32 %v8780_v22, %v8782_v25  ;;  %v8851_v8 = vmax.f32 %v8781_v32, %v8783_v41  ;;  %v8467_v34 = vadd.f32 %v14850_v13, %v11273_v10  ;;  %v8659_v53 = vld [vmem:[#allocation3 + $0x1d0] sm:$0xff] }
 0x655   :  { %9169 = vst.msk [vmem:[#allocation12 + $0xc4] sm:$0xf] %vm9119_vm6, %v9880_v60  ;;  %v8528_v30 = vmax.f32 %v8464_v31, 0.0  ;;  %v8465_v9 = vadd.f32 %v14850_v13, %v11274_v38  ;;  %v8720_v56 = vld [vmem:[#allocation3 + $0x1b9] sm:$0xff]  ;;  %v8797_v20 = vmax.f32 %v8793_v28, %v8795_v51  ;;  %v8798_v37 = vmax.f32 %v8794_v39, %v8796_v50 }
 0x656   :  { %v9881_v36 = vpack.c.bf16 %v8849_v45, %v8849_v45  ;;  %v9882_v7 = vpack.c.bf16 %v8850_v63, %v8850_v63  ;;  %v9883_v58 = vpack.c.bf16 %v8851_v8, %v8851_v8  ;;  %8599 = vst.msk [vmem:[#allocation3 + $0x1f0] sm:$0xff] %vm8532_vm5, %v8530_v48  ;;  %v8784_v52 = vmax.f32 %v8656_v46, %v8720_v56  ;;  %v8657_v33 = vld [vmem:[#allocation3 + $0x1c0] sm:$0xff] }
 0x657   :  { %8597 = vst.msk [vmem:[#allocation3 + $0x1e0] sm:$0xff] %vm8532_vm5, %v8528_v30  ;;  %v8531_v6 = vmax.f32 %v8467_v34, 0.0  ;;  %v8529_v35 = vmax.f32 %v8465_v9, 0.0 }
 0x658   :  { %9170 = vst.msk [vmem:[#allocation12 + $0xc8] sm:$0xf] %vm9119_vm6, %v9881_v36  ;;  %9171 = vst.msk [vmem:[#allocation12 + $0xcc] sm:$0xf] %vm9119_vm6, %v9882_v7  ;;  %v8723_v13 = vld [vmem:[#allocation3 + $0x1d1] sm:$0xff]  ;;  %v8658_v11 = vld [vmem:[#allocation3 + $0x1c8] sm:$0xff]  ;;  %v8852_v17 = vmax.f32 %v8782_v25, %v8784_v52 }
 0x659   :  { %9172 = vst.msk [vmem:[#allocation12 + $0xd0] sm:$0xf] %vm9119_vm6, %v9883_v58  ;;  %v8787_v42 = vmax.f32 %v8659_v53, %v8723_v13  ;;  %v8721_v59 = vld [vmem:[#allocation3 + $0x1c1] sm:$0xff]  ;;  %v8722_v14 = vld [vmem:[#allocation3 + $0x1c9] sm:$0xff]  ;;  %v8660_v27 = vld [vmem:[#allocation3 + $0x1d8] sm:$0xff] }
 0x65a   :  { %8600 = vst.msk [vmem:[#allocation3 + $0x1f8] sm:$0xff] %vm8532_vm5, %v8531_v6  ;;  %8598 = vst.msk [vmem:[#allocation3 + $0x1e8] sm:$0xff] %vm8532_vm5, %v8529_v35  ;;  %v8785_v47 = vmax.f32 %v8657_v33, %v8721_v59  ;;  %v8786_v43 = vmax.f32 %v8658_v11, %v8722_v14  ;;  %v9884_v26 = vpack.c.bf16 %v8852_v17, %v8852_v17 }
 0x65c   :  { %v8853_v49 = vmax.f32 %v8783_v41, %v8785_v47  ;;  %v8854_v55 = vmax.f32 %v8784_v52, %v8786_v43  ;;  %v8855_v1 = vmax.f32 %v8785_v47, %v8787_v42  ;;  %9173 = vst.msk [vmem:[#allocation12 + $0xd4] sm:$0xf] %vm9119_vm6, %v9884_v26 }
 0x65d   :  { %v8663_v19 = vld [vmem:[#allocation3 + $0x1f0] sm:$0xff] }
 0x65e   :  { %v9885_v16 = vpack.c.bf16 %v8853_v49, %v8853_v49  ;;  %v9886_v21 = vpack.c.bf16 %v8854_v55, %v8854_v55  ;;  %v9887_v22 = vpack.c.bf16 %v8855_v1, %v8855_v1  ;;  %v8724_v3 = vld [vmem:[#allocation3 + $0x1d9] sm:$0xff] }
 0x65f   :  { %v8661_v5 = vld [vmem:[#allocation3 + $0x1e0] sm:$0xff]  ;;  %v8788_v2 = vmax.f32 %v8660_v27, %v8724_v3 }
 0x660   :  { %9174 = vst.msk [vmem:[#allocation12 + $0xd8] sm:$0xf] %vm9119_vm6, %v9885_v16  ;;  %9175 = vst.msk [vmem:[#allocation12 + $0xdc] sm:$0xf] %vm9119_vm6, %v9886_v21 }
 0x661   :  { %9176 = vst.msk [vmem:[#allocation12 + $0xe0] sm:$0xf] %vm9119_vm6, %v9887_v22  ;;  %v8664_v40 = vld [vmem:[#allocation3 + $0x1f8] sm:$0xff]  ;;  %v8856_v61 = vmax.f32 %v8786_v43, %v8788_v2  ;;  %v8662_v23 = vld [vmem:[#allocation3 + $0x1e8] sm:$0xff] }
 0x662   :  { %v8727_v18 = vld [vmem:[#allocation3 + $0x1f1] sm:$0xff]  ;;  %v8728_v12 = vld [vmem:[#allocation3 + $0x1f9] sm:$0xff]  ;;  %v8725_v57 = vld [vmem:[#allocation3 + $0x1e1] sm:$0xff] }
 0x663   :  { %v8791_v29 = vmax.f32 %v8663_v19, %v8727_v18  ;;  %v8792_v41 = vmax.f32 %v8664_v40, %v8728_v12  ;;  %v8726_v54 = vld [vmem:[#allocation3 + $0x1e9] sm:$0xff]  ;;  %v8789_v4 = vmax.f32 %v8661_v5, %v8725_v57  ;;  %v9888_v32 = vpack.c.bf16 %v8856_v61, %v8856_v61 }
 0x664   :  { %v8790_v15 = vmax.f32 %v8662_v23, %v8726_v54 }
 0x665   :  { %v8861_v25 = vmax.f32 %v8791_v29, %v8797_v20  ;;  %v8862_v0 = vmax.f32 %v8792_v41, %v8798_v37  ;;  %v8857_v62 = vmax.f32 %v8787_v42, %v8789_v4  ;;  %v8859_v24 = vmax.f32 %v8789_v4, %v8791_v29  ;;  %9177 = vst.msk [vmem:[#allocation12 + $0xe4] sm:$0xf] %vm9119_vm6, %v9888_v32 }
 0x666   :  { %v8858_v10 = vmax.f32 %v8788_v2, %v8790_v15  ;;  %v8860_v60 = vmax.f32 %v8790_v15, %v8792_v41 }
 0x667   :  { %v9893_v31 = vpack.c.bf16 %v8861_v25, %v8861_v25  ;;  %v9894_v44 = vpack.c.bf16 %v8862_v0, %v8862_v0  ;;  %v9889_v38 = vpack.c.bf16 %v8857_v62, %v8857_v62  ;;  %v9891_v63 = vpack.c.bf16 %v8859_v24, %v8859_v24 }
 0x668   :  { %v9890_v45 = vpack.c.bf16 %v8858_v10, %v8858_v10  ;;  %v9892_v8 = vpack.c.bf16 %v8860_v60, %v8860_v60 }
 0x669   :  { %9182 = vst.msk [vmem:[#allocation12 + $0xf8] sm:$0xf] %vm9119_vm6, %v9893_v31  ;;  %9183 = vst.msk [vmem:[#allocation12 + $0xfc] sm:$0xf] %vm9119_vm6, %v9894_v44 }
 0x66a   :  { %9178 = vst.msk [vmem:[#allocation12 + $0xe8] sm:$0xf] %vm9119_vm6, %v9889_v38  ;;  %9179 = vst.msk [vmem:[#allocation12 + $0xec] sm:$0xf] %vm9119_vm6, %v9890_v45 }
 0x66b   :  { %9180 = vst.msk [vmem:[#allocation12 + $0xf0] sm:$0xf] %vm9119_vm6, %v9891_v63  ;;  %9181 = vst.msk [vmem:[#allocation12 + $0xf4] sm:$0xf] %vm9119_vm6, %v9892_v8 }
 0x66c   :  { %12031 = shalt.err (!%p12028_p8)
}
 0x66d   :  { %s12032_s16 = scalar_lea.hbm %s14928_s4, 4096 }
 0x66e   :  { %p12033_p9 = scmp.ne.s32.totalorder %s14928_s4, %s12032_s16  ;;  %p12036_p10 = scmp.lt.u32.totalorder %s12032_s16, %s14928_s4 }
 0x670   :  { %p12038_p11 = pnand %p12036_p10, %p12033_p9 }
 0x672   :  { %12041 = shalt.err (!%p12038_p11)
}
 0x673   :  { %9195 = dma.vmem_to_hbm [thread:$0]  %s9190_s1, 4096, %s14928_s4, [#allocation6], %s12052_s27, %s12052_s27, %s12053_s28  }
 0x674   :  { %12048 = dma.done.wait [#allocation6], 4096  }
 0x675   :  { %12049 = vsyncadd [#allocation6], 4294963200 }
 0x676   :  { %9199 = vsyncpa [#allocation5], 1 }
 0x677   :  { %9200 = vsyncpa [#allocation8], 1 }
 0x678   :  { %9201 = vsyncpa [#allocation11], 1 }
 0x679   :  { %9202 = vsyncpa [#allocation6], 1 }

// kernel: mnist_convnet_forward.3
= control target key start
LH: loop header
LB: loop body
LE: loop exit
PB: predicated region body
PF: predicated region fallthrough
CT: control target
= control target key end

     0   :  { %8 = vsyncpa [#allocation3], 0  ;;  %s15673_s0 = inlined_call_operand.hbm [shape: bf16[2,16384], index: 0, kind: input, shape index: {}]   ;;  %s15674_s1 = inlined_call_operand.hbm [shape: bf16[16384,10], index: 1, kind: input, shape index: {}]   ;;  %s15675_s2 = inlined_call_operand.hbm [shape: f32[1,10], index: 2, kind: input, shape index: {}]   ;;  %s15676_s3 = inlined_call_operand.hbm [shape: f32[2,10], index: 3, kind: output, shape index: {}]  }
   0x1   :  { %9 = vsyncpa [#allocation6], 0 }
   0x2   :  { %10 = vsyncpa [#allocation4], 0  ;;  %s15348_s12 = smov [#allocation5]   ;;  %s15254_s16 = scalar_lea.hbm %s15674_s1, 131072 }
   0x3   :  { %s26_s13 = sshll.u32 %s15348_s12, 4  ;;  %p15255_p0 = scmp.ne.s32.totalorder %s15674_s1, %s15254_s16  ;;  %s27_s13 = int_to_ptr.vmem [resolvable:$true] %s26_s13 }
   0x4   :  { %p15258_p1 = scmp.lt.u32.totalorder %s15254_s16, %s15674_s1 }
   0x6   :  { %p15260_p2 = pnand %p15258_p1, %p15255_p0 }
   0x8   :  { %15263 = shalt.err (!%p15260_p2)
}
   0x9   :  { %s15264_s21 = scalar_lea.vmem %s27_s13, 131072  ;;  %p15269_p4 = scmp.lt.s32.totalorder %s27_s13, %s27_s13 }
   0xa   :  { %p15265_p3 = scmp.ne.s32.totalorder %s27_s13, %s15264_s21  ;;  %p15270_p5 = scmp.lt.s32.totalorder %s15264_s21, %s15264_s21 }
   0xc   :  { %p15271_p6 = por %p15270_p5, %p15269_p4 }
   0xe   :  { %p15272_p7 = pnand %p15271_p6, %p15265_p3 }
  0x10   :  { %15275 = shalt.err (!%p15272_p7)
}
  0x11   :  { %s15349_s22 = smov 64   ;;  %s15350_s23 = smov 4  }
  0x12   :  { %32 = dma.hbm_to_vmem [thread:$0]  %s15674_s1, 131072, %s27_s13, [#allocation6], %s15349_s22, %s15349_s22, %s15350_s23  }
  0x13   :  { %s15351_s26 = smov [#allocation2]   ;;  %s15352_s28 = smov [#allocation7]  }
  0x14   :  { %s17_s27 = sshll.u32 %s15351_s26, 4  ;;  %s39_s29 = sshll.u32 %s15352_s28, 4  ;;  %s18_s27 = int_to_ptr.vmem [resolvable:$true] %s17_s27  ;;  %s40_s29 = int_to_ptr.vmem [resolvable:$true] %s39_s29 }
  0x15   :  { %s15276_s5 = scalar_lea.hbm %s15673_s0, 2048 }
  0x16   :  { %p15277_p8 = scmp.ne.s32.totalorder %s15673_s0, %s15276_s5  ;;  %p15280_p9 = scmp.lt.u32.totalorder %s15276_s5, %s15673_s0 }
  0x18   :  { %p15282_p10 = pnand %p15280_p9, %p15277_p8 }
  0x1a   :  { %15285 = shalt.err (!%p15282_p10)
}
  0x1b   :  { %s15286_s1 = scalar_lea.vmem %s18_s27, 2048  ;;  %p15291_p12 = scmp.lt.s32.totalorder %s18_s27, %s18_s27 }
  0x1c   :  { %p15287_p11 = scmp.ne.s32.totalorder %s18_s27, %s15286_s1  ;;  %p15292_p13 = scmp.lt.s32.totalorder %s15286_s1, %s15286_s1 }
  0x1e   :  { %p15293_p0 = por %p15292_p13, %p15291_p12 }
  0x20   :  { %p15294_p1 = pnand %p15293_p0, %p15287_p11 }
  0x22   :  { %15297 = shalt.err (!%p15294_p1)
}
  0x23   :  { %20 = dma.hbm_to_vmem [thread:$0]  %s15673_s0, 2048, %s18_s27, [#allocation3]  }
  0x24   :  { %s15298_s14 = scalar_lea.hbm %s15675_s2, 16 }
  0x25   :  { %p15299_p2 = scmp.ne.s32.totalorder %s15675_s2, %s15298_s14  ;;  %p15302_p3 = scmp.lt.u32.totalorder %s15298_s14, %s15675_s2 }
  0x27   :  { %p15304_p4 = pnand %p15302_p3, %p15299_p2 }
  0x29   :  { %15307 = shalt.err (!%p15304_p4)
}
  0x2a   :  { %s15308_s19 = scalar_lea.vmem %s40_s29, 16  ;;  %s15312_s20 = scalar_lea.vmem %s40_s29, 32 }
  0x2b   :  { %p15309_p5 = scmp.ne.s32.totalorder %s40_s29, %s15308_s19  ;;  %p15313_p6 = scmp.lt.s32.totalorder %s40_s29, %s40_s29 }
  0x2c   :  { %p15314_p7 = scmp.lt.s32.totalorder %s15312_s20, %s15308_s19 }
  0x2e   :  { %p15315_p8 = por %p15314_p7, %p15313_p6 }
  0x30   :  { %p15316_p9 = pnand %p15315_p8, %p15309_p5 }
  0x32   :  { %15319 = shalt.err (!%p15316_p9)
}
  0x33   :  { %42 = dma.hbm_to_vmem [thread:$0]  %s15675_s2, 16, %s40_s29, [#allocation6]  }
  0x34   :  { %15342 = dma.done.wait [#allocation3], 2048  }
  0x35   :  { %15343 = vsyncadd [#allocation3], 4294965248 }
  0x36   :  { %15344 = dma.done.wait [#allocation6], 131088  }
  0x37   :  { %15345 = vsyncadd [#allocation6], 4294836208  ;;  %v14214_v0 = vld [vmem:[#allocation5 + $0x40] sm:$0xff]   ;;  %v14218_v4 = vld [vmem:[#allocation5 + $0x48] sm:$0xff]   ;;  %v15353_v22 = vmov 1966171168   ;;  %v2144_v24 = vlaneseq }
  0x38   :  { %v14215_v1 = vld [vmem:[#allocation5 + $0xc0] sm:$0xff]   ;;  %12799 = vmatprep.subr.bf16.mxu0 %v14214_v0  ;;  %v14219_v5 = vld [vmem:[#allocation5 + $0xc8] sm:$0xff]   ;;  %v14222_v8 = vld [vmem:[#allocation5 + $0x50] sm:$0xff]   ;;  %v2142_v23 = vunpack.c.l.s4 %v15353_v22  ;;  %s15354_s2 = smov [#allocation8]   ;;  %vm11756_vm0 = vcmask 74752  }
  0x39   :  { %v14216_v2 = vld [vmem:[#allocation5] sm:$0xff]   ;;  %12821 = vmatprep.subr.bf16.mxu1 %v14215_v1  ;;  %v14220_v6 = vld [vmem:[#allocation5 + $0x8] sm:$0xff]   ;;  %v14223_v9 = vld [vmem:[#allocation5 + $0xd0] sm:$0xff]   ;;  %v2145_v30 = vshrl.u32 %v2144_v24, 7  ;;  %s11764_s22 = sshll.u32 %s15354_s2, 4  ;;  %s11765_s22 = int_to_ptr.vmem [resolvable:$true] %s11764_s22 }
  0x3a   :  { %v14217_v3 = vld [vmem:[#allocation5 + $0x80] sm:$0xff]   ;;  %12800 = vmatpush3.bf16.msra.mxu0 %v14216_v2  ;;  %v14221_v7 = vld [vmem:[#allocation5 + $0x88] sm:$0xff]   ;;  %v14224_v10 = vld [vmem:[#allocation5 + $0x10] sm:$0xff]   ;;  %v2143_v29 = vunpack.c.0.s8 %v2142_v23  ;;  %s15320_s23 = scalar_lea.vmem %s11765_s22, 32  ;;  %p15325_p11 = scmp.lt.s32.totalorder %s11765_s22, %s11765_s22 }
  0x3b   :  { %12822 = vmatpush3.bf16.msra.mxu1 %v14217_v3  ;;  %12801 = vmatprep.subr.bf16.mxu0 %v14218_v4  ;;  %v14225_v11 = vld [vmem:[#allocation5 + $0x90] sm:$0xff]   ;;  %v14226_v12 = vld [vmem:[#allocation5 + $0x58] sm:$0xff]   ;;  %v14230_v16 = vld [vmem:[#allocation5 + $0x60] sm:$0xff]   ;;  %p15321_p10 = scmp.ne.s32.totalorder %s11765_s22, %s15320_s23  ;;  %p15326_p12 = scmp.lt.s32.totalorder %s15320_s23, %s15320_s23 }
  0x3c   :  { %12823 = vmatprep.subr.bf16.mxu1 %v14219_v5  ;;  %v14227_v13 = vld [vmem:[#allocation5 + $0xd8] sm:$0xff]   ;;  %v14231_v17 = vld [vmem:[#allocation5 + $0xe0] sm:$0xff]   ;;  %v14234_v20 = vld [vmem:[#allocation5 + $0x68] sm:$0xff]   ;;  %v15411_v35 = vsub.s32 %v2143_v29, %v2145_v30 }
  0x3d   :  { %v14228_v14 = vld [vmem:[#allocation5 + $0x18] sm:$0xff]   ;;  %v14232_v18 = vld [vmem:[#allocation5 + $0x20] sm:$0xff]   ;;  %v14235_v21 = vld [vmem:[#allocation5 + $0xe8] sm:$0xff]   ;;  %p15327_p13 = por %p15326_p12, %p15325_p11 }
  0x3e   :  { %12802 = vmatpush3.bf16.msra.mxu0 %v14220_v6  ;;  %v14229_v15 = vld [vmem:[#allocation5 + $0x98] sm:$0xff]   ;;  %v14233_v19 = vld [vmem:[#allocation5 + $0xa0] sm:$0xff]   ;;  %v14236_v25 = vld [vmem:[#allocation5 + $0x28] sm:$0xff]  }
  0x3f   :  { %12824 = vmatpush3.bf16.msra.mxu1 %v14221_v7  ;;  %12803 = vmatprep.subr.bf16.mxu0 %v14222_v8  ;;  %v14237_v26 = vld [vmem:[#allocation5 + $0xa8] sm:$0xff]   ;;  %v14238_v27 = vld [vmem:[#allocation5 + $0x70] sm:$0xff]   ;;  %v14242_v33 = vld [vmem:[#allocation5 + $0x78] sm:$0xff]   ;;  %p15328_p0 = pnand %p15327_p13, %p15321_p10 }
  0x40   :  { %12825 = vmatprep.subr.bf16.mxu1 %v14223_v9  ;;  %v14239_v28 = vld [vmem:[#allocation5 + $0xf0] sm:$0xff]   ;;  %v14243_v34 = vld [vmem:[#allocation5 + $0xf8] sm:$0xff]   ;;  %v53_v38 = vld [vmem:[#allocation2] sm:$0xff] }
  0x41   :  { %v14240_v31 = vld [vmem:[#allocation5 + $0x30] sm:$0xff]   ;;  %v14244_v36 = vld [vmem:[#allocation5 + $0x38] sm:$0xff]   ;;  %v2140_v39 = vcombine.high %v53_v38, %v53_v38  ;;  %v2147_v40 = vrot.slane %v53_v38, %v15411_v35  ;;  %v14247_v41 = vld [vmem:[#allocation5 + $0x140] sm:$0xff]  }
  0x42   :  { %12804 = vmatpush3.bf16.msra.mxu0 %v14224_v10  ;;  %v14241_v32 = vld [vmem:[#allocation5 + $0xb0] sm:$0xff]   ;;  %v14245_v37 = vld [vmem:[#allocation5 + $0xb8] sm:$0xff]   ;;  %v14248_v42 = vld [vmem:[#allocation5 + $0x1c0] sm:$0xff]  }
  0x43   :  { %12826 = vmatpush3.bf16.msra.mxu1 %v14225_v11  ;;  %12805 = vmatprep.subr.bf16.mxu0 %v14226_v12  ;;  %v2155_v43 = vcombine.high %v2147_v40, %v2147_v40  ;;  %v2163_v44 = vrot.slane %v2147_v40, %v15411_v35  ;;  %v15416_v45 = vrot.slane %v2140_v39, %v15411_v35  ;;  %v14249_v46 = vld [vmem:[#allocation5 + $0x100] sm:$0xff]   ;;  %v14251_v51 = vld [vmem:[#allocation5 + $0x148] sm:$0xff]   ;;  %v14255_v58 = vld [vmem:[#allocation5 + $0x150] sm:$0xff]  }
  0x44   :  { %12827 = vmatprep.subr.bf16.mxu1 %v14227_v13  ;;  %v14250_v48 = vld [vmem:[#allocation5 + $0x180] sm:$0xff]   ;;  %v14252_v53 = vld [vmem:[#allocation5 + $0x1c8] sm:$0xff]   ;;  %v14256_v59 = vld [vmem:[#allocation5 + $0x1d0] sm:$0xff]  }
  0x45   :  { %v2177_v47 = vrot.slane %v2155_v43, %v15411_v35  ;;  %v2156_v49 = vcombine.high %v15416_v45, %v15416_v45  ;;  %v2185_v50 = vcombine.high %v2163_v44, %v2163_v44  ;;  %v14253_v55 = vld [vmem:[#allocation5 + $0x108] sm:$0xff]   ;;  %v14257_v60 = vld [vmem:[#allocation5 + $0x110] sm:$0xff]   ;;  %v14259_v62 = vld [vmem:[#allocation5 + $0x158] sm:$0xff]  }
  0x46   :  { %12806 = vmatpush3.bf16.msra.mxu0 %v14228_v14  ;;  %v14254_v56 = vld [vmem:[#allocation5 + $0x188] sm:$0xff]   ;;  %v14258_v61 = vld [vmem:[#allocation5 + $0x190] sm:$0xff]   ;;  %v14260_v63 = vld [vmem:[#allocation5 + $0x1d8] sm:$0xff]  }
  0x47   :  { %12828 = vmatpush3.bf16.msra.mxu1 %v14229_v15  ;;  %12807 = vmatprep.subr.bf16.mxu0 %v14230_v16  ;;  %v2187_v52 = vcombine.high %v2177_v47, %v2177_v47  ;;  %v2184_v54 = vrot.slane %v2156_v49, %v15411_v35  ;;  %v14261_v0 = vld [vmem:[#allocation5 + $0x118] sm:$0xff]   ;;  %v14263_v2 = vld [vmem:[#allocation5 + $0x160] sm:$0xff]   ;;  %v14267_v6 = vld [vmem:[#allocation5 + $0x168] sm:$0xff]  }
  0x48   :  { %12829 = vmatprep.subr.bf16.mxu1 %v14231_v17  ;;  %9228 = vmatprep.mubr.bf16.mxu0 %v2177_v47  ;;  %v14262_v1 = vld [vmem:[#allocation5 + $0x198] sm:$0xff]   ;;  %v14264_v3 = vld [vmem:[#allocation5 + $0x1e0] sm:$0xff]   ;;  %v14268_v7 = vld [vmem:[#allocation5 + $0x1e8] sm:$0xff]  }
  0x49   :  { %9268 = vmatprep.mubr.bf16.mxu1 %v2187_v52  ;;  %v2188_v57 = vcombine.high %v2184_v54, %v2184_v54  ;;  %v14265_v4 = vld [vmem:[#allocation5 + $0x120] sm:$0xff]   ;;  %v14269_v8 = vld [vmem:[#allocation5 + $0x128] sm:$0xff]   ;;  %v14271_v10 = vld [vmem:[#allocation5 + $0x170] sm:$0xff]  }
  0x4a   :  { %12808 = vmatpush3.bf16.msra.mxu0 %v14232_v18  ;;  %v14266_v5 = vld [vmem:[#allocation5 + $0x1a0] sm:$0xff]   ;;  %v14270_v9 = vld [vmem:[#allocation5 + $0x1a8] sm:$0xff]   ;;  %v14272_v11 = vld [vmem:[#allocation5 + $0x1f0] sm:$0xff]   ;;  %v2170_v18 = vrot.slane %v15416_v45, %v15411_v35 }
  0x4b   :  { %12830 = vmatpush3.bf16.msra.mxu1 %v14233_v19  ;;  %12809 = vmatprep.subr.bf16.mxu0 %v14234_v20  ;;  %v14273_v12 = vld [vmem:[#allocation5 + $0x130] sm:$0xff]   ;;  %v14275_v14 = vld [vmem:[#allocation5 + $0x178] sm:$0xff]   ;;  %v14279_v19 = vld [vmem:[#allocation5 + $0x240] sm:$0xff]  }
  0x4c   :  { %12831 = vmatprep.subr.bf16.mxu1 %v14235_v21  ;;  %v14274_v13 = vld [vmem:[#allocation5 + $0x1b0] sm:$0xff]   ;;  %v14276_v15 = vld [vmem:[#allocation5 + $0x1f8] sm:$0xff]   ;;  %v14280_v20 = vld [vmem:[#allocation5 + $0x2c0] sm:$0xff]   ;;  %v2186_v23 = vcombine.high %v2170_v18, %v2170_v18 }
  0x4d   :  { %v14277_v16 = vld [vmem:[#allocation5 + $0x138] sm:$0xff]   ;;  %v14281_v21 = vld [vmem:[#allocation5 + $0x200] sm:$0xff]   ;;  %v14283_v24 = vld [vmem:[#allocation5 + $0x248] sm:$0xff]  }
  0x4e   :  { %12810 = vmatpush3.bf16.msra.mxu0 %v14236_v25  ;;  %v14278_v17 = vld [vmem:[#allocation5 + $0x1b8] sm:$0xff]   ;;  %v14282_v22 = vld [vmem:[#allocation5 + $0x280] sm:$0xff]   ;;  %v14284_v25 = vld [vmem:[#allocation5 + $0x2c8] sm:$0xff]  }
  0x4f   :  { %12832 = vmatpush3.bf16.msra.mxu1 %v14237_v26  ;;  %12811 = vmatprep.subr.bf16.mxu0 %v14238_v27  ;;  %v14285_v26 = vld [vmem:[#allocation5 + $0x208] sm:$0xff]   ;;  %v14288_v29 = vld [vmem:[#allocation5 + $0x2d0] sm:$0xff]   ;;  %v14296_v38 = vld [vmem:[#allocation5 + $0x2e0] sm:$0xff]  }
  0x50   :  { %12833 = vmatprep.subr.bf16.mxu1 %v14239_v28  ;;  %v14286_v27 = vld [vmem:[#allocation5 + $0x288] sm:$0xff]   ;;  %v14287_v28 = vld [vmem:[#allocation5 + $0x250] sm:$0xff]   ;;  %v14297_v39 = vld [vmem:[#allocation5 + $0x220] sm:$0xff]  }
  0x51   :  { %v14289_v30 = vld [vmem:[#allocation5 + $0x210] sm:$0xff]   ;;  %v14298_v40 = vld [vmem:[#allocation5 + $0x2a0] sm:$0xff]   ;;  %v14301_v43 = vld [vmem:[#allocation5 + $0x228] sm:$0xff]  }
  0x52   :  { %12812 = vmatpush3.bf16.msra.mxu0 %v14240_v31  ;;  %v14290_v31 = vld [vmem:[#allocation5 + $0x290] sm:$0xff]   ;;  %v14307_v49 = vld [vmem:[#allocation5 + $0x278] sm:$0xff]   ;;  %v54_v52 = vld [vmem:[#allocation2 + $0x8] sm:$0xff] }
  0x53   :  { %12834 = vmatpush3.bf16.msra.mxu1 %v14241_v32  ;;  %12813 = vmatprep.subr.bf16.mxu0 %v14242_v33  ;;  %v14291_v32 = vld [vmem:[#allocation5 + $0x258] sm:$0xff]   ;;  %v14303_v45 = vld [vmem:[#allocation5 + $0x270] sm:$0xff]  }
  0x54   :  { %12835 = vmatprep.subr.bf16.mxu1 %v14243_v34  ;;  %v14292_v33 = vld [vmem:[#allocation5 + $0x2d8] sm:$0xff]   ;;  %v14305_v47 = vld [vmem:[#allocation5 + $0x230] sm:$0xff]  }
  0x55   :  { %v14293_v34 = vld [vmem:[#allocation5 + $0x218] sm:$0xff]  }
  0x56   :  { %12814 = vmatpush3.bf16.msra.mxu0 %v14244_v36  ;;  %v14294_v36 = vld [vmem:[#allocation5 + $0x298] sm:$0xff]  }
  0x57   :  { %12836 = vmatpush3.bf16.msra.mxu1 %v14245_v37  ;;  %12843 = vmatprep.subr.bf16.mxu0 %v14247_v41  ;;  %v14295_v37 = vld [vmem:[#allocation5 + $0x260] sm:$0xff]   ;;  %v14299_v41 = vld [vmem:[#allocation5 + $0x268] sm:$0xff]  }
  0x58   :  { %12865 = vmatprep.subr.bf16.mxu1 %v14248_v42  ;;  %v14300_v42 = vld [vmem:[#allocation5 + $0x2e8] sm:$0xff]  }
  0x59   :  { %9229 = vmatmul.mubr.bf16.vlgmr.msra.gmra.mrb[0].mxu0 %v2163_v44  ;;  %v14302_v44 = vld [vmem:[#allocation5 + $0x2a8] sm:$0xff]  }
  0x5a   :  { %12844 = vmatpush3.bf16.msra.mxu0 %v14249_v46  ;;  %9269 = vmatmul.mubr.bf16.vlgmr.msra.gmra.mrb[0].mxu1 %v2185_v50  ;;  %v14304_v46 = vld [vmem:[#allocation5 + $0x2f0] sm:$0xff]   ;;  %v14308_v50 = vld [vmem:[#allocation5 + $0x2f8] sm:$0xff]  }
  0x5b   :  { %12845 = vmatprep.subr.bf16.mxu0 %v14251_v51  ;;  %12866 = vmatpush3.bf16.msra.mxu1 %v14250_v48  ;;  %v14306_v48 = vld [vmem:[#allocation5 + $0x2b0] sm:$0xff]   ;;  %v14309_v51 = vld [vmem:[#allocation5 + $0x238] sm:$0xff]  }
  0x5c   :  { %9308 = vmatprep.mubr.bf16.mxu0 %v2184_v54  ;;  %12867 = vmatprep.subr.bf16.mxu1 %v14252_v53  ;;  %v14310_v53 = vld [vmem:[#allocation5 + $0x2b8] sm:$0xff]   ;;  %v2196_v54 = vrot.slane %v54_v52, %v15411_v35 }
  0x5d   :  { %9348 = vmatprep.mubr.bf16.mxu1 %v2188_v57 }
  0x5e   :  { %12846 = vmatpush3.bf16.msra.mxu0 %v14253_v55  ;;  %v2189_v55 = vcombine.high %v54_v52, %v54_v52  ;;  %v2204_v57 = vcombine.high %v2196_v54, %v2196_v54  ;;  %v14360_v52 = vld [vmem:[#allocation5 + $0x460] sm:$0xff]  }
  0x5f   :  { %12847 = vmatprep.subr.bf16.mxu0 %v14255_v58  ;;  %12868 = vmatpush3.bf16.msra.mxu1 %v14254_v56  ;;  %v14311_v56 = vld [vmem:[#allocation5 + $0x340] sm:$0xff]   ;;  %v2212_v58 = vrot.slane %v2196_v54, %v15411_v35 }
  0x60   :  { %12869 = vmatprep.subr.bf16.mxu1 %v14256_v59  ;;  %v14312_v59 = vld [vmem:[#allocation5 + $0x3c0] sm:$0xff]  }
  0x61   :  { %v14362_v54 = vld [vmem:[#allocation5 + $0x420] sm:$0xff]  }
  0x62   :  { %12848 = vmatpush3.bf16.msra.mxu0 %v14257_v60  ;;  %v15427_v60 = vrot.slane %v2189_v55, %v15411_v35  ;;  %v14363_v55 = vld [vmem:[#allocation5 + $0x4a0] sm:$0xff]  }
  0x63   :  { %12849 = vmatprep.subr.bf16.mxu0 %v14259_v62  ;;  %12870 = vmatpush3.bf16.msra.mxu1 %v14258_v61  ;;  %v14313_v61 = vld [vmem:[#allocation5 + $0x300] sm:$0xff]   ;;  %v2226_v62 = vrot.slane %v2204_v57, %v15411_v35  ;;  %v14365_v57 = vld [vmem:[#allocation5 + $0x4e8] sm:$0xff]  }
  0x64   :  { %12871 = vmatprep.subr.bf16.mxu1 %v14260_v63  ;;  %v14314_v63 = vld [vmem:[#allocation5 + $0x380] sm:$0xff]  }
  0x66   :  { %12850 = vmatpush3.bf16.msra.mxu0 %v14261_v0  ;;  %v2205_v0 = vcombine.high %v15427_v60, %v15427_v60 }
  0x67   :  { %12851 = vmatprep.subr.bf16.mxu0 %v14263_v2  ;;  %12872 = vmatpush3.bf16.msra.mxu1 %v14262_v1  ;;  %v2234_v1 = vcombine.high %v2212_v58, %v2212_v58  ;;  %v14315_v2 = vld [vmem:[#allocation5 + $0x348] sm:$0xff]  }
  0x68   :  { %12873 = vmatprep.subr.bf16.mxu1 %v14264_v3  ;;  %v2236_v3 = vcombine.high %v2226_v62, %v2226_v62 }
  0x6a   :  { %12852 = vmatpush3.bf16.msra.mxu0 %v14265_v4  ;;  %v14316_v4 = vld [vmem:[#allocation5 + $0x3c8] sm:$0xff]  }
  0x6b   :  { %12853 = vmatprep.subr.bf16.mxu0 %v14267_v6  ;;  %12874 = vmatpush3.bf16.msra.mxu1 %v14266_v5  ;;  %v2233_v5 = vrot.slane %v2205_v0, %v15411_v35  ;;  %v14317_v6 = vld [vmem:[#allocation5 + $0x308] sm:$0xff]   ;;  %v14372_v0 = vld [vmem:[#allocation5 + $0x478] sm:$0xff]  }
  0x6c   :  { %12875 = vmatprep.subr.bf16.mxu1 %v14268_v7  ;;  %v14318_v7 = vld [vmem:[#allocation5 + $0x388] sm:$0xff]  }
  0x6e   :  { %12854 = vmatpush3.bf16.msra.mxu0 %v14269_v8  ;;  %v2237_v8 = vcombine.high %v2233_v5, %v2233_v5 }
  0x6f   :  { %12855 = vmatprep.subr.bf16.mxu0 %v14271_v10  ;;  %12876 = vmatpush3.bf16.msra.mxu1 %v14270_v9  ;;  %v14319_v9 = vld [vmem:[#allocation5 + $0x350] sm:$0xff]  }
  0x70   :  { %12877 = vmatprep.subr.bf16.mxu1 %v14272_v11  ;;  %v14320_v10 = vld [vmem:[#allocation5 + $0x3d0] sm:$0xff]  }
  0x71   :  { %v14321_v11 = vld [vmem:[#allocation5 + $0x310] sm:$0xff]  }
  0x72   :  { %12856 = vmatpush3.bf16.msra.mxu0 %v14273_v12  ;;  %v14322_v12 = vld [vmem:[#allocation5 + $0x390] sm:$0xff]  }
  0x73   :  { %12857 = vmatprep.subr.bf16.mxu0 %v14275_v14  ;;  %12878 = vmatpush3.bf16.msra.mxu1 %v14274_v13  ;;  %v14323_v13 = vld [vmem:[#allocation5 + $0x358] sm:$0xff]  }
  0x74   :  { %12879 = vmatprep.subr.bf16.mxu1 %v14276_v15  ;;  %v14324_v14 = vld [vmem:[#allocation5 + $0x3d8] sm:$0xff]  }
  0x75   :  { %v14325_v15 = vld [vmem:[#allocation5 + $0x318] sm:$0xff]  }
  0x76   :  { %12858 = vmatpush3.bf16.msra.mxu0 %v14277_v16  ;;  %v14326_v16 = vld [vmem:[#allocation5 + $0x398] sm:$0xff]  }
  0x77   :  { %12887 = vmatprep.subr.bf16.mxu0 %v14279_v19  ;;  %12880 = vmatpush3.bf16.msra.mxu1 %v14278_v17  ;;  %v14327_v17 = vld [vmem:[#allocation5 + $0x360] sm:$0xff]  }
  0x78   :  { %12909 = vmatprep.subr.bf16.mxu1 %v14280_v20  ;;  %v14329_v19 = vld [vmem:[#allocation5 + $0x320] sm:$0xff]  }
  0x79   :  { %9309 = vmatmul.mubr.bf16.vlgmr.msra.gmra.mrb[4].mxu0 %v2170_v18  ;;  %v14328_v18 = vld [vmem:[#allocation5 + $0x3e0] sm:$0xff]  }
  0x7a   :  { %12888 = vmatpush3.bf16.msra.mxu0 %v14281_v21  ;;  %9349 = vmatmul.mubr.bf16.vlgmr.msra.gmra.mrb[4].mxu1 %v2186_v23  ;;  %v14330_v20 = vld [vmem:[#allocation5 + $0x3a0] sm:$0xff]   ;;  %v14331_v21 = vld [vmem:[#allocation5 + $0x368] sm:$0xff]  }
  0x7b   :  { %12889 = vmatprep.subr.bf16.mxu0 %v14283_v24  ;;  %12910 = vmatpush3.bf16.msra.mxu1 %v14282_v22  ;;  %v14332_v22 = vld [vmem:[#allocation5 + $0x3e8] sm:$0xff]  }
  0x7c   :  { %12911 = vmatprep.subr.bf16.mxu1 %v14284_v25  ;;  %9388 = vmatprep.mubr.bf16.mxu0 %v2226_v62  ;;  %v14333_v23 = vld [vmem:[#allocation5 + $0x328] sm:$0xff]   ;;  %v14335_v25 = vld [vmem:[#allocation5 + $0x370] sm:$0xff]  }
  0x7d   :  { %9428 = vmatprep.mubr.bf16.mxu1 %v2236_v3  ;;  %v14334_v24 = vld [vmem:[#allocation5 + $0x3a8] sm:$0xff]   ;;  %v14370_v62 = vld [vmem:[#allocation5 + $0x430] sm:$0xff]  }
  0x7e   :  { %12890 = vmatpush3.bf16.msra.mxu0 %v14285_v26  ;;  %v14336_v26 = vld [vmem:[#allocation5 + $0x3f0] sm:$0xff]  }
  0x7f   :  { %12891 = vmatprep.subr.bf16.mxu0 %v14287_v28  ;;  %12912 = vmatpush3.bf16.msra.mxu1 %v14286_v27  ;;  %v14337_v27 = vld [vmem:[#allocation5 + $0x330] sm:$0xff]  }
  0x80   :  { %12913 = vmatprep.subr.bf16.mxu1 %v14288_v29  ;;  %v14338_v28 = vld [vmem:[#allocation5 + $0x3b0] sm:$0xff]   ;;  %v14339_v29 = vld [vmem:[#allocation5 + $0x378] sm:$0xff]  }
  0x81   :  { %v55_v3 = vld [vmem:[#allocation2 + $0x10] sm:$0xff] }
  0x82   :  { %12892 = vmatpush3.bf16.msra.mxu0 %v14289_v30  ;;  %v14340_v30 = vld [vmem:[#allocation5 + $0x3f8] sm:$0xff]  }
  0x83   :  { %12893 = vmatprep.subr.bf16.mxu0 %v14291_v32  ;;  %12914 = vmatpush3.bf16.msra.mxu1 %v14290_v31  ;;  %v14341_v31 = vld [vmem:[#allocation5 + $0x338] sm:$0xff]  }
  0x84   :  { %12915 = vmatprep.subr.bf16.mxu1 %v14292_v33  ;;  %v14342_v32 = vld [vmem:[#allocation5 + $0x3b8] sm:$0xff]   ;;  %v2219_v33 = vrot.slane %v15427_v60, %v15411_v35  ;;  %v14368_v60 = vld [vmem:[#allocation5 + $0x470] sm:$0xff]  }
  0x86   :  { %12894 = vmatpush3.bf16.msra.mxu0 %v14293_v34  ;;  %v14344_v34 = vld [vmem:[#allocation5 + $0x440] sm:$0xff]  }
  0x87   :  { %12895 = vmatprep.subr.bf16.mxu0 %v14295_v37  ;;  %12916 = vmatpush3.bf16.msra.mxu1 %v14294_v36  ;;  %v14345_v36 = vld [vmem:[#allocation5 + $0x4c0] sm:$0xff]  }
  0x88   :  { %12917 = vmatprep.subr.bf16.mxu1 %v14296_v38  ;;  %v14346_v37 = vld [vmem:[#allocation5 + $0x400] sm:$0xff]  }
  0x89   :  { %v14347_v38 = vld [vmem:[#allocation5 + $0x480] sm:$0xff]  }
  0x8a   :  { %12896 = vmatpush3.bf16.msra.mxu0 %v14297_v39  ;;  %v2235_v39 = vcombine.high %v2219_v33, %v2219_v33 }
  0x8b   :  { %12897 = vmatprep.subr.bf16.mxu0 %v14299_v41  ;;  %12918 = vmatpush3.bf16.msra.mxu1 %v14298_v40  ;;  %v14348_v40 = vld [vmem:[#allocation5 + $0x448] sm:$0xff]  }
  0x8c   :  { %12919 = vmatprep.subr.bf16.mxu1 %v14300_v42  ;;  %v14349_v41 = vld [vmem:[#allocation5 + $0x4c8] sm:$0xff]  }
  0x8d   :  { %v14350_v42 = vld [vmem:[#allocation5 + $0x408] sm:$0xff]  }
  0x8e   :  { %12898 = vmatpush3.bf16.msra.mxu0 %v14301_v43  ;;  %v14351_v43 = vld [vmem:[#allocation5 + $0x488] sm:$0xff]  }
  0x8f   :  { %12899 = vmatprep.subr.bf16.mxu0 %v14303_v45  ;;  %12920 = vmatpush3.bf16.msra.mxu1 %v14302_v44  ;;  %v14352_v44 = vld [vmem:[#allocation5 + $0x450] sm:$0xff]  }
  0x90   :  { %12921 = vmatprep.subr.bf16.mxu1 %v14304_v46  ;;  %v14353_v45 = vld [vmem:[#allocation5 + $0x4d0] sm:$0xff]  }
  0x91   :  { %v14354_v46 = vld [vmem:[#allocation5 + $0x410] sm:$0xff]  }
  0x92   :  { %12900 = vmatpush3.bf16.msra.mxu0 %v14305_v47  ;;  %v14355_v47 = vld [vmem:[#allocation5 + $0x490] sm:$0xff]  }
  0x93   :  { %12901 = vmatprep.subr.bf16.mxu0 %v14307_v49  ;;  %12922 = vmatpush3.bf16.msra.mxu1 %v14306_v48  ;;  %v14356_v48 = vld [vmem:[#allocation5 + $0x458] sm:$0xff]  }
  0x94   :  { %12923 = vmatprep.subr.bf16.mxu1 %v14308_v50  ;;  %v14357_v49 = vld [vmem:[#allocation5 + $0x4d8] sm:$0xff]  }
  0x95   :  { %v14358_v50 = vld [vmem:[#allocation5 + $0x418] sm:$0xff]  }
  0x96   :  { %12902 = vmatpush3.bf16.msra.mxu0 %v14309_v51  ;;  %v14359_v51 = vld [vmem:[#allocation5 + $0x498] sm:$0xff]  }
  0x97   :  { %12931 = vmatprep.subr.bf16.mxu0 %v14311_v56  ;;  %12924 = vmatpush3.bf16.msra.mxu1 %v14310_v53  ;;  %v14361_v53 = vld [vmem:[#allocation5 + $0x4e0] sm:$0xff]   ;;  %v14364_v56 = vld [vmem:[#allocation5 + $0x468] sm:$0xff]  }
  0x98   :  { %12953 = vmatprep.subr.bf16.mxu1 %v14312_v59  ;;  %v14367_v59 = vld [vmem:[#allocation5 + $0x4a8] sm:$0xff]  }
  0x99   :  { %9389 = vmatmul.mubr.bf16.vlgmr.msra.gmra.mrb[8].mxu0 %v2212_v58  ;;  %v14366_v58 = vld [vmem:[#allocation5 + $0x428] sm:$0xff]  }
  0x9a   :  { %12932 = vmatpush3.bf16.msra.mxu0 %v14313_v61  ;;  %9429 = vmatmul.mubr.bf16.vlgmr.msra.gmra.mrb[8].mxu1 %v2234_v1  ;;  %v14369_v61 = vld [vmem:[#allocation5 + $0x4f0] sm:$0xff]   ;;  %v14373_v1 = vld [vmem:[#allocation5 + $0x4f8] sm:$0xff]  }
  0x9b   :  { %12933 = vmatprep.subr.bf16.mxu0 %v14315_v2  ;;  %12954 = vmatpush3.bf16.msra.mxu1 %v14314_v63  ;;  %v14371_v63 = vld [vmem:[#allocation5 + $0x4b0] sm:$0xff]   ;;  %v14374_v2 = vld [vmem:[#allocation5 + $0x438] sm:$0xff]  }
  0x9c   :  { %9468 = vmatprep.mubr.bf16.mxu0 %v2233_v5  ;;  %12955 = vmatprep.subr.bf16.mxu1 %v14316_v4  ;;  %v14375_v4 = vld [vmem:[#allocation5 + $0x4b8] sm:$0xff]   ;;  %v2245_v5 = vrot.slane %v55_v3, %v15411_v35 }
  0x9d   :  { %9508 = vmatprep.mubr.bf16.mxu1 %v2237_v8 }
  0x9e   :  { %12934 = vmatpush3.bf16.msra.mxu0 %v14317_v6  ;;  %v2238_v6 = vcombine.high %v55_v3, %v55_v3  ;;  %v2253_v8 = vcombine.high %v2245_v5, %v2245_v5  ;;  %v14425_v3 = vld [vmem:[#allocation5 + $0x660] sm:$0xff]  }
  0x9f   :  { %12935 = vmatprep.subr.bf16.mxu0 %v14319_v9  ;;  %12956 = vmatpush3.bf16.msra.mxu1 %v14318_v7  ;;  %v14376_v7 = vld [vmem:[#allocation5 + $0x540] sm:$0xff]   ;;  %v2261_v9 = vrot.slane %v2245_v5, %v15411_v35 }
  0xa0   :  { %12957 = vmatprep.subr.bf16.mxu1 %v14320_v10  ;;  %v14377_v10 = vld [vmem:[#allocation5 + $0x5c0] sm:$0xff]  }
  0xa1   :  { %v14427_v5 = vld [vmem:[#allocation5 + $0x620] sm:$0xff]  }
  0xa2   :  { %12936 = vmatpush3.bf16.msra.mxu0 %v14321_v11  ;;  %v15438_v11 = vrot.slane %v2238_v6, %v15411_v35  ;;  %v14428_v6 = vld [vmem:[#allocation5 + $0x6a0] sm:$0xff]  }
  0xa3   :  { %12937 = vmatprep.subr.bf16.mxu0 %v14323_v13  ;;  %12958 = vmatpush3.bf16.msra.mxu1 %v14322_v12  ;;  %v14378_v12 = vld [vmem:[#allocation5 + $0x500] sm:$0xff]   ;;  %v2275_v13 = vrot.slane %v2253_v8, %v15411_v35  ;;  %v14430_v8 = vld [vmem:[#allocation5 + $0x6e8] sm:$0xff]  }
  0xa4   :  { %12959 = vmatprep.subr.bf16.mxu1 %v14324_v14  ;;  %v14379_v14 = vld [vmem:[#allocation5 + $0x580] sm:$0xff]  }
  0xa6   :  { %12938 = vmatpush3.bf16.msra.mxu0 %v14325_v15  ;;  %v2254_v15 = vcombine.high %v15438_v11, %v15438_v11 }
  0xa7   :  { %12939 = vmatprep.subr.bf16.mxu0 %v14327_v17  ;;  %12960 = vmatpush3.bf16.msra.mxu1 %v14326_v16  ;;  %v2283_v16 = vcombine.high %v2261_v9, %v2261_v9  ;;  %v14380_v17 = vld [vmem:[#allocation5 + $0x548] sm:$0xff]  }
  0xa8   :  { %12961 = vmatprep.subr.bf16.mxu1 %v14328_v18  ;;  %v2285_v18 = vcombine.high %v2275_v13, %v2275_v13 }
  0xaa   :  { %12940 = vmatpush3.bf16.msra.mxu0 %v14329_v19  ;;  %v14381_v19 = vld [vmem:[#allocation5 + $0x5c8] sm:$0xff]  }
  0xab   :  { %12941 = vmatprep.subr.bf16.mxu0 %v14331_v21  ;;  %12962 = vmatpush3.bf16.msra.mxu1 %v14330_v20  ;;  %v2282_v20 = vrot.slane %v2254_v15, %v15411_v35  ;;  %v14382_v21 = vld [vmem:[#allocation5 + $0x508] sm:$0xff]   ;;  %v14437_v15 = vld [vmem:[#allocation5 + $0x678] sm:$0xff]  }
  0xac   :  { %12963 = vmatprep.subr.bf16.mxu1 %v14332_v22  ;;  %v14383_v22 = vld [vmem:[#allocation5 + $0x588] sm:$0xff]  }
  0xae   :  { %12942 = vmatpush3.bf16.msra.mxu0 %v14333_v23  ;;  %v2286_v23 = vcombine.high %v2282_v20, %v2282_v20 }
  0xaf   :  { %12943 = vmatprep.subr.bf16.mxu0 %v14335_v25  ;;  %12964 = vmatpush3.bf16.msra.mxu1 %v14334_v24  ;;  %v14384_v24 = vld [vmem:[#allocation5 + $0x550] sm:$0xff]  }
  0xb0   :  { %12965 = vmatprep.subr.bf16.mxu1 %v14336_v26  ;;  %v14385_v25 = vld [vmem:[#allocation5 + $0x5d0] sm:$0xff]  }
  0xb1   :  { %v14386_v26 = vld [vmem:[#allocation5 + $0x510] sm:$0xff]  }
  0xb2   :  { %12944 = vmatpush3.bf16.msra.mxu0 %v14337_v27  ;;  %v14387_v27 = vld [vmem:[#allocation5 + $0x590] sm:$0xff]  }
  0xb3   :  { %12945 = vmatprep.subr.bf16.mxu0 %v14339_v29  ;;  %12966 = vmatpush3.bf16.msra.mxu1 %v14338_v28  ;;  %v14388_v28 = vld [vmem:[#allocation5 + $0x558] sm:$0xff]  }
  0xb4   :  { %12967 = vmatprep.subr.bf16.mxu1 %v14340_v30  ;;  %v14389_v29 = vld [vmem:[#allocation5 + $0x5d8] sm:$0xff]  }
  0xb5   :  { %v14390_v30 = vld [vmem:[#allocation5 + $0x518] sm:$0xff]  }
  0xb6   :  { %12946 = vmatpush3.bf16.msra.mxu0 %v14341_v31  ;;  %v14391_v31 = vld [vmem:[#allocation5 + $0x598] sm:$0xff]  }
  0xb7   :  { %12975 = vmatprep.subr.bf16.mxu0 %v14344_v34  ;;  %12968 = vmatpush3.bf16.msra.mxu1 %v14342_v32  ;;  %v14392_v32 = vld [vmem:[#allocation5 + $0x560] sm:$0xff]  }
  0xb8   :  { %12997 = vmatprep.subr.bf16.mxu1 %v14345_v36  ;;  %v14394_v34 = vld [vmem:[#allocation5 + $0x520] sm:$0xff]  }
  0xb9   :  { %9469 = vmatmul.mubr.bf16.vlgmr.msra.gmra.mrb[12].mxu0 %v2219_v33  ;;  %v14393_v33 = vld [vmem:[#allocation5 + $0x5e0] sm:$0xff]  }
  0xba   :  { %12976 = vmatpush3.bf16.msra.mxu0 %v14346_v37  ;;  %9509 = vmatmul.mubr.bf16.vlgmr.msra.gmra.mrb[12].mxu1 %v2235_v39  ;;  %v14395_v36 = vld [vmem:[#allocation5 + $0x5a0] sm:$0xff]   ;;  %v14396_v37 = vld [vmem:[#allocation5 + $0x568] sm:$0xff]  }
  0xbb   :  { %12977 = vmatprep.subr.bf16.mxu0 %v14348_v40  ;;  %12998 = vmatpush3.bf16.msra.mxu1 %v14347_v38  ;;  %v14397_v38 = vld [vmem:[#allocation5 + $0x5e8] sm:$0xff]  }
  0xbc   :  { %12999 = vmatprep.subr.bf16.mxu1 %v14349_v41  ;;  %9548 = vmatprep.mubr.bf16.mxu0 %v2275_v13  ;;  %v14398_v39 = vld [vmem:[#allocation5 + $0x528] sm:$0xff]   ;;  %v14400_v41 = vld [vmem:[#allocation5 + $0x570] sm:$0xff]  }
  0xbd   :  { %9588 = vmatprep.mubr.bf16.mxu1 %v2285_v18  ;;  %v14399_v40 = vld [vmem:[#allocation5 + $0x5a8] sm:$0xff]   ;;  %v14435_v13 = vld [vmem:[#allocation5 + $0x630] sm:$0xff]   ;;  %v56_v18 = vld [vmem:[#allocation2 + $0x18] sm:$0xff] }
  0xbe   :  { %12978 = vmatpush3.bf16.msra.mxu0 %v14350_v42  ;;  %v14401_v42 = vld [vmem:[#allocation5 + $0x5f0] sm:$0xff]  }
  0xbf   :  { %12979 = vmatprep.subr.bf16.mxu0 %v14352_v44  ;;  %13000 = vmatpush3.bf16.msra.mxu1 %v14351_v43  ;;  %v14402_v43 = vld [vmem:[#allocation5 + $0x530] sm:$0xff]  }
  0xc0   :  { %13001 = vmatprep.subr.bf16.mxu1 %v14353_v45  ;;  %v14403_v44 = vld [vmem:[#allocation5 + $0x5b0] sm:$0xff]   ;;  %v14404_v45 = vld [vmem:[#allocation5 + $0x578] sm:$0xff]  }
  0xc2   :  { %12980 = vmatpush3.bf16.msra.mxu0 %v14354_v46  ;;  %v14405_v46 = vld [vmem:[#allocation5 + $0x5f8] sm:$0xff]  }
  0xc3   :  { %12981 = vmatprep.subr.bf16.mxu0 %v14356_v48  ;;  %13002 = vmatpush3.bf16.msra.mxu1 %v14355_v47  ;;  %v14406_v47 = vld [vmem:[#allocation5 + $0x538] sm:$0xff]  }
  0xc4   :  { %13003 = vmatprep.subr.bf16.mxu1 %v14357_v49  ;;  %v14407_v48 = vld [vmem:[#allocation5 + $0x5b8] sm:$0xff]   ;;  %v2268_v49 = vrot.slane %v15438_v11, %v15411_v35  ;;  %v14433_v11 = vld [vmem:[#allocation5 + $0x670] sm:$0xff]  }
  0xc6   :  { %12982 = vmatpush3.bf16.msra.mxu0 %v14358_v50  ;;  %v14409_v50 = vld [vmem:[#allocation5 + $0x640] sm:$0xff]  }
  0xc7   :  { %12983 = vmatprep.subr.bf16.mxu0 %v14360_v52  ;;  %13004 = vmatpush3.bf16.msra.mxu1 %v14359_v51  ;;  %v14410_v51 = vld [vmem:[#allocation5 + $0x6c0] sm:$0xff]  }
  0xc8   :  { %13005 = vmatprep.subr.bf16.mxu1 %v14361_v53  ;;  %v14411_v52 = vld [vmem:[#allocation5 + $0x600] sm:$0xff]  }
  0xc9   :  { %v14412_v53 = vld [vmem:[#allocation5 + $0x680] sm:$0xff]  }
  0xca   :  { %12984 = vmatpush3.bf16.msra.mxu0 %v14362_v54  ;;  %v2284_v54 = vcombine.high %v2268_v49, %v2268_v49 }
  0xcb   :  { %12985 = vmatprep.subr.bf16.mxu0 %v14364_v56  ;;  %13006 = vmatpush3.bf16.msra.mxu1 %v14363_v55  ;;  %v14413_v55 = vld [vmem:[#allocation5 + $0x648] sm:$0xff]  }
  0xcc   :  { %13007 = vmatprep.subr.bf16.mxu1 %v14365_v57  ;;  %v14414_v56 = vld [vmem:[#allocation5 + $0x6c8] sm:$0xff]  }
  0xcd   :  { %v14415_v57 = vld [vmem:[#allocation5 + $0x608] sm:$0xff]  }
  0xce   :  { %12986 = vmatpush3.bf16.msra.mxu0 %v14366_v58  ;;  %v14416_v58 = vld [vmem:[#allocation5 + $0x688] sm:$0xff]  }
  0xcf   :  { %12987 = vmatprep.subr.bf16.mxu0 %v14368_v60  ;;  %13008 = vmatpush3.bf16.msra.mxu1 %v14367_v59  ;;  %v14417_v59 = vld [vmem:[#allocation5 + $0x650] sm:$0xff]  }
  0xd0   :  { %13009 = vmatprep.subr.bf16.mxu1 %v14369_v61  ;;  %v14418_v60 = vld [vmem:[#allocation5 + $0x6d0] sm:$0xff]  }
  0xd1   :  { %v14419_v61 = vld [vmem:[#allocation5 + $0x610] sm:$0xff]  }
  0xd2   :  { %12988 = vmatpush3.bf16.msra.mxu0 %v14370_v62  ;;  %v14420_v62 = vld [vmem:[#allocation5 + $0x690] sm:$0xff]  }
  0xd3   :  { %12989 = vmatprep.subr.bf16.mxu0 %v14372_v0  ;;  %13010 = vmatpush3.bf16.msra.mxu1 %v14371_v63  ;;  %v14421_v63 = vld [vmem:[#allocation5 + $0x658] sm:$0xff]  }
  0xd4   :  { %13011 = vmatprep.subr.bf16.mxu1 %v14373_v1  ;;  %v14422_v0 = vld [vmem:[#allocation5 + $0x6d8] sm:$0xff]  }
  0xd5   :  { %v14423_v1 = vld [vmem:[#allocation5 + $0x618] sm:$0xff]  }
  0xd6   :  { %12990 = vmatpush3.bf16.msra.mxu0 %v14374_v2  ;;  %v14424_v2 = vld [vmem:[#allocation5 + $0x698] sm:$0xff]  }
  0xd7   :  { %13019 = vmatprep.subr.bf16.mxu0 %v14376_v7  ;;  %13012 = vmatpush3.bf16.msra.mxu1 %v14375_v4  ;;  %v14426_v4 = vld [vmem:[#allocation5 + $0x6e0] sm:$0xff]   ;;  %v14429_v7 = vld [vmem:[#allocation5 + $0x668] sm:$0xff]  }
  0xd8   :  { %13041 = vmatprep.subr.bf16.mxu1 %v14377_v10  ;;  %v14432_v10 = vld [vmem:[#allocation5 + $0x6a8] sm:$0xff]  }
  0xd9   :  { %9549 = vmatmul.mubr.bf16.vlgmr.msra.gmra.mrb[16].mxu0 %v2261_v9  ;;  %v14431_v9 = vld [vmem:[#allocation5 + $0x628] sm:$0xff]  }
  0xda   :  { %13020 = vmatpush3.bf16.msra.mxu0 %v14378_v12  ;;  %9589 = vmatmul.mubr.bf16.vlgmr.msra.gmra.mrb[16].mxu1 %v2283_v16  ;;  %v14434_v12 = vld [vmem:[#allocation5 + $0x6f0] sm:$0xff]   ;;  %v14438_v16 = vld [vmem:[#allocation5 + $0x6f8] sm:$0xff]  }
  0xdb   :  { %13021 = vmatprep.subr.bf16.mxu0 %v14380_v17  ;;  %13042 = vmatpush3.bf16.msra.mxu1 %v14379_v14  ;;  %v14436_v14 = vld [vmem:[#allocation5 + $0x6b0] sm:$0xff]   ;;  %v14439_v17 = vld [vmem:[#allocation5 + $0x638] sm:$0xff]  }
  0xdc   :  { %9628 = vmatprep.mubr.bf16.mxu0 %v2282_v20  ;;  %13043 = vmatprep.subr.bf16.mxu1 %v14381_v19  ;;  %v2294_v19 = vrot.slane %v56_v18, %v15411_v35  ;;  %v14441_v20 = vld [vmem:[#allocation5 + $0x740] sm:$0xff]  }
  0xdd   :  { %9668 = vmatprep.mubr.bf16.mxu1 %v2286_v23 }
  0xde   :  { %13022 = vmatpush3.bf16.msra.mxu0 %v14382_v21  ;;  %v2287_v21 = vcombine.high %v56_v18, %v56_v18  ;;  %v2302_v23 = vcombine.high %v2294_v19, %v2294_v19 }
  0xdf   :  { %13023 = vmatprep.subr.bf16.mxu0 %v14384_v24  ;;  %13044 = vmatpush3.bf16.msra.mxu1 %v14383_v22  ;;  %v14440_v22 = vld [vmem:[#allocation5 + $0x6b8] sm:$0xff]   ;;  %v2310_v24 = vrot.slane %v2294_v19, %v15411_v35  ;;  %v14478_v19 = vld [vmem:[#allocation5 + $0x848] sm:$0xff]  }
  0xe0   :  { %13045 = vmatprep.subr.bf16.mxu1 %v14385_v25  ;;  %v14442_v25 = vld [vmem:[#allocation5 + $0x7c0] sm:$0xff]  }
  0xe2   :  { %13024 = vmatpush3.bf16.msra.mxu0 %v14386_v26  ;;  %v15449_v26 = vrot.slane %v2287_v21, %v15411_v35  ;;  %v14480_v21 = vld [vmem:[#allocation5 + $0x808] sm:$0xff]  }
  0xe3   :  { %13025 = vmatprep.subr.bf16.mxu0 %v14388_v28  ;;  %13046 = vmatpush3.bf16.msra.mxu1 %v14387_v27  ;;  %v2324_v27 = vrot.slane %v2302_v23, %v15411_v35  ;;  %v14443_v28 = vld [vmem:[#allocation5 + $0x700] sm:$0xff]   ;;  %v14482_v23 = vld [vmem:[#allocation5 + $0x850] sm:$0xff]  }
  0xe4   :  { %13047 = vmatprep.subr.bf16.mxu1 %v14389_v29  ;;  %v2303_v29 = vcombine.high %v15449_v26, %v15449_v26 }
  0xe6   :  { %13026 = vmatpush3.bf16.msra.mxu0 %v14390_v30  ;;  %v2332_v30 = vcombine.high %v2310_v24, %v2310_v24 }
  0xe7   :  { %13027 = vmatprep.subr.bf16.mxu0 %v14392_v32  ;;  %13048 = vmatpush3.bf16.msra.mxu1 %v14391_v31  ;;  %v14445_v31 = vld [vmem:[#allocation5 + $0x748] sm:$0xff]   ;;  %v2334_v32 = vcombine.high %v2324_v27, %v2324_v27 }
  0xe8   :  { %13049 = vmatprep.subr.bf16.mxu1 %v14393_v33  ;;  %v14444_v33 = vld [vmem:[#allocation5 + $0x780] sm:$0xff]  }
  0xea   :  { %13028 = vmatpush3.bf16.msra.mxu0 %v14394_v34  ;;  %v2331_v34 = vrot.slane %v2303_v29, %v15411_v35  ;;  %v14488_v29 = vld [vmem:[#allocation5 + $0x818] sm:$0xff]  }
  0xeb   :  { %13029 = vmatprep.subr.bf16.mxu0 %v14396_v37  ;;  %13050 = vmatpush3.bf16.msra.mxu1 %v14395_v36  ;;  %v14446_v36 = vld [vmem:[#allocation5 + $0x7c8] sm:$0xff]  }
  0xec   :  { %13051 = vmatprep.subr.bf16.mxu1 %v14397_v38  ;;  %v14447_v37 = vld [vmem:[#allocation5 + $0x708] sm:$0xff]   ;;  %v2335_v38 = vcombine.high %v2331_v34, %v2331_v34 }
  0xee   :  { %13030 = vmatpush3.bf16.msra.mxu0 %v14398_v39  ;;  %v14449_v39 = vld [vmem:[#allocation5 + $0x750] sm:$0xff]  }
  0xef   :  { %13031 = vmatprep.subr.bf16.mxu0 %v14400_v41  ;;  %13052 = vmatpush3.bf16.msra.mxu1 %v14399_v40  ;;  %v14448_v40 = vld [vmem:[#allocation5 + $0x788] sm:$0xff]   ;;  %v14450_v41 = vld [vmem:[#allocation5 + $0x7d0] sm:$0xff]  }
  0xf0   :  { %13053 = vmatprep.subr.bf16.mxu1 %v14401_v42  ;;  %v14451_v42 = vld [vmem:[#allocation5 + $0x710] sm:$0xff]  }
  0xf2   :  { %13032 = vmatpush3.bf16.msra.mxu0 %v14402_v43  ;;  %v14453_v43 = vld [vmem:[#allocation5 + $0x758] sm:$0xff]  }
  0xf3   :  { %13033 = vmatprep.subr.bf16.mxu0 %v14404_v45  ;;  %13054 = vmatpush3.bf16.msra.mxu1 %v14403_v44  ;;  %v14452_v44 = vld [vmem:[#allocation5 + $0x790] sm:$0xff]   ;;  %v14454_v45 = vld [vmem:[#allocation5 + $0x7d8] sm:$0xff]  }
  0xf4   :  { %13055 = vmatprep.subr.bf16.mxu1 %v14405_v46  ;;  %v14455_v46 = vld [vmem:[#allocation5 + $0x718] sm:$0xff]  }
  0xf6   :  { %13034 = vmatpush3.bf16.msra.mxu0 %v14406_v47  ;;  %v14457_v47 = vld [vmem:[#allocation5 + $0x760] sm:$0xff]  }
  0xf7   :  { %13063 = vmatprep.subr.bf16.mxu0 %v14409_v50  ;;  %13056 = vmatpush3.bf16.msra.mxu1 %v14407_v48  ;;  %v14456_v48 = vld [vmem:[#allocation5 + $0x798] sm:$0xff]   ;;  %v14459_v50 = vld [vmem:[#allocation5 + $0x720] sm:$0xff]  }
  0xf8   :  { %13085 = vmatprep.subr.bf16.mxu1 %v14410_v51  ;;  %v14461_v51 = vld [vmem:[#allocation5 + $0x768] sm:$0xff]  }
  0xf9   :  { %9629 = vmatmul.mubr.bf16.vlgmr.msra.gmra.mrb[20].mxu0 %v2268_v49  ;;  %v14458_v49 = vld [vmem:[#allocation5 + $0x7e0] sm:$0xff]  }
  0xfa   :  { %13064 = vmatpush3.bf16.msra.mxu0 %v14411_v52  ;;  %9669 = vmatmul.mubr.bf16.vlgmr.msra.gmra.mrb[20].mxu1 %v2284_v54  ;;  %v14460_v52 = vld [vmem:[#allocation5 + $0x7a0] sm:$0xff]  }
  0xfb   :  { %13065 = vmatprep.subr.bf16.mxu0 %v14413_v55  ;;  %13086 = vmatpush3.bf16.msra.mxu1 %v14412_v53  ;;  %v14462_v53 = vld [vmem:[#allocation5 + $0x7e8] sm:$0xff]   ;;  %v11774_v54 = vld [vmem:[#allocation7] ss:$0 sm:$0xff] }
  0xfc   :  { %13087 = vmatprep.subr.bf16.mxu1 %v14414_v56  ;;  %9708 = vmatprep.mubr.bf16.mxu0 %v2324_v27  ;;  %v14463_v55 = vld [vmem:[#allocation5 + $0x728] sm:$0xff]   ;;  %v14486_v27 = vld [vmem:[#allocation5 + $0x858] sm:$0xff]  }
  0xfd   :  { %9748 = vmatprep.mubr.bf16.mxu1 %v2334_v32  ;;  %v14491_v32 = vld [vmem:[#allocation5 + $0x8e0] sm:$0xff]  }
  0xfe   :  { %13066 = vmatpush3.bf16.msra.mxu0 %v14415_v57  ;;  %v14465_v57 = vld [vmem:[#allocation5 + $0x770] sm:$0xff]  }
  0xff   :  { %13067 = vmatprep.subr.bf16.mxu0 %v14417_v59  ;;  %13088 = vmatpush3.bf16.msra.mxu1 %v14416_v58  ;;  %v14464_v59 = vld [vmem:[#allocation5 + $0x7a8] sm:$0xff]  }
 0x100   :  { %13089 = vmatprep.subr.bf16.mxu1 %v14418_v60 }
 0x102   :  { %13068 = vmatpush3.bf16.msra.mxu0 %v14419_v61 }
 0x103   :  { %13069 = vmatprep.subr.bf16.mxu0 %v14421_v63  ;;  %13090 = vmatpush3.bf16.msra.mxu1 %v14420_v62  ;;  %v14466_v63 = vld [vmem:[#allocation5 + $0x7f0] sm:$0xff]  }
 0x104   :  { %13091 = vmatprep.subr.bf16.mxu1 %v14422_v0  ;;  %v14467_v0 = vld [vmem:[#allocation5 + $0x730] sm:$0xff]  }
 0x106   :  { %13070 = vmatpush3.bf16.msra.mxu0 %v14423_v1 }
 0x107   :  { %13071 = vmatprep.subr.bf16.mxu0 %v14425_v3  ;;  %13092 = vmatpush3.bf16.msra.mxu1 %v14424_v2  ;;  %v14468_v3 = vld [vmem:[#allocation5 + $0x7b0] sm:$0xff]  }
 0x108   :  { %13093 = vmatprep.subr.bf16.mxu1 %v14426_v4 }
 0x10a   :  { %13072 = vmatpush3.bf16.msra.mxu0 %v14427_v5 }
 0x10b   :  { %13073 = vmatprep.subr.bf16.mxu0 %v14429_v7  ;;  %13094 = vmatpush3.bf16.msra.mxu1 %v14428_v6  ;;  %v14469_v7 = vld [vmem:[#allocation5 + $0x778] sm:$0xff]  }
 0x10c   :  { %13095 = vmatprep.subr.bf16.mxu1 %v14430_v8 }
 0x10e   :  { %13074 = vmatpush3.bf16.msra.mxu0 %v14431_v9  ;;  %v14470_v9 = vld [vmem:[#allocation5 + $0x7f8] sm:$0xff]  }
 0x10f   :  { %13075 = vmatprep.subr.bf16.mxu0 %v14433_v11  ;;  %13096 = vmatpush3.bf16.msra.mxu1 %v14432_v10  ;;  %v14471_v11 = vld [vmem:[#allocation5 + $0x738] sm:$0xff]  }
 0x110   :  { %13097 = vmatprep.subr.bf16.mxu1 %v14434_v12  ;;  %v14472_v12 = vld [vmem:[#allocation5 + $0x7b8] sm:$0xff]  }
 0x112   :  { %13076 = vmatpush3.bf16.msra.mxu0 %v14435_v13  ;;  %v2317_v13 = vrot.slane %v15449_v26, %v15411_v35  ;;  %v14485_v26 = vld [vmem:[#allocation5 + $0x890] sm:$0xff]  }
 0x113   :  { %13077 = vmatprep.subr.bf16.mxu0 %v14437_v15  ;;  %13098 = vmatpush3.bf16.msra.mxu1 %v14436_v14  ;;  %v14474_v14 = vld [vmem:[#allocation5 + $0x840] sm:$0xff]  }
 0x114   :  { %13099 = vmatprep.subr.bf16.mxu1 %v14438_v16  ;;  %v14475_v15 = vld [vmem:[#allocation5 + $0x8c0] sm:$0xff]   ;;  %v2333_v18 = vcombine.high %v2317_v13, %v2317_v13 }
 0x115   :  { %v14476_v16 = vld [vmem:[#allocation5 + $0x800] sm:$0xff]  }
 0x116   :  { %13078 = vmatpush3.bf16.msra.mxu0 %v14439_v17  ;;  %v14477_v17 = vld [vmem:[#allocation5 + $0x880] sm:$0xff]  }
 0x117   :  { %13107 = vmatprep.subr.bf16.mxu0 %v14441_v20  ;;  %13100 = vmatpush3.bf16.msra.mxu1 %v14440_v22  ;;  %v14479_v20 = vld [vmem:[#allocation5 + $0x8c8] sm:$0xff]  }
 0x118   :  { %13129 = vmatprep.subr.bf16.mxu1 %v14442_v25  ;;  %v14481_v22 = vld [vmem:[#allocation5 + $0x888] sm:$0xff]   ;;  %v14484_v25 = vld [vmem:[#allocation5 + $0x810] sm:$0xff]  }
 0x119   :  { %9709 = vmatmul.mubr.bf16.vlgmr.msra.gmra.mrb[24].mxu0 %v2310_v24  ;;  %v14483_v24 = vld [vmem:[#allocation5 + $0x8d0] sm:$0xff]  }
 0x11a   :  { %13108 = vmatpush3.bf16.msra.mxu0 %v14443_v28  ;;  %9749 = vmatmul.mubr.bf16.vlgmr.msra.gmra.mrb[24].mxu1 %v2332_v30  ;;  %v14487_v28 = vld [vmem:[#allocation5 + $0x8d8] sm:$0xff]  }
 0x11b   :  { %13109 = vmatprep.subr.bf16.mxu0 %v14445_v31  ;;  %13130 = vmatpush3.bf16.msra.mxu1 %v14444_v33  ;;  %v14489_v30 = vld [vmem:[#allocation5 + $0x898] sm:$0xff]   ;;  %v14490_v31 = vld [vmem:[#allocation5 + $0x860] sm:$0xff]  }
 0x11c   :  { %9788 = vmatprep.mubr.bf16.mxu0 %v2331_v34  ;;  %13131 = vmatprep.subr.bf16.mxu1 %v14446_v36  ;;  %v14492_v33 = vld [vmem:[#allocation5 + $0x820] sm:$0xff]   ;;  %v14494_v36 = vld [vmem:[#allocation5 + $0x868] sm:$0xff]  }
 0x11d   :  { %9828 = vmatprep.mubr.bf16.mxu1 %v2335_v38  ;;  %v14493_v34 = vld [vmem:[#allocation5 + $0x8a0] sm:$0xff]   ;;  %v14496_v38 = vld [vmem:[#allocation5 + $0x828] sm:$0xff]  }
 0x11e   :  { %13110 = vmatpush3.bf16.msra.mxu0 %v14447_v37  ;;  %v14495_v37 = vld [vmem:[#allocation5 + $0x8e8] sm:$0xff]  }
 0x11f   :  { %13111 = vmatprep.subr.bf16.mxu0 %v14449_v39  ;;  %13132 = vmatpush3.bf16.msra.mxu1 %v14448_v40  ;;  %v14497_v39 = vld [vmem:[#allocation5 + $0x8a8] sm:$0xff]  }
 0x120   :  { %13133 = vmatprep.subr.bf16.mxu1 %v14450_v41  ;;  %v14498_v41 = vld [vmem:[#allocation5 + $0x870] sm:$0xff]  }
 0x122   :  { %13112 = vmatpush3.bf16.msra.mxu0 %v14451_v42 }
 0x123   :  { %13113 = vmatprep.subr.bf16.mxu0 %v14453_v43  ;;  %13134 = vmatpush3.bf16.msra.mxu1 %v14452_v44  ;;  %v14499_v43 = vld [vmem:[#allocation5 + $0x8f0] sm:$0xff]  }
 0x124   :  { %13135 = vmatprep.subr.bf16.mxu1 %v14454_v45 }
 0x126   :  { %13114 = vmatpush3.bf16.msra.mxu0 %v14455_v46 }
 0x127   :  { %13115 = vmatprep.subr.bf16.mxu0 %v14457_v47  ;;  %13136 = vmatpush3.bf16.msra.mxu1 %v14456_v48 }
 0x128   :  { %13137 = vmatprep.subr.bf16.mxu1 %v14458_v49  ;;  %v14500_v49 = vld [vmem:[#allocation5 + $0x830] sm:$0xff]  }
 0x12a   :  { %13116 = vmatpush3.bf16.msra.mxu0 %v14459_v50  ;;  %v14501_v50 = vld [vmem:[#allocation5 + $0x8b0] sm:$0xff]  }
 0x12b   :  { %13117 = vmatprep.subr.bf16.mxu0 %v14461_v51  ;;  %13138 = vmatpush3.bf16.msra.mxu1 %v14460_v52 }
 0x12c   :  { %v12815_v56 = vpop.f32.mrb[0].mxu0  ;;  %13139 = vmatprep.subr.bf16.mxu1 %v14462_v53 }
 0x12d   :  { %v12816_v58 = vpop.f32.mrb[1].mxu0  ;;  %v12837_v60 = vpop.f32.mrb[0].mxu1 }
 0x12e   :  { %v12817_v61 = vadd.f32 %v12816_v58, %v12815_v56  ;;  %v12818_v62 = vpop.f32.mrb[2].mxu0  ;;  %v12838_v1 = vpop.f32.mrb[1].mxu1  ;;  %13118 = vmatpush3.bf16.msra.mxu0 %v14463_v55  ;;  %v14503_v56 = vld [vmem:[#allocation5 + $0x8f8] sm:$0xff]  }
 0x12f   :  { %v12819_v2 = vpop.f32.mrb[3].mxu0  ;;  %v12839_v5 = vadd.f32 %v12838_v1, %v12837_v60  ;;  %v12840_v6 = vpop.f32.mrb[2].mxu1  ;;  %13119 = vmatprep.subr.bf16.mxu0 %v14465_v57  ;;  %13140 = vmatpush3.bf16.msra.mxu1 %v14464_v59  ;;  %v14504_v58 = vld [vmem:[#allocation5 + $0x838] sm:$0xff]   ;;  %v57_v59 = vld [vmem:[#allocation2 + $0x20] sm:$0xff] }
 0x130   :  { %v9231_v4 = vadd.f32 %v12817_v61, %v11774_v54  ;;  %v12841_v8 = vpop.f32.mrb[3].mxu1  ;;  %13141 = vmatprep.subr.bf16.mxu1 %v14466_v63  ;;  %v14502_v54 = vld [vmem:[#allocation5 + $0x878] sm:$0xff]   ;;  %v2343_v60 = vrot.slane %v57_v59, %v15411_v35  ;;  %v14506_v61 = vld [vmem:[#allocation5 + $0x940] sm:$0xff]   ;;  %v2336_v62 = vcombine.high %v57_v59, %v57_v59  ;;  %v14543_v59 = vld [vmem:[#allocation5 + $0xa48] sm:$0xff]  }
 0x131   :  { %v14505_v63 = vld [vmem:[#allocation5 + $0x8b8] sm:$0xff]   ;;  %v14507_v2 = vld [vmem:[#allocation5 + $0x9c0] sm:$0xff]  }
 0x132   :  { %v15455_v10 = vadd.f32 %v12839_v5, %v9231_v4  ;;  %13120 = vmatpush3.bf16.msra.mxu0 %v14467_v0  ;;  %v2351_v0 = vcombine.high %v2343_v60, %v2343_v60  ;;  %v2359_v1 = vrot.slane %v2343_v60, %v15411_v35  ;;  %v14508_v4 = vld [vmem:[#allocation5 + $0x900] sm:$0xff]   ;;  %v14544_v60 = vld [vmem:[#allocation5 + $0xac8] sm:$0xff]  }
 0x133   :  { %13121 = vmatprep.subr.bf16.mxu0 %v14469_v7  ;;  %13142 = vmatpush3.bf16.msra.mxu1 %v14468_v3  ;;  %v15465_v3 = vrot.slane %v2336_v62, %v15411_v35  ;;  %v14509_v6 = vld [vmem:[#allocation5 + $0x980] sm:$0xff]   ;;  %v14546_v62 = vld [vmem:[#allocation5 + $0xa88] sm:$0xff]  }
 0x134   :  { %13143 = vmatprep.subr.bf16.mxu1 %v14470_v9  ;;  %v2373_v5 = vrot.slane %v2351_v0, %v15411_v35  ;;  %v2381_v8 = vcombine.high %v2359_v1, %v2359_v1  ;;  %v14510_v9 = vld [vmem:[#allocation5 + $0x948] sm:$0xff]   ;;  %v14548_v0 = vld [vmem:[#allocation5 + $0xad0] sm:$0xff]  }
 0x135   :  { %v2352_v7 = vcombine.high %v15465_v3, %v15465_v3 }
 0x136   :  { %13122 = vmatpush3.bf16.msra.mxu0 %v14471_v11  ;;  %v14511_v11 = vld [vmem:[#allocation5 + $0x9c8] sm:$0xff]  }
 0x137   :  { %13151 = vmatprep.subr.bf16.mxu0 %v14474_v14  ;;  %13144 = vmatpush3.bf16.msra.mxu1 %v14472_v12  ;;  %v2380_v12 = vrot.slane %v2352_v7, %v15411_v35  ;;  %v14513_v14 = vld [vmem:[#allocation5 + $0x988] sm:$0xff]   ;;  %v14555_v7 = vld [vmem:[#allocation5 + $0xa60] sm:$0xff]  }
 0x138   :  { %13173 = vmatprep.subr.bf16.mxu1 %v14475_v15 }
 0x139   :  { %9789 = vmatmul.mubr.bf16.vlgmr.msra.gmra.mrb[28].mxu0 %v2317_v13  ;;  %v14512_v13 = vld [vmem:[#allocation5 + $0x908] sm:$0xff]   ;;  %v2384_v15 = vcombine.high %v2380_v12, %v2380_v12 }
 0x13a   :  { %13152 = vmatpush3.bf16.msra.mxu0 %v14476_v16  ;;  %9829 = vmatmul.mubr.bf16.vlgmr.msra.gmra.mrb[28].mxu1 %v2333_v18  ;;  %v14514_v16 = vld [vmem:[#allocation5 + $0x950] sm:$0xff]  }
 0x13b   :  { %13153 = vmatprep.subr.bf16.mxu0 %v14478_v19  ;;  %13174 = vmatpush3.bf16.msra.mxu1 %v14477_v17  ;;  %v14515_v17 = vld [vmem:[#allocation5 + $0x9d0] sm:$0xff]  }
 0x13c   :  { %13175 = vmatprep.subr.bf16.mxu1 %v14479_v20  ;;  %9868 = vmatprep.mubr.bf16.mxu0 %v2373_v5  ;;  %v14516_v18 = vld [vmem:[#allocation5 + $0x910] sm:$0xff]   ;;  %v14518_v20 = vld [vmem:[#allocation5 + $0x958] sm:$0xff]  }
 0x13d   :  { %v14517_v19 = vld [vmem:[#allocation5 + $0x990] sm:$0xff]  }
 0x13e   :  { %13154 = vmatpush3.bf16.msra.mxu0 %v14480_v21  ;;  %v14519_v21 = vld [vmem:[#allocation5 + $0x9d8] sm:$0xff]  }
 0x13f   :  { %13155 = vmatprep.subr.bf16.mxu0 %v14482_v23  ;;  %13176 = vmatpush3.bf16.msra.mxu1 %v14481_v22  ;;  %v14520_v22 = vld [vmem:[#allocation5 + $0x918] sm:$0xff]  }
 0x140   :  { %13177 = vmatprep.subr.bf16.mxu1 %v14483_v24  ;;  %v14521_v23 = vld [vmem:[#allocation5 + $0x998] sm:$0xff]   ;;  %v14522_v24 = vld [vmem:[#allocation5 + $0x960] sm:$0xff]  }
 0x142   :  { %13156 = vmatpush3.bf16.msra.mxu0 %v14484_v25  ;;  %v14523_v25 = vld [vmem:[#allocation5 + $0x9e0] sm:$0xff]  }
 0x143   :  { %13157 = vmatprep.subr.bf16.mxu0 %v14486_v27  ;;  %13178 = vmatpush3.bf16.msra.mxu1 %v14485_v26  ;;  %v14524_v26 = vld [vmem:[#allocation5 + $0x920] sm:$0xff]  }
 0x144   :  { %13179 = vmatprep.subr.bf16.mxu1 %v14487_v28  ;;  %v14525_v27 = vld [vmem:[#allocation5 + $0x9a0] sm:$0xff]   ;;  %v14526_v28 = vld [vmem:[#allocation5 + $0x968] sm:$0xff]  }
 0x146   :  { %13158 = vmatpush3.bf16.msra.mxu0 %v14488_v29  ;;  %v14527_v29 = vld [vmem:[#allocation5 + $0x9e8] sm:$0xff]  }
 0x147   :  { %13159 = vmatprep.subr.bf16.mxu0 %v14490_v31  ;;  %13180 = vmatpush3.bf16.msra.mxu1 %v14489_v30  ;;  %v14528_v30 = vld [vmem:[#allocation5 + $0x928] sm:$0xff]  }
 0x148   :  { %13181 = vmatprep.subr.bf16.mxu1 %v14491_v32  ;;  %v14529_v32 = vld [vmem:[#allocation5 + $0x9a8] sm:$0xff]  }
 0x14a   :  { %13160 = vmatpush3.bf16.msra.mxu0 %v14492_v33 }
 0x14b   :  { %13161 = vmatprep.subr.bf16.mxu0 %v14494_v36  ;;  %13182 = vmatpush3.bf16.msra.mxu1 %v14493_v34  ;;  %v14530_v34 = vld [vmem:[#allocation5 + $0x970] sm:$0xff]  }
 0x14c   :  { %v12859_v40 = vpop.f32.mrb[4].mxu0  ;;  %13183 = vmatprep.subr.bf16.mxu1 %v14495_v37 }
 0x14d   :  { %v12860_v42 = vpop.f32.mrb[5].mxu0  ;;  %v12881_v44 = vpop.f32.mrb[4].mxu1 }
 0x14e   :  { %v12861_v45 = vadd.f32 %v12860_v42, %v12859_v40  ;;  %v12862_v46 = vpop.f32.mrb[6].mxu0  ;;  %v12882_v47 = vpop.f32.mrb[5].mxu1  ;;  %13162 = vmatpush3.bf16.msra.mxu0 %v14496_v38  ;;  %v14532_v40 = vld [vmem:[#allocation5 + $0x930] sm:$0xff]  }
 0x14f   :  { %v12863_v48 = vpop.f32.mrb[7].mxu0  ;;  %v12883_v52 = vadd.f32 %v12882_v47, %v12881_v44  ;;  %v12884_v53 = vpop.f32.mrb[6].mxu1  ;;  %13163 = vmatprep.subr.bf16.mxu0 %v14498_v41  ;;  %13184 = vmatpush3.bf16.msra.mxu1 %v14497_v39  ;;  %v14531_v39 = vld [vmem:[#allocation5 + $0x9f0] sm:$0xff]  }
 0x150   :  { %v9311_v51 = vadd.f32 %v12861_v45, %v15455_v10  ;;  %v12885_v55 = vpop.f32.mrb[7].mxu1  ;;  %13185 = vmatprep.subr.bf16.mxu1 %v14499_v43  ;;  %v2383_v10 = vcombine.high %v2373_v5, %v2373_v5  ;;  %v14533_v46 = vld [vmem:[#allocation5 + $0x9b0] sm:$0xff]   ;;  %v14534_v48 = vld [vmem:[#allocation5 + $0x978] sm:$0xff]   ;;  %v2366_v53 = vrot.slane %v15465_v3, %v15411_v35 }
 0x151   :  { %v14540_v55 = vld [vmem:[#allocation5 + $0xac0] sm:$0xff]   ;;  %v14551_v3 = vld [vmem:[#allocation5 + $0xa58] sm:$0xff]  }
 0x152   :  { %v15460_v57 = vadd.f32 %v12883_v52, %v9311_v51  ;;  %13164 = vmatpush3.bf16.msra.mxu0 %v14500_v49  ;;  %9908 = vmatprep.mubr.bf16.mxu1 %v2383_v10  ;;  %v14536_v51 = vld [vmem:[#allocation5 + $0x938] sm:$0xff]   ;;  %v14558_v10 = vld [vmem:[#allocation5 + $0xaa0] sm:$0xff]  }
 0x153   :  { %13165 = vmatprep.subr.bf16.mxu0 %v14502_v54  ;;  %13186 = vmatpush3.bf16.msra.mxu1 %v14501_v50  ;;  %v14535_v50 = vld [vmem:[#allocation5 + $0x9f8] sm:$0xff]   ;;  %v14539_v54 = vld [vmem:[#allocation5 + $0xa40] sm:$0xff]  }
 0x154   :  { %13187 = vmatprep.subr.bf16.mxu1 %v14503_v56  ;;  %v14537_v52 = vld [vmem:[#allocation5 + $0x9b8] sm:$0xff]   ;;  %v14541_v56 = vld [vmem:[#allocation5 + $0xa00] sm:$0xff]  }
 0x155   :  { %v14553_v5 = vld [vmem:[#allocation5 + $0xa18] sm:$0xff]  }
 0x156   :  { %13166 = vmatpush3.bf16.msra.mxu0 %v14504_v58  ;;  %v2382_v58 = vcombine.high %v2366_v53, %v2366_v53 }
 0x157   :  { %13195 = vmatprep.subr.bf16.mxu0 %v14506_v61  ;;  %13188 = vmatpush3.bf16.msra.mxu1 %v14505_v63  ;;  %v14545_v61 = vld [vmem:[#allocation5 + $0xa08] sm:$0xff]   ;;  %v14547_v63 = vld [vmem:[#allocation5 + $0xa50] sm:$0xff]  }
 0x158   :  { %13217 = vmatprep.subr.bf16.mxu1 %v14507_v2  ;;  %v14550_v2 = vld [vmem:[#allocation5 + $0xa90] sm:$0xff]  }
 0x159   :  { %9869 = vmatmul.mubr.bf16.vlgmr.msra.gmra.mrb[32].mxu0 %v2359_v1  ;;  %v14549_v1 = vld [vmem:[#allocation5 + $0xa10] sm:$0xff]  }
 0x15a   :  { %13196 = vmatpush3.bf16.msra.mxu0 %v14508_v4  ;;  %9909 = vmatmul.mubr.bf16.vlgmr.msra.gmra.mrb[32].mxu1 %v2381_v8  ;;  %v14552_v4 = vld [vmem:[#allocation5 + $0xad8] sm:$0xff]   ;;  %v14556_v8 = vld [vmem:[#allocation5 + $0xae0] sm:$0xff]  }
 0x15b   :  { %13197 = vmatprep.subr.bf16.mxu0 %v14510_v9  ;;  %13218 = vmatpush3.bf16.msra.mxu1 %v14509_v6  ;;  %v14554_v6 = vld [vmem:[#allocation5 + $0xa98] sm:$0xff]   ;;  %v14557_v9 = vld [vmem:[#allocation5 + $0xa20] sm:$0xff]  }
 0x15c   :  { %9948 = vmatprep.mubr.bf16.mxu0 %v2380_v12  ;;  %13219 = vmatprep.subr.bf16.mxu1 %v14511_v11  ;;  %v14559_v11 = vld [vmem:[#allocation5 + $0xa68] sm:$0xff]  }
 0x15d   :  { %9988 = vmatprep.mubr.bf16.mxu1 %v2384_v15  ;;  %v14560_v12 = vld [vmem:[#allocation5 + $0xae8] sm:$0xff]  }
 0x15e   :  { %13198 = vmatpush3.bf16.msra.mxu0 %v14512_v13  ;;  %v14561_v13 = vld [vmem:[#allocation5 + $0xa28] sm:$0xff]  }
 0x15f   :  { %13199 = vmatprep.subr.bf16.mxu0 %v14514_v16  ;;  %13220 = vmatpush3.bf16.msra.mxu1 %v14513_v14  ;;  %v14562_v15 = vld [vmem:[#allocation5 + $0xaa8] sm:$0xff]  }
 0x160   :  { %13221 = vmatprep.subr.bf16.mxu1 %v14515_v17  ;;  %v14563_v17 = vld [vmem:[#allocation5 + $0xa70] sm:$0xff]  }
 0x162   :  { %13200 = vmatpush3.bf16.msra.mxu0 %v14516_v18 }
 0x163   :  { %13201 = vmatprep.subr.bf16.mxu0 %v14518_v20  ;;  %13222 = vmatpush3.bf16.msra.mxu1 %v14517_v19 }
 0x164   :  { %13223 = vmatprep.subr.bf16.mxu1 %v14519_v21 }
 0x166   :  { %13202 = vmatpush3.bf16.msra.mxu0 %v14520_v22 }
 0x167   :  { %13203 = vmatprep.subr.bf16.mxu0 %v14522_v24  ;;  %13224 = vmatpush3.bf16.msra.mxu1 %v14521_v23  ;;  %v14564_v23 = vld [vmem:[#allocation5 + $0xaf0] sm:$0xff]  }
 0x168   :  { %13225 = vmatprep.subr.bf16.mxu1 %v14523_v25  ;;  %v14565_v24 = vld [vmem:[#allocation5 + $0xa30] sm:$0xff]  }
 0x16a   :  { %13204 = vmatpush3.bf16.msra.mxu0 %v14524_v26 }
 0x16b   :  { %13205 = vmatprep.subr.bf16.mxu0 %v14526_v28  ;;  %13226 = vmatpush3.bf16.msra.mxu1 %v14525_v27  ;;  %v14566_v28 = vld [vmem:[#allocation5 + $0xab0] sm:$0xff]  }
 0x16c   :  { %v12903_v31 = vpop.f32.mrb[8].mxu0  ;;  %13227 = vmatprep.subr.bf16.mxu1 %v14527_v29 }
 0x16d   :  { %v12904_v33 = vpop.f32.mrb[9].mxu0  ;;  %v12925_v36 = vpop.f32.mrb[8].mxu1 }
 0x16e   :  { %v12905_v37 = vadd.f32 %v12904_v33, %v12903_v31  ;;  %v12906_v38 = vpop.f32.mrb[10].mxu0  ;;  %v12926_v41 = vpop.f32.mrb[9].mxu1  ;;  %13206 = vmatpush3.bf16.msra.mxu0 %v14528_v30  ;;  %v14567_v30 = vld [vmem:[#allocation5 + $0xa78] sm:$0xff]  }
 0x16f   :  { %v12907_v42 = vpop.f32.mrb[11].mxu0  ;;  %v12927_v44 = vadd.f32 %v12926_v41, %v12925_v36  ;;  %v12928_v45 = vpop.f32.mrb[10].mxu1  ;;  %13207 = vmatprep.subr.bf16.mxu0 %v14530_v34  ;;  %13228 = vmatpush3.bf16.msra.mxu1 %v14529_v32  ;;  %v14568_v32 = vld [vmem:[#allocation5 + $0xaf8] sm:$0xff]   ;;  %v58_v34 = vld [vmem:[#allocation2 + $0x28] sm:$0xff] }
 0x170   :  { %v9391_v43 = vadd.f32 %v12905_v37, %v15460_v57  ;;  %v12929_v47 = vpop.f32.mrb[11].mxu1  ;;  %13229 = vmatprep.subr.bf16.mxu1 %v14531_v39  ;;  %v14542_v57 = vld [vmem:[#allocation5 + $0xa80] sm:$0xff]   ;;  %v14569_v33 = vld [vmem:[#allocation5 + $0xa38] sm:$0xff]   ;;  %v2392_v36 = vrot.slane %v58_v34, %v15411_v35  ;;  %v2385_v38 = vcombine.high %v58_v34, %v58_v34  ;;  %v14608_v34 = vld [vmem:[#allocation5 + $0xc48] sm:$0xff]  }
 0x171   :  { %v14571_v37 = vld [vmem:[#allocation5 + $0xb40] sm:$0xff]   ;;  %v14570_v39 = vld [vmem:[#allocation5 + $0xab8] sm:$0xff]  }
 0x172   :  { %v15472_v49 = vadd.f32 %v12927_v44, %v9391_v43  ;;  %13208 = vmatpush3.bf16.msra.mxu0 %v14532_v40  ;;  %v2400_v40 = vcombine.high %v2392_v36, %v2392_v36  ;;  %v2408_v41 = vrot.slane %v2392_v36, %v15411_v35  ;;  %v14572_v42 = vld [vmem:[#allocation5 + $0xbc0] sm:$0xff]   ;;  %v15482_v43 = vrot.slane %v2385_v38, %v15411_v35  ;;  %v14609_v36 = vld [vmem:[#allocation5 + $0xcc8] sm:$0xff]  }
 0x173   :  { %13209 = vmatprep.subr.bf16.mxu0 %v14534_v48  ;;  %13230 = vmatpush3.bf16.msra.mxu1 %v14533_v46  ;;  %v14573_v44 = vld [vmem:[#allocation5 + $0xb00] sm:$0xff]   ;;  %v14611_v38 = vld [vmem:[#allocation5 + $0xc88] sm:$0xff]  }
 0x174   :  { %13231 = vmatprep.subr.bf16.mxu1 %v14535_v50  ;;  %v2422_v45 = vrot.slane %v2400_v40, %v15411_v35  ;;  %v14574_v46 = vld [vmem:[#allocation5 + $0xb80] sm:$0xff]   ;;  %v2401_v47 = vcombine.high %v15482_v43, %v15482_v43  ;;  %v2430_v48 = vcombine.high %v2408_v41, %v2408_v41  ;;  %v14613_v40 = vld [vmem:[#allocation5 + $0xcd0] sm:$0xff]  }
 0x176   :  { %13210 = vmatpush3.bf16.msra.mxu0 %v14536_v51  ;;  %v2432_v50 = vcombine.high %v2422_v45, %v2422_v45  ;;  %v14576_v51 = vld [vmem:[#allocation5 + $0xbc8] sm:$0xff]  }
 0x177   :  { %13239 = vmatprep.subr.bf16.mxu0 %v14539_v54  ;;  %13232 = vmatpush3.bf16.msra.mxu1 %v14537_v52  ;;  %v2429_v52 = vrot.slane %v2401_v47, %v15411_v35  ;;  %v14578_v54 = vld [vmem:[#allocation5 + $0xb88] sm:$0xff]   ;;  %v14620_v47 = vld [vmem:[#allocation5 + $0xc60] sm:$0xff]  }
 0x178   :  { %13261 = vmatprep.subr.bf16.mxu1 %v14540_v55 }
 0x179   :  { %9949 = vmatmul.mubr.bf16.vlgmr.msra.gmra.mrb[36].mxu0 %v2366_v53  ;;  %v14577_v53 = vld [vmem:[#allocation5 + $0xb08] sm:$0xff]   ;;  %v2433_v55 = vcombine.high %v2429_v52, %v2429_v52 }
 0x17a   :  { %13240 = vmatpush3.bf16.msra.mxu0 %v14541_v56  ;;  %9989 = vmatmul.mubr.bf16.vlgmr.msra.gmra.mrb[36].mxu1 %v2382_v58  ;;  %v14579_v56 = vld [vmem:[#allocation5 + $0xb50] sm:$0xff]  }
 0x17b   :  { %13241 = vmatprep.subr.bf16.mxu0 %v14543_v59  ;;  %13262 = vmatpush3.bf16.msra.mxu1 %v14542_v57  ;;  %v14580_v57 = vld [vmem:[#allocation5 + $0xbd0] sm:$0xff]  }
 0x17c   :  { %13263 = vmatprep.subr.bf16.mxu1 %v14544_v60  ;;  %10028 = vmatprep.mubr.bf16.mxu0 %v2422_v45  ;;  %v14581_v58 = vld [vmem:[#allocation5 + $0xb10] sm:$0xff]   ;;  %v14583_v60 = vld [vmem:[#allocation5 + $0xb58] sm:$0xff]  }
 0x17d   :  { %10068 = vmatprep.mubr.bf16.mxu1 %v2432_v50  ;;  %v14582_v59 = vld [vmem:[#allocation5 + $0xb90] sm:$0xff]   ;;  %v14618_v45 = vld [vmem:[#allocation5 + $0xc18] sm:$0xff]   ;;  %v14623_v50 = vld [vmem:[#allocation5 + $0xca0] sm:$0xff]  }
 0x17e   :  { %13242 = vmatpush3.bf16.msra.mxu0 %v14545_v61  ;;  %v14584_v61 = vld [vmem:[#allocation5 + $0xbd8] sm:$0xff]  }
 0x17f   :  { %13243 = vmatprep.subr.bf16.mxu0 %v14547_v63  ;;  %13264 = vmatpush3.bf16.msra.mxu1 %v14546_v62  ;;  %v14585_v62 = vld [vmem:[#allocation5 + $0xb18] sm:$0xff]  }
 0x180   :  { %13265 = vmatprep.subr.bf16.mxu1 %v14548_v0  ;;  %v14586_v63 = vld [vmem:[#allocation5 + $0xb98] sm:$0xff]   ;;  %v14587_v0 = vld [vmem:[#allocation5 + $0xb60] sm:$0xff]  }
 0x182   :  { %13244 = vmatpush3.bf16.msra.mxu0 %v14549_v1  ;;  %v14588_v1 = vld [vmem:[#allocation5 + $0xbe0] sm:$0xff]  }
 0x183   :  { %13245 = vmatprep.subr.bf16.mxu0 %v14551_v3  ;;  %13266 = vmatpush3.bf16.msra.mxu1 %v14550_v2  ;;  %v14589_v2 = vld [vmem:[#allocation5 + $0xb20] sm:$0xff]  }
 0x184   :  { %13267 = vmatprep.subr.bf16.mxu1 %v14552_v4  ;;  %v14590_v3 = vld [vmem:[#allocation5 + $0xba0] sm:$0xff]   ;;  %v14591_v4 = vld [vmem:[#allocation5 + $0xb68] sm:$0xff]  }
 0x186   :  { %13246 = vmatpush3.bf16.msra.mxu0 %v14553_v5  ;;  %v14592_v5 = vld [vmem:[#allocation5 + $0xbe8] sm:$0xff]  }
 0x187   :  { %13247 = vmatprep.subr.bf16.mxu0 %v14555_v7  ;;  %13268 = vmatpush3.bf16.msra.mxu1 %v14554_v6  ;;  %v14593_v7 = vld [vmem:[#allocation5 + $0xb28] sm:$0xff]  }
 0x188   :  { %13269 = vmatprep.subr.bf16.mxu1 %v14556_v8 }
 0x18a   :  { %13248 = vmatpush3.bf16.msra.mxu0 %v14557_v9  ;;  %v14594_v9 = vld [vmem:[#allocation5 + $0xba8] sm:$0xff]  }
 0x18b   :  { %13249 = vmatprep.subr.bf16.mxu0 %v14559_v11  ;;  %13270 = vmatpush3.bf16.msra.mxu1 %v14558_v10 }
 0x18c   :  { %v12947_v14 = vpop.f32.mrb[12].mxu0  ;;  %13271 = vmatprep.subr.bf16.mxu1 %v14560_v12 }
 0x18d   :  { %v12948_v16 = vpop.f32.mrb[13].mxu0  ;;  %v12969_v18 = vpop.f32.mrb[12].mxu1 }
 0x18e   :  { %v12949_v19 = vadd.f32 %v12948_v16, %v12947_v14  ;;  %v12950_v20 = vpop.f32.mrb[14].mxu0  ;;  %v12970_v21 = vpop.f32.mrb[13].mxu1  ;;  %13250 = vmatpush3.bf16.msra.mxu0 %v14561_v13  ;;  %v14595_v13 = vld [vmem:[#allocation5 + $0xb70] sm:$0xff]  }
 0x18f   :  { %v12951_v22 = vpop.f32.mrb[15].mxu0  ;;  %v12971_v26 = vadd.f32 %v12970_v21, %v12969_v18  ;;  %v12972_v27 = vpop.f32.mrb[14].mxu1  ;;  %13251 = vmatprep.subr.bf16.mxu0 %v14563_v17  ;;  %13272 = vmatpush3.bf16.msra.mxu1 %v14562_v15  ;;  %v14596_v14 = vld [vmem:[#allocation5 + $0xbf0] sm:$0xff]  }
 0x190   :  { %v9471_v25 = vadd.f32 %v12949_v19, %v15472_v49  ;;  %v12973_v29 = vpop.f32.mrb[15].mxu1  ;;  %13273 = vmatprep.subr.bf16.mxu1 %v14564_v23  ;;  %v14575_v49 = vld [vmem:[#allocation5 + $0xb48] sm:$0xff]   ;;  %v14597_v20 = vld [vmem:[#allocation5 + $0xb30] sm:$0xff]   ;;  %v14602_v27 = vld [vmem:[#allocation5 + $0xbb8] sm:$0xff]  }
 0x191   :  { %v14598_v22 = vld [vmem:[#allocation5 + $0xbb0] sm:$0xff]   ;;  %v14604_v29 = vld [vmem:[#allocation5 + $0xc40] sm:$0xff]  }
 0x192   :  { %v15477_v31 = vadd.f32 %v12971_v26, %v9471_v25  ;;  %13252 = vmatpush3.bf16.msra.mxu0 %v14565_v24  ;;  %v14599_v24 = vld [vmem:[#allocation5 + $0xb78] sm:$0xff]  }
 0x193   :  { %13253 = vmatprep.subr.bf16.mxu0 %v14567_v30  ;;  %13274 = vmatpush3.bf16.msra.mxu1 %v14566_v28  ;;  %v14600_v25 = vld [vmem:[#allocation5 + $0xbf8] sm:$0xff]   ;;  %v2415_v28 = vrot.slane %v15482_v43, %v15411_v35  ;;  %v14605_v30 = vld [vmem:[#allocation5 + $0xcc0] sm:$0xff]  }
 0x194   :  { %13275 = vmatprep.subr.bf16.mxu1 %v14568_v32  ;;  %v14601_v26 = vld [vmem:[#allocation5 + $0xb38] sm:$0xff]   ;;  %v14607_v32 = vld [vmem:[#allocation5 + $0xc80] sm:$0xff]  }
 0x195   :  { %v14616_v43 = vld [vmem:[#allocation5 + $0xc58] sm:$0xff]  }
 0x196   :  { %13254 = vmatpush3.bf16.msra.mxu0 %v14569_v33  ;;  %v2431_v33 = vcombine.high %v2415_v28, %v2415_v28 }
 0x197   :  { %13283 = vmatprep.subr.bf16.mxu0 %v14571_v37  ;;  %13276 = vmatpush3.bf16.msra.mxu1 %v14570_v39  ;;  %v14610_v37 = vld [vmem:[#allocation5 + $0xc08] sm:$0xff]   ;;  %v14612_v39 = vld [vmem:[#allocation5 + $0xc50] sm:$0xff]  }
 0x198   :  { %13305 = vmatprep.subr.bf16.mxu1 %v14572_v42  ;;  %v14615_v42 = vld [vmem:[#allocation5 + $0xc90] sm:$0xff]  }
 0x199   :  { %10029 = vmatmul.mubr.bf16.vlgmr.msra.gmra.mrb[40].mxu0 %v2408_v41  ;;  %v14614_v41 = vld [vmem:[#allocation5 + $0xc10] sm:$0xff]  }
 0x19a   :  { %13284 = vmatpush3.bf16.msra.mxu0 %v14573_v44  ;;  %10069 = vmatmul.mubr.bf16.vlgmr.msra.gmra.mrb[40].mxu1 %v2430_v48  ;;  %v14617_v44 = vld [vmem:[#allocation5 + $0xcd8] sm:$0xff]   ;;  %v14621_v48 = vld [vmem:[#allocation5 + $0xce0] sm:$0xff]  }
 0x19b   :  { %13285 = vmatprep.subr.bf16.mxu0 %v14575_v49  ;;  %13306 = vmatpush3.bf16.msra.mxu1 %v14574_v46  ;;  %v14619_v46 = vld [vmem:[#allocation5 + $0xc98] sm:$0xff]   ;;  %v14622_v49 = vld [vmem:[#allocation5 + $0xc20] sm:$0xff]  }
 0x19c   :  { %10108 = vmatprep.mubr.bf16.mxu0 %v2429_v52  ;;  %13307 = vmatprep.subr.bf16.mxu1 %v14576_v51  ;;  %v14624_v51 = vld [vmem:[#allocation5 + $0xc68] sm:$0xff]  }
 0x19d   :  { %10148 = vmatprep.mubr.bf16.mxu1 %v2433_v55  ;;  %v14625_v52 = vld [vmem:[#allocation5 + $0xce8] sm:$0xff]  }
 0x19e   :  { %13286 = vmatpush3.bf16.msra.mxu0 %v14577_v53 }
 0x19f   :  { %13287 = vmatprep.subr.bf16.mxu0 %v14579_v56  ;;  %13308 = vmatpush3.bf16.msra.mxu1 %v14578_v54  ;;  %v14626_v54 = vld [vmem:[#allocation5 + $0xc28] sm:$0xff]   ;;  %v14628_v56 = vld [vmem:[#allocation5 + $0xc70] sm:$0xff]  }
 0x1a0   :  { %13309 = vmatprep.subr.bf16.mxu1 %v14580_v57 }
 0x1a2   :  { %13288 = vmatpush3.bf16.msra.mxu0 %v14581_v58 }
 0x1a3   :  { %13289 = vmatprep.subr.bf16.mxu0 %v14583_v60  ;;  %13310 = vmatpush3.bf16.msra.mxu1 %v14582_v59 }
 0x1a4   :  { %13311 = vmatprep.subr.bf16.mxu1 %v14584_v61  ;;  %v14627_v61 = vld [vmem:[#allocation5 + $0xca8] sm:$0xff]  }
 0x1a6   :  { %13290 = vmatpush3.bf16.msra.mxu0 %v14585_v62 }
 0x1a7   :  { %13291 = vmatprep.subr.bf16.mxu0 %v14587_v0  ;;  %13312 = vmatpush3.bf16.msra.mxu1 %v14586_v63  ;;  %v14629_v63 = vld [vmem:[#allocation5 + $0xcf0] sm:$0xff]  }
 0x1a8   :  { %13313 = vmatprep.subr.bf16.mxu1 %v14588_v1 }
 0x1aa   :  { %13292 = vmatpush3.bf16.msra.mxu0 %v14589_v2 }
 0x1ab   :  { %13293 = vmatprep.subr.bf16.mxu0 %v14591_v4  ;;  %13314 = vmatpush3.bf16.msra.mxu1 %v14590_v3  ;;  %v14630_v3 = vld [vmem:[#allocation5 + $0xc30] sm:$0xff]  }
 0x1ac   :  { %v12991_v6 = vpop.f32.mrb[16].mxu0  ;;  %13315 = vmatprep.subr.bf16.mxu1 %v14592_v5  ;;  %v14632_v5 = vld [vmem:[#allocation5 + $0xc78] sm:$0xff]  }
 0x1ad   :  { %v12992_v8 = vpop.f32.mrb[17].mxu0  ;;  %v13013_v10 = vpop.f32.mrb[16].mxu1 }
 0x1ae   :  { %v12993_v11 = vadd.f32 %v12992_v8, %v12991_v6  ;;  %v12994_v12 = vpop.f32.mrb[18].mxu0  ;;  %v13014_v15 = vpop.f32.mrb[17].mxu1  ;;  %13294 = vmatpush3.bf16.msra.mxu0 %v14593_v7  ;;  %v14631_v7 = vld [vmem:[#allocation5 + $0xcb0] sm:$0xff]   ;;  %v14633_v8 = vld [vmem:[#allocation5 + $0xcf8] sm:$0xff]  }
 0x1af   :  { %v12995_v16 = vpop.f32.mrb[19].mxu0  ;;  %v13015_v18 = vadd.f32 %v13014_v15, %v13013_v10  ;;  %v13016_v19 = vpop.f32.mrb[18].mxu1  ;;  %13295 = vmatprep.subr.bf16.mxu0 %v14595_v13  ;;  %13316 = vmatpush3.bf16.msra.mxu1 %v14594_v9  ;;  %v14634_v9 = vld [vmem:[#allocation5 + $0xc38] sm:$0xff]   ;;  %v59_v10 = vld [vmem:[#allocation2 + $0x30] sm:$0xff]  ;;  %v14636_v12 = vld [vmem:[#allocation5 + $0xd40] sm:$0xff]  }
 0x1b0   :  { %v9551_v17 = vadd.f32 %v12993_v11, %v15477_v31  ;;  %v13017_v21 = vpop.f32.mrb[19].mxu1  ;;  %13317 = vmatprep.subr.bf16.mxu1 %v14596_v14  ;;  %v14606_v31 = vld [vmem:[#allocation5 + $0xc00] sm:$0xff]   ;;  %v2441_v11 = vrot.slane %v59_v10, %v15411_v35  ;;  %v2434_v13 = vcombine.high %v59_v10, %v59_v10  ;;  %v14635_v14 = vld [vmem:[#allocation5 + $0xcb8] sm:$0xff]   ;;  %v14673_v10 = vld [vmem:[#allocation5 + $0xe48] sm:$0xff]  }
 0x1b1   :  { %v14638_v19 = vld [vmem:[#allocation5 + $0xd00] sm:$0xff]  }
 0x1b2   :  { %v15489_v23 = vadd.f32 %v13015_v18, %v9551_v17  ;;  %13296 = vmatpush3.bf16.msra.mxu0 %v14597_v20  ;;  %v2449_v15 = vcombine.high %v2441_v11, %v2441_v11  ;;  %v2457_v16 = vrot.slane %v2441_v11, %v15411_v35  ;;  %v14637_v17 = vld [vmem:[#allocation5 + $0xdc0] sm:$0xff]   ;;  %v15499_v18 = vrot.slane %v2434_v13, %v15411_v35  ;;  %v14674_v11 = vld [vmem:[#allocation5 + $0xec8] sm:$0xff]  }
 0x1b3   :  { %13297 = vmatprep.subr.bf16.mxu0 %v14599_v24  ;;  %13318 = vmatpush3.bf16.msra.mxu1 %v14598_v22  ;;  %v14639_v21 = vld [vmem:[#allocation5 + $0xd80] sm:$0xff]   ;;  %v14640_v24 = vld [vmem:[#allocation5 + $0xd48] sm:$0xff]  }
 0x1b4   :  { %13319 = vmatprep.subr.bf16.mxu1 %v14600_v25  ;;  %v2471_v20 = vrot.slane %v2449_v15, %v15411_v35  ;;  %v2450_v22 = vcombine.high %v15499_v18, %v15499_v18  ;;  %v14676_v13 = vld [vmem:[#allocation5 + $0xe88] sm:$0xff]   ;;  %v14678_v15 = vld [vmem:[#allocation5 + $0xed0] sm:$0xff]  }
 0x1b6   :  { %13298 = vmatpush3.bf16.msra.mxu0 %v14601_v26  ;;  %v2481_v25 = vcombine.high %v2471_v20, %v2471_v20  ;;  %v14641_v26 = vld [vmem:[#allocation5 + $0xdc8] sm:$0xff]  }
 0x1b7   :  { %13327 = vmatprep.subr.bf16.mxu0 %v14604_v29  ;;  %13320 = vmatpush3.bf16.msra.mxu1 %v14602_v27  ;;  %v2478_v27 = vrot.slane %v2450_v22, %v15411_v35  ;;  %v14643_v29 = vld [vmem:[#allocation5 + $0xd88] sm:$0xff]   ;;  %v14685_v22 = vld [vmem:[#allocation5 + $0xe60] sm:$0xff]  }
 0x1b8   :  { %13349 = vmatprep.subr.bf16.mxu1 %v14605_v30 }
 0x1b9   :  { %10109 = vmatmul.mubr.bf16.vlgmr.msra.gmra.mrb[44].mxu0 %v2415_v28  ;;  %v14642_v28 = vld [vmem:[#allocation5 + $0xd08] sm:$0xff]   ;;  %v2482_v30 = vcombine.high %v2478_v27, %v2478_v27 }
 0x1ba   :  { %13328 = vmatpush3.bf16.msra.mxu0 %v14606_v31  ;;  %10149 = vmatmul.mubr.bf16.vlgmr.msra.gmra.mrb[44].mxu1 %v2431_v33  ;;  %v14644_v31 = vld [vmem:[#allocation5 + $0xd50] sm:$0xff]  }
 0x1bb   :  { %13329 = vmatprep.subr.bf16.mxu0 %v14608_v34  ;;  %13350 = vmatpush3.bf16.msra.mxu1 %v14607_v32  ;;  %v14645_v32 = vld [vmem:[#allocation5 + $0xdd0] sm:$0xff]  }
 0x1bc   :  { %13351 = vmatprep.subr.bf16.mxu1 %v14609_v36  ;;  %10188 = vmatprep.mubr.bf16.mxu0 %v2471_v20  ;;  %v14646_v33 = vld [vmem:[#allocation5 + $0xd10] sm:$0xff]   ;;  %v14648_v36 = vld [vmem:[#allocation5 + $0xd58] sm:$0xff]  }
 0x1bd   :  { %10228 = vmatprep.mubr.bf16.mxu1 %v2481_v25  ;;  %v14647_v34 = vld [vmem:[#allocation5 + $0xd90] sm:$0xff]   ;;  %v14683_v20 = vld [vmem:[#allocation5 + $0xe18] sm:$0xff]   ;;  %v14688_v25 = vld [vmem:[#allocation5 + $0xea0] sm:$0xff]  }
 0x1be   :  { %13330 = vmatpush3.bf16.msra.mxu0 %v14610_v37  ;;  %v14649_v37 = vld [vmem:[#allocation5 + $0xdd8] sm:$0xff]  }
 0x1bf   :  { %13331 = vmatprep.subr.bf16.mxu0 %v14612_v39  ;;  %13352 = vmatpush3.bf16.msra.mxu1 %v14611_v38  ;;  %v14650_v38 = vld [vmem:[#allocation5 + $0xd18] sm:$0xff]  }
 0x1c0   :  { %13353 = vmatprep.subr.bf16.mxu1 %v14613_v40  ;;  %v14651_v39 = vld [vmem:[#allocation5 + $0xd98] sm:$0xff]   ;;  %v14652_v40 = vld [vmem:[#allocation5 + $0xd60] sm:$0xff]  }
 0x1c2   :  { %13332 = vmatpush3.bf16.msra.mxu0 %v14614_v41  ;;  %v14653_v41 = vld [vmem:[#allocation5 + $0xde0] sm:$0xff]  }
 0x1c3   :  { %13333 = vmatprep.subr.bf16.mxu0 %v14616_v43  ;;  %13354 = vmatpush3.bf16.msra.mxu1 %v14615_v42  ;;  %v14654_v42 = vld [vmem:[#allocation5 + $0xd20] sm:$0xff]  }
 0x1c4   :  { %13355 = vmatprep.subr.bf16.mxu1 %v14617_v44  ;;  %v14655_v43 = vld [vmem:[#allocation5 + $0xda0] sm:$0xff]   ;;  %v14656_v44 = vld [vmem:[#allocation5 + $0xd68] sm:$0xff]  }
 0x1c6   :  { %13334 = vmatpush3.bf16.msra.mxu0 %v14618_v45  ;;  %v14657_v45 = vld [vmem:[#allocation5 + $0xde8] sm:$0xff]  }
 0x1c7   :  { %13335 = vmatprep.subr.bf16.mxu0 %v14620_v47  ;;  %13356 = vmatpush3.bf16.msra.mxu1 %v14619_v46  ;;  %v14658_v47 = vld [vmem:[#allocation5 + $0xd28] sm:$0xff]  }
 0x1c8   :  { %13357 = vmatprep.subr.bf16.mxu1 %v14621_v48 }
 0x1ca   :  { %13336 = vmatpush3.bf16.msra.mxu0 %v14622_v49  ;;  %v14659_v49 = vld [vmem:[#allocation5 + $0xda8] sm:$0xff]  }
 0x1cb   :  { %13337 = vmatprep.subr.bf16.mxu0 %v14624_v51  ;;  %13358 = vmatpush3.bf16.msra.mxu1 %v14623_v50 }
 0x1cc   :  { %v13035_v53 = vpop.f32.mrb[20].mxu0  ;;  %13359 = vmatprep.subr.bf16.mxu1 %v14625_v52 }
 0x1cd   :  { %v13036_v55 = vpop.f32.mrb[21].mxu0  ;;  %v13057_v57 = vpop.f32.mrb[20].mxu1 }
 0x1ce   :  { %v13037_v58 = vadd.f32 %v13036_v55, %v13035_v53  ;;  %v13038_v59 = vpop.f32.mrb[22].mxu0  ;;  %v13058_v60 = vpop.f32.mrb[21].mxu1  ;;  %13338 = vmatpush3.bf16.msra.mxu0 %v14626_v54  ;;  %v14660_v53 = vld [vmem:[#allocation5 + $0xd70] sm:$0xff]  }
 0x1cf   :  { %v13039_v62 = vpop.f32.mrb[23].mxu0  ;;  %v13059_v1 = vadd.f32 %v13058_v60, %v13057_v57  ;;  %v13060_v2 = vpop.f32.mrb[22].mxu1  ;;  %13339 = vmatprep.subr.bf16.mxu0 %v14628_v56  ;;  %13360 = vmatpush3.bf16.msra.mxu1 %v14627_v61  ;;  %v14661_v54 = vld [vmem:[#allocation5 + $0xdf0] sm:$0xff]  }
 0x1d0   :  { %v9631_v0 = vadd.f32 %v13037_v58, %v15489_v23  ;;  %v13061_v4 = vpop.f32.mrb[23].mxu1  ;;  %13361 = vmatprep.subr.bf16.mxu1 %v14629_v63  ;;  %v2479_v23 = vcombine.high %v2457_v16, %v2457_v16  ;;  %v14662_v60 = vld [vmem:[#allocation5 + $0xd30] sm:$0xff]   ;;  %v14666_v2 = vld [vmem:[#allocation5 + $0xd38] sm:$0xff]  }
 0x1d1   :  { %v14663_v62 = vld [vmem:[#allocation5 + $0xdb0] sm:$0xff]   ;;  %v2464_v4 = vrot.slane %v15499_v18, %v15411_v35  ;;  %v14681_v18 = vld [vmem:[#allocation5 + $0xe58] sm:$0xff]  }
 0x1d2   :  { %v15494_v6 = vadd.f32 %v13059_v1, %v9631_v0  ;;  %13340 = vmatpush3.bf16.msra.mxu0 %v14630_v3  ;;  %v14664_v0 = vld [vmem:[#allocation5 + $0xd78] sm:$0xff]  }
 0x1d3   :  { %13341 = vmatprep.subr.bf16.mxu0 %v14632_v5  ;;  %13362 = vmatpush3.bf16.msra.mxu1 %v14631_v7  ;;  %v14665_v1 = vld [vmem:[#allocation5 + $0xdf8] sm:$0xff]   ;;  %v14669_v5 = vld [vmem:[#allocation5 + $0xe40] sm:$0xff]  }
 0x1d4   :  { %13363 = vmatprep.subr.bf16.mxu1 %v14633_v8  ;;  %v14667_v3 = vld [vmem:[#allocation5 + $0xdb8] sm:$0xff]   ;;  %v14671_v7 = vld [vmem:[#allocation5 + $0xe00] sm:$0xff]  }
 0x1d5   :  { %v14672_v8 = vld [vmem:[#allocation5 + $0xe80] sm:$0xff]  }
 0x1d6   :  { %13342 = vmatpush3.bf16.msra.mxu0 %v14634_v9  ;;  %v2480_v9 = vcombine.high %v2464_v4, %v2464_v4 }
 0x1d7   :  { %13371 = vmatprep.subr.bf16.mxu0 %v14636_v12  ;;  %13364 = vmatpush3.bf16.msra.mxu1 %v14635_v14  ;;  %v14675_v12 = vld [vmem:[#allocation5 + $0xe08] sm:$0xff]   ;;  %v14677_v14 = vld [vmem:[#allocation5 + $0xe50] sm:$0xff]  }
 0x1d8   :  { %13393 = vmatprep.subr.bf16.mxu1 %v14637_v17  ;;  %v14680_v17 = vld [vmem:[#allocation5 + $0xe90] sm:$0xff]  }
 0x1d9   :  { %10189 = vmatmul.mubr.bf16.vlgmr.msra.gmra.mrb[48].mxu0 %v2457_v16  ;;  %v14679_v16 = vld [vmem:[#allocation5 + $0xe10] sm:$0xff]  }
 0x1da   :  { %13372 = vmatpush3.bf16.msra.mxu0 %v14638_v19  ;;  %10229 = vmatmul.mubr.bf16.vlgmr.msra.gmra.mrb[48].mxu1 %v2479_v23  ;;  %v14682_v19 = vld [vmem:[#allocation5 + $0xed8] sm:$0xff]   ;;  %v14686_v23 = vld [vmem:[#allocation5 + $0xee0] sm:$0xff]  }
 0x1db   :  { %13373 = vmatprep.subr.bf16.mxu0 %v14640_v24  ;;  %13394 = vmatpush3.bf16.msra.mxu1 %v14639_v21  ;;  %v14684_v21 = vld [vmem:[#allocation5 + $0xe98] sm:$0xff]   ;;  %v14687_v24 = vld [vmem:[#allocation5 + $0xe20] sm:$0xff]  }
 0x1dc   :  { %10268 = vmatprep.mubr.bf16.mxu0 %v2478_v27  ;;  %13395 = vmatprep.subr.bf16.mxu1 %v14641_v26  ;;  %v14689_v26 = vld [vmem:[#allocation5 + $0xe68] sm:$0xff]  }
 0x1dd   :  { %10308 = vmatprep.mubr.bf16.mxu1 %v2482_v30  ;;  %v14690_v27 = vld [vmem:[#allocation5 + $0xee8] sm:$0xff]  }
 0x1de   :  { %13374 = vmatpush3.bf16.msra.mxu0 %v14642_v28 }
 0x1df   :  { %13375 = vmatprep.subr.bf16.mxu0 %v14644_v31  ;;  %13396 = vmatpush3.bf16.msra.mxu1 %v14643_v29  ;;  %v14691_v29 = vld [vmem:[#allocation5 + $0xe28] sm:$0xff]   ;;  %v14693_v31 = vld [vmem:[#allocation5 + $0xe70] sm:$0xff]  }
 0x1e0   :  { %13397 = vmatprep.subr.bf16.mxu1 %v14645_v32 }
 0x1e2   :  { %13376 = vmatpush3.bf16.msra.mxu0 %v14646_v33 }
 0x1e3   :  { %13377 = vmatprep.subr.bf16.mxu0 %v14648_v36  ;;  %13398 = vmatpush3.bf16.msra.mxu1 %v14647_v34 }
 0x1e4   :  { %13399 = vmatprep.subr.bf16.mxu1 %v14649_v37  ;;  %v14692_v37 = vld [vmem:[#allocation5 + $0xea8] sm:$0xff]  }
 0x1e6   :  { %13378 = vmatpush3.bf16.msra.mxu0 %v14650_v38 }
 0x1e7   :  { %13379 = vmatprep.subr.bf16.mxu0 %v14652_v40  ;;  %13400 = vmatpush3.bf16.msra.mxu1 %v14651_v39  ;;  %v14694_v39 = vld [vmem:[#allocation5 + $0xef0] sm:$0xff]  }
 0x1e8   :  { %13401 = vmatprep.subr.bf16.mxu1 %v14653_v41 }
 0x1ea   :  { %13380 = vmatpush3.bf16.msra.mxu0 %v14654_v42 }
 0x1eb   :  { %13381 = vmatprep.subr.bf16.mxu0 %v14656_v44  ;;  %13402 = vmatpush3.bf16.msra.mxu1 %v14655_v43  ;;  %v14695_v43 = vld [vmem:[#allocation5 + $0xe30] sm:$0xff]  }
 0x1ec   :  { %v13079_v46 = vpop.f32.mrb[24].mxu0  ;;  %13403 = vmatprep.subr.bf16.mxu1 %v14657_v45  ;;  %v14697_v45 = vld [vmem:[#allocation5 + $0xe78] sm:$0xff]  }
 0x1ed   :  { %v13080_v48 = vpop.f32.mrb[25].mxu0  ;;  %v13101_v50 = vpop.f32.mrb[24].mxu1 }
 0x1ee   :  { %v13081_v51 = vadd.f32 %v13080_v48, %v13079_v46  ;;  %v13082_v52 = vpop.f32.mrb[26].mxu0  ;;  %v13102_v55 = vpop.f32.mrb[25].mxu1  ;;  %13382 = vmatpush3.bf16.msra.mxu0 %v14658_v47  ;;  %v14696_v47 = vld [vmem:[#allocation5 + $0xeb0] sm:$0xff]   ;;  %v14698_v48 = vld [vmem:[#allocation5 + $0xef8] sm:$0xff]  }
 0x1ef   :  { %v13083_v56 = vpop.f32.mrb[27].mxu0  ;;  %v13103_v58 = vadd.f32 %v13102_v55, %v13101_v50  ;;  %v13104_v59 = vpop.f32.mrb[26].mxu1  ;;  %13383 = vmatprep.subr.bf16.mxu0 %v14660_v53  ;;  %13404 = vmatpush3.bf16.msra.mxu1 %v14659_v49  ;;  %v14699_v49 = vld [vmem:[#allocation5 + $0xe38] sm:$0xff]   ;;  %v14701_v52 = vld [vmem:[#allocation5 + $0xf40] sm:$0xff]  }
 0x1f0   :  { %v9711_v57 = vadd.f32 %v13081_v51, %v15494_v6  ;;  %v13105_v61 = vpop.f32.mrb[27].mxu1  ;;  %13405 = vmatprep.subr.bf16.mxu1 %v14661_v54  ;;  %v14670_v6 = vld [vmem:[#allocation5 + $0xec0] sm:$0xff]   ;;  %v60_v50 = vld [vmem:[#allocation2 + $0x38] sm:$0xff] }
 0x1f1   :  { %v2490_v51 = vrot.slane %v60_v50, %v15411_v35  ;;  %v2483_v53 = vcombine.high %v60_v50, %v60_v50  ;;  %v14700_v54 = vld [vmem:[#allocation5 + $0xeb8] sm:$0xff]   ;;  %v14703_v59 = vld [vmem:[#allocation5 + $0xf00] sm:$0xff]   ;;  %v14738_v50 = vld [vmem:[#allocation5 + $0x1048] sm:$0xff]  }
 0x1f2   :  { %v15506_v63 = vadd.f32 %v13103_v58, %v9711_v57  ;;  %13384 = vmatpush3.bf16.msra.mxu0 %v14662_v60  ;;  %v14702_v57 = vld [vmem:[#allocation5 + $0xfc0] sm:$0xff]  }
 0x1f3   :  { %13385 = vmatprep.subr.bf16.mxu0 %v14664_v0  ;;  %13406 = vmatpush3.bf16.msra.mxu1 %v14663_v62  ;;  %v2498_v55 = vcombine.high %v2490_v51, %v2490_v51  ;;  %v2506_v56 = vrot.slane %v2490_v51, %v15411_v35  ;;  %v15516_v58 = vrot.slane %v2483_v53, %v15411_v35  ;;  %v14704_v61 = vld [vmem:[#allocation5 + $0xf80] sm:$0xff]   ;;  %v14705_v0 = vld [vmem:[#allocation5 + $0xf48] sm:$0xff]  }
 0x1f4   :  { %13407 = vmatprep.subr.bf16.mxu1 %v14665_v1  ;;  %v14739_v51 = vld [vmem:[#allocation5 + $0x10c8] sm:$0xff]  }
 0x1f5   :  { %v2520_v60 = vrot.slane %v2498_v55, %v15411_v35  ;;  %v2499_v62 = vcombine.high %v15516_v58, %v15516_v58  ;;  %v14741_v53 = vld [vmem:[#allocation5 + $0x1088] sm:$0xff]   ;;  %v14743_v55 = vld [vmem:[#allocation5 + $0x10d0] sm:$0xff]  }
 0x1f6   :  { %13386 = vmatpush3.bf16.msra.mxu0 %v14666_v2  ;;  %v14706_v2 = vld [vmem:[#allocation5 + $0xfc8] sm:$0xff]  }
 0x1f7   :  { %13415 = vmatprep.subr.bf16.mxu0 %v14669_v5  ;;  %13408 = vmatpush3.bf16.msra.mxu1 %v14667_v3  ;;  %v2530_v1 = vcombine.high %v2520_v60, %v2520_v60  ;;  %v2527_v3 = vrot.slane %v2499_v62, %v15411_v35  ;;  %v14708_v5 = vld [vmem:[#allocation5 + $0xf88] sm:$0xff]   ;;  %v14750_v62 = vld [vmem:[#allocation5 + $0x1060] sm:$0xff]  }
 0x1f8   :  { %13437 = vmatprep.subr.bf16.mxu1 %v14670_v6 }
 0x1f9   :  { %10269 = vmatmul.mubr.bf16.vlgmr.msra.gmra.mrb[52].mxu0 %v2464_v4  ;;  %v14707_v4 = vld [vmem:[#allocation5 + $0xf08] sm:$0xff]   ;;  %v2531_v6 = vcombine.high %v2527_v3, %v2527_v3 }
 0x1fa   :  { %13416 = vmatpush3.bf16.msra.mxu0 %v14671_v7  ;;  %10309 = vmatmul.mubr.bf16.vlgmr.msra.gmra.mrb[52].mxu1 %v2480_v9  ;;  %v14709_v7 = vld [vmem:[#allocation5 + $0xf50] sm:$0xff]  }
 0x1fb   :  { %13417 = vmatprep.subr.bf16.mxu0 %v14673_v10  ;;  %13438 = vmatpush3.bf16.msra.mxu1 %v14672_v8  ;;  %v14710_v8 = vld [vmem:[#allocation5 + $0xfd0] sm:$0xff]  }
 0x1fc   :  { %13439 = vmatprep.subr.bf16.mxu1 %v14674_v11  ;;  %10348 = vmatprep.mubr.bf16.mxu0 %v2520_v60  ;;  %v14711_v9 = vld [vmem:[#allocation5 + $0xf10] sm:$0xff]   ;;  %v14713_v11 = vld [vmem:[#allocation5 + $0xf58] sm:$0xff]  }
 0x1fd   :  { %10388 = vmatprep.mubr.bf16.mxu1 %v2530_v1  ;;  %v14712_v10 = vld [vmem:[#allocation5 + $0xf90] sm:$0xff]   ;;  %v14748_v60 = vld [vmem:[#allocation5 + $0x1018] sm:$0xff]   ;;  %v14753_v1 = vld [vmem:[#allocation5 + $0x10a0] sm:$0xff]  }
 0x1fe   :  { %13418 = vmatpush3.bf16.msra.mxu0 %v14675_v12  ;;  %v14714_v12 = vld [vmem:[#allocation5 + $0xfd8] sm:$0xff]  }
 0x1ff   :  { %13419 = vmatprep.subr.bf16.mxu0 %v14677_v14  ;;  %13440 = vmatpush3.bf16.msra.mxu1 %v14676_v13  ;;  %v14715_v13 = vld [vmem:[#allocation5 + $0xf18] sm:$0xff]  }
 0x200   :  { %13441 = vmatprep.subr.bf16.mxu1 %v14678_v15  ;;  %v14716_v14 = vld [vmem:[#allocation5 + $0xf98] sm:$0xff]   ;;  %v14717_v15 = vld [vmem:[#allocation5 + $0xf60] sm:$0xff]  }
 0x202   :  { %13420 = vmatpush3.bf16.msra.mxu0 %v14679_v16  ;;  %v14718_v16 = vld [vmem:[#allocation5 + $0xfe0] sm:$0xff]  }
 0x203   :  { %13421 = vmatprep.subr.bf16.mxu0 %v14681_v18  ;;  %13442 = vmatpush3.bf16.msra.mxu1 %v14680_v17  ;;  %v14719_v17 = vld [vmem:[#allocation5 + $0xf20] sm:$0xff]  }
 0x204   :  { %13443 = vmatprep.subr.bf16.mxu1 %v14682_v19  ;;  %v14720_v18 = vld [vmem:[#allocation5 + $0xfa0] sm:$0xff]   ;;  %v14721_v19 = vld [vmem:[#allocation5 + $0xf68] sm:$0xff]  }
 0x206   :  { %13422 = vmatpush3.bf16.msra.mxu0 %v14683_v20  ;;  %v14722_v20 = vld [vmem:[#allocation5 + $0xfe8] sm:$0xff]  }
 0x207   :  { %13423 = vmatprep.subr.bf16.mxu0 %v14685_v22  ;;  %13444 = vmatpush3.bf16.msra.mxu1 %v14684_v21  ;;  %v14723_v22 = vld [vmem:[#allocation5 + $0xf28] sm:$0xff]  }
 0x208   :  { %13445 = vmatprep.subr.bf16.mxu1 %v14686_v23 }
 0x20a   :  { %13424 = vmatpush3.bf16.msra.mxu0 %v14687_v24  ;;  %v14724_v24 = vld [vmem:[#allocation5 + $0xfa8] sm:$0xff]  }
 0x20b   :  { %13425 = vmatprep.subr.bf16.mxu0 %v14689_v26  ;;  %13446 = vmatpush3.bf16.msra.mxu1 %v14688_v25 }
 0x20c   :  { %v13123_v28 = vpop.f32.mrb[28].mxu0  ;;  %13447 = vmatprep.subr.bf16.mxu1 %v14690_v27 }
 0x20d   :  { %v13124_v30 = vpop.f32.mrb[29].mxu0  ;;  %v13145_v32 = vpop.f32.mrb[28].mxu1 }
 0x20e   :  { %v13125_v33 = vadd.f32 %v13124_v30, %v13123_v28  ;;  %v13126_v34 = vpop.f32.mrb[30].mxu0  ;;  %v13146_v36 = vpop.f32.mrb[29].mxu1  ;;  %13426 = vmatpush3.bf16.msra.mxu0 %v14691_v29  ;;  %v14725_v28 = vld [vmem:[#allocation5 + $0xf70] sm:$0xff]  }
 0x20f   :  { %v13127_v38 = vpop.f32.mrb[31].mxu0  ;;  %v13147_v41 = vadd.f32 %v13146_v36, %v13145_v32  ;;  %v13148_v42 = vpop.f32.mrb[30].mxu1  ;;  %13427 = vmatprep.subr.bf16.mxu0 %v14693_v31  ;;  %13448 = vmatpush3.bf16.msra.mxu1 %v14692_v37  ;;  %v14726_v29 = vld [vmem:[#allocation5 + $0xff0] sm:$0xff]  }
 0x210   :  { %v9791_v40 = vadd.f32 %v13125_v33, %v15506_v63  ;;  %v13149_v44 = vpop.f32.mrb[31].mxu1  ;;  %13449 = vmatprep.subr.bf16.mxu1 %v14694_v39  ;;  %v2528_v63 = vcombine.high %v2506_v56, %v2506_v56  ;;  %v14727_v36 = vld [vmem:[#allocation5 + $0xf30] sm:$0xff]   ;;  %v14731_v42 = vld [vmem:[#allocation5 + $0xf38] sm:$0xff]  }
 0x211   :  { %v14728_v38 = vld [vmem:[#allocation5 + $0xfb0] sm:$0xff]   ;;  %v2513_v44 = vrot.slane %v15516_v58, %v15411_v35  ;;  %v14746_v58 = vld [vmem:[#allocation5 + $0x1058] sm:$0xff]  }
 0x212   :  { %v15511_v46 = vadd.f32 %v13147_v41, %v9791_v40  ;;  %13428 = vmatpush3.bf16.msra.mxu0 %v14695_v43  ;;  %v14729_v40 = vld [vmem:[#allocation5 + $0xf78] sm:$0xff]  }
 0x213   :  { %13429 = vmatprep.subr.bf16.mxu0 %v14697_v45  ;;  %13450 = vmatpush3.bf16.msra.mxu1 %v14696_v47  ;;  %v14730_v41 = vld [vmem:[#allocation5 + $0xff8] sm:$0xff]   ;;  %v14734_v45 = vld [vmem:[#allocation5 + $0x1040] sm:$0xff]  }
 0x214   :  { %13451 = vmatprep.subr.bf16.mxu1 %v14698_v48  ;;  %v14732_v43 = vld [vmem:[#allocation5 + $0xfb8] sm:$0xff]   ;;  %v14736_v47 = vld [vmem:[#allocation5 + $0x1000] sm:$0xff]  }
 0x215   :  { %v14737_v48 = vld [vmem:[#allocation5 + $0x1080] sm:$0xff]  }
 0x216   :  { %13430 = vmatpush3.bf16.msra.mxu0 %v14699_v49  ;;  %v2529_v49 = vcombine.high %v2513_v44, %v2513_v44 }
 0x217   :  { %13459 = vmatprep.subr.bf16.mxu0 %v14701_v52  ;;  %13452 = vmatpush3.bf16.msra.mxu1 %v14700_v54  ;;  %v14740_v52 = vld [vmem:[#allocation5 + $0x1008] sm:$0xff]   ;;  %v14742_v54 = vld [vmem:[#allocation5 + $0x1050] sm:$0xff]  }
 0x218   :  { %13481 = vmatprep.subr.bf16.mxu1 %v14702_v57  ;;  %v14745_v57 = vld [vmem:[#allocation5 + $0x1090] sm:$0xff]  }
 0x219   :  { %10349 = vmatmul.mubr.bf16.vlgmr.msra.gmra.mrb[56].mxu0 %v2506_v56  ;;  %v14744_v56 = vld [vmem:[#allocation5 + $0x1010] sm:$0xff]  }
 0x21a   :  { %13460 = vmatpush3.bf16.msra.mxu0 %v14703_v59  ;;  %10389 = vmatmul.mubr.bf16.vlgmr.msra.gmra.mrb[56].mxu1 %v2528_v63  ;;  %v14747_v59 = vld [vmem:[#allocation5 + $0x10d8] sm:$0xff]   ;;  %v14751_v63 = vld [vmem:[#allocation5 + $0x10e0] sm:$0xff]  }
 0x21b   :  { %13461 = vmatprep.subr.bf16.mxu0 %v14705_v0  ;;  %13482 = vmatpush3.bf16.msra.mxu1 %v14704_v61  ;;  %v14749_v61 = vld [vmem:[#allocation5 + $0x1098] sm:$0xff]   ;;  %v14752_v0 = vld [vmem:[#allocation5 + $0x1020] sm:$0xff]  }
 0x21c   :  { %10428 = vmatprep.mubr.bf16.mxu0 %v2527_v3  ;;  %13483 = vmatprep.subr.bf16.mxu1 %v14706_v2  ;;  %v14754_v2 = vld [vmem:[#allocation5 + $0x1068] sm:$0xff]  }
 0x21d   :  { %10468 = vmatprep.mubr.bf16.mxu1 %v2531_v6  ;;  %v14755_v3 = vld [vmem:[#allocation5 + $0x10e8] sm:$0xff]  }
 0x21e   :  { %13462 = vmatpush3.bf16.msra.mxu0 %v14707_v4 }
 0x21f   :  { %13463 = vmatprep.subr.bf16.mxu0 %v14709_v7  ;;  %13484 = vmatpush3.bf16.msra.mxu1 %v14708_v5  ;;  %v14756_v5 = vld [vmem:[#allocation5 + $0x1028] sm:$0xff]   ;;  %v14758_v7 = vld [vmem:[#allocation5 + $0x1070] sm:$0xff]  }
 0x220   :  { %13485 = vmatprep.subr.bf16.mxu1 %v14710_v8 }
 0x222   :  { %13464 = vmatpush3.bf16.msra.mxu0 %v14711_v9 }
 0x223   :  { %13465 = vmatprep.subr.bf16.mxu0 %v14713_v11  ;;  %13486 = vmatpush3.bf16.msra.mxu1 %v14712_v10 }
 0x224   :  { %13487 = vmatprep.subr.bf16.mxu1 %v14714_v12  ;;  %v14757_v12 = vld [vmem:[#allocation5 + $0x10a8] sm:$0xff]  }
 0x226   :  { %13466 = vmatpush3.bf16.msra.mxu0 %v14715_v13 }
 0x227   :  { %13467 = vmatprep.subr.bf16.mxu0 %v14717_v15  ;;  %13488 = vmatpush3.bf16.msra.mxu1 %v14716_v14  ;;  %v14759_v14 = vld [vmem:[#allocation5 + $0x10f0] sm:$0xff]  }
 0x228   :  { %13489 = vmatprep.subr.bf16.mxu1 %v14718_v16 }
 0x22a   :  { %13468 = vmatpush3.bf16.msra.mxu0 %v14719_v17 }
 0x22b   :  { %13469 = vmatprep.subr.bf16.mxu0 %v14721_v19  ;;  %13490 = vmatpush3.bf16.msra.mxu1 %v14720_v18  ;;  %v14760_v18 = vld [vmem:[#allocation5 + $0x1030] sm:$0xff]  }
 0x22c   :  { %v13167_v21 = vpop.f32.mrb[32].mxu0  ;;  %13491 = vmatprep.subr.bf16.mxu1 %v14722_v20  ;;  %v14762_v20 = vld [vmem:[#allocation5 + $0x1078] sm:$0xff]  }
 0x22d   :  { %v13168_v23 = vpop.f32.mrb[33].mxu0  ;;  %v13189_v25 = vpop.f32.mrb[32].mxu1 }
 0x22e   :  { %v13169_v26 = vadd.f32 %v13168_v23, %v13167_v21  ;;  %v13170_v27 = vpop.f32.mrb[34].mxu0  ;;  %v13190_v30 = vpop.f32.mrb[33].mxu1  ;;  %13470 = vmatpush3.bf16.msra.mxu0 %v14723_v22  ;;  %v14761_v22 = vld [vmem:[#allocation5 + $0x10b0] sm:$0xff]   ;;  %v14763_v23 = vld [vmem:[#allocation5 + $0x10f8] sm:$0xff]  }
 0x22f   :  { %v13171_v31 = vpop.f32.mrb[35].mxu0  ;;  %v13191_v33 = vadd.f32 %v13190_v30, %v13189_v25  ;;  %v13192_v34 = vpop.f32.mrb[34].mxu1  ;;  %13471 = vmatprep.subr.bf16.mxu0 %v14725_v28  ;;  %13492 = vmatpush3.bf16.msra.mxu1 %v14724_v24  ;;  %v14764_v24 = vld [vmem:[#allocation5 + $0x1038] sm:$0xff]   ;;  %v61_v25 = vld [vmem:[#allocation2 + $0x40] sm:$0xff] }
 0x230   :  { %v9871_v32 = vadd.f32 %v13169_v26, %v15511_v46  ;;  %v13193_v37 = vpop.f32.mrb[35].mxu1  ;;  %13493 = vmatprep.subr.bf16.mxu1 %v14726_v29  ;;  %v14735_v46 = vld [vmem:[#allocation5 + $0x10c0] sm:$0xff]   ;;  %v2539_v26 = vrot.slane %v61_v25, %v15411_v35  ;;  %v2532_v28 = vcombine.high %v61_v25, %v61_v25  ;;  %v14765_v29 = vld [vmem:[#allocation5 + $0x10b8] sm:$0xff]   ;;  %v14803_v25 = vld [vmem:[#allocation5 + $0x1248] sm:$0xff]  }
 0x231   :  { %v14766_v27 = vld [vmem:[#allocation5 + $0x1140] sm:$0xff]  }
 0x232   :  { %v15523_v39 = vadd.f32 %v13191_v33, %v9871_v32  ;;  %13472 = vmatpush3.bf16.msra.mxu0 %v14727_v36  ;;  %v2547_v30 = vcombine.high %v2539_v26, %v2539_v26  ;;  %v2555_v31 = vrot.slane %v2539_v26, %v15411_v35  ;;  %v14767_v32 = vld [vmem:[#allocation5 + $0x11c0] sm:$0xff]   ;;  %v15533_v33 = vrot.slane %v2532_v28, %v15411_v35  ;;  %v14804_v26 = vld [vmem:[#allocation5 + $0x12c8] sm:$0xff]  }
 0x233   :  { %13473 = vmatprep.subr.bf16.mxu0 %v14729_v40  ;;  %13494 = vmatpush3.bf16.msra.mxu1 %v14728_v38  ;;  %v14768_v34 = vld [vmem:[#allocation5 + $0x1100] sm:$0xff]   ;;  %v14770_v40 = vld [vmem:[#allocation5 + $0x1148] sm:$0xff]  }
 0x234   :  { %13495 = vmatprep.subr.bf16.mxu1 %v14730_v41  ;;  %v2569_v36 = vrot.slane %v2547_v30, %v15411_v35  ;;  %v14769_v37 = vld [vmem:[#allocation5 + $0x1180] sm:$0xff]   ;;  %v2548_v38 = vcombine.high %v15533_v33, %v15533_v33  ;;  %v14806_v28 = vld [vmem:[#allocation5 + $0x1288] sm:$0xff]   ;;  %v14808_v30 = vld [vmem:[#allocation5 + $0x12d0] sm:$0xff]  }
 0x236   :  { %13474 = vmatpush3.bf16.msra.mxu0 %v14731_v42  ;;  %v2579_v41 = vcombine.high %v2569_v36, %v2569_v36  ;;  %v14771_v42 = vld [vmem:[#allocation5 + $0x11c8] sm:$0xff]  }
 0x237   :  { %13503 = vmatprep.subr.bf16.mxu0 %v14734_v45  ;;  %13496 = vmatpush3.bf16.msra.mxu1 %v14732_v43  ;;  %v2576_v43 = vrot.slane %v2548_v38, %v15411_v35  ;;  %v14773_v45 = vld [vmem:[#allocation5 + $0x1188] sm:$0xff]   ;;  %v14815_v38 = vld [vmem:[#allocation5 + $0x1260] sm:$0xff]  }
 0x238   :  { %13525 = vmatprep.subr.bf16.mxu1 %v14735_v46 }
 0x239   :  { %10429 = vmatmul.mubr.bf16.vlgmr.msra.gmra.mrb[60].mxu0 %v2513_v44  ;;  %v14772_v44 = vld [vmem:[#allocation5 + $0x1108] sm:$0xff]   ;;  %v2580_v46 = vcombine.high %v2576_v43, %v2576_v43 }
 0x23a   :  { %13504 = vmatpush3.bf16.msra.mxu0 %v14736_v47  ;;  %10469 = vmatmul.mubr.bf16.vlgmr.msra.gmra.mrb[60].mxu1 %v2529_v49  ;;  %v14774_v47 = vld [vmem:[#allocation5 + $0x1150] sm:$0xff]  }
 0x23b   :  { %13505 = vmatprep.subr.bf16.mxu0 %v14738_v50  ;;  %13526 = vmatpush3.bf16.msra.mxu1 %v14737_v48  ;;  %v14775_v48 = vld [vmem:[#allocation5 + $0x11d0] sm:$0xff]  }
 0x23c   :  { %13527 = vmatprep.subr.bf16.mxu1 %v14739_v51  ;;  %10508 = vmatprep.mubr.bf16.mxu0 %v2569_v36  ;;  %v14776_v49 = vld [vmem:[#allocation5 + $0x1110] sm:$0xff]   ;;  %v14778_v51 = vld [vmem:[#allocation5 + $0x1158] sm:$0xff]  }
 0x23d   :  { %10548 = vmatprep.mubr.bf16.mxu1 %v2579_v41  ;;  %v14777_v50 = vld [vmem:[#allocation5 + $0x1190] sm:$0xff]   ;;  %v14813_v36 = vld [vmem:[#allocation5 + $0x1218] sm:$0xff]   ;;  %v14818_v41 = vld [vmem:[#allocation5 + $0x12a0] sm:$0xff]  }
 0x23e   :  { %13506 = vmatpush3.bf16.msra.mxu0 %v14740_v52  ;;  %v14779_v52 = vld [vmem:[#allocation5 + $0x11d8] sm:$0xff]  }
 0x23f   :  { %13507 = vmatprep.subr.bf16.mxu0 %v14742_v54  ;;  %13528 = vmatpush3.bf16.msra.mxu1 %v14741_v53  ;;  %v14780_v53 = vld [vmem:[#allocation5 + $0x1118] sm:$0xff]  }
 0x240   :  { %13529 = vmatprep.subr.bf16.mxu1 %v14743_v55  ;;  %v14781_v54 = vld [vmem:[#allocation5 + $0x1198] sm:$0xff]   ;;  %v14782_v55 = vld [vmem:[#allocation5 + $0x1160] sm:$0xff]  }
 0x242   :  { %13508 = vmatpush3.bf16.msra.mxu0 %v14744_v56  ;;  %v14783_v56 = vld [vmem:[#allocation5 + $0x11e0] sm:$0xff]  }
 0x243   :  { %13509 = vmatprep.subr.bf16.mxu0 %v14746_v58  ;;  %13530 = vmatpush3.bf16.msra.mxu1 %v14745_v57  ;;  %v14784_v57 = vld [vmem:[#allocation5 + $0x1120] sm:$0xff]  }
 0x244   :  { %13531 = vmatprep.subr.bf16.mxu1 %v14747_v59  ;;  %v14785_v58 = vld [vmem:[#allocation5 + $0x11a0] sm:$0xff]   ;;  %v14786_v59 = vld [vmem:[#allocation5 + $0x1168] sm:$0xff]  }
 0x246   :  { %13510 = vmatpush3.bf16.msra.mxu0 %v14748_v60  ;;  %v14787_v60 = vld [vmem:[#allocation5 + $0x11e8] sm:$0xff]  }
 0x247   :  { %13511 = vmatprep.subr.bf16.mxu0 %v14750_v62  ;;  %13532 = vmatpush3.bf16.msra.mxu1 %v14749_v61  ;;  %v14788_v62 = vld [vmem:[#allocation5 + $0x1128] sm:$0xff]  }
 0x248   :  { %13533 = vmatprep.subr.bf16.mxu1 %v14751_v63 }
 0x24a   :  { %13512 = vmatpush3.bf16.msra.mxu0 %v14752_v0  ;;  %v14789_v0 = vld [vmem:[#allocation5 + $0x11a8] sm:$0xff]  }
 0x24b   :  { %13513 = vmatprep.subr.bf16.mxu0 %v14754_v2  ;;  %13534 = vmatpush3.bf16.msra.mxu1 %v14753_v1 }
 0x24c   :  { %v13211_v4 = vpop.f32.mrb[36].mxu0  ;;  %13535 = vmatprep.subr.bf16.mxu1 %v14755_v3 }
 0x24d   :  { %v13212_v6 = vpop.f32.mrb[37].mxu0  ;;  %v13233_v8 = vpop.f32.mrb[36].mxu1 }
 0x24e   :  { %v13213_v9 = vadd.f32 %v13212_v6, %v13211_v4  ;;  %v13214_v10 = vpop.f32.mrb[38].mxu0  ;;  %v13234_v11 = vpop.f32.mrb[37].mxu1  ;;  %13514 = vmatpush3.bf16.msra.mxu0 %v14756_v5  ;;  %v14790_v4 = vld [vmem:[#allocation5 + $0x1170] sm:$0xff]  }
 0x24f   :  { %v13215_v13 = vpop.f32.mrb[39].mxu0  ;;  %v13235_v16 = vadd.f32 %v13234_v11, %v13233_v8  ;;  %v13236_v17 = vpop.f32.mrb[38].mxu1  ;;  %13515 = vmatprep.subr.bf16.mxu0 %v14758_v7  ;;  %13536 = vmatpush3.bf16.msra.mxu1 %v14757_v12  ;;  %v14791_v5 = vld [vmem:[#allocation5 + $0x11f0] sm:$0xff]  }
 0x250   :  { %v9951_v15 = vadd.f32 %v13213_v9, %v15523_v39  ;;  %v13237_v19 = vpop.f32.mrb[39].mxu1  ;;  %13537 = vmatprep.subr.bf16.mxu1 %v14759_v14  ;;  %v2577_v39 = vcombine.high %v2555_v31, %v2555_v31  ;;  %v14792_v11 = vld [vmem:[#allocation5 + $0x1130] sm:$0xff]   ;;  %v14796_v17 = vld [vmem:[#allocation5 + $0x1138] sm:$0xff]  }
 0x251   :  { %v14793_v13 = vld [vmem:[#allocation5 + $0x11b0] sm:$0xff]   ;;  %v2562_v19 = vrot.slane %v15533_v33, %v15411_v35  ;;  %v14811_v33 = vld [vmem:[#allocation5 + $0x1258] sm:$0xff]  }
 0x252   :  { %v15528_v21 = vadd.f32 %v13235_v16, %v9951_v15  ;;  %13516 = vmatpush3.bf16.msra.mxu0 %v14760_v18  ;;  %v14794_v15 = vld [vmem:[#allocation5 + $0x1178] sm:$0xff]  }
 0x253   :  { %13517 = vmatprep.subr.bf16.mxu0 %v14762_v20  ;;  %13538 = vmatpush3.bf16.msra.mxu1 %v14761_v22  ;;  %v14795_v16 = vld [vmem:[#allocation5 + $0x11f8] sm:$0xff]   ;;  %v14799_v20 = vld [vmem:[#allocation5 + $0x1240] sm:$0xff]  }
 0x254   :  { %13539 = vmatprep.subr.bf16.mxu1 %v14763_v23  ;;  %v14797_v18 = vld [vmem:[#allocation5 + $0x11b8] sm:$0xff]   ;;  %v14801_v22 = vld [vmem:[#allocation5 + $0x1200] sm:$0xff]  }
 0x255   :  { %v14802_v23 = vld [vmem:[#allocation5 + $0x1280] sm:$0xff]  }
 0x256   :  { %13518 = vmatpush3.bf16.msra.mxu0 %v14764_v24  ;;  %v2578_v24 = vcombine.high %v2562_v19, %v2562_v19 }
 0x257   :  { %13547 = vmatprep.subr.bf16.mxu0 %v14766_v27  ;;  %13540 = vmatpush3.bf16.msra.mxu1 %v14765_v29  ;;  %v14805_v27 = vld [vmem:[#allocation5 + $0x1208] sm:$0xff]   ;;  %v14807_v29 = vld [vmem:[#allocation5 + $0x1250] sm:$0xff]  }
 0x258   :  { %13569 = vmatprep.subr.bf16.mxu1 %v14767_v32  ;;  %v14810_v32 = vld [vmem:[#allocation5 + $0x1290] sm:$0xff]  }
 0x259   :  { %10509 = vmatmul.mubr.bf16.vlgmr.msra.gmra.mrb[64].mxu0 %v2555_v31  ;;  %v14809_v31 = vld [vmem:[#allocation5 + $0x1210] sm:$0xff]  }
 0x25a   :  { %13548 = vmatpush3.bf16.msra.mxu0 %v14768_v34  ;;  %10549 = vmatmul.mubr.bf16.vlgmr.msra.gmra.mrb[64].mxu1 %v2577_v39  ;;  %v14812_v34 = vld [vmem:[#allocation5 + $0x12d8] sm:$0xff]   ;;  %v14816_v39 = vld [vmem:[#allocation5 + $0x12e0] sm:$0xff]  }
 0x25b   :  { %13549 = vmatprep.subr.bf16.mxu0 %v14770_v40  ;;  %13570 = vmatpush3.bf16.msra.mxu1 %v14769_v37  ;;  %v14814_v37 = vld [vmem:[#allocation5 + $0x1298] sm:$0xff]   ;;  %v14817_v40 = vld [vmem:[#allocation5 + $0x1220] sm:$0xff]  }
 0x25c   :  { %10588 = vmatprep.mubr.bf16.mxu0 %v2576_v43  ;;  %13571 = vmatprep.subr.bf16.mxu1 %v14771_v42  ;;  %v14819_v42 = vld [vmem:[#allocation5 + $0x1268] sm:$0xff]  }
 0x25d   :  { %10628 = vmatprep.mubr.bf16.mxu1 %v2580_v46  ;;  %v14820_v43 = vld [vmem:[#allocation5 + $0x12e8] sm:$0xff]  }
 0x25e   :  { %13550 = vmatpush3.bf16.msra.mxu0 %v14772_v44 }
 0x25f   :  { %13551 = vmatprep.subr.bf16.mxu0 %v14774_v47  ;;  %13572 = vmatpush3.bf16.msra.mxu1 %v14773_v45  ;;  %v14821_v45 = vld [vmem:[#allocation5 + $0x1228] sm:$0xff]   ;;  %v14823_v47 = vld [vmem:[#allocation5 + $0x1270] sm:$0xff]  }
 0x260   :  { %13573 = vmatprep.subr.bf16.mxu1 %v14775_v48 }
 0x262   :  { %13552 = vmatpush3.bf16.msra.mxu0 %v14776_v49 }
 0x263   :  { %13553 = vmatprep.subr.bf16.mxu0 %v14778_v51  ;;  %13574 = vmatpush3.bf16.msra.mxu1 %v14777_v50 }
 0x264   :  { %13575 = vmatprep.subr.bf16.mxu1 %v14779_v52  ;;  %v14822_v52 = vld [vmem:[#allocation5 + $0x12a8] sm:$0xff]  }
 0x266   :  { %13554 = vmatpush3.bf16.msra.mxu0 %v14780_v53 }
 0x267   :  { %13555 = vmatprep.subr.bf16.mxu0 %v14782_v55  ;;  %13576 = vmatpush3.bf16.msra.mxu1 %v14781_v54  ;;  %v14824_v54 = vld [vmem:[#allocation5 + $0x12f0] sm:$0xff]  }
 0x268   :  { %13577 = vmatprep.subr.bf16.mxu1 %v14783_v56 }
 0x26a   :  { %13556 = vmatpush3.bf16.msra.mxu0 %v14784_v57 }
 0x26b   :  { %13557 = vmatprep.subr.bf16.mxu0 %v14786_v59  ;;  %13578 = vmatpush3.bf16.msra.mxu1 %v14785_v58  ;;  %v14825_v58 = vld [vmem:[#allocation5 + $0x1230] sm:$0xff]  }
 0x26c   :  { %v13255_v61 = vpop.f32.mrb[40].mxu0  ;;  %13579 = vmatprep.subr.bf16.mxu1 %v14787_v60  ;;  %v14827_v60 = vld [vmem:[#allocation5 + $0x1278] sm:$0xff]  }
 0x26d   :  { %v13256_v63 = vpop.f32.mrb[41].mxu0  ;;  %v13277_v1 = vpop.f32.mrb[40].mxu1 }
 0x26e   :  { %v13257_v2 = vadd.f32 %v13256_v63, %v13255_v61  ;;  %v13258_v3 = vpop.f32.mrb[42].mxu0  ;;  %v13278_v6 = vpop.f32.mrb[41].mxu1  ;;  %13558 = vmatpush3.bf16.msra.mxu0 %v14788_v62  ;;  %v14826_v62 = vld [vmem:[#allocation5 + $0x12b0] sm:$0xff]   ;;  %v14828_v63 = vld [vmem:[#allocation5 + $0x12f8] sm:$0xff]  }
 0x26f   :  { %v13259_v7 = vpop.f32.mrb[43].mxu0  ;;  %v13279_v9 = vadd.f32 %v13278_v6, %v13277_v1  ;;  %v13280_v10 = vpop.f32.mrb[42].mxu1  ;;  %13559 = vmatprep.subr.bf16.mxu0 %v14790_v4  ;;  %13580 = vmatpush3.bf16.msra.mxu1 %v14789_v0  ;;  %v14829_v0 = vld [vmem:[#allocation5 + $0x1238] sm:$0xff]   ;;  %v62_v1 = vld [vmem:[#allocation2 + $0x48] sm:$0xff]  ;;  %v14831_v3 = vld [vmem:[#allocation5 + $0x1340] sm:$0xff]  }
 0x270   :  { %v10031_v8 = vadd.f32 %v13257_v2, %v15528_v21  ;;  %v13281_v12 = vpop.f32.mrb[43].mxu1  ;;  %13581 = vmatprep.subr.bf16.mxu1 %v14791_v5  ;;  %v14800_v21 = vld [vmem:[#allocation5 + $0x12c0] sm:$0xff]   ;;  %v2588_v2 = vrot.slane %v62_v1, %v15411_v35  ;;  %v2581_v4 = vcombine.high %v62_v1, %v62_v1  ;;  %v14830_v5 = vld [vmem:[#allocation5 + $0x12b8] sm:$0xff]   ;;  %v14868_v1 = vld [vmem:[#allocation5 + $0x1448] sm:$0xff]  }
 0x271   :  { %v14833_v10 = vld [vmem:[#allocation5 + $0x1300] sm:$0xff]  }
 0x272   :  { %v15540_v14 = vadd.f32 %v13279_v9, %v10031_v8  ;;  %13560 = vmatpush3.bf16.msra.mxu0 %v14792_v11  ;;  %v2596_v6 = vcombine.high %v2588_v2, %v2588_v2  ;;  %v2604_v7 = vrot.slane %v2588_v2, %v15411_v35  ;;  %v14832_v8 = vld [vmem:[#allocation5 + $0x13c0] sm:$0xff]   ;;  %v15550_v9 = vrot.slane %v2581_v4, %v15411_v35  ;;  %v14869_v2 = vld [vmem:[#allocation5 + $0x14c8] sm:$0xff]  }
 0x273   :  { %13561 = vmatprep.subr.bf16.mxu0 %v14794_v15  ;;  %13582 = vmatpush3.bf16.msra.mxu1 %v14793_v13  ;;  %v14834_v12 = vld [vmem:[#allocation5 + $0x1380] sm:$0xff]   ;;  %v14835_v15 = vld [vmem:[#allocation5 + $0x1348] sm:$0xff]  }
 0x274   :  { %13583 = vmatprep.subr.bf16.mxu1 %v14795_v16  ;;  %v2618_v11 = vrot.slane %v2596_v6, %v15411_v35  ;;  %v2597_v13 = vcombine.high %v15550_v9, %v15550_v9  ;;  %v14871_v4 = vld [vmem:[#allocation5 + $0x1488] sm:$0xff]   ;;  %v14873_v6 = vld [vmem:[#allocation5 + $0x14d0] sm:$0xff]  }
 0x276   :  { %13562 = vmatpush3.bf16.msra.mxu0 %v14796_v17  ;;  %v2628_v16 = vcombine.high %v2618_v11, %v2618_v11  ;;  %v14836_v17 = vld [vmem:[#allocation5 + $0x13c8] sm:$0xff]  }
 0x277   :  { %13591 = vmatprep.subr.bf16.mxu0 %v14799_v20  ;;  %13584 = vmatpush3.bf16.msra.mxu1 %v14797_v18  ;;  %v2625_v18 = vrot.slane %v2597_v13, %v15411_v35  ;;  %v14838_v20 = vld [vmem:[#allocation5 + $0x1388] sm:$0xff]   ;;  %v14880_v13 = vld [vmem:[#allocation5 + $0x1460] sm:$0xff]  }
 0x278   :  { %13613 = vmatprep.subr.bf16.mxu1 %v14800_v21 }
 0x279   :  { %10589 = vmatmul.mubr.bf16.vlgmr.msra.gmra.mrb[68].mxu0 %v2562_v19  ;;  %v14837_v19 = vld [vmem:[#allocation5 + $0x1308] sm:$0xff]   ;;  %v2629_v21 = vcombine.high %v2625_v18, %v2625_v18 }
 0x27a   :  { %13592 = vmatpush3.bf16.msra.mxu0 %v14801_v22  ;;  %10629 = vmatmul.mubr.bf16.vlgmr.msra.gmra.mrb[68].mxu1 %v2578_v24  ;;  %v14839_v22 = vld [vmem:[#allocation5 + $0x1350] sm:$0xff]  }
 0x27b   :  { %13593 = vmatprep.subr.bf16.mxu0 %v14803_v25  ;;  %13614 = vmatpush3.bf16.msra.mxu1 %v14802_v23  ;;  %v14840_v23 = vld [vmem:[#allocation5 + $0x13d0] sm:$0xff]  }
 0x27c   :  { %13615 = vmatprep.subr.bf16.mxu1 %v14804_v26  ;;  %10668 = vmatprep.mubr.bf16.mxu0 %v2618_v11  ;;  %v14841_v24 = vld [vmem:[#allocation5 + $0x1310] sm:$0xff]   ;;  %v14843_v26 = vld [vmem:[#allocation5 + $0x1358] sm:$0xff]  }
 0x27d   :  { %10708 = vmatprep.mubr.bf16.mxu1 %v2628_v16  ;;  %v14842_v25 = vld [vmem:[#allocation5 + $0x1390] sm:$0xff]   ;;  %v14878_v11 = vld [vmem:[#allocation5 + $0x1418] sm:$0xff]   ;;  %v14883_v16 = vld [vmem:[#allocation5 + $0x14a0] sm:$0xff]  }
 0x27e   :  { %13594 = vmatpush3.bf16.msra.mxu0 %v14805_v27  ;;  %v14844_v27 = vld [vmem:[#allocation5 + $0x13d8] sm:$0xff]  }
 0x27f   :  { %13595 = vmatprep.subr.bf16.mxu0 %v14807_v29  ;;  %13616 = vmatpush3.bf16.msra.mxu1 %v14806_v28  ;;  %v14845_v28 = vld [vmem:[#allocation5 + $0x1318] sm:$0xff]  }
 0x280   :  { %13617 = vmatprep.subr.bf16.mxu1 %v14808_v30  ;;  %v14846_v29 = vld [vmem:[#allocation5 + $0x1398] sm:$0xff]   ;;  %v14847_v30 = vld [vmem:[#allocation5 + $0x1360] sm:$0xff]  }
 0x282   :  { %13596 = vmatpush3.bf16.msra.mxu0 %v14809_v31  ;;  %v14848_v31 = vld [vmem:[#allocation5 + $0x13e0] sm:$0xff]  }
 0x283   :  { %13597 = vmatprep.subr.bf16.mxu0 %v14811_v33  ;;  %13618 = vmatpush3.bf16.msra.mxu1 %v14810_v32  ;;  %v14849_v32 = vld [vmem:[#allocation5 + $0x1320] sm:$0xff]  }
 0x284   :  { %13619 = vmatprep.subr.bf16.mxu1 %v14812_v34  ;;  %v14850_v33 = vld [vmem:[#allocation5 + $0x13a0] sm:$0xff]   ;;  %v14851_v34 = vld [vmem:[#allocation5 + $0x1368] sm:$0xff]  }
 0x286   :  { %13598 = vmatpush3.bf16.msra.mxu0 %v14813_v36  ;;  %v14852_v36 = vld [vmem:[#allocation5 + $0x13e8] sm:$0xff]  }
 0x287   :  { %13599 = vmatprep.subr.bf16.mxu0 %v14815_v38  ;;  %13620 = vmatpush3.bf16.msra.mxu1 %v14814_v37  ;;  %v14853_v38 = vld [vmem:[#allocation5 + $0x1328] sm:$0xff]  }
 0x288   :  { %13621 = vmatprep.subr.bf16.mxu1 %v14816_v39 }
 0x28a   :  { %13600 = vmatpush3.bf16.msra.mxu0 %v14817_v40  ;;  %v14854_v40 = vld [vmem:[#allocation5 + $0x13a8] sm:$0xff]  }
 0x28b   :  { %13601 = vmatprep.subr.bf16.mxu0 %v14819_v42  ;;  %13622 = vmatpush3.bf16.msra.mxu1 %v14818_v41 }
 0x28c   :  { %v13299_v44 = vpop.f32.mrb[44].mxu0  ;;  %13623 = vmatprep.subr.bf16.mxu1 %v14820_v43 }
 0x28d   :  { %v13300_v46 = vpop.f32.mrb[45].mxu0  ;;  %v13321_v48 = vpop.f32.mrb[44].mxu1 }
 0x28e   :  { %v13301_v49 = vadd.f32 %v13300_v46, %v13299_v44  ;;  %v13302_v50 = vpop.f32.mrb[46].mxu0  ;;  %v13322_v51 = vpop.f32.mrb[45].mxu1  ;;  %13602 = vmatpush3.bf16.msra.mxu0 %v14821_v45  ;;  %v14855_v44 = vld [vmem:[#allocation5 + $0x1370] sm:$0xff]  }
 0x28f   :  { %v13303_v53 = vpop.f32.mrb[47].mxu0  ;;  %v13323_v56 = vadd.f32 %v13322_v51, %v13321_v48  ;;  %v13324_v57 = vpop.f32.mrb[46].mxu1  ;;  %13603 = vmatprep.subr.bf16.mxu0 %v14823_v47  ;;  %13624 = vmatpush3.bf16.msra.mxu1 %v14822_v52  ;;  %v14856_v45 = vld [vmem:[#allocation5 + $0x13f0] sm:$0xff]  }
 0x290   :  { %v10111_v55 = vadd.f32 %v13301_v49, %v15540_v14  ;;  %v13325_v59 = vpop.f32.mrb[47].mxu1  ;;  %13625 = vmatprep.subr.bf16.mxu1 %v14824_v54  ;;  %v2626_v14 = vcombine.high %v2604_v7, %v2604_v7  ;;  %v14857_v51 = vld [vmem:[#allocation5 + $0x1330] sm:$0xff]   ;;  %v14861_v57 = vld [vmem:[#allocation5 + $0x1338] sm:$0xff]  }
 0x291   :  { %v14858_v53 = vld [vmem:[#allocation5 + $0x13b0] sm:$0xff]   ;;  %v2611_v59 = vrot.slane %v15550_v9, %v15411_v35  ;;  %v14876_v9 = vld [vmem:[#allocation5 + $0x1458] sm:$0xff]  }
 0x292   :  { %v15545_v61 = vadd.f32 %v13323_v56, %v10111_v55  ;;  %13604 = vmatpush3.bf16.msra.mxu0 %v14825_v58  ;;  %v14859_v55 = vld [vmem:[#allocation5 + $0x1378] sm:$0xff]  }
 0x293   :  { %13605 = vmatprep.subr.bf16.mxu0 %v14827_v60  ;;  %13626 = vmatpush3.bf16.msra.mxu1 %v14826_v62  ;;  %v14860_v56 = vld [vmem:[#allocation5 + $0x13f8] sm:$0xff]   ;;  %v14864_v60 = vld [vmem:[#allocation5 + $0x1440] sm:$0xff]  }
 0x294   :  { %13627 = vmatprep.subr.bf16.mxu1 %v14828_v63  ;;  %v14862_v58 = vld [vmem:[#allocation5 + $0x13b8] sm:$0xff]   ;;  %v14866_v62 = vld [vmem:[#allocation5 + $0x1400] sm:$0xff]  }
 0x295   :  { %v14867_v63 = vld [vmem:[#allocation5 + $0x1480] sm:$0xff]  }
 0x296   :  { %13606 = vmatpush3.bf16.msra.mxu0 %v14829_v0  ;;  %v2627_v0 = vcombine.high %v2611_v59, %v2611_v59 }
 0x297   :  { %13635 = vmatprep.subr.bf16.mxu0 %v14831_v3  ;;  %13628 = vmatpush3.bf16.msra.mxu1 %v14830_v5  ;;  %v14870_v3 = vld [vmem:[#allocation5 + $0x1408] sm:$0xff]   ;;  %v14872_v5 = vld [vmem:[#allocation5 + $0x1450] sm:$0xff]  }
 0x298   :  { %13657 = vmatprep.subr.bf16.mxu1 %v14832_v8  ;;  %v14875_v8 = vld [vmem:[#allocation5 + $0x1490] sm:$0xff]  }
 0x299   :  { %10669 = vmatmul.mubr.bf16.vlgmr.msra.gmra.mrb[72].mxu0 %v2604_v7  ;;  %v14874_v7 = vld [vmem:[#allocation5 + $0x1410] sm:$0xff]  }
 0x29a   :  { %13636 = vmatpush3.bf16.msra.mxu0 %v14833_v10  ;;  %10709 = vmatmul.mubr.bf16.vlgmr.msra.gmra.mrb[72].mxu1 %v2626_v14  ;;  %v14877_v10 = vld [vmem:[#allocation5 + $0x14d8] sm:$0xff]   ;;  %v14881_v14 = vld [vmem:[#allocation5 + $0x14e0] sm:$0xff]  }
 0x29b   :  { %13637 = vmatprep.subr.bf16.mxu0 %v14835_v15  ;;  %13658 = vmatpush3.bf16.msra.mxu1 %v14834_v12  ;;  %v14879_v12 = vld [vmem:[#allocation5 + $0x1498] sm:$0xff]   ;;  %v14882_v15 = vld [vmem:[#allocation5 + $0x1420] sm:$0xff]  }
 0x29c   :  { %10748 = vmatprep.mubr.bf16.mxu0 %v2625_v18  ;;  %13659 = vmatprep.subr.bf16.mxu1 %v14836_v17  ;;  %v14884_v17 = vld [vmem:[#allocation5 + $0x1468] sm:$0xff]  }
 0x29d   :  { %10788 = vmatprep.mubr.bf16.mxu1 %v2629_v21  ;;  %v14885_v18 = vld [vmem:[#allocation5 + $0x14e8] sm:$0xff]  }
 0x29e   :  { %13638 = vmatpush3.bf16.msra.mxu0 %v14837_v19 }
 0x29f   :  { %13639 = vmatprep.subr.bf16.mxu0 %v14839_v22  ;;  %13660 = vmatpush3.bf16.msra.mxu1 %v14838_v20  ;;  %v14886_v20 = vld [vmem:[#allocation5 + $0x1428] sm:$0xff]   ;;  %v14888_v22 = vld [vmem:[#allocation5 + $0x1470] sm:$0xff]  }
 0x2a0   :  { %13661 = vmatprep.subr.bf16.mxu1 %v14840_v23 }
 0x2a2   :  { %13640 = vmatpush3.bf16.msra.mxu0 %v14841_v24 }
 0x2a3   :  { %13641 = vmatprep.subr.bf16.mxu0 %v14843_v26  ;;  %13662 = vmatpush3.bf16.msra.mxu1 %v14842_v25 }
 0x2a4   :  { %13663 = vmatprep.subr.bf16.mxu1 %v14844_v27  ;;  %v14887_v27 = vld [vmem:[#allocation5 + $0x14a8] sm:$0xff]  }
 0x2a6   :  { %13642 = vmatpush3.bf16.msra.mxu0 %v14845_v28 }
 0x2a7   :  { %13643 = vmatprep.subr.bf16.mxu0 %v14847_v30  ;;  %13664 = vmatpush3.bf16.msra.mxu1 %v14846_v29  ;;  %v14889_v29 = vld [vmem:[#allocation5 + $0x14f0] sm:$0xff]  }
 0x2a8   :  { %13665 = vmatprep.subr.bf16.mxu1 %v14848_v31 }
 0x2aa   :  { %13644 = vmatpush3.bf16.msra.mxu0 %v14849_v32 }
 0x2ab   :  { %13645 = vmatprep.subr.bf16.mxu0 %v14851_v34  ;;  %13666 = vmatpush3.bf16.msra.mxu1 %v14850_v33  ;;  %v14890_v33 = vld [vmem:[#allocation5 + $0x1430] sm:$0xff]  }
 0x2ac   :  { %v13343_v37 = vpop.f32.mrb[48].mxu0  ;;  %13667 = vmatprep.subr.bf16.mxu1 %v14852_v36  ;;  %v14892_v36 = vld [vmem:[#allocation5 + $0x1478] sm:$0xff]  }
 0x2ad   :  { %v13344_v39 = vpop.f32.mrb[49].mxu0  ;;  %v13365_v41 = vpop.f32.mrb[48].mxu1 }
 0x2ae   :  { %v13345_v42 = vadd.f32 %v13344_v39, %v13343_v37  ;;  %v13346_v43 = vpop.f32.mrb[50].mxu0  ;;  %v13366_v46 = vpop.f32.mrb[49].mxu1  ;;  %13646 = vmatpush3.bf16.msra.mxu0 %v14853_v38  ;;  %v14891_v38 = vld [vmem:[#allocation5 + $0x14b0] sm:$0xff]   ;;  %v14893_v39 = vld [vmem:[#allocation5 + $0x14f8] sm:$0xff]  }
 0x2af   :  { %v13347_v47 = vpop.f32.mrb[51].mxu0  ;;  %v13367_v49 = vadd.f32 %v13366_v46, %v13365_v41  ;;  %v13368_v50 = vpop.f32.mrb[50].mxu1  ;;  %13647 = vmatprep.subr.bf16.mxu0 %v14855_v44  ;;  %13668 = vmatpush3.bf16.msra.mxu1 %v14854_v40  ;;  %v14894_v40 = vld [vmem:[#allocation5 + $0x1438] sm:$0xff]   ;;  %v63_v41 = vld [vmem:[#allocation2 + $0x50] sm:$0xff]  ;;  %v14896_v43 = vld [vmem:[#allocation5 + $0x1540] sm:$0xff]  }
 0x2b0   :  { %v10191_v48 = vadd.f32 %v13345_v42, %v15545_v61  ;;  %v13369_v52 = vpop.f32.mrb[51].mxu1  ;;  %13669 = vmatprep.subr.bf16.mxu1 %v14856_v45  ;;  %v14865_v61 = vld [vmem:[#allocation5 + $0x14c0] sm:$0xff]   ;;  %v2637_v42 = vrot.slane %v63_v41, %v15411_v35  ;;  %v2630_v44 = vcombine.high %v63_v41, %v63_v41  ;;  %v14895_v45 = vld [vmem:[#allocation5 + $0x14b8] sm:$0xff]   ;;  %v14933_v41 = vld [vmem:[#allocation5 + $0x1648] sm:$0xff]  }
 0x2b1   :  { %v14898_v50 = vld [vmem:[#allocation5 + $0x1500] sm:$0xff]  }
 0x2b2   :  { %v15557_v54 = vadd.f32 %v13367_v49, %v10191_v48  ;;  %13648 = vmatpush3.bf16.msra.mxu0 %v14857_v51  ;;  %v2645_v46 = vcombine.high %v2637_v42, %v2637_v42  ;;  %v2653_v47 = vrot.slane %v2637_v42, %v15411_v35  ;;  %v14897_v48 = vld [vmem:[#allocation5 + $0x15c0] sm:$0xff]   ;;  %v15567_v49 = vrot.slane %v2630_v44, %v15411_v35  ;;  %v14934_v42 = vld [vmem:[#allocation5 + $0x16c8] sm:$0xff]  }
 0x2b3   :  { %13649 = vmatprep.subr.bf16.mxu0 %v14859_v55  ;;  %13670 = vmatpush3.bf16.msra.mxu1 %v14858_v53  ;;  %v14899_v52 = vld [vmem:[#allocation5 + $0x1580] sm:$0xff]   ;;  %v14900_v55 = vld [vmem:[#allocation5 + $0x1548] sm:$0xff]  }
 0x2b4   :  { %13671 = vmatprep.subr.bf16.mxu1 %v14860_v56  ;;  %v2667_v51 = vrot.slane %v2645_v46, %v15411_v35  ;;  %v2646_v53 = vcombine.high %v15567_v49, %v15567_v49  ;;  %v14936_v44 = vld [vmem:[#allocation5 + $0x1688] sm:$0xff]   ;;  %v14938_v46 = vld [vmem:[#allocation5 + $0x16d0] sm:$0xff]  }
 0x2b6   :  { %13650 = vmatpush3.bf16.msra.mxu0 %v14861_v57  ;;  %v2677_v56 = vcombine.high %v2667_v51, %v2667_v51  ;;  %v14901_v57 = vld [vmem:[#allocation5 + $0x15c8] sm:$0xff]  }
 0x2b7   :  { %13679 = vmatprep.subr.bf16.mxu0 %v14864_v60  ;;  %13672 = vmatpush3.bf16.msra.mxu1 %v14862_v58  ;;  %v2674_v58 = vrot.slane %v2646_v53, %v15411_v35  ;;  %v14903_v60 = vld [vmem:[#allocation5 + $0x1588] sm:$0xff]   ;;  %v14945_v53 = vld [vmem:[#allocation5 + $0x1660] sm:$0xff]  }
 0x2b8   :  { %13701 = vmatprep.subr.bf16.mxu1 %v14865_v61 }
 0x2b9   :  { %10749 = vmatmul.mubr.bf16.vlgmr.msra.gmra.mrb[76].mxu0 %v2611_v59  ;;  %v14902_v59 = vld [vmem:[#allocation5 + $0x1508] sm:$0xff]   ;;  %v2678_v61 = vcombine.high %v2674_v58, %v2674_v58 }
 0x2ba   :  { %13680 = vmatpush3.bf16.msra.mxu0 %v14866_v62  ;;  %10789 = vmatmul.mubr.bf16.vlgmr.msra.gmra.mrb[76].mxu1 %v2627_v0  ;;  %v14904_v62 = vld [vmem:[#allocation5 + $0x1550] sm:$0xff]  }
 0x2bb   :  { %13681 = vmatprep.subr.bf16.mxu0 %v14868_v1  ;;  %13702 = vmatpush3.bf16.msra.mxu1 %v14867_v63  ;;  %v14905_v63 = vld [vmem:[#allocation5 + $0x15d0] sm:$0xff]  }
 0x2bc   :  { %13703 = vmatprep.subr.bf16.mxu1 %v14869_v2  ;;  %10828 = vmatprep.mubr.bf16.mxu0 %v2667_v51  ;;  %v14906_v0 = vld [vmem:[#allocation5 + $0x1510] sm:$0xff]   ;;  %v14908_v2 = vld [vmem:[#allocation5 + $0x1558] sm:$0xff]  }
 0x2bd   :  { %10868 = vmatprep.mubr.bf16.mxu1 %v2677_v56  ;;  %v14907_v1 = vld [vmem:[#allocation5 + $0x1590] sm:$0xff]   ;;  %v14943_v51 = vld [vmem:[#allocation5 + $0x1618] sm:$0xff]   ;;  %v14948_v56 = vld [vmem:[#allocation5 + $0x16a0] sm:$0xff]  }
 0x2be   :  { %13682 = vmatpush3.bf16.msra.mxu0 %v14870_v3  ;;  %v14909_v3 = vld [vmem:[#allocation5 + $0x15d8] sm:$0xff]  }
 0x2bf   :  { %13683 = vmatprep.subr.bf16.mxu0 %v14872_v5  ;;  %13704 = vmatpush3.bf16.msra.mxu1 %v14871_v4  ;;  %v14910_v4 = vld [vmem:[#allocation5 + $0x1518] sm:$0xff]  }
 0x2c0   :  { %13705 = vmatprep.subr.bf16.mxu1 %v14873_v6  ;;  %v14911_v5 = vld [vmem:[#allocation5 + $0x1598] sm:$0xff]   ;;  %v14912_v6 = vld [vmem:[#allocation5 + $0x1560] sm:$0xff]  }
 0x2c2   :  { %13684 = vmatpush3.bf16.msra.mxu0 %v14874_v7  ;;  %v14913_v7 = vld [vmem:[#allocation5 + $0x15e0] sm:$0xff]  }
 0x2c3   :  { %13685 = vmatprep.subr.bf16.mxu0 %v14876_v9  ;;  %13706 = vmatpush3.bf16.msra.mxu1 %v14875_v8  ;;  %v14914_v8 = vld [vmem:[#allocation5 + $0x1520] sm:$0xff]  }
 0x2c4   :  { %13707 = vmatprep.subr.bf16.mxu1 %v14877_v10  ;;  %v14915_v9 = vld [vmem:[#allocation5 + $0x15a0] sm:$0xff]   ;;  %v14916_v10 = vld [vmem:[#allocation5 + $0x1568] sm:$0xff]  }
 0x2c6   :  { %13686 = vmatpush3.bf16.msra.mxu0 %v14878_v11  ;;  %v14917_v11 = vld [vmem:[#allocation5 + $0x15e8] sm:$0xff]  }
 0x2c7   :  { %13687 = vmatprep.subr.bf16.mxu0 %v14880_v13  ;;  %13708 = vmatpush3.bf16.msra.mxu1 %v14879_v12  ;;  %v14918_v13 = vld [vmem:[#allocation5 + $0x1528] sm:$0xff]  }
 0x2c8   :  { %13709 = vmatprep.subr.bf16.mxu1 %v14881_v14 }
 0x2ca   :  { %13688 = vmatpush3.bf16.msra.mxu0 %v14882_v15  ;;  %v14919_v15 = vld [vmem:[#allocation5 + $0x15a8] sm:$0xff]  }
 0x2cb   :  { %13689 = vmatprep.subr.bf16.mxu0 %v14884_v17  ;;  %13710 = vmatpush3.bf16.msra.mxu1 %v14883_v16 }
 0x2cc   :  { %v13387_v19 = vpop.f32.mrb[52].mxu0  ;;  %13711 = vmatprep.subr.bf16.mxu1 %v14885_v18 }
 0x2cd   :  { %v13388_v21 = vpop.f32.mrb[53].mxu0  ;;  %v13409_v23 = vpop.f32.mrb[52].mxu1 }
 0x2ce   :  { %v13389_v24 = vadd.f32 %v13388_v21, %v13387_v19  ;;  %v13390_v25 = vpop.f32.mrb[54].mxu0  ;;  %v13410_v26 = vpop.f32.mrb[53].mxu1  ;;  %13690 = vmatpush3.bf16.msra.mxu0 %v14886_v20  ;;  %v14920_v19 = vld [vmem:[#allocation5 + $0x1570] sm:$0xff]  }
 0x2cf   :  { %v13391_v28 = vpop.f32.mrb[55].mxu0  ;;  %v13411_v31 = vadd.f32 %v13410_v26, %v13409_v23  ;;  %v13412_v32 = vpop.f32.mrb[54].mxu1  ;;  %13691 = vmatprep.subr.bf16.mxu0 %v14888_v22  ;;  %13712 = vmatpush3.bf16.msra.mxu1 %v14887_v27  ;;  %v14921_v20 = vld [vmem:[#allocation5 + $0x15f0] sm:$0xff]  }
 0x2d0   :  { %v10271_v30 = vadd.f32 %v13389_v24, %v15557_v54  ;;  %v13413_v34 = vpop.f32.mrb[55].mxu1  ;;  %13713 = vmatprep.subr.bf16.mxu1 %v14889_v29  ;;  %v2675_v54 = vcombine.high %v2653_v47, %v2653_v47  ;;  %v14922_v26 = vld [vmem:[#allocation5 + $0x1530] sm:$0xff]   ;;  %v14926_v32 = vld [vmem:[#allocation5 + $0x1538] sm:$0xff]  }
 0x2d1   :  { %v14923_v28 = vld [vmem:[#allocation5 + $0x15b0] sm:$0xff]   ;;  %v2660_v34 = vrot.slane %v15567_v49, %v15411_v35  ;;  %v14941_v49 = vld [vmem:[#allocation5 + $0x1658] sm:$0xff]  }
 0x2d2   :  { %v15562_v37 = vadd.f32 %v13411_v31, %v10271_v30  ;;  %13692 = vmatpush3.bf16.msra.mxu0 %v14890_v33  ;;  %v14924_v30 = vld [vmem:[#allocation5 + $0x1578] sm:$0xff]  }
 0x2d3   :  { %13693 = vmatprep.subr.bf16.mxu0 %v14892_v36  ;;  %13714 = vmatpush3.bf16.msra.mxu1 %v14891_v38  ;;  %v14925_v31 = vld [vmem:[#allocation5 + $0x15f8] sm:$0xff]   ;;  %v14929_v36 = vld [vmem:[#allocation5 + $0x1640] sm:$0xff]  }
 0x2d4   :  { %13715 = vmatprep.subr.bf16.mxu1 %v14893_v39  ;;  %v14927_v33 = vld [vmem:[#allocation5 + $0x15b8] sm:$0xff]   ;;  %v14931_v38 = vld [vmem:[#allocation5 + $0x1600] sm:$0xff]  }
 0x2d5   :  { %v14932_v39 = vld [vmem:[#allocation5 + $0x1680] sm:$0xff]  }
 0x2d6   :  { %13694 = vmatpush3.bf16.msra.mxu0 %v14894_v40  ;;  %v2676_v40 = vcombine.high %v2660_v34, %v2660_v34 }
 0x2d7   :  { %13723 = vmatprep.subr.bf16.mxu0 %v14896_v43  ;;  %13716 = vmatpush3.bf16.msra.mxu1 %v14895_v45  ;;  %v14935_v43 = vld [vmem:[#allocation5 + $0x1608] sm:$0xff]   ;;  %v14937_v45 = vld [vmem:[#allocation5 + $0x1650] sm:$0xff]  }
 0x2d8   :  { %13745 = vmatprep.subr.bf16.mxu1 %v14897_v48  ;;  %v14940_v48 = vld [vmem:[#allocation5 + $0x1690] sm:$0xff]  }
 0x2d9   :  { %10829 = vmatmul.mubr.bf16.vlgmr.msra.gmra.mrb[80].mxu0 %v2653_v47  ;;  %v14939_v47 = vld [vmem:[#allocation5 + $0x1610] sm:$0xff]  }
 0x2da   :  { %13724 = vmatpush3.bf16.msra.mxu0 %v14898_v50  ;;  %10869 = vmatmul.mubr.bf16.vlgmr.msra.gmra.mrb[80].mxu1 %v2675_v54  ;;  %v14942_v50 = vld [vmem:[#allocation5 + $0x16d8] sm:$0xff]   ;;  %v14946_v54 = vld [vmem:[#allocation5 + $0x16e0] sm:$0xff]  }
 0x2db   :  { %13725 = vmatprep.subr.bf16.mxu0 %v14900_v55  ;;  %13746 = vmatpush3.bf16.msra.mxu1 %v14899_v52  ;;  %v14944_v52 = vld [vmem:[#allocation5 + $0x1698] sm:$0xff]   ;;  %v14947_v55 = vld [vmem:[#allocation5 + $0x1620] sm:$0xff]  }
 0x2dc   :  { %10908 = vmatprep.mubr.bf16.mxu0 %v2674_v58  ;;  %13747 = vmatprep.subr.bf16.mxu1 %v14901_v57  ;;  %v14949_v57 = vld [vmem:[#allocation5 + $0x1668] sm:$0xff]  }
 0x2dd   :  { %10948 = vmatprep.mubr.bf16.mxu1 %v2678_v61  ;;  %v14950_v58 = vld [vmem:[#allocation5 + $0x16e8] sm:$0xff]  }
 0x2de   :  { %13726 = vmatpush3.bf16.msra.mxu0 %v14902_v59 }
 0x2df   :  { %13727 = vmatprep.subr.bf16.mxu0 %v14904_v62  ;;  %13748 = vmatpush3.bf16.msra.mxu1 %v14903_v60  ;;  %v14951_v60 = vld [vmem:[#allocation5 + $0x1628] sm:$0xff]   ;;  %v14953_v62 = vld [vmem:[#allocation5 + $0x1670] sm:$0xff]  }
 0x2e0   :  { %13749 = vmatprep.subr.bf16.mxu1 %v14905_v63 }
 0x2e2   :  { %13728 = vmatpush3.bf16.msra.mxu0 %v14906_v0 }
 0x2e3   :  { %13729 = vmatprep.subr.bf16.mxu0 %v14908_v2  ;;  %13750 = vmatpush3.bf16.msra.mxu1 %v14907_v1 }
 0x2e4   :  { %13751 = vmatprep.subr.bf16.mxu1 %v14909_v3  ;;  %v14952_v3 = vld [vmem:[#allocation5 + $0x16a8] sm:$0xff]  }
 0x2e6   :  { %13730 = vmatpush3.bf16.msra.mxu0 %v14910_v4 }
 0x2e7   :  { %13731 = vmatprep.subr.bf16.mxu0 %v14912_v6  ;;  %13752 = vmatpush3.bf16.msra.mxu1 %v14911_v5  ;;  %v14954_v5 = vld [vmem:[#allocation5 + $0x16f0] sm:$0xff]  }
 0x2e8   :  { %13753 = vmatprep.subr.bf16.mxu1 %v14913_v7 }
 0x2ea   :  { %13732 = vmatpush3.bf16.msra.mxu0 %v14914_v8 }
 0x2eb   :  { %13733 = vmatprep.subr.bf16.mxu0 %v14916_v10  ;;  %13754 = vmatpush3.bf16.msra.mxu1 %v14915_v9  ;;  %v14955_v9 = vld [vmem:[#allocation5 + $0x1630] sm:$0xff]  }
 0x2ec   :  { %v13431_v12 = vpop.f32.mrb[56].mxu0  ;;  %13755 = vmatprep.subr.bf16.mxu1 %v14917_v11  ;;  %v14957_v11 = vld [vmem:[#allocation5 + $0x1678] sm:$0xff]  }
 0x2ed   :  { %v13432_v14 = vpop.f32.mrb[57].mxu0  ;;  %v13453_v16 = vpop.f32.mrb[56].mxu1 }
 0x2ee   :  { %v13433_v17 = vadd.f32 %v13432_v14, %v13431_v12  ;;  %v13434_v18 = vpop.f32.mrb[58].mxu0  ;;  %v13454_v21 = vpop.f32.mrb[57].mxu1  ;;  %13734 = vmatpush3.bf16.msra.mxu0 %v14918_v13  ;;  %v14956_v13 = vld [vmem:[#allocation5 + $0x16b0] sm:$0xff]   ;;  %v14958_v14 = vld [vmem:[#allocation5 + $0x16f8] sm:$0xff]  }
 0x2ef   :  { %v13435_v22 = vpop.f32.mrb[59].mxu0  ;;  %v13455_v24 = vadd.f32 %v13454_v21, %v13453_v16  ;;  %v13456_v25 = vpop.f32.mrb[58].mxu1  ;;  %13735 = vmatprep.subr.bf16.mxu0 %v14920_v19  ;;  %13756 = vmatpush3.bf16.msra.mxu1 %v14919_v15  ;;  %v14959_v15 = vld [vmem:[#allocation5 + $0x1638] sm:$0xff]   ;;  %v14961_v18 = vld [vmem:[#allocation5 + $0x1740] sm:$0xff]  }
 0x2f0   :  { %v10351_v23 = vadd.f32 %v13433_v17, %v15562_v37  ;;  %v13457_v27 = vpop.f32.mrb[59].mxu1  ;;  %13757 = vmatprep.subr.bf16.mxu1 %v14921_v20  ;;  %v14930_v37 = vld [vmem:[#allocation5 + $0x16c0] sm:$0xff]   ;;  %v64_v16 = vld [vmem:[#allocation2 + $0x58] sm:$0xff] }
 0x2f1   :  { %v2686_v17 = vrot.slane %v64_v16, %v15411_v35  ;;  %v2679_v19 = vcombine.high %v64_v16, %v64_v16  ;;  %v14960_v20 = vld [vmem:[#allocation5 + $0x16b8] sm:$0xff]   ;;  %v14963_v25 = vld [vmem:[#allocation5 + $0x1700] sm:$0xff]   ;;  %v14998_v16 = vld [vmem:[#allocation5 + $0x1848] sm:$0xff]  }
 0x2f2   :  { %v15574_v29 = vadd.f32 %v13455_v24, %v10351_v23  ;;  %13736 = vmatpush3.bf16.msra.mxu0 %v14922_v26  ;;  %v14962_v23 = vld [vmem:[#allocation5 + $0x17c0] sm:$0xff]  }
 0x2f3   :  { %13737 = vmatprep.subr.bf16.mxu0 %v14924_v30  ;;  %13758 = vmatpush3.bf16.msra.mxu1 %v14923_v28  ;;  %v2694_v21 = vcombine.high %v2686_v17, %v2686_v17  ;;  %v2702_v22 = vrot.slane %v2686_v17, %v15411_v35  ;;  %v15584_v24 = vrot.slane %v2679_v19, %v15411_v35  ;;  %v14964_v27 = vld [vmem:[#allocation5 + $0x1780] sm:$0xff]   ;;  %v14965_v30 = vld [vmem:[#allocation5 + $0x1748] sm:$0xff]  }
 0x2f4   :  { %13759 = vmatprep.subr.bf16.mxu1 %v14925_v31  ;;  %v14999_v17 = vld [vmem:[#allocation5 + $0x18c8] sm:$0xff]  }
 0x2f5   :  { %v2716_v26 = vrot.slane %v2694_v21, %v15411_v35  ;;  %v2695_v28 = vcombine.high %v15584_v24, %v15584_v24  ;;  %v15001_v19 = vld [vmem:[#allocation5 + $0x1888] sm:$0xff]   ;;  %v15003_v21 = vld [vmem:[#allocation5 + $0x18d0] sm:$0xff]  }
 0x2f6   :  { %13738 = vmatpush3.bf16.msra.mxu0 %v14926_v32  ;;  %v14966_v32 = vld [vmem:[#allocation5 + $0x17c8] sm:$0xff]  }
 0x2f7   :  { %13767 = vmatprep.subr.bf16.mxu0 %v14929_v36  ;;  %13760 = vmatpush3.bf16.msra.mxu1 %v14927_v33  ;;  %v2726_v31 = vcombine.high %v2716_v26, %v2716_v26  ;;  %v2723_v33 = vrot.slane %v2695_v28, %v15411_v35  ;;  %v14968_v36 = vld [vmem:[#allocation5 + $0x1788] sm:$0xff]   ;;  %v15010_v28 = vld [vmem:[#allocation5 + $0x1860] sm:$0xff]  }
 0x2f8   :  { %13789 = vmatprep.subr.bf16.mxu1 %v14930_v37 }
 0x2f9   :  { %10909 = vmatmul.mubr.bf16.vlgmr.msra.gmra.mrb[84].mxu0 %v2660_v34  ;;  %v14967_v34 = vld [vmem:[#allocation5 + $0x1708] sm:$0xff]   ;;  %v2727_v37 = vcombine.high %v2723_v33, %v2723_v33 }
 0x2fa   :  { %13768 = vmatpush3.bf16.msra.mxu0 %v14931_v38  ;;  %10949 = vmatmul.mubr.bf16.vlgmr.msra.gmra.mrb[84].mxu1 %v2676_v40  ;;  %v14969_v38 = vld [vmem:[#allocation5 + $0x1750] sm:$0xff]  }
 0x2fb   :  { %13769 = vmatprep.subr.bf16.mxu0 %v14933_v41  ;;  %13790 = vmatpush3.bf16.msra.mxu1 %v14932_v39  ;;  %v14970_v39 = vld [vmem:[#allocation5 + $0x17d0] sm:$0xff]  }
 0x2fc   :  { %13791 = vmatprep.subr.bf16.mxu1 %v14934_v42  ;;  %10988 = vmatprep.mubr.bf16.mxu0 %v2716_v26  ;;  %v14971_v40 = vld [vmem:[#allocation5 + $0x1710] sm:$0xff]   ;;  %v14973_v42 = vld [vmem:[#allocation5 + $0x1758] sm:$0xff]  }
 0x2fd   :  { %11028 = vmatprep.mubr.bf16.mxu1 %v2726_v31  ;;  %v14972_v41 = vld [vmem:[#allocation5 + $0x1790] sm:$0xff]   ;;  %v15008_v26 = vld [vmem:[#allocation5 + $0x1818] sm:$0xff]   ;;  %v15013_v31 = vld [vmem:[#allocation5 + $0x18a0] sm:$0xff]  }
 0x2fe   :  { %13770 = vmatpush3.bf16.msra.mxu0 %v14935_v43  ;;  %v14974_v43 = vld [vmem:[#allocation5 + $0x17d8] sm:$0xff]  }
 0x2ff   :  { %13771 = vmatprep.subr.bf16.mxu0 %v14937_v45  ;;  %13792 = vmatpush3.bf16.msra.mxu1 %v14936_v44  ;;  %v14975_v44 = vld [vmem:[#allocation5 + $0x1718] sm:$0xff]  }
 0x300   :  { %13793 = vmatprep.subr.bf16.mxu1 %v14938_v46  ;;  %v14976_v45 = vld [vmem:[#allocation5 + $0x1798] sm:$0xff]   ;;  %v14977_v46 = vld [vmem:[#allocation5 + $0x1760] sm:$0xff]  }
 0x302   :  { %13772 = vmatpush3.bf16.msra.mxu0 %v14939_v47  ;;  %v14978_v47 = vld [vmem:[#allocation5 + $0x17e0] sm:$0xff]  }
 0x303   :  { %13773 = vmatprep.subr.bf16.mxu0 %v14941_v49  ;;  %13794 = vmatpush3.bf16.msra.mxu1 %v14940_v48  ;;  %v14979_v48 = vld [vmem:[#allocation5 + $0x1720] sm:$0xff]  }
 0x304   :  { %13795 = vmatprep.subr.bf16.mxu1 %v14942_v50  ;;  %v14980_v49 = vld [vmem:[#allocation5 + $0x17a0] sm:$0xff]   ;;  %v14981_v50 = vld [vmem:[#allocation5 + $0x1768] sm:$0xff]  }
 0x306   :  { %13774 = vmatpush3.bf16.msra.mxu0 %v14943_v51  ;;  %v14982_v51 = vld [vmem:[#allocation5 + $0x17e8] sm:$0xff]  }
 0x307   :  { %13775 = vmatprep.subr.bf16.mxu0 %v14945_v53  ;;  %13796 = vmatpush3.bf16.msra.mxu1 %v14944_v52  ;;  %v14983_v53 = vld [vmem:[#allocation5 + $0x1728] sm:$0xff]  }
 0x308   :  { %13797 = vmatprep.subr.bf16.mxu1 %v14946_v54 }
 0x30a   :  { %13776 = vmatpush3.bf16.msra.mxu0 %v14947_v55  ;;  %v14984_v55 = vld [vmem:[#allocation5 + $0x17a8] sm:$0xff]  }
 0x30b   :  { %13777 = vmatprep.subr.bf16.mxu0 %v14949_v57  ;;  %13798 = vmatpush3.bf16.msra.mxu1 %v14948_v56 }
 0x30c   :  { %v13475_v59 = vpop.f32.mrb[60].mxu0  ;;  %13799 = vmatprep.subr.bf16.mxu1 %v14950_v58 }
 0x30d   :  { %v13476_v61 = vpop.f32.mrb[61].mxu0  ;;  %v13497_v63 = vpop.f32.mrb[60].mxu1 }
 0x30e   :  { %v13477_v0 = vadd.f32 %v13476_v61, %v13475_v59  ;;  %v13478_v1 = vpop.f32.mrb[62].mxu0  ;;  %v13498_v2 = vpop.f32.mrb[61].mxu1  ;;  %13778 = vmatpush3.bf16.msra.mxu0 %v14951_v60  ;;  %v14985_v59 = vld [vmem:[#allocation5 + $0x1770] sm:$0xff]  }
 0x30f   :  { %v13479_v4 = vpop.f32.mrb[63].mxu0  ;;  %v13499_v7 = vadd.f32 %v13498_v2, %v13497_v63  ;;  %v13500_v8 = vpop.f32.mrb[62].mxu1  ;;  %13779 = vmatprep.subr.bf16.mxu0 %v14953_v62  ;;  %13800 = vmatpush3.bf16.msra.mxu1 %v14952_v3  ;;  %v14986_v60 = vld [vmem:[#allocation5 + $0x17f0] sm:$0xff]  }
 0x310   :  { %v10431_v6 = vadd.f32 %v13477_v0, %v15574_v29  ;;  %v13501_v10 = vpop.f32.mrb[63].mxu1  ;;  %13801 = vmatprep.subr.bf16.mxu1 %v14954_v5  ;;  %v2724_v29 = vcombine.high %v2702_v22, %v2702_v22  ;;  %v14987_v2 = vld [vmem:[#allocation5 + $0x1730] sm:$0xff]   ;;  %v14991_v8 = vld [vmem:[#allocation5 + $0x1738] sm:$0xff]  }
 0x311   :  { %v14988_v4 = vld [vmem:[#allocation5 + $0x17b0] sm:$0xff]   ;;  %v2709_v10 = vrot.slane %v15584_v24, %v15411_v35  ;;  %v15006_v24 = vld [vmem:[#allocation5 + $0x1858] sm:$0xff]  }
 0x312   :  { %v15579_v12 = vadd.f32 %v13499_v7, %v10431_v6  ;;  %13780 = vmatpush3.bf16.msra.mxu0 %v14955_v9  ;;  %v14989_v6 = vld [vmem:[#allocation5 + $0x1778] sm:$0xff]  }
 0x313   :  { %13781 = vmatprep.subr.bf16.mxu0 %v14957_v11  ;;  %13802 = vmatpush3.bf16.msra.mxu1 %v14956_v13  ;;  %v14990_v7 = vld [vmem:[#allocation5 + $0x17f8] sm:$0xff]   ;;  %v14994_v11 = vld [vmem:[#allocation5 + $0x1840] sm:$0xff]  }
 0x314   :  { %13803 = vmatprep.subr.bf16.mxu1 %v14958_v14  ;;  %v14992_v9 = vld [vmem:[#allocation5 + $0x17b8] sm:$0xff]   ;;  %v14996_v13 = vld [vmem:[#allocation5 + $0x1800] sm:$0xff]  }
 0x315   :  { %v14997_v14 = vld [vmem:[#allocation5 + $0x1880] sm:$0xff]  }
 0x316   :  { %13782 = vmatpush3.bf16.msra.mxu0 %v14959_v15  ;;  %v2725_v15 = vcombine.high %v2709_v10, %v2709_v10 }
 0x317   :  { %13811 = vmatprep.subr.bf16.mxu0 %v14961_v18  ;;  %13804 = vmatpush3.bf16.msra.mxu1 %v14960_v20  ;;  %v15000_v18 = vld [vmem:[#allocation5 + $0x1808] sm:$0xff]   ;;  %v15002_v20 = vld [vmem:[#allocation5 + $0x1850] sm:$0xff]  }
 0x318   :  { %13833 = vmatprep.subr.bf16.mxu1 %v14962_v23  ;;  %v15005_v23 = vld [vmem:[#allocation5 + $0x1890] sm:$0xff]  }
 0x319   :  { %10989 = vmatmul.mubr.bf16.vlgmr.msra.gmra.mrb[88].mxu0 %v2702_v22  ;;  %v15004_v22 = vld [vmem:[#allocation5 + $0x1810] sm:$0xff]  }
 0x31a   :  { %13812 = vmatpush3.bf16.msra.mxu0 %v14963_v25  ;;  %11029 = vmatmul.mubr.bf16.vlgmr.msra.gmra.mrb[88].mxu1 %v2724_v29  ;;  %v15007_v25 = vld [vmem:[#allocation5 + $0x18d8] sm:$0xff]   ;;  %v15011_v29 = vld [vmem:[#allocation5 + $0x18e0] sm:$0xff]  }
 0x31b   :  { %13813 = vmatprep.subr.bf16.mxu0 %v14965_v30  ;;  %13834 = vmatpush3.bf16.msra.mxu1 %v14964_v27  ;;  %v15009_v27 = vld [vmem:[#allocation5 + $0x1898] sm:$0xff]   ;;  %v15012_v30 = vld [vmem:[#allocation5 + $0x1820] sm:$0xff]  }
 0x31c   :  { %11068 = vmatprep.mubr.bf16.mxu0 %v2723_v33  ;;  %13835 = vmatprep.subr.bf16.mxu1 %v14966_v32  ;;  %v15014_v32 = vld [vmem:[#allocation5 + $0x1868] sm:$0xff]  }
 0x31d   :  { %11108 = vmatprep.mubr.bf16.mxu1 %v2727_v37  ;;  %v15015_v33 = vld [vmem:[#allocation5 + $0x18e8] sm:$0xff]  }
 0x31e   :  { %13814 = vmatpush3.bf16.msra.mxu0 %v14967_v34 }
 0x31f   :  { %13815 = vmatprep.subr.bf16.mxu0 %v14969_v38  ;;  %13836 = vmatpush3.bf16.msra.mxu1 %v14968_v36  ;;  %v15016_v36 = vld [vmem:[#allocation5 + $0x1828] sm:$0xff]   ;;  %v15018_v38 = vld [vmem:[#allocation5 + $0x1870] sm:$0xff]  }
 0x320   :  { %13837 = vmatprep.subr.bf16.mxu1 %v14970_v39 }
 0x322   :  { %13816 = vmatpush3.bf16.msra.mxu0 %v14971_v40 }
 0x323   :  { %13817 = vmatprep.subr.bf16.mxu0 %v14973_v42  ;;  %13838 = vmatpush3.bf16.msra.mxu1 %v14972_v41 }
 0x324   :  { %13839 = vmatprep.subr.bf16.mxu1 %v14974_v43  ;;  %v15017_v43 = vld [vmem:[#allocation5 + $0x18a8] sm:$0xff]  }
 0x326   :  { %13818 = vmatpush3.bf16.msra.mxu0 %v14975_v44 }
 0x327   :  { %13819 = vmatprep.subr.bf16.mxu0 %v14977_v46  ;;  %13840 = vmatpush3.bf16.msra.mxu1 %v14976_v45  ;;  %v15019_v45 = vld [vmem:[#allocation5 + $0x18f0] sm:$0xff]  }
 0x328   :  { %13841 = vmatprep.subr.bf16.mxu1 %v14978_v47 }
 0x32a   :  { %13820 = vmatpush3.bf16.msra.mxu0 %v14979_v48 }
 0x32b   :  { %13821 = vmatprep.subr.bf16.mxu0 %v14981_v50  ;;  %13842 = vmatpush3.bf16.msra.mxu1 %v14980_v49  ;;  %v15020_v49 = vld [vmem:[#allocation5 + $0x1830] sm:$0xff]  }
 0x32c   :  { %v13519_v52 = vpop.f32.mrb[64].mxu0  ;;  %13843 = vmatprep.subr.bf16.mxu1 %v14982_v51  ;;  %v15022_v51 = vld [vmem:[#allocation5 + $0x1878] sm:$0xff]  }
 0x32d   :  { %v13520_v54 = vpop.f32.mrb[65].mxu0  ;;  %v13541_v56 = vpop.f32.mrb[64].mxu1 }
 0x32e   :  { %v13521_v57 = vadd.f32 %v13520_v54, %v13519_v52  ;;  %v13522_v58 = vpop.f32.mrb[66].mxu0  ;;  %v13542_v61 = vpop.f32.mrb[65].mxu1  ;;  %13822 = vmatpush3.bf16.msra.mxu0 %v14983_v53  ;;  %v15021_v53 = vld [vmem:[#allocation5 + $0x18b0] sm:$0xff]   ;;  %v15023_v54 = vld [vmem:[#allocation5 + $0x18f8] sm:$0xff]  }
 0x32f   :  { %v13523_v62 = vpop.f32.mrb[67].mxu0  ;;  %v13543_v0 = vadd.f32 %v13542_v61, %v13541_v56  ;;  %v13544_v1 = vpop.f32.mrb[66].mxu1  ;;  %13823 = vmatprep.subr.bf16.mxu0 %v14985_v59  ;;  %13844 = vmatpush3.bf16.msra.mxu1 %v14984_v55  ;;  %v15024_v55 = vld [vmem:[#allocation5 + $0x1838] sm:$0xff]   ;;  %v65_v56 = vld [vmem:[#allocation2 + $0x60] sm:$0xff] }
 0x330   :  { %v10511_v63 = vadd.f32 %v13521_v57, %v15579_v12  ;;  %v13545_v3 = vpop.f32.mrb[67].mxu1  ;;  %13845 = vmatprep.subr.bf16.mxu1 %v14986_v60  ;;  %v14995_v12 = vld [vmem:[#allocation5 + $0x18c0] sm:$0xff]   ;;  %v2735_v57 = vrot.slane %v65_v56, %v15411_v35  ;;  %v2728_v59 = vcombine.high %v65_v56, %v65_v56  ;;  %v15025_v60 = vld [vmem:[#allocation5 + $0x18b8] sm:$0xff]   ;;  %v15063_v56 = vld [vmem:[#allocation5 + $0x1a48] sm:$0xff]  }
 0x331   :  { %v15026_v58 = vld [vmem:[#allocation5 + $0x1940] sm:$0xff]  }
 0x332   :  { %v15591_v5 = vadd.f32 %v13543_v0, %v10511_v63  ;;  %13824 = vmatpush3.bf16.msra.mxu0 %v14987_v2  ;;  %v2743_v61 = vcombine.high %v2735_v57, %v2735_v57  ;;  %v2751_v62 = vrot.slane %v2735_v57, %v15411_v35  ;;  %v15027_v63 = vld [vmem:[#allocation5 + $0x19c0] sm:$0xff]   ;;  %v15601_v0 = vrot.slane %v2728_v59, %v15411_v35  ;;  %v15064_v57 = vld [vmem:[#allocation5 + $0x1ac8] sm:$0xff]  }
 0x333   :  { %13825 = vmatprep.subr.bf16.mxu0 %v14989_v6  ;;  %13846 = vmatpush3.bf16.msra.mxu1 %v14988_v4  ;;  %v15028_v1 = vld [vmem:[#allocation5 + $0x1900] sm:$0xff]   ;;  %v15030_v6 = vld [vmem:[#allocation5 + $0x1948] sm:$0xff]  }
 0x334   :  { %13847 = vmatprep.subr.bf16.mxu1 %v14990_v7  ;;  %v2765_v2 = vrot.slane %v2743_v61, %v15411_v35  ;;  %v15029_v3 = vld [vmem:[#allocation5 + $0x1980] sm:$0xff]   ;;  %v2744_v4 = vcombine.high %v15601_v0, %v15601_v0  ;;  %v15066_v59 = vld [vmem:[#allocation5 + $0x1a88] sm:$0xff]   ;;  %v15068_v61 = vld [vmem:[#allocation5 + $0x1ad0] sm:$0xff]  }
 0x336   :  { %13826 = vmatpush3.bf16.msra.mxu0 %v14991_v8  ;;  %v2775_v7 = vcombine.high %v2765_v2, %v2765_v2  ;;  %v15031_v8 = vld [vmem:[#allocation5 + $0x19c8] sm:$0xff]  }
 0x337   :  { %13855 = vmatprep.subr.bf16.mxu0 %v14994_v11  ;;  %13848 = vmatpush3.bf16.msra.mxu1 %v14992_v9  ;;  %v2772_v9 = vrot.slane %v2744_v4, %v15411_v35  ;;  %v15033_v11 = vld [vmem:[#allocation5 + $0x1988] sm:$0xff]   ;;  %v15075_v4 = vld [vmem:[#allocation5 + $0x1a60] sm:$0xff]  }
 0x338   :  { %13877 = vmatprep.subr.bf16.mxu1 %v14995_v12 }
 0x339   :  { %11069 = vmatmul.mubr.bf16.vlgmr.msra.gmra.mrb[92].mxu0 %v2709_v10  ;;  %v15032_v10 = vld [vmem:[#allocation5 + $0x1908] sm:$0xff]   ;;  %v2776_v12 = vcombine.high %v2772_v9, %v2772_v9 }
 0x33a   :  { %13856 = vmatpush3.bf16.msra.mxu0 %v14996_v13  ;;  %11109 = vmatmul.mubr.bf16.vlgmr.msra.gmra.mrb[92].mxu1 %v2725_v15  ;;  %v15034_v13 = vld [vmem:[#allocation5 + $0x1950] sm:$0xff]  }
 0x33b   :  { %13857 = vmatprep.subr.bf16.mxu0 %v14998_v16  ;;  %13878 = vmatpush3.bf16.msra.mxu1 %v14997_v14  ;;  %v15035_v14 = vld [vmem:[#allocation5 + $0x19d0] sm:$0xff]  }
 0x33c   :  { %13879 = vmatprep.subr.bf16.mxu1 %v14999_v17  ;;  %11148 = vmatprep.mubr.bf16.mxu0 %v2765_v2  ;;  %v15036_v15 = vld [vmem:[#allocation5 + $0x1910] sm:$0xff]   ;;  %v15038_v17 = vld [vmem:[#allocation5 + $0x1958] sm:$0xff]  }
 0x33d   :  { %11188 = vmatprep.mubr.bf16.mxu1 %v2775_v7  ;;  %v15037_v16 = vld [vmem:[#allocation5 + $0x1990] sm:$0xff]   ;;  %v15073_v2 = vld [vmem:[#allocation5 + $0x1a18] sm:$0xff]   ;;  %v15078_v7 = vld [vmem:[#allocation5 + $0x1aa0] sm:$0xff]  }
 0x33e   :  { %13858 = vmatpush3.bf16.msra.mxu0 %v15000_v18  ;;  %v15039_v18 = vld [vmem:[#allocation5 + $0x19d8] sm:$0xff]  }
 0x33f   :  { %13859 = vmatprep.subr.bf16.mxu0 %v15002_v20  ;;  %13880 = vmatpush3.bf16.msra.mxu1 %v15001_v19  ;;  %v15040_v19 = vld [vmem:[#allocation5 + $0x1918] sm:$0xff]  }
 0x340   :  { %13881 = vmatprep.subr.bf16.mxu1 %v15003_v21  ;;  %v15041_v20 = vld [vmem:[#allocation5 + $0x1998] sm:$0xff]   ;;  %v15042_v21 = vld [vmem:[#allocation5 + $0x1960] sm:$0xff]  }
 0x342   :  { %13860 = vmatpush3.bf16.msra.mxu0 %v15004_v22  ;;  %v15043_v22 = vld [vmem:[#allocation5 + $0x19e0] sm:$0xff]  }
 0x343   :  { %13861 = vmatprep.subr.bf16.mxu0 %v15006_v24  ;;  %13882 = vmatpush3.bf16.msra.mxu1 %v15005_v23  ;;  %v15044_v23 = vld [vmem:[#allocation5 + $0x1920] sm:$0xff]  }
 0x344   :  { %13883 = vmatprep.subr.bf16.mxu1 %v15007_v25  ;;  %v15045_v24 = vld [vmem:[#allocation5 + $0x19a0] sm:$0xff]   ;;  %v15046_v25 = vld [vmem:[#allocation5 + $0x1968] sm:$0xff]  }
 0x346   :  { %13862 = vmatpush3.bf16.msra.mxu0 %v15008_v26  ;;  %v15047_v26 = vld [vmem:[#allocation5 + $0x19e8] sm:$0xff]  }
 0x347   :  { %13863 = vmatprep.subr.bf16.mxu0 %v15010_v28  ;;  %13884 = vmatpush3.bf16.msra.mxu1 %v15009_v27  ;;  %v15048_v28 = vld [vmem:[#allocation5 + $0x1928] sm:$0xff]  }
 0x348   :  { %13885 = vmatprep.subr.bf16.mxu1 %v15011_v29 }
 0x34a   :  { %13864 = vmatpush3.bf16.msra.mxu0 %v15012_v30  ;;  %v15049_v30 = vld [vmem:[#allocation5 + $0x19a8] sm:$0xff]  }
 0x34b   :  { %13865 = vmatprep.subr.bf16.mxu0 %v15014_v32  ;;  %13886 = vmatpush3.bf16.msra.mxu1 %v15013_v31 }
 0x34c   :  { %v13563_v34 = vpop.f32.mrb[68].mxu0  ;;  %13887 = vmatprep.subr.bf16.mxu1 %v15015_v33 }
 0x34d   :  { %v13564_v37 = vpop.f32.mrb[69].mxu0  ;;  %v13585_v39 = vpop.f32.mrb[68].mxu1 }
 0x34e   :  { %v13565_v40 = vadd.f32 %v13564_v37, %v13563_v34  ;;  %v13566_v41 = vpop.f32.mrb[70].mxu0  ;;  %v13586_v42 = vpop.f32.mrb[69].mxu1  ;;  %13866 = vmatpush3.bf16.msra.mxu0 %v15016_v36  ;;  %v15050_v34 = vld [vmem:[#allocation5 + $0x1970] sm:$0xff]  }
 0x34f   :  { %v13567_v44 = vpop.f32.mrb[71].mxu0  ;;  %v13587_v47 = vadd.f32 %v13586_v42, %v13585_v39  ;;  %v13588_v48 = vpop.f32.mrb[70].mxu1  ;;  %13867 = vmatprep.subr.bf16.mxu0 %v15018_v38  ;;  %13888 = vmatpush3.bf16.msra.mxu1 %v15017_v43  ;;  %v15051_v36 = vld [vmem:[#allocation5 + $0x19f0] sm:$0xff]  }
 0x350   :  { %v10591_v46 = vadd.f32 %v13565_v40, %v15591_v5  ;;  %v13589_v50 = vpop.f32.mrb[71].mxu1  ;;  %13889 = vmatprep.subr.bf16.mxu1 %v15019_v45  ;;  %v2773_v5 = vcombine.high %v2751_v62, %v2751_v62  ;;  %v15052_v42 = vld [vmem:[#allocation5 + $0x1930] sm:$0xff]   ;;  %v15056_v48 = vld [vmem:[#allocation5 + $0x1938] sm:$0xff]  }
 0x351   :  { %v15053_v44 = vld [vmem:[#allocation5 + $0x19b0] sm:$0xff]   ;;  %v2758_v50 = vrot.slane %v15601_v0, %v15411_v35  ;;  %v15071_v0 = vld [vmem:[#allocation5 + $0x1a58] sm:$0xff]  }
 0x352   :  { %v15596_v52 = vadd.f32 %v13587_v47, %v10591_v46  ;;  %13868 = vmatpush3.bf16.msra.mxu0 %v15020_v49  ;;  %v15054_v46 = vld [vmem:[#allocation5 + $0x1978] sm:$0xff]  }
 0x353   :  { %13869 = vmatprep.subr.bf16.mxu0 %v15022_v51  ;;  %13890 = vmatpush3.bf16.msra.mxu1 %v15021_v53  ;;  %v15055_v47 = vld [vmem:[#allocation5 + $0x19f8] sm:$0xff]   ;;  %v15059_v51 = vld [vmem:[#allocation5 + $0x1a40] sm:$0xff]  }
 0x354   :  { %13891 = vmatprep.subr.bf16.mxu1 %v15023_v54  ;;  %v15057_v49 = vld [vmem:[#allocation5 + $0x19b8] sm:$0xff]   ;;  %v15061_v53 = vld [vmem:[#allocation5 + $0x1a00] sm:$0xff]  }
 0x355   :  { %v15062_v54 = vld [vmem:[#allocation5 + $0x1a80] sm:$0xff]  }
 0x356   :  { %13870 = vmatpush3.bf16.msra.mxu0 %v15024_v55  ;;  %v2774_v55 = vcombine.high %v2758_v50, %v2758_v50 }
 0x357   :  { %13899 = vmatprep.subr.bf16.mxu0 %v15026_v58  ;;  %13892 = vmatpush3.bf16.msra.mxu1 %v15025_v60  ;;  %v15065_v58 = vld [vmem:[#allocation5 + $0x1a08] sm:$0xff]   ;;  %v15067_v60 = vld [vmem:[#allocation5 + $0x1a50] sm:$0xff]  }
 0x358   :  { %13921 = vmatprep.subr.bf16.mxu1 %v15027_v63  ;;  %v15070_v63 = vld [vmem:[#allocation5 + $0x1a90] sm:$0xff]  }
 0x359   :  { %11149 = vmatmul.mubr.bf16.vlgmr.msra.gmra.mrb[96].mxu0 %v2751_v62  ;;  %v15069_v62 = vld [vmem:[#allocation5 + $0x1a10] sm:$0xff]  }
 0x35a   :  { %13900 = vmatpush3.bf16.msra.mxu0 %v15028_v1  ;;  %11189 = vmatmul.mubr.bf16.vlgmr.msra.gmra.mrb[96].mxu1 %v2773_v5  ;;  %v15072_v1 = vld [vmem:[#allocation5 + $0x1ad8] sm:$0xff]   ;;  %v15076_v5 = vld [vmem:[#allocation5 + $0x1ae0] sm:$0xff]  }
 0x35b   :  { %13901 = vmatprep.subr.bf16.mxu0 %v15030_v6  ;;  %13922 = vmatpush3.bf16.msra.mxu1 %v15029_v3  ;;  %v15074_v3 = vld [vmem:[#allocation5 + $0x1a98] sm:$0xff]   ;;  %v15077_v6 = vld [vmem:[#allocation5 + $0x1a20] sm:$0xff]  }
 0x35c   :  { %11228 = vmatprep.mubr.bf16.mxu0 %v2772_v9  ;;  %13923 = vmatprep.subr.bf16.mxu1 %v15031_v8  ;;  %v15079_v8 = vld [vmem:[#allocation5 + $0x1a68] sm:$0xff]  }
 0x35d   :  { %11268 = vmatprep.mubr.bf16.mxu1 %v2776_v12  ;;  %v15080_v9 = vld [vmem:[#allocation5 + $0x1ae8] sm:$0xff]  }
 0x35e   :  { %13902 = vmatpush3.bf16.msra.mxu0 %v15032_v10 }
 0x35f   :  { %13903 = vmatprep.subr.bf16.mxu0 %v15034_v13  ;;  %13924 = vmatpush3.bf16.msra.mxu1 %v15033_v11  ;;  %v15081_v11 = vld [vmem:[#allocation5 + $0x1a28] sm:$0xff]   ;;  %v15083_v13 = vld [vmem:[#allocation5 + $0x1a70] sm:$0xff]  }
 0x360   :  { %13925 = vmatprep.subr.bf16.mxu1 %v15035_v14 }
 0x362   :  { %13904 = vmatpush3.bf16.msra.mxu0 %v15036_v15 }
 0x363   :  { %13905 = vmatprep.subr.bf16.mxu0 %v15038_v17  ;;  %13926 = vmatpush3.bf16.msra.mxu1 %v15037_v16 }
 0x364   :  { %13927 = vmatprep.subr.bf16.mxu1 %v15039_v18  ;;  %v15082_v18 = vld [vmem:[#allocation5 + $0x1aa8] sm:$0xff]  }
 0x366   :  { %13906 = vmatpush3.bf16.msra.mxu0 %v15040_v19 }
 0x367   :  { %13907 = vmatprep.subr.bf16.mxu0 %v15042_v21  ;;  %13928 = vmatpush3.bf16.msra.mxu1 %v15041_v20  ;;  %v15084_v20 = vld [vmem:[#allocation5 + $0x1af0] sm:$0xff]  }
 0x368   :  { %13929 = vmatprep.subr.bf16.mxu1 %v15043_v22 }
 0x36a   :  { %13908 = vmatpush3.bf16.msra.mxu0 %v15044_v23 }
 0x36b   :  { %13909 = vmatprep.subr.bf16.mxu0 %v15046_v25  ;;  %13930 = vmatpush3.bf16.msra.mxu1 %v15045_v24  ;;  %v15085_v24 = vld [vmem:[#allocation5 + $0x1a30] sm:$0xff]  }
 0x36c   :  { %v13607_v27 = vpop.f32.mrb[72].mxu0  ;;  %13931 = vmatprep.subr.bf16.mxu1 %v15047_v26  ;;  %v15087_v26 = vld [vmem:[#allocation5 + $0x1a78] sm:$0xff]  }
 0x36d   :  { %v13608_v29 = vpop.f32.mrb[73].mxu0  ;;  %v13629_v31 = vpop.f32.mrb[72].mxu1 }
 0x36e   :  { %v13609_v32 = vadd.f32 %v13608_v29, %v13607_v27  ;;  %v13610_v33 = vpop.f32.mrb[74].mxu0  ;;  %v13630_v37 = vpop.f32.mrb[73].mxu1  ;;  %13910 = vmatpush3.bf16.msra.mxu0 %v15048_v28  ;;  %v15086_v28 = vld [vmem:[#allocation5 + $0x1ab0] sm:$0xff]   ;;  %v15088_v29 = vld [vmem:[#allocation5 + $0x1af8] sm:$0xff]  }
 0x36f   :  { %v13611_v38 = vpop.f32.mrb[75].mxu0  ;;  %v13631_v40 = vadd.f32 %v13630_v37, %v13629_v31  ;;  %v13632_v41 = vpop.f32.mrb[74].mxu1  ;;  %13911 = vmatprep.subr.bf16.mxu0 %v15050_v34  ;;  %13932 = vmatpush3.bf16.msra.mxu1 %v15049_v30  ;;  %v15089_v30 = vld [vmem:[#allocation5 + $0x1a38] sm:$0xff]   ;;  %v66_v31 = vld [vmem:[#allocation2 + $0x68] sm:$0xff]  ;;  %v15091_v33 = vld [vmem:[#allocation5 + $0x1b40] sm:$0xff]  }
 0x370   :  { %v10671_v39 = vadd.f32 %v13609_v32, %v15596_v52  ;;  %v13633_v43 = vpop.f32.mrb[75].mxu1  ;;  %13933 = vmatprep.subr.bf16.mxu1 %v15051_v36  ;;  %v15060_v52 = vld [vmem:[#allocation5 + $0x1ac0] sm:$0xff]   ;;  %v2784_v32 = vrot.slane %v66_v31, %v15411_v35  ;;  %v2777_v34 = vcombine.high %v66_v31, %v66_v31  ;;  %v15090_v36 = vld [vmem:[#allocation5 + $0x1ab8] sm:$0xff]   ;;  %v15128_v31 = vld [vmem:[#allocation5 + $0x1c48] sm:$0xff]  }
 0x371   :  { %v15093_v41 = vld [vmem:[#allocation5 + $0x1b00] sm:$0xff]  }
 0x372   :  { %v15608_v45 = vadd.f32 %v13631_v40, %v10671_v39  ;;  %13912 = vmatpush3.bf16.msra.mxu0 %v15052_v42  ;;  %v2792_v37 = vcombine.high %v2784_v32, %v2784_v32  ;;  %v2800_v38 = vrot.slane %v2784_v32, %v15411_v35  ;;  %v15092_v39 = vld [vmem:[#allocation5 + $0x1bc0] sm:$0xff]   ;;  %v15618_v40 = vrot.slane %v2777_v34, %v15411_v35  ;;  %v15129_v32 = vld [vmem:[#allocation5 + $0x1cc8] sm:$0xff]  }
 0x373   :  { %13913 = vmatprep.subr.bf16.mxu0 %v15054_v46  ;;  %13934 = vmatpush3.bf16.msra.mxu1 %v15053_v44  ;;  %v15094_v43 = vld [vmem:[#allocation5 + $0x1b80] sm:$0xff]   ;;  %v15095_v46 = vld [vmem:[#allocation5 + $0x1b48] sm:$0xff]  }
 0x374   :  { %13935 = vmatprep.subr.bf16.mxu1 %v15055_v47  ;;  %v2814_v42 = vrot.slane %v2792_v37, %v15411_v35  ;;  %v2793_v44 = vcombine.high %v15618_v40, %v15618_v40  ;;  %v15131_v34 = vld [vmem:[#allocation5 + $0x1c88] sm:$0xff]   ;;  %v15133_v37 = vld [vmem:[#allocation5 + $0x1cd0] sm:$0xff]  }
 0x376   :  { %13914 = vmatpush3.bf16.msra.mxu0 %v15056_v48  ;;  %v2824_v47 = vcombine.high %v2814_v42, %v2814_v42  ;;  %v15096_v48 = vld [vmem:[#allocation5 + $0x1bc8] sm:$0xff]  }
 0x377   :  { %13943 = vmatprep.subr.bf16.mxu0 %v15059_v51  ;;  %13936 = vmatpush3.bf16.msra.mxu1 %v15057_v49  ;;  %v2821_v49 = vrot.slane %v2793_v44, %v15411_v35  ;;  %v15098_v51 = vld [vmem:[#allocation5 + $0x1b88] sm:$0xff]   ;;  %v15140_v44 = vld [vmem:[#allocation5 + $0x1c60] sm:$0xff]  }
 0x378   :  { %13965 = vmatprep.subr.bf16.mxu1 %v15060_v52 }
 0x379   :  { %11229 = vmatmul.mubr.bf16.vlgmr.msra.gmra.mrb[100].mxu0 %v2758_v50  ;;  %v15097_v50 = vld [vmem:[#allocation5 + $0x1b08] sm:$0xff]   ;;  %v2825_v52 = vcombine.high %v2821_v49, %v2821_v49 }
 0x37a   :  { %13944 = vmatpush3.bf16.msra.mxu0 %v15061_v53  ;;  %11269 = vmatmul.mubr.bf16.vlgmr.msra.gmra.mrb[100].mxu1 %v2774_v55  ;;  %v15099_v53 = vld [vmem:[#allocation5 + $0x1b50] sm:$0xff]  }
 0x37b   :  { %13945 = vmatprep.subr.bf16.mxu0 %v15063_v56  ;;  %13966 = vmatpush3.bf16.msra.mxu1 %v15062_v54  ;;  %v15100_v54 = vld [vmem:[#allocation5 + $0x1bd0] sm:$0xff]  }
 0x37c   :  { %13967 = vmatprep.subr.bf16.mxu1 %v15064_v57  ;;  %11308 = vmatprep.mubr.bf16.mxu0 %v2814_v42  ;;  %v15101_v55 = vld [vmem:[#allocation5 + $0x1b10] sm:$0xff]   ;;  %v15103_v57 = vld [vmem:[#allocation5 + $0x1b58] sm:$0xff]  }
 0x37d   :  { %11348 = vmatprep.mubr.bf16.mxu1 %v2824_v47  ;;  %v15102_v56 = vld [vmem:[#allocation5 + $0x1b90] sm:$0xff]   ;;  %v15138_v42 = vld [vmem:[#allocation5 + $0x1c18] sm:$0xff]   ;;  %v15143_v47 = vld [vmem:[#allocation5 + $0x1ca0] sm:$0xff]  }
 0x37e   :  { %13946 = vmatpush3.bf16.msra.mxu0 %v15065_v58  ;;  %v15104_v58 = vld [vmem:[#allocation5 + $0x1bd8] sm:$0xff]  }
 0x37f   :  { %13947 = vmatprep.subr.bf16.mxu0 %v15067_v60  ;;  %13968 = vmatpush3.bf16.msra.mxu1 %v15066_v59  ;;  %v15105_v59 = vld [vmem:[#allocation5 + $0x1b18] sm:$0xff]  }
 0x380   :  { %13969 = vmatprep.subr.bf16.mxu1 %v15068_v61  ;;  %v15106_v60 = vld [vmem:[#allocation5 + $0x1b98] sm:$0xff]   ;;  %v15107_v61 = vld [vmem:[#allocation5 + $0x1b60] sm:$0xff]  }
 0x382   :  { %13948 = vmatpush3.bf16.msra.mxu0 %v15069_v62  ;;  %v15108_v62 = vld [vmem:[#allocation5 + $0x1be0] sm:$0xff]  }
 0x383   :  { %13949 = vmatprep.subr.bf16.mxu0 %v15071_v0  ;;  %13970 = vmatpush3.bf16.msra.mxu1 %v15070_v63  ;;  %v15109_v63 = vld [vmem:[#allocation5 + $0x1b20] sm:$0xff]  }
 0x384   :  { %13971 = vmatprep.subr.bf16.mxu1 %v15072_v1  ;;  %v15110_v0 = vld [vmem:[#allocation5 + $0x1ba0] sm:$0xff]   ;;  %v15111_v1 = vld [vmem:[#allocation5 + $0x1b68] sm:$0xff]  }
 0x386   :  { %13950 = vmatpush3.bf16.msra.mxu0 %v15073_v2  ;;  %v15112_v2 = vld [vmem:[#allocation5 + $0x1be8] sm:$0xff]  }
 0x387   :  { %13951 = vmatprep.subr.bf16.mxu0 %v15075_v4  ;;  %13972 = vmatpush3.bf16.msra.mxu1 %v15074_v3  ;;  %v15113_v4 = vld [vmem:[#allocation5 + $0x1b28] sm:$0xff]  }
 0x388   :  { %13973 = vmatprep.subr.bf16.mxu1 %v15076_v5 }
 0x38a   :  { %13952 = vmatpush3.bf16.msra.mxu0 %v15077_v6  ;;  %v15114_v6 = vld [vmem:[#allocation5 + $0x1ba8] sm:$0xff]  }
 0x38b   :  { %13953 = vmatprep.subr.bf16.mxu0 %v15079_v8  ;;  %13974 = vmatpush3.bf16.msra.mxu1 %v15078_v7 }
 0x38c   :  { %v13651_v10 = vpop.f32.mrb[76].mxu0  ;;  %13975 = vmatprep.subr.bf16.mxu1 %v15080_v9 }
 0x38d   :  { %v13652_v12 = vpop.f32.mrb[77].mxu0  ;;  %v13673_v14 = vpop.f32.mrb[76].mxu1 }
 0x38e   :  { %v13653_v15 = vadd.f32 %v13652_v12, %v13651_v10  ;;  %v13654_v16 = vpop.f32.mrb[78].mxu0  ;;  %v13674_v17 = vpop.f32.mrb[77].mxu1  ;;  %13954 = vmatpush3.bf16.msra.mxu0 %v15081_v11  ;;  %v15115_v10 = vld [vmem:[#allocation5 + $0x1b70] sm:$0xff]  }
 0x38f   :  { %v13655_v19 = vpop.f32.mrb[79].mxu0  ;;  %v13675_v22 = vadd.f32 %v13674_v17, %v13673_v14  ;;  %v13676_v23 = vpop.f32.mrb[78].mxu1  ;;  %13955 = vmatprep.subr.bf16.mxu0 %v15083_v13  ;;  %13976 = vmatpush3.bf16.msra.mxu1 %v15082_v18  ;;  %v15116_v11 = vld [vmem:[#allocation5 + $0x1bf0] sm:$0xff]  }
 0x390   :  { %v10751_v21 = vadd.f32 %v13653_v15, %v15608_v45  ;;  %v13677_v25 = vpop.f32.mrb[79].mxu1  ;;  %13977 = vmatprep.subr.bf16.mxu1 %v15084_v20  ;;  %v2822_v45 = vcombine.high %v2800_v38, %v2800_v38  ;;  %v15117_v17 = vld [vmem:[#allocation5 + $0x1b30] sm:$0xff]   ;;  %v15121_v23 = vld [vmem:[#allocation5 + $0x1b38] sm:$0xff]  }
 0x391   :  { %v15118_v19 = vld [vmem:[#allocation5 + $0x1bb0] sm:$0xff]   ;;  %v2807_v25 = vrot.slane %v15618_v40, %v15411_v35  ;;  %v15136_v40 = vld [vmem:[#allocation5 + $0x1c58] sm:$0xff]  }
 0x392   :  { %v15613_v27 = vadd.f32 %v13675_v22, %v10751_v21  ;;  %13956 = vmatpush3.bf16.msra.mxu0 %v15085_v24  ;;  %v15119_v21 = vld [vmem:[#allocation5 + $0x1b78] sm:$0xff]  }
 0x393   :  { %13957 = vmatprep.subr.bf16.mxu0 %v15087_v26  ;;  %13978 = vmatpush3.bf16.msra.mxu1 %v15086_v28  ;;  %v15120_v22 = vld [vmem:[#allocation5 + $0x1bf8] sm:$0xff]   ;;  %v15124_v26 = vld [vmem:[#allocation5 + $0x1c40] sm:$0xff]  }
 0x394   :  { %13979 = vmatprep.subr.bf16.mxu1 %v15088_v29  ;;  %v15122_v24 = vld [vmem:[#allocation5 + $0x1bb8] sm:$0xff]   ;;  %v15126_v28 = vld [vmem:[#allocation5 + $0x1c00] sm:$0xff]  }
 0x395   :  { %v15127_v29 = vld [vmem:[#allocation5 + $0x1c80] sm:$0xff]  }
 0x396   :  { %13958 = vmatpush3.bf16.msra.mxu0 %v15089_v30  ;;  %v2823_v30 = vcombine.high %v2807_v25, %v2807_v25 }
 0x397   :  { %13987 = vmatprep.subr.bf16.mxu0 %v15091_v33  ;;  %13980 = vmatpush3.bf16.msra.mxu1 %v15090_v36  ;;  %v15130_v33 = vld [vmem:[#allocation5 + $0x1c08] sm:$0xff]   ;;  %v15132_v36 = vld [vmem:[#allocation5 + $0x1c50] sm:$0xff]  }
 0x398   :  { %14009 = vmatprep.subr.bf16.mxu1 %v15092_v39  ;;  %v15135_v39 = vld [vmem:[#allocation5 + $0x1c90] sm:$0xff]  }
 0x399   :  { %11309 = vmatmul.mubr.bf16.vlgmr.msra.gmra.mrb[104].mxu0 %v2800_v38  ;;  %v15134_v38 = vld [vmem:[#allocation5 + $0x1c10] sm:$0xff]  }
 0x39a   :  { %13988 = vmatpush3.bf16.msra.mxu0 %v15093_v41  ;;  %11349 = vmatmul.mubr.bf16.vlgmr.msra.gmra.mrb[104].mxu1 %v2822_v45  ;;  %v15137_v41 = vld [vmem:[#allocation5 + $0x1cd8] sm:$0xff]   ;;  %v15141_v45 = vld [vmem:[#allocation5 + $0x1ce0] sm:$0xff]  }
 0x39b   :  { %13989 = vmatprep.subr.bf16.mxu0 %v15095_v46  ;;  %14010 = vmatpush3.bf16.msra.mxu1 %v15094_v43  ;;  %v15139_v43 = vld [vmem:[#allocation5 + $0x1c98] sm:$0xff]   ;;  %v15142_v46 = vld [vmem:[#allocation5 + $0x1c20] sm:$0xff]  }
 0x39c   :  { %11388 = vmatprep.mubr.bf16.mxu0 %v2821_v49  ;;  %14011 = vmatprep.subr.bf16.mxu1 %v15096_v48  ;;  %v15144_v48 = vld [vmem:[#allocation5 + $0x1c68] sm:$0xff]  }
 0x39d   :  { %11428 = vmatprep.mubr.bf16.mxu1 %v2825_v52  ;;  %v15145_v49 = vld [vmem:[#allocation5 + $0x1ce8] sm:$0xff]  }
 0x39e   :  { %13990 = vmatpush3.bf16.msra.mxu0 %v15097_v50 }
 0x39f   :  { %13991 = vmatprep.subr.bf16.mxu0 %v15099_v53  ;;  %14012 = vmatpush3.bf16.msra.mxu1 %v15098_v51  ;;  %v15146_v51 = vld [vmem:[#allocation5 + $0x1c28] sm:$0xff]   ;;  %v15148_v53 = vld [vmem:[#allocation5 + $0x1c70] sm:$0xff]  }
 0x3a0   :  { %14013 = vmatprep.subr.bf16.mxu1 %v15100_v54 }
 0x3a2   :  { %13992 = vmatpush3.bf16.msra.mxu0 %v15101_v55 }
 0x3a3   :  { %13993 = vmatprep.subr.bf16.mxu0 %v15103_v57  ;;  %14014 = vmatpush3.bf16.msra.mxu1 %v15102_v56 }
 0x3a4   :  { %14015 = vmatprep.subr.bf16.mxu1 %v15104_v58  ;;  %v15147_v58 = vld [vmem:[#allocation5 + $0x1ca8] sm:$0xff]  }
 0x3a6   :  { %13994 = vmatpush3.bf16.msra.mxu0 %v15105_v59 }
 0x3a7   :  { %13995 = vmatprep.subr.bf16.mxu0 %v15107_v61  ;;  %14016 = vmatpush3.bf16.msra.mxu1 %v15106_v60  ;;  %v15149_v60 = vld [vmem:[#allocation5 + $0x1cf0] sm:$0xff]  }
 0x3a8   :  { %14017 = vmatprep.subr.bf16.mxu1 %v15108_v62 }
 0x3aa   :  { %13996 = vmatpush3.bf16.msra.mxu0 %v15109_v63 }
 0x3ab   :  { %13997 = vmatprep.subr.bf16.mxu0 %v15111_v1  ;;  %14018 = vmatpush3.bf16.msra.mxu1 %v15110_v0  ;;  %v15150_v0 = vld [vmem:[#allocation5 + $0x1c30] sm:$0xff]  }
 0x3ac   :  { %v13695_v3 = vpop.f32.mrb[80].mxu0  ;;  %14019 = vmatprep.subr.bf16.mxu1 %v15112_v2  ;;  %v15152_v2 = vld [vmem:[#allocation5 + $0x1c78] sm:$0xff]  }
 0x3ad   :  { %v13696_v5 = vpop.f32.mrb[81].mxu0  ;;  %v13717_v7 = vpop.f32.mrb[80].mxu1 }
 0x3ae   :  { %v13697_v8 = vadd.f32 %v13696_v5, %v13695_v3  ;;  %v13698_v9 = vpop.f32.mrb[82].mxu0  ;;  %v13718_v12 = vpop.f32.mrb[81].mxu1  ;;  %13998 = vmatpush3.bf16.msra.mxu0 %v15113_v4  ;;  %v15151_v4 = vld [vmem:[#allocation5 + $0x1cb0] sm:$0xff]   ;;  %v15153_v5 = vld [vmem:[#allocation5 + $0x1cf8] sm:$0xff]  }
 0x3af   :  { %v13699_v13 = vpop.f32.mrb[83].mxu0  ;;  %v13719_v15 = vadd.f32 %v13718_v12, %v13717_v7  ;;  %v13720_v16 = vpop.f32.mrb[82].mxu1  ;;  %13999 = vmatprep.subr.bf16.mxu0 %v15115_v10  ;;  %14020 = vmatpush3.bf16.msra.mxu1 %v15114_v6  ;;  %v15154_v6 = vld [vmem:[#allocation5 + $0x1c38] sm:$0xff]   ;;  %v67_v7 = vld [vmem:[#allocation2 + $0x70] sm:$0xff]  ;;  %v15156_v9 = vld [vmem:[#allocation5 + $0x1d40] sm:$0xff]  }
 0x3b0   :  { %v10831_v14 = vadd.f32 %v13697_v8, %v15613_v27  ;;  %v13721_v18 = vpop.f32.mrb[83].mxu1  ;;  %14021 = vmatprep.subr.bf16.mxu1 %v15116_v11  ;;  %v15125_v27 = vld [vmem:[#allocation5 + $0x1cc0] sm:$0xff]   ;;  %v2833_v8 = vrot.slane %v67_v7, %v15411_v35  ;;  %v2826_v10 = vcombine.high %v67_v7, %v67_v7  ;;  %v15155_v11 = vld [vmem:[#allocation5 + $0x1cb8] sm:$0xff]   ;;  %v15193_v7 = vld [vmem:[#allocation5 + $0x1e48] sm:$0xff]  }
 0x3b1   :  { %v15158_v16 = vld [vmem:[#allocation5 + $0x1d00] sm:$0xff]  }
 0x3b2   :  { %v15625_v20 = vadd.f32 %v13719_v15, %v10831_v14  ;;  %14000 = vmatpush3.bf16.msra.mxu0 %v15117_v17  ;;  %v2841_v12 = vcombine.high %v2833_v8, %v2833_v8  ;;  %v2849_v13 = vrot.slane %v2833_v8, %v15411_v35  ;;  %v15157_v14 = vld [vmem:[#allocation5 + $0x1dc0] sm:$0xff]   ;;  %v15635_v15 = vrot.slane %v2826_v10, %v15411_v35  ;;  %v15194_v8 = vld [vmem:[#allocation5 + $0x1ec8] sm:$0xff]  }
 0x3b3   :  { %14001 = vmatprep.subr.bf16.mxu0 %v15119_v21  ;;  %14022 = vmatpush3.bf16.msra.mxu1 %v15118_v19  ;;  %v15159_v18 = vld [vmem:[#allocation5 + $0x1d80] sm:$0xff]   ;;  %v15160_v21 = vld [vmem:[#allocation5 + $0x1d48] sm:$0xff]  }
 0x3b4   :  { %14023 = vmatprep.subr.bf16.mxu1 %v15120_v22  ;;  %v2863_v17 = vrot.slane %v2841_v12, %v15411_v35  ;;  %v2842_v19 = vcombine.high %v15635_v15, %v15635_v15  ;;  %v15196_v10 = vld [vmem:[#allocation5 + $0x1e88] sm:$0xff]   ;;  %v15198_v12 = vld [vmem:[#allocation5 + $0x1ed0] sm:$0xff]  }
 0x3b6   :  { %14002 = vmatpush3.bf16.msra.mxu0 %v15121_v23  ;;  %v2873_v22 = vcombine.high %v2863_v17, %v2863_v17  ;;  %v15161_v23 = vld [vmem:[#allocation5 + $0x1dc8] sm:$0xff]  }
 0x3b7   :  { %14031 = vmatprep.subr.bf16.mxu0 %v15124_v26  ;;  %14024 = vmatpush3.bf16.msra.mxu1 %v15122_v24  ;;  %v2870_v24 = vrot.slane %v2842_v19, %v15411_v35  ;;  %v15163_v26 = vld [vmem:[#allocation5 + $0x1d88] sm:$0xff]   ;;  %v15205_v19 = vld [vmem:[#allocation5 + $0x1e60] sm:$0xff]  }
 0x3b8   :  { %14053 = vmatprep.subr.bf16.mxu1 %v15125_v27 }
 0x3b9   :  { %11389 = vmatmul.mubr.bf16.vlgmr.msra.gmra.mrb[108].mxu0 %v2807_v25  ;;  %v15162_v25 = vld [vmem:[#allocation5 + $0x1d08] sm:$0xff]   ;;  %v2874_v27 = vcombine.high %v2870_v24, %v2870_v24 }
 0x3ba   :  { %14032 = vmatpush3.bf16.msra.mxu0 %v15126_v28  ;;  %11429 = vmatmul.mubr.bf16.vlgmr.msra.gmra.mrb[108].mxu1 %v2823_v30  ;;  %v15164_v28 = vld [vmem:[#allocation5 + $0x1d50] sm:$0xff]  }
 0x3bb   :  { %14033 = vmatprep.subr.bf16.mxu0 %v15128_v31  ;;  %14054 = vmatpush3.bf16.msra.mxu1 %v15127_v29  ;;  %v15165_v29 = vld [vmem:[#allocation5 + $0x1dd0] sm:$0xff]  }
 0x3bc   :  { %14055 = vmatprep.subr.bf16.mxu1 %v15129_v32  ;;  %11468 = vmatprep.mubr.bf16.mxu0 %v2863_v17  ;;  %v15166_v30 = vld [vmem:[#allocation5 + $0x1d10] sm:$0xff]   ;;  %v15168_v32 = vld [vmem:[#allocation5 + $0x1d58] sm:$0xff]  }
 0x3bd   :  { %11508 = vmatprep.mubr.bf16.mxu1 %v2873_v22  ;;  %v15167_v31 = vld [vmem:[#allocation5 + $0x1d90] sm:$0xff]   ;;  %v15203_v17 = vld [vmem:[#allocation5 + $0x1e18] sm:$0xff]   ;;  %v15208_v22 = vld [vmem:[#allocation5 + $0x1ea0] sm:$0xff]  }
 0x3be   :  { %14034 = vmatpush3.bf16.msra.mxu0 %v15130_v33  ;;  %v15169_v33 = vld [vmem:[#allocation5 + $0x1dd8] sm:$0xff]  }
 0x3bf   :  { %14035 = vmatprep.subr.bf16.mxu0 %v15132_v36  ;;  %14056 = vmatpush3.bf16.msra.mxu1 %v15131_v34  ;;  %v15170_v34 = vld [vmem:[#allocation5 + $0x1d18] sm:$0xff]  }
 0x3c0   :  { %14057 = vmatprep.subr.bf16.mxu1 %v15133_v37  ;;  %v15171_v36 = vld [vmem:[#allocation5 + $0x1d98] sm:$0xff]   ;;  %v15172_v37 = vld [vmem:[#allocation5 + $0x1d60] sm:$0xff]  }
 0x3c2   :  { %14036 = vmatpush3.bf16.msra.mxu0 %v15134_v38  ;;  %v15173_v38 = vld [vmem:[#allocation5 + $0x1de0] sm:$0xff]  }
 0x3c3   :  { %14037 = vmatprep.subr.bf16.mxu0 %v15136_v40  ;;  %14058 = vmatpush3.bf16.msra.mxu1 %v15135_v39  ;;  %v15174_v39 = vld [vmem:[#allocation5 + $0x1d20] sm:$0xff]  }
 0x3c4   :  { %14059 = vmatprep.subr.bf16.mxu1 %v15137_v41  ;;  %v15175_v40 = vld [vmem:[#allocation5 + $0x1da0] sm:$0xff]   ;;  %v15176_v41 = vld [vmem:[#allocation5 + $0x1d68] sm:$0xff]  }
 0x3c6   :  { %14038 = vmatpush3.bf16.msra.mxu0 %v15138_v42  ;;  %v15177_v42 = vld [vmem:[#allocation5 + $0x1de8] sm:$0xff]  }
 0x3c7   :  { %14039 = vmatprep.subr.bf16.mxu0 %v15140_v44  ;;  %14060 = vmatpush3.bf16.msra.mxu1 %v15139_v43  ;;  %v15178_v44 = vld [vmem:[#allocation5 + $0x1d28] sm:$0xff]  }
 0x3c8   :  { %14061 = vmatprep.subr.bf16.mxu1 %v15141_v45 }
 0x3ca   :  { %14040 = vmatpush3.bf16.msra.mxu0 %v15142_v46  ;;  %v15179_v46 = vld [vmem:[#allocation5 + $0x1da8] sm:$0xff]  }
 0x3cb   :  { %14041 = vmatprep.subr.bf16.mxu0 %v15144_v48  ;;  %14062 = vmatpush3.bf16.msra.mxu1 %v15143_v47 }
 0x3cc   :  { %v13739_v50 = vpop.f32.mrb[84].mxu0  ;;  %14063 = vmatprep.subr.bf16.mxu1 %v15145_v49 }
 0x3cd   :  { %v13740_v52 = vpop.f32.mrb[85].mxu0  ;;  %v13761_v54 = vpop.f32.mrb[84].mxu1 }
 0x3ce   :  { %v13741_v55 = vadd.f32 %v13740_v52, %v13739_v50  ;;  %v13742_v56 = vpop.f32.mrb[86].mxu0  ;;  %v13762_v57 = vpop.f32.mrb[85].mxu1  ;;  %14042 = vmatpush3.bf16.msra.mxu0 %v15146_v51  ;;  %v15180_v50 = vld [vmem:[#allocation5 + $0x1d70] sm:$0xff]  }
 0x3cf   :  { %v13743_v59 = vpop.f32.mrb[87].mxu0  ;;  %v13763_v62 = vadd.f32 %v13762_v57, %v13761_v54  ;;  %v13764_v63 = vpop.f32.mrb[86].mxu1  ;;  %14043 = vmatprep.subr.bf16.mxu0 %v15148_v53  ;;  %14064 = vmatpush3.bf16.msra.mxu1 %v15147_v58  ;;  %v15181_v51 = vld [vmem:[#allocation5 + $0x1df0] sm:$0xff]  }
 0x3d0   :  { %v10911_v61 = vadd.f32 %v13741_v55, %v15625_v20  ;;  %v13765_v1 = vpop.f32.mrb[87].mxu1  ;;  %14065 = vmatprep.subr.bf16.mxu1 %v15149_v60  ;;  %v2871_v20 = vcombine.high %v2849_v13, %v2849_v13  ;;  %v15182_v57 = vld [vmem:[#allocation5 + $0x1d30] sm:$0xff]   ;;  %v15186_v63 = vld [vmem:[#allocation5 + $0x1d38] sm:$0xff]  }
 0x3d1   :  { %v15183_v59 = vld [vmem:[#allocation5 + $0x1db0] sm:$0xff]   ;;  %v2856_v1 = vrot.slane %v15635_v15, %v15411_v35  ;;  %v15201_v15 = vld [vmem:[#allocation5 + $0x1e58] sm:$0xff]  }
 0x3d2   :  { %v15630_v3 = vadd.f32 %v13763_v62, %v10911_v61  ;;  %14044 = vmatpush3.bf16.msra.mxu0 %v15150_v0  ;;  %v15184_v61 = vld [vmem:[#allocation5 + $0x1d78] sm:$0xff]  }
 0x3d3   :  { %14045 = vmatprep.subr.bf16.mxu0 %v15152_v2  ;;  %14066 = vmatpush3.bf16.msra.mxu1 %v15151_v4  ;;  %v15185_v62 = vld [vmem:[#allocation5 + $0x1df8] sm:$0xff]   ;;  %v15189_v2 = vld [vmem:[#allocation5 + $0x1e40] sm:$0xff]  }
 0x3d4   :  { %14067 = vmatprep.subr.bf16.mxu1 %v15153_v5  ;;  %v15187_v0 = vld [vmem:[#allocation5 + $0x1db8] sm:$0xff]   ;;  %v15191_v4 = vld [vmem:[#allocation5 + $0x1e00] sm:$0xff]  }
 0x3d5   :  { %v15192_v5 = vld [vmem:[#allocation5 + $0x1e80] sm:$0xff]  }
 0x3d6   :  { %14046 = vmatpush3.bf16.msra.mxu0 %v15154_v6  ;;  %v2872_v6 = vcombine.high %v2856_v1, %v2856_v1 }
 0x3d7   :  { %14075 = vmatprep.subr.bf16.mxu0 %v15156_v9  ;;  %14068 = vmatpush3.bf16.msra.mxu1 %v15155_v11  ;;  %v15195_v9 = vld [vmem:[#allocation5 + $0x1e08] sm:$0xff]   ;;  %v15197_v11 = vld [vmem:[#allocation5 + $0x1e50] sm:$0xff]  }
 0x3d8   :  { %14097 = vmatprep.subr.bf16.mxu1 %v15157_v14  ;;  %v15200_v14 = vld [vmem:[#allocation5 + $0x1e90] sm:$0xff]  }
 0x3d9   :  { %11469 = vmatmul.mubr.bf16.vlgmr.msra.gmra.mrb[112].mxu0 %v2849_v13  ;;  %v15199_v13 = vld [vmem:[#allocation5 + $0x1e10] sm:$0xff]  }
 0x3da   :  { %14076 = vmatpush3.bf16.msra.mxu0 %v15158_v16  ;;  %11509 = vmatmul.mubr.bf16.vlgmr.msra.gmra.mrb[112].mxu1 %v2871_v20  ;;  %v15202_v16 = vld [vmem:[#allocation5 + $0x1ed8] sm:$0xff]   ;;  %v15206_v20 = vld [vmem:[#allocation5 + $0x1ee0] sm:$0xff]  }
 0x3db   :  { %14077 = vmatprep.subr.bf16.mxu0 %v15160_v21  ;;  %14098 = vmatpush3.bf16.msra.mxu1 %v15159_v18  ;;  %v15204_v18 = vld [vmem:[#allocation5 + $0x1e98] sm:$0xff]   ;;  %v15207_v21 = vld [vmem:[#allocation5 + $0x1e20] sm:$0xff]  }
 0x3dc   :  { %11548 = vmatprep.mubr.bf16.mxu0 %v2870_v24  ;;  %14099 = vmatprep.subr.bf16.mxu1 %v15161_v23  ;;  %v15209_v23 = vld [vmem:[#allocation5 + $0x1e68] sm:$0xff]  }
 0x3dd   :  { %11588 = vmatprep.mubr.bf16.mxu1 %v2874_v27  ;;  %v15210_v24 = vld [vmem:[#allocation5 + $0x1ee8] sm:$0xff]  }
 0x3de   :  { %14078 = vmatpush3.bf16.msra.mxu0 %v15162_v25 }
 0x3df   :  { %14079 = vmatprep.subr.bf16.mxu0 %v15164_v28  ;;  %14100 = vmatpush3.bf16.msra.mxu1 %v15163_v26  ;;  %v15211_v26 = vld [vmem:[#allocation5 + $0x1e28] sm:$0xff]   ;;  %v15213_v28 = vld [vmem:[#allocation5 + $0x1e70] sm:$0xff]  }
 0x3e0   :  { %14101 = vmatprep.subr.bf16.mxu1 %v15165_v29 }
 0x3e2   :  { %14080 = vmatpush3.bf16.msra.mxu0 %v15166_v30 }
 0x3e3   :  { %14081 = vmatprep.subr.bf16.mxu0 %v15168_v32  ;;  %14102 = vmatpush3.bf16.msra.mxu1 %v15167_v31 }
 0x3e4   :  { %14103 = vmatprep.subr.bf16.mxu1 %v15169_v33  ;;  %v15212_v33 = vld [vmem:[#allocation5 + $0x1ea8] sm:$0xff]  }
 0x3e6   :  { %14082 = vmatpush3.bf16.msra.mxu0 %v15170_v34 }
 0x3e7   :  { %14083 = vmatprep.subr.bf16.mxu0 %v15172_v37  ;;  %14104 = vmatpush3.bf16.msra.mxu1 %v15171_v36  ;;  %v15214_v36 = vld [vmem:[#allocation5 + $0x1ef0] sm:$0xff]  }
 0x3e8   :  { %14105 = vmatprep.subr.bf16.mxu1 %v15173_v38 }
 0x3ea   :  { %14084 = vmatpush3.bf16.msra.mxu0 %v15174_v39 }
 0x3eb   :  { %14085 = vmatprep.subr.bf16.mxu0 %v15176_v41  ;;  %14106 = vmatpush3.bf16.msra.mxu1 %v15175_v40  ;;  %v15215_v40 = vld [vmem:[#allocation5 + $0x1e30] sm:$0xff]  }
 0x3ec   :  { %v13783_v43 = vpop.f32.mrb[88].mxu0  ;;  %14107 = vmatprep.subr.bf16.mxu1 %v15177_v42  ;;  %v15217_v42 = vld [vmem:[#allocation5 + $0x1e78] sm:$0xff]  }
 0x3ed   :  { %v13784_v45 = vpop.f32.mrb[89].mxu0  ;;  %v13805_v47 = vpop.f32.mrb[88].mxu1 }
 0x3ee   :  { %v13785_v48 = vadd.f32 %v13784_v45, %v13783_v43  ;;  %v13786_v49 = vpop.f32.mrb[90].mxu0  ;;  %v13806_v52 = vpop.f32.mrb[89].mxu1  ;;  %14086 = vmatpush3.bf16.msra.mxu0 %v15178_v44  ;;  %v15216_v44 = vld [vmem:[#allocation5 + $0x1eb0] sm:$0xff]   ;;  %v15218_v45 = vld [vmem:[#allocation5 + $0x1ef8] sm:$0xff]  }
 0x3ef   :  { %v13787_v53 = vpop.f32.mrb[91].mxu0  ;;  %v13807_v55 = vadd.f32 %v13806_v52, %v13805_v47  ;;  %v13808_v56 = vpop.f32.mrb[90].mxu1  ;;  %14087 = vmatprep.subr.bf16.mxu0 %v15180_v50  ;;  %14108 = vmatpush3.bf16.msra.mxu1 %v15179_v46  ;;  %v15219_v46 = vld [vmem:[#allocation5 + $0x1e38] sm:$0xff]   ;;  %v15221_v49 = vld [vmem:[#allocation5 + $0x1f40] sm:$0xff]  }
 0x3f0   :  { %v10991_v54 = vadd.f32 %v13785_v48, %v15630_v3  ;;  %v13809_v58 = vpop.f32.mrb[91].mxu1  ;;  %14109 = vmatprep.subr.bf16.mxu1 %v15181_v51  ;;  %v15190_v3 = vld [vmem:[#allocation5 + $0x1ec0] sm:$0xff]   ;;  %v68_v47 = vld [vmem:[#allocation2 + $0x78] sm:$0xff] }
 0x3f1   :  { %v2882_v48 = vrot.slane %v68_v47, %v15411_v35  ;;  %v2875_v50 = vcombine.high %v68_v47, %v68_v47  ;;  %v15220_v51 = vld [vmem:[#allocation5 + $0x1eb8] sm:$0xff]  }
 0x3f2   :  { %v15642_v60 = vadd.f32 %v13807_v55, %v10991_v54  ;;  %14088 = vmatpush3.bf16.msra.mxu0 %v15182_v57  ;;  %v15222_v54 = vld [vmem:[#allocation5 + $0x1fc0] sm:$0xff]  }
 0x3f3   :  { %14089 = vmatprep.subr.bf16.mxu0 %v15184_v61  ;;  %14110 = vmatpush3.bf16.msra.mxu1 %v15183_v59  ;;  %v2890_v52 = vcombine.high %v2882_v48, %v2882_v48  ;;  %v2898_v53 = vrot.slane %v2882_v48, %v15411_v35  ;;  %v15652_v55 = vrot.slane %v2875_v50, %v15411_v35  ;;  %v15223_v57 = vld [vmem:[#allocation5 + $0x1f00] sm:$0xff]  }
 0x3f4   :  { %14111 = vmatprep.subr.bf16.mxu1 %v15185_v62  ;;  %v15224_v62 = vld [vmem:[#allocation5 + $0x1f80] sm:$0xff]  }
 0x3f5   :  { %v2912_v56 = vrot.slane %v2890_v52, %v15411_v35  ;;  %v2891_v58 = vcombine.high %v15652_v55, %v15652_v55  ;;  %v2920_v59 = vcombine.high %v2898_v53, %v2898_v53 }
 0x3f6   :  { %14090 = vmatpush3.bf16.msra.mxu0 %v15186_v63 }
 0x3f7   :  { %14119 = vmatprep.subr.bf16.mxu0 %v15189_v2  ;;  %14112 = vmatpush3.bf16.msra.mxu1 %v15187_v0  ;;  %v2922_v61 = vcombine.high %v2912_v56, %v2912_v56  ;;  %v2919_v63 = vrot.slane %v2891_v58, %v15411_v35  ;;  %v15226_v0 = vld [vmem:[#allocation5 + $0x1fc8] sm:$0xff]  }
 0x3f8   :  { %14141 = vmatprep.subr.bf16.mxu1 %v15190_v3  ;;  %v15229_v3 = vld [vmem:[#allocation5 + $0x1f50] sm:$0xff]  }
 0x3f9   :  { %11549 = vmatmul.mubr.bf16.vlgmr.msra.gmra.mrb[116].mxu0 %v2856_v1  ;;  %v15227_v1 = vld [vmem:[#allocation5 + $0x1f08] sm:$0xff]   ;;  %v2923_v2 = vcombine.high %v2919_v63, %v2919_v63 }
 0x3fa   :  { %14120 = vmatpush3.bf16.msra.mxu0 %v15191_v4  ;;  %11589 = vmatmul.mubr.bf16.vlgmr.msra.gmra.mrb[116].mxu1 %v2872_v6  ;;  %v15228_v4 = vld [vmem:[#allocation5 + $0x1f88] sm:$0xff]   ;;  %v15231_v6 = vld [vmem:[#allocation5 + $0x1f10] sm:$0xff]  }
 0x3fb   :  { %14121 = vmatprep.subr.bf16.mxu0 %v15193_v7  ;;  %14142 = vmatpush3.bf16.msra.mxu1 %v15192_v5  ;;  %v15230_v5 = vld [vmem:[#allocation5 + $0x1fd0] sm:$0xff]   ;;  %v15233_v7 = vld [vmem:[#allocation5 + $0x1f58] sm:$0xff]  }
 0x3fc   :  { %14143 = vmatprep.subr.bf16.mxu1 %v15194_v8  ;;  %11628 = vmatprep.mubr.bf16.mxu0 %v2912_v56  ;;  %v15232_v8 = vld [vmem:[#allocation5 + $0x1f90] sm:$0xff]  }
 0x3fd   :  { %11668 = vmatprep.mubr.bf16.mxu1 %v2922_v61 }
 0x3fe   :  { %14122 = vmatpush3.bf16.msra.mxu0 %v15195_v9  ;;  %v15234_v9 = vld [vmem:[#allocation5 + $0x1fd8] sm:$0xff]  }
 0x3ff   :  { %14123 = vmatprep.subr.bf16.mxu0 %v15197_v11  ;;  %14144 = vmatpush3.bf16.msra.mxu1 %v15196_v10  ;;  %v15235_v10 = vld [vmem:[#allocation5 + $0x1f18] sm:$0xff]   ;;  %v15237_v11 = vld [vmem:[#allocation5 + $0x1f60] sm:$0xff]  }
 0x400   :  { %14145 = vmatprep.subr.bf16.mxu1 %v15198_v12  ;;  %v15236_v12 = vld [vmem:[#allocation5 + $0x1f98] sm:$0xff]  }
 0x402   :  { %14124 = vmatpush3.bf16.msra.mxu0 %v15199_v13  ;;  %v15238_v13 = vld [vmem:[#allocation5 + $0x1fe0] sm:$0xff]  }
 0x403   :  { %14125 = vmatprep.subr.bf16.mxu0 %v15201_v15  ;;  %14146 = vmatpush3.bf16.msra.mxu1 %v15200_v14  ;;  %v15239_v14 = vld [vmem:[#allocation5 + $0x1f20] sm:$0xff]   ;;  %v15241_v15 = vld [vmem:[#allocation5 + $0x1f68] sm:$0xff]  }
 0x404   :  { %14147 = vmatprep.subr.bf16.mxu1 %v15202_v16  ;;  %v15240_v16 = vld [vmem:[#allocation5 + $0x1fa0] sm:$0xff]  }
 0x406   :  { %14126 = vmatpush3.bf16.msra.mxu0 %v15203_v17 }
 0x407   :  { %14127 = vmatprep.subr.bf16.mxu0 %v15205_v19  ;;  %14148 = vmatpush3.bf16.msra.mxu1 %v15204_v18  ;;  %v15242_v18 = vld [vmem:[#allocation5 + $0x1fe8] sm:$0xff]  }
 0x408   :  { %14149 = vmatprep.subr.bf16.mxu1 %v15206_v20  ;;  %v15243_v20 = vld [vmem:[#allocation5 + $0x1f28] sm:$0xff]  }
 0x40a   :  { %14128 = vmatpush3.bf16.msra.mxu0 %v15207_v21 }
 0x40b   :  { %14129 = vmatprep.subr.bf16.mxu0 %v15209_v23  ;;  %14150 = vmatpush3.bf16.msra.mxu1 %v15208_v22 }
 0x40c   :  { %v13827_v25 = vpop.f32.mrb[92].mxu0  ;;  %14151 = vmatprep.subr.bf16.mxu1 %v15210_v24  ;;  %v15244_v24 = vld [vmem:[#allocation5 + $0x1fa8] sm:$0xff]  }
 0x40d   :  { %v13828_v27 = vpop.f32.mrb[93].mxu0  ;;  %v13849_v29 = vpop.f32.mrb[92].mxu1 }
 0x40e   :  { %v13829_v30 = vadd.f32 %v13828_v27, %v13827_v25  ;;  %v13830_v31 = vpop.f32.mrb[94].mxu0  ;;  %v13850_v32 = vpop.f32.mrb[93].mxu1  ;;  %14130 = vmatpush3.bf16.msra.mxu0 %v15211_v26  ;;  %v15245_v25 = vld [vmem:[#allocation5 + $0x1f70] sm:$0xff]  }
 0x40f   :  { %v13831_v34 = vpop.f32.mrb[95].mxu0  ;;  %v13851_v38 = vadd.f32 %v13850_v32, %v13849_v29  ;;  %v13852_v39 = vpop.f32.mrb[94].mxu1  ;;  %14131 = vmatprep.subr.bf16.mxu0 %v15213_v28  ;;  %14152 = vmatpush3.bf16.msra.mxu1 %v15212_v33  ;;  %v15246_v31 = vld [vmem:[#allocation5 + $0x1ff0] sm:$0xff]  }
 0x410   :  { %v11071_v37 = vadd.f32 %v13829_v30, %v15642_v60  ;;  %v13853_v41 = vpop.f32.mrb[95].mxu1  ;;  %14153 = vmatprep.subr.bf16.mxu1 %v15214_v36  ;;  %v15225_v60 = vld [vmem:[#allocation5 + $0x1f48] sm:$0xff]   ;;  %v15247_v33 = vld [vmem:[#allocation5 + $0x1f30] sm:$0xff]   ;;  %v15249_v36 = vld [vmem:[#allocation5 + $0x1f78] sm:$0xff]  }
 0x411   :  { %v15251_v39 = vld [vmem:[#allocation5 + $0x1f38] sm:$0xff]  }
 0x412   :  { %v15647_v43 = vadd.f32 %v13851_v38, %v11071_v37  ;;  %14132 = vmatpush3.bf16.msra.mxu0 %v15215_v40  ;;  %v15248_v37 = vld [vmem:[#allocation5 + $0x1fb0] sm:$0xff]   ;;  %v15250_v38 = vld [vmem:[#allocation5 + $0x1ff8] sm:$0xff]   ;;  %v2905_v40 = vrot.slane %v15652_v55, %v15411_v35 }
 0x413   :  { %14133 = vmatprep.subr.bf16.mxu0 %v15217_v42  ;;  %14154 = vmatpush3.bf16.msra.mxu1 %v15216_v44  ;;  %v15252_v41 = vld [vmem:[#allocation5 + $0x1fb8] sm:$0xff]  }
 0x414   :  { %14155 = vmatprep.subr.bf16.mxu1 %v15218_v45  ;;  %v2921_v42 = vcombine.high %v2905_v40, %v2905_v40 }
 0x416   :  { %14134 = vmatpush3.bf16.msra.mxu0 %v15219_v46 }
 0x417   :  { %14163 = vmatprep.subr.bf16.mxu0 %v15221_v49  ;;  %14156 = vmatpush3.bf16.msra.mxu1 %v15220_v51 }
 0x418   :  { %14185 = vmatprep.subr.bf16.mxu1 %v15222_v54 }
 0x419   :  { %11629 = vmatmul.mubr.bf16.vlgmr.msra.gmra.mrb[120].mxu0 %v2898_v53 }
 0x41a   :  { %14164 = vmatpush3.bf16.msra.mxu0 %v15223_v57  ;;  %11669 = vmatmul.mubr.bf16.vlgmr.msra.gmra.mrb[120].mxu1 %v2920_v59 }
 0x41b   :  { %14165 = vmatprep.subr.bf16.mxu0 %v15225_v60  ;;  %14186 = vmatpush3.bf16.msra.mxu1 %v15224_v62 }
 0x41c   :  { %11708 = vmatprep.mubr.bf16.mxu0 %v2919_v63  ;;  %14187 = vmatprep.subr.bf16.mxu1 %v15226_v0 }
 0x41d   :  { %11748 = vmatprep.mubr.bf16.mxu1 %v2923_v2 }
 0x41e   :  { %14166 = vmatpush3.bf16.msra.mxu0 %v15227_v1 }
 0x41f   :  { %14167 = vmatprep.subr.bf16.mxu0 %v15229_v3  ;;  %14188 = vmatpush3.bf16.msra.mxu1 %v15228_v4 }
 0x420   :  { %14189 = vmatprep.subr.bf16.mxu1 %v15230_v5 }
 0x422   :  { %14168 = vmatpush3.bf16.msra.mxu0 %v15231_v6 }
 0x423   :  { %14169 = vmatprep.subr.bf16.mxu0 %v15233_v7  ;;  %14190 = vmatpush3.bf16.msra.mxu1 %v15232_v8 }
 0x424   :  { %14191 = vmatprep.subr.bf16.mxu1 %v15234_v9 }
 0x426   :  { %14170 = vmatpush3.bf16.msra.mxu0 %v15235_v10 }
 0x427   :  { %14171 = vmatprep.subr.bf16.mxu0 %v15237_v11  ;;  %14192 = vmatpush3.bf16.msra.mxu1 %v15236_v12 }
 0x428   :  { %14193 = vmatprep.subr.bf16.mxu1 %v15238_v13 }
 0x42a   :  { %14172 = vmatpush3.bf16.msra.mxu0 %v15239_v14 }
 0x42b   :  { %14173 = vmatprep.subr.bf16.mxu0 %v15241_v15  ;;  %14194 = vmatpush3.bf16.msra.mxu1 %v15240_v16 }
 0x42c   :  { %v13871_v17 = vpop.f32.mrb[96].mxu0  ;;  %14195 = vmatprep.subr.bf16.mxu1 %v15242_v18 }
 0x42d   :  { %v13872_v19 = vpop.f32.mrb[97].mxu0  ;;  %v13893_v21 = vpop.f32.mrb[96].mxu1 }
 0x42e   :  { %v13873_v22 = vadd.f32 %v13872_v19, %v13871_v17  ;;  %v13874_v23 = vpop.f32.mrb[98].mxu0  ;;  %v13894_v26 = vpop.f32.mrb[97].mxu1  ;;  %14174 = vmatpush3.bf16.msra.mxu0 %v15243_v20 }
 0x42f   :  { %v13875_v27 = vpop.f32.mrb[99].mxu0  ;;  %v13895_v29 = vadd.f32 %v13894_v26, %v13893_v21  ;;  %v13896_v30 = vpop.f32.mrb[98].mxu1  ;;  %14175 = vmatprep.subr.bf16.mxu0 %v15245_v25  ;;  %14196 = vmatpush3.bf16.msra.mxu1 %v15244_v24 }
 0x430   :  { %v11151_v28 = vadd.f32 %v13873_v22, %v15647_v43  ;;  %v13897_v32 = vpop.f32.mrb[99].mxu1  ;;  %14197 = vmatprep.subr.bf16.mxu1 %v15246_v31 }
 0x432   :  { %v11191_v34 = vadd.f32 %v13895_v29, %v11151_v28  ;;  %14176 = vmatpush3.bf16.msra.mxu0 %v15247_v33 }
 0x433   :  { %14177 = vmatprep.subr.bf16.mxu0 %v15249_v36  ;;  %14198 = vmatpush3.bf16.msra.mxu1 %v15248_v37 }
 0x434   :  { %14199 = vmatprep.subr.bf16.mxu1 %v15250_v38 }
 0x436   :  { %14178 = vmatpush3.bf16.msra.mxu0 %v15251_v39 }
 0x437   :  { %14200 = vmatpush3.bf16.msra.mxu1 %v15252_v41 }
 0x439   :  { %11709 = vmatmul.mubr.bf16.vlgmr.msra.gmra.mrb[124].mxu0 %v2905_v40 }
 0x43a   :  { %11749 = vmatmul.mubr.bf16.vlgmr.msra.gmra.mrb[124].mxu1 %v2921_v42 }
 0x44c   :  { %v13915_v43 = vpop.f32.mrb[100].mxu0 }
 0x44d   :  { %v13916_v44 = vpop.f32.mrb[101].mxu0  ;;  %v13937_v45 = vpop.f32.mrb[100].mxu1 }
 0x44e   :  { %v13917_v46 = vadd.f32 %v13916_v44, %v13915_v43  ;;  %v13918_v47 = vpop.f32.mrb[102].mxu0  ;;  %v13938_v48 = vpop.f32.mrb[101].mxu1 }
 0x44f   :  { %v13919_v49 = vpop.f32.mrb[103].mxu0  ;;  %v13939_v51 = vadd.f32 %v13938_v48, %v13937_v45  ;;  %v13940_v52 = vpop.f32.mrb[102].mxu1 }
 0x450   :  { %v11231_v50 = vadd.f32 %v13917_v46, %v11191_v34  ;;  %v13941_v53 = vpop.f32.mrb[103].mxu1 }
 0x452   :  { %v11271_v35 = vadd.f32 %v13939_v51, %v11231_v50 }
 0x46c   :  { %v13959_v54 = vpop.f32.mrb[104].mxu0 }
 0x46d   :  { %v13960_v55 = vpop.f32.mrb[105].mxu0  ;;  %v13981_v56 = vpop.f32.mrb[104].mxu1 }
 0x46e   :  { %v13961_v57 = vadd.f32 %v13960_v55, %v13959_v54  ;;  %v13962_v58 = vpop.f32.mrb[106].mxu0  ;;  %v13982_v59 = vpop.f32.mrb[105].mxu1 }
 0x46f   :  { %v13963_v60 = vpop.f32.mrb[107].mxu0  ;;  %v13983_v62 = vadd.f32 %v13982_v59, %v13981_v56  ;;  %v13984_v63 = vpop.f32.mrb[106].mxu1 }
 0x470   :  { %v11311_v61 = vadd.f32 %v13961_v57, %v11271_v35  ;;  %v13985_v0 = vpop.f32.mrb[107].mxu1 }
 0x472   :  { %v11351_v1 = vadd.f32 %v13983_v62, %v11311_v61 }
 0x48c   :  { %v14003_v2 = vpop.f32.mrb[108].mxu0 }
 0x48d   :  { %v14004_v3 = vpop.f32.mrb[109].mxu0  ;;  %v14025_v4 = vpop.f32.mrb[108].mxu1 }
 0x48e   :  { %v14005_v5 = vadd.f32 %v14004_v3, %v14003_v2  ;;  %v14006_v6 = vpop.f32.mrb[110].mxu0  ;;  %v14026_v7 = vpop.f32.mrb[109].mxu1 }
 0x48f   :  { %v14007_v8 = vpop.f32.mrb[111].mxu0  ;;  %v14027_v10 = vadd.f32 %v14026_v7, %v14025_v4  ;;  %v14028_v11 = vpop.f32.mrb[110].mxu1 }
 0x490   :  { %v11391_v9 = vadd.f32 %v14005_v5, %v11351_v1  ;;  %v14029_v12 = vpop.f32.mrb[111].mxu1 }
 0x492   :  { %v11431_v13 = vadd.f32 %v14027_v10, %v11391_v9 }
 0x4ac   :  { %v14047_v14 = vpop.f32.mrb[112].mxu0 }
 0x4ad   :  { %v14048_v15 = vpop.f32.mrb[113].mxu0  ;;  %v14069_v16 = vpop.f32.mrb[112].mxu1 }
 0x4ae   :  { %v14049_v17 = vadd.f32 %v14048_v15, %v14047_v14  ;;  %v14050_v18 = vpop.f32.mrb[114].mxu0  ;;  %v14070_v19 = vpop.f32.mrb[113].mxu1 }
 0x4af   :  { %v14051_v20 = vpop.f32.mrb[115].mxu0  ;;  %v14071_v22 = vadd.f32 %v14070_v19, %v14069_v16  ;;  %v14072_v23 = vpop.f32.mrb[114].mxu1 }
 0x4b0   :  { %v11471_v21 = vadd.f32 %v14049_v17, %v11431_v13  ;;  %v14073_v24 = vpop.f32.mrb[115].mxu1 }
 0x4b2   :  { %v11511_v25 = vadd.f32 %v14071_v22, %v11471_v21 }
 0x4cc   :  { %v14091_v26 = vpop.f32.mrb[116].mxu0 }
 0x4cd   :  { %v14092_v27 = vpop.f32.mrb[117].mxu0  ;;  %v14113_v28 = vpop.f32.mrb[116].mxu1 }
 0x4ce   :  { %v14093_v29 = vadd.f32 %v14092_v27, %v14091_v26  ;;  %v14094_v30 = vpop.f32.mrb[118].mxu0  ;;  %v14114_v31 = vpop.f32.mrb[117].mxu1 }
 0x4cf   :  { %v14095_v32 = vpop.f32.mrb[119].mxu0  ;;  %v14115_v34 = vadd.f32 %v14114_v31, %v14113_v28  ;;  %v14116_v36 = vpop.f32.mrb[118].mxu1 }
 0x4d0   :  { %v11551_v33 = vadd.f32 %v14093_v29, %v11511_v25  ;;  %v14117_v37 = vpop.f32.mrb[119].mxu1 }
 0x4d2   :  { %v11591_v38 = vadd.f32 %v14115_v34, %v11551_v33 }
 0x4ec   :  { %v14135_v39 = vpop.f32.mrb[120].mxu0 }
 0x4ed   :  { %v14136_v40 = vpop.f32.mrb[121].mxu0  ;;  %v14157_v41 = vpop.f32.mrb[120].mxu1 }
 0x4ee   :  { %v14137_v42 = vadd.f32 %v14136_v40, %v14135_v39  ;;  %v14138_v43 = vpop.f32.mrb[122].mxu0  ;;  %v14158_v44 = vpop.f32.mrb[121].mxu1 }
 0x4ef   :  { %v14139_v45 = vpop.f32.mrb[123].mxu0  ;;  %v14159_v47 = vadd.f32 %v14158_v44, %v14157_v41  ;;  %v14160_v48 = vpop.f32.mrb[122].mxu1 }
 0x4f0   :  { %v11631_v46 = vadd.f32 %v14137_v42, %v11591_v38  ;;  %v14161_v49 = vpop.f32.mrb[123].mxu1 }
 0x4f2   :  { %v11671_v50 = vadd.f32 %v14159_v47, %v11631_v46 }
 0x50c   :  { %v14179_v51 = vpop.f32.mrb[124].mxu0 }
 0x50d   :  { %v14180_v52 = vpop.f32.mrb[125].mxu0  ;;  %v14201_v53 = vpop.f32.mrb[124].mxu1 }
 0x50e   :  { %v14181_v35 = vadd.f32 %v14180_v52, %v14179_v51  ;;  %v14182_v54 = vpop.f32.mrb[126].mxu0  ;;  %v14202_v55 = vpop.f32.mrb[125].mxu1 }
 0x50f   :  { %v14183_v56 = vpop.f32.mrb[127].mxu0  ;;  %v14203_v58 = vadd.f32 %v14202_v55, %v14201_v53  ;;  %v14204_v59 = vpop.f32.mrb[126].mxu1 }
 0x510   :  { %v11711_v57 = vadd.f32 %v14181_v35, %v11671_v50  ;;  %v14205_v60 = vpop.f32.mrb[127].mxu1 }
 0x512   :  { %v11751_v61 = vadd.f32 %v14203_v58, %v11711_v57 }
 0x514   :  { %11757 = vst.msk [vmem:[#allocation8] sm:$0x3] %vm11756_vm0, %v11751_v61 }
 0x515   :  { %15331 = shalt.err (!%p15328_p0)
}
 0x516   :  { %s15332_s26 = scalar_lea.hbm %s15676_s3, 32 }
 0x517   :  { %p15333_p1 = scmp.ne.s32.totalorder %s15676_s3, %s15332_s26  ;;  %p15336_p2 = scmp.lt.u32.totalorder %s15332_s26, %s15676_s3 }
 0x519   :  { %p15338_p3 = pnand %p15336_p2, %p15333_p1 }
 0x51b   :  { %15341 = shalt.err (!%p15338_p3)
}
 0x51c   :  { %11767 = dma.vmem_to_hbm [thread:$0]  %s11765_s22, 32, %s15676_s3, [#allocation4]  }
 0x51d   :  { %15346 = dma.done.wait [#allocation4], 32  }
 0x51e   :  { %15347 = vsyncadd [#allocation4], 4294967264 }
 0x51f   :  { %11771 = vsyncpa [#allocation3], 1 }
 0x520   :  { %11772 = vsyncpa [#allocation6], 1 }
 0x521   :  { %11773 = vsyncpa [#allocation4], 1 }

</bundles_post_ra>
